<compile_context>
chip_gen: v7x
topology: tpu7x:2x2x1
jax: 0.10.0
libtpu: 0.0.40
codegen_flags: <defaults>
</compile_context>

<pallas_src>
import math
from functools import partial

import numpy as np
import jax
import jax.numpy as jnp
from jax.experimental import pallas as pl
from jax.experimental.pallas import tpu as pltpu

# ----------------------------- model hyper-params (small) -----------------------------
IMG_SIZE = 16
PATCH = 4
IN_CHANS = 3
EMBED_DIM = 32
DEPTH = 2
NUM_HEADS = 4
MLP_RATIO = 4.0
LN_EPS = 1e-5                                     # nn.LayerNorm default
NUM_PATCHES = (IMG_SIZE // PATCH) ** 3            # 64
PATCH_DIM = IN_CHANS * PATCH ** 3                 # 192
HIDDEN = int(EMBED_DIM * MLP_RATIO)               # 128
HEAD_DIM = EMBED_DIM // NUM_HEADS                 # 8
BATCH = 2

MXU_DTYPE = jnp.bfloat16   # matmul operand dtype (f32 accumulation everywhere)

# drop_rate / attn_drop / drop_path are 0.0 and init_values=0.0 disables layer-scale in
# the reference defaults, so they are identities and omitted.  num_classes=0 -> head=Identity.


# ----------------------------- fused Pallas kernel -----------------------------
def _layernorm(x, w, b, eps):
    mu = jnp.mean(x, axis=-1, keepdims=True)
    var = jnp.mean(jnp.square(x - mu), axis=-1, keepdims=True)
    return (x - mu) * jax.lax.rsqrt(var + eps) * w + b


def _fused_encoder_kernel(p_ref, pw_ref, pos_ref, qkvw_ref, projw_ref,
                          fc1w_ref, fc2w_ref, aux_ref, o_ref,
                          *, batch, depth, num_heads, eps):
    f32 = jnp.float32
    cdt = pw_ref.dtype                                   # bf16 MXU operands
    M = p_ref.shape[0]                                   # M = B * N (batch folded in rows)
    C = pw_ref.shape[1]
    B, N, dh = batch, M // batch, C // num_heads

    # ---- patch embed: (B*N, P) @ (P, C) + (conv bias + sincos pos) ----
    x = jnp.dot(p_ref[...], pw_ref[...], preferred_element_type=f32) + pos_ref[...]  # (M,C) f32

    # ---- transformer blocks, statically unrolled; weights stay VMEM-resident ----
    for l in range(depth):
        r = 7 * l
        ln1w, ln1b = aux_ref[r + 0:r + 1, :C], aux_ref[r + 1:r + 2, :C]
        ln2w, ln2b = aux_ref[r + 2:r + 3, :C], aux_ref[r + 3:r + 4, :C]
        proj_b, fc2_b = aux_ref[r + 4:r + 5, :C], aux_ref[r + 5:r + 6, :C]
        fc1_b = aux_ref[r + 6:r + 7, :]                  # (1, HIDDEN)

        # -- multi-head self-attention (pre-LN, qkv_bias=False) --
        hln = _layernorm(x, ln1w, ln1b, eps).astype(cdt)             # (M, C)
        x = x + proj_b
        for hd in range(num_heads):
            # fused per-head QKV: one (M,C)x(C,3dh) dot; attention scale is pre-folded
            qkv = jnp.dot(hln, qkvw_ref[l, hd], preferred_element_type=f32)   # (M, 3dh)
            q = qkv[:, 0:dh].reshape(B, N, dh)
            k = qkv[:, dh:2 * dh].reshape(B, N, dh)
            v = qkv[:, 2 * dh:3 * dh].reshape(B, N, dh)
            s = jnp.einsum('bnd,bmd->bnm', q.astype(cdt), k.astype(cdt),
                           preferred_element_type=f32)               # (B, N, N) f32
            s = s - jnp.max(s, axis=-1, keepdims=True)
            p = jnp.exp(s)
            p = p * pl.reciprocal(jnp.sum(p, axis=-1, keepdims=True), approx=True)
            av = jnp.einsum('bnm,bmd->bnd', p.astype(cdt), v.astype(cdt),
                            preferred_element_type=f32)              # (B, N, dh)
            # head reduction accumulated directly into the residual stream
            x = x + jnp.dot(av.reshape(M, dh).astype(cdt), projw_ref[l, hd],
                            preferred_element_type=f32)

        # -- MLP (pre-LN); tanh GELU runs on the EUP; VPU math stays f32 --
        h2 = _layernorm(x, ln2w, ln2b, eps).astype(cdt)
        y = jnp.dot(h2, fc1w_ref[l], preferred_element_type=f32) + fc1_b
        y = jax.nn.gelu(y, approximate=True)
        x = x + jnp.dot(y.astype(cdt), fc2w_ref[l], preferred_element_type=f32) + fc2_b

    # ---- final LayerNorm; head = nn.Identity (num_classes=0) ----
    d2 = 7 * depth
    o_ref[...] = _layernorm(x, aux_ref[d2:d2 + 1, :C], aux_ref[d2 + 1:d2 + 2, :C],
                            eps).astype(o_ref.dtype)


# ----------------------------- param packing -----------------------------
def pack_params(params, mxu_dtype=MXU_DTYPE):
    """Stack / pre-split the per-block weights once (trace time, free)."""
    C, H, dh, D, HID = EMBED_DIM, NUM_HEADS, HEAD_DIM, DEPTH, HIDDEN
    blocks = params["blocks"]
    scale = jnp.float32(dh ** -0.5)

    def pack_qkv(w):                                  # (C, 3C), torch column order (3, H, dh)
        w4 = w.reshape(C, 3, H, dh)
        w4 = w4.at[:, 0].multiply(scale)              # fold attn scale into Q, in f32
        return w4.transpose(2, 0, 1, 3).reshape(H, C, 3 * dh)

    def pad_c(v):                                     # (1, C) -> (1, HID), zero-padded lanes
        return jnp.pad(v, ((0, 0), (0, HID - C)))

    aux_rows = []
    for b in blocks:
        aux_rows += [pad_c(b["ln1_w"]), pad_c(b["ln1_b"]), pad_c(b["ln2_w"]),
                     pad_c(b["ln2_b"]), pad_c(b["proj_b"]), pad_c(b["fc2_b"]),
                     b["fc1_b"]]
    aux_rows += [pad_c(params["norm_w"]), pad_c(params["norm_b"])]

    return {
        "patch_w": params["patch_w"].astype(mxu_dtype),                         # (P, C)
        "pos_pb": params["pos"] + params["patch_b"],                            # (N, C) f32
        "qkv_w": jnp.stack([pack_qkv(b["qkv_w"]) for b in blocks]).astype(mxu_dtype),   # (D,H,C,3dh)
        "proj_w": jnp.stack([b["proj_w"].reshape(H, dh, C)
                             for b in blocks]).astype(mxu_dtype),               # (D, H, dh, C)
        "fc1_w": jnp.stack([b["fc1_w"] for b in blocks]).astype(mxu_dtype),     # (D, C, HID)
        "fc2_w": jnp.stack([b["fc2_w"] for b in blocks]).astype(mxu_dtype),     # (D, HID, C)
        "aux": jnp.concatenate(aux_rows, axis=0),                               # (7D+2, HID) f32
    }


# ----------------------------- wrapper -----------------------------
def forward(packed, x, mask=None):
    patches = extract_patches(x, PATCH)                   # (B, Np, P) f32
    pos_pb = packed["pos_pb"]
    if mask is not None:
        # static numpy bool mask over patches; keep visible tokens (x[:, ~mask]).
        vis = np.where(~np.asarray(mask))[0]
        patches = patches[:, vis, :]
        pos_pb = pos_pb[vis, :]
    B, N, P = patches.shape
    C, D, H, dh, HID = EMBED_DIM, DEPTH, NUM_HEADS, HEAD_DIM, HIDDEN
    M = B * N

    # batch folded into the matmul row (sublane) dim; bf16 patches halve the input DMA
    patches2d = patches.reshape(M, P).astype(packed["patch_w"].dtype)
    pos_full = jnp.tile(pos_pb, (B, 1))                   # (M, C) f32

    def cspec(shape):
        nd = len(shape)
        return pl.BlockSpec(shape, lambda i, _nd=nd: (0,) * _nd)

    out2d = pl.pallas_call(
        partial(_fused_encoder_kernel, batch=B, depth=D, num_heads=H, eps=LN_EPS),
        out_shape=jax.ShapeDtypeStruct((M, C), jnp.float32),
        grid=(1,),
        in_specs=[cspec((M, P)),
                  cspec((P, C)),
                  cspec((M, C)),
                  cspec((D, H, C, 3 * dh)),
                  cspec((D, H, dh, C)),
                  cspec((D, C, HID)),
                  cspec((D, HID, C)),
                  cspec((7 * D + 2, HID))],
        out_specs=cspec((M, C)),
        compiler_params=pltpu.CompilerParams(dimension_semantics=("arbitrary",)),
    )(patches2d, packed["patch_w"], pos_full, packed["qkv_w"], packed["proj_w"],
      packed["fc1_w"], packed["fc2_w"], packed["aux"])
    return out2d.reshape(B, N, C)


# ----------------------------- glue: params / patches -----------------------------
def get_sinusoid_encoding_table(n_position, d_hid):
    pos = np.arange(n_position, dtype=np.float64)[:, None]
    hid = np.arange(d_hid)[None, :]
    angle = pos / np.power(10000, 2 * (hid // 2) / d_hid)
    table = np.zeros((n_position, d_hid), dtype=np.float32)
    table[:, 0::2] = np.sin(angle[:, 0::2])
    table[:, 1::2] = np.cos(angle[:, 1::2])
    return jnp.asarray(table)                             # (N, C)


def _xavier_uniform(key, fan_in, fan_out):
    limit = math.sqrt(6.0 / (fan_in + fan_out))
    return jax.random.uniform(key, (fan_in, fan_out), jnp.float32, -limit, limit)


def init_params(key):
    keys = jax.random.split(key, 2 + 4 * DEPTH)
    bound = 1.0 / math.sqrt(PATCH_DIM)                    # Conv3d default init
    params = {
        "patch_w": jax.random.uniform(keys[0], (PATCH_DIM, EMBED_DIM), jnp.float32, -bound, bound),
        "patch_b": jax.random.uniform(keys[1], (1, EMBED_DIM), jnp.float32, -bound, bound),
        "pos": get_sinusoid_encoding_table(NUM_PATCHES, EMBED_DIM),
        "norm_w": jnp.ones((1, EMBED_DIM), jnp.float32),
        "norm_b": jnp.zeros((1, EMBED_DIM), jnp.float32),
        "blocks": [],
    }
    for i in range(DEPTH):
        k0, k1, k2, k3 = keys[2 + 4 * i: 6 + 4 * i]
        params["blocks"].append({
            "ln1_w": jnp.ones((1, EMBED_DIM), jnp.float32),
            "ln1_b": jnp.zeros((1, EMBED_DIM), jnp.float32),
            "qkv_w": _xavier_uniform(k0, EMBED_DIM, 3 * EMBED_DIM),     # qkv_bias=False
            "proj_w": _xavier_uniform(k1, EMBED_DIM, EMBED_DIM),
            "proj_b": jnp.zeros((1, EMBED_DIM), jnp.float32),
            "ln2_w": jnp.ones((1, EMBED_DIM), jnp.float32),
            "ln2_b": jnp.zeros((1, EMBED_DIM), jnp.float32),
            "fc1_w": _xavier_uniform(k2, EMBED_DIM, HIDDEN),
            "fc1_b": jnp.zeros((1, HIDDEN), jnp.float32),
            "fc2_w": _xavier_uniform(k3, HIDDEN, EMBED_DIM),
            "fc2_b": jnp.zeros((1, EMBED_DIM), jnp.float32),
        })
    return params


def extract_patches(x, p):
    # x: (B, C, D, H, W) -> (B, N, C*p^3), matching Conv3d(stride=p) + flatten(2).transpose(1,2)
    B, C, D, H, W = x.shape
    x = x.reshape(B, C, D // p, p, H // p, p, W // p, p)
    x = x.transpose(0, 2, 4, 6, 1, 3, 5, 7)               # (B, Dp, Hp, Wp, C, p, p, p)
    return x.reshape(B, (D // p) * (H // p) * (W // p), C * p * p * p)


# ----------------------------- references for validation -----------------------------
def _ref_ln(x, w, b, eps=LN_EPS):
    mu = jnp.mean(x, axis=-1, keepdims=True)
    var = jnp.mean(jnp.square(x - mu), axis=-1, keepdims=True)
    return (x - mu) * jax.lax.rsqrt(var + eps) * w + b


def _bf16_dot(a, b):
    return jnp.dot(a.astype(MXU_DTYPE), b.astype(MXU_DTYPE), preferred_element_type=jnp.float32)


def mirror_forward(params, x, mask=None):
    """Mirrors the kernel's arithmetic (bf16 MXU operands, f32 accumulation, tanh GELU,
    scale folded into Wq before the bf16 cast) but uses the *unpacked* torch-layout
    weights, so head-packing / layout bugs in pack_params() show up as mismatches."""
    patches = extract_patches(x, PATCH)
    pos_pb = params["pos"] + params["patch_b"]
    if mask is not None:
        vis = np.where(~np.asarray(mask))[0]
        patches = patches[:, vis, :]
        pos_pb = pos_pb[vis]
    t = _bf16_dot(patches, params["patch_w"]) + pos_pb
    B, N, C = t.shape
    dh = C // NUM_HEADS
    for blk in params["blocks"]:
        h = _ref_ln(t, blk["ln1_w"], blk["ln1_b"])
        wq = blk["qkv_w"].reshape(C, 3, NUM_HEADS, dh)
        wq = wq.at[:, 0].multiply(jnp.float32(dh ** -0.5)).reshape(C, 3 * C)
        qkv = _bf16_dot(h, wq).reshape(B, N, 3, NUM_HEADS, dh).transpose(2, 0, 3, 1, 4)
        q, k, v = qkv[0], qkv[1], qkv[2]
        s = jnp.einsum('bhnd,bhmd->bhnm', q.astype(MXU_DTYPE), k.astype(MXU_DTYPE),
                       preferred_element_type=jnp.float32)
        p = jax.nn.softmax(s, axis=-1)
        out = jnp.einsum('bhnm,bhmd->bhnd', p.astype(MXU_DTYPE), v.astype(MXU_DTYPE),
                         preferred_element_type=jnp.float32)
        out = out.transpose(0, 2, 1, 3).reshape(B, N, C)
        t = t + _bf16_dot(out, blk["proj_w"]) + blk["proj_b"]
        h2 = _ref_ln(t, blk["ln2_w"], blk["ln2_b"])
        y = jax.nn.gelu(_bf16_dot(h2, blk["fc1_w"]) + blk["fc1_b"], approximate=True)
        t = t + _bf16_dot(y, blk["fc2_w"]) + blk["fc2_b"]
    return _ref_ln(t, params["norm_w"], params["norm_b"])


def reference_forward(params, x, mask=None):
    """Exact f32 / exact-GELU reference matching the PyTorch module semantics."""
    patches = extract_patches(x, PATCH)
    pos_pb = params["pos"] + params["patch_b"]
    if mask is not None:
        vis = np.where(~np.asarray(mask))[0]
        patches = patches[:, vis, :]
        pos_pb = pos_pb[vis]
    t = patches @ params["patch_w"] + pos_pb
    B, N, C = t.shape
    dh = C // NUM_HEADS
    for blk in params["blocks"]:
        h = _ref_ln(t, blk["ln1_w"], blk["ln1_b"])
        qkv = (h @ blk["qkv_w"]).reshape(B, N, 3, NUM_HEADS, dh).transpose(2, 0, 3, 1, 4)
        q, k, v = qkv[0] * dh ** -0.5, qkv[1], qkv[2]
        attn = jax.nn.softmax(q @ jnp.swapaxes(k, -2, -1), axis=-1)
        out = (attn @ v).transpose(0, 2, 1, 3).reshape(B, N, C)
        t = t + out @ blk["proj_w"] + blk["proj_b"]
        h2 = _ref_ln(t, blk["ln2_w"], blk["ln2_b"])
        t = t + jax.nn.gelu(h2 @ blk["fc1_w"] + blk["fc1_b"], approximate=False) @ blk["fc2_w"] + blk["fc2_b"]
    return _ref_ln(t, params["norm_w"], params["norm_b"])


# ----------------------------- main -----------------------------
if __name__ == "__main__":
    key = jax.random.PRNGKey(0)
    kx, kp = jax.random.split(key)
    x = jax.random.normal(kx, (BATCH, IN_CHANS, IMG_SIZE, IMG_SIZE, IMG_SIZE), jnp.float32)
    params = init_params(kp)
    packed = pack_params(params, MXU_DTYPE)

    # --- full-token (mask=None) encoder forward ---
    out = jax.block_until_ready(jax.jit(forward)(packed, x))
    assert out.shape == (BATCH, NUM_PATCHES, EMBED_DIM), out.shape
    # bf16-mirror reference (tight): catches head packing / layout bugs.
    np.testing.assert_allclose(np.asarray(out), np.asarray(mirror_forward(params, x)),
                               rtol=1e-2, atol=1e-2)
    # exact-f32 / exact-GELU reference (loose): bf16 MXU + approx reciprocal + tanh GELU budget.
    np.testing.assert_allclose(np.asarray(out), np.asarray(reference_forward(params, x)),
                               rtol=5e-2, atol=5e-2)

    # --- masked (visible-token) path, as used by PretrainVisionTransformer.forward ---
    mask = np.zeros(NUM_PATCHES, dtype=bool)
    mask[np.random.default_rng(0).choice(NUM_PATCHES, 16, replace=False)] = True
    out_m = jax.block_until_ready(jax.jit(partial(forward, mask=mask))(packed, x))
    assert out_m.shape == (BATCH, NUM_PATCHES - 16, EMBED_DIM), out_m.shape
    np.testing.assert_allclose(np.asarray(out_m), np.asarray(mirror_forward(params, x, mask)),
                               rtol=1e-2, atol=1e-2)

    print("KERNEL_OK")
</pallas_src>

<mosaic_0001>
module attributes {stable_mosaic.version = 11 : i64} {
  func.func @_fused_encoder_kernel(%arg0: i32, %arg1: memref<128x192xbf16, #tpu.memory_space<vmem>>, %arg2: memref<192x32xbf16, #tpu.memory_space<vmem>>, %arg3: memref<128x32xf32, #tpu.memory_space<vmem>>, %arg4: memref<2x4x32x24xbf16, #tpu.memory_space<vmem>>, %arg5: memref<2x4x8x32xbf16, #tpu.memory_space<vmem>>, %arg6: memref<2x32x128xbf16, #tpu.memory_space<vmem>>, %arg7: memref<2x128x32xbf16, #tpu.memory_space<vmem>>, %arg8: memref<16x128xf32, #tpu.memory_space<vmem>>, %arg9: memref<128x32xf32, #tpu.memory_space<vmem>>) attributes {dimension_semantics = [#tpu.dimension_semantics<arbitrary>], iteration_bounds = array<i64: 1>, scalar_prefetch = 0 : i64, scratch_operands = 0 : i64, tpu.core_type = #tpu.core_type<tc>, window_params = [{pipeline_mode = #tpu.pipeline_mode<synchronous>, transform_indices = @transform_0, window_bounds = array<i64: 128, 192>}, {pipeline_mode = #tpu.pipeline_mode<synchronous>, transform_indices = @transform_1, window_bounds = array<i64: 192, 32>}, {pipeline_mode = #tpu.pipeline_mode<synchronous>, transform_indices = @transform_2, window_bounds = array<i64: 128, 32>}, {pipeline_mode = #tpu.pipeline_mode<synchronous>, transform_indices = @transform_3, window_bounds = array<i64: 2, 4, 32, 24>}, {pipeline_mode = #tpu.pipeline_mode<synchronous>, transform_indices = @transform_4, window_bounds = array<i64: 2, 4, 8, 32>}, {pipeline_mode = #tpu.pipeline_mode<synchronous>, transform_indices = @transform_5, window_bounds = array<i64: 2, 32, 128>}, {pipeline_mode = #tpu.pipeline_mode<synchronous>, transform_indices = @transform_6, window_bounds = array<i64: 2, 128, 32>}, {pipeline_mode = #tpu.pipeline_mode<synchronous>, transform_indices = @transform_7, window_bounds = array<i64: 16, 128>}, {pipeline_mode = #tpu.pipeline_mode<synchronous>, transform_indices = @transform_8, window_bounds = array<i64: 128, 32>}]} {
    %c0 = arith.constant 0 : index
    %c0_0 = arith.constant 0 : index
    %0 = vector.load %arg1[%c0, %c0_0] : memref<128x192xbf16, #tpu.memory_space<vmem>>, vector<128x192xbf16>
    %c0_1 = arith.constant 0 : index
    %c0_2 = arith.constant 0 : index
    %1 = vector.load %arg2[%c0_1, %c0_2] : memref<192x32xbf16, #tpu.memory_space<vmem>>, vector<192x32xbf16>
    %cst = arith.constant dense<0.000000e+00> : vector<128x32xf32>
    %2 = tpu.matmul %0, %1, %cst {dimension_numbers = #tpu.dot_dimension_numbers<[1], [0], [0], [1], [0, 0, 1, 1], [], []>} : vector<128x192xbf16>, vector<192x32xbf16>, vector<128x32xf32> -> vector<128x32xf32>
    %c0_3 = arith.constant 0 : index
    %c0_4 = arith.constant 0 : index
    %3 = vector.load %arg3[%c0_3, %c0_4] : memref<128x32xf32, #tpu.memory_space<vmem>>, vector<128x32xf32>
    %4 = arith.addf %2, %3 : vector<128x32xf32>
    %c0_5 = arith.constant 0 : index
    %c0_6 = arith.constant 0 : index
    %5 = vector.load %arg8[%c0_5, %c0_6] : memref<16x128xf32, #tpu.memory_space<vmem>>, vector<1x32xf32>
    %c1 = arith.constant 1 : index
    %c0_7 = arith.constant 0 : index
    %6 = vector.load %arg8[%c1, %c0_7] : memref<16x128xf32, #tpu.memory_space<vmem>>, vector<1x32xf32>
    %c2 = arith.constant 2 : index
    %c0_8 = arith.constant 0 : index
    %7 = vector.load %arg8[%c2, %c0_8] : memref<16x128xf32, #tpu.memory_space<vmem>>, vector<1x32xf32>
    %c3 = arith.constant 3 : index
    %c0_9 = arith.constant 0 : index
    %8 = vector.load %arg8[%c3, %c0_9] : memref<16x128xf32, #tpu.memory_space<vmem>>, vector<1x32xf32>
    %c4 = arith.constant 4 : index
    %c0_10 = arith.constant 0 : index
    %9 = vector.load %arg8[%c4, %c0_10] : memref<16x128xf32, #tpu.memory_space<vmem>>, vector<1x32xf32>
    %c5 = arith.constant 5 : index
    %c0_11 = arith.constant 0 : index
    %10 = vector.load %arg8[%c5, %c0_11] : memref<16x128xf32, #tpu.memory_space<vmem>>, vector<1x32xf32>
    %c6 = arith.constant 6 : index
    %c0_12 = arith.constant 0 : index
    %11 = vector.load %arg8[%c6, %c0_12] : memref<16x128xf32, #tpu.memory_space<vmem>>, vector<1x128xf32>
    %cst_13 = arith.constant dense<0.000000e+00> : vector<128xf32>
    %12 = vector.multi_reduction <add>, %4, %cst_13 [1] : vector<128x32xf32> to vector<128xf32>
    %13 = vector.shape_cast %12 : vector<128xf32> to vector<128x1xf32>
    %cst_14 = arith.constant 3.200000e+01 : f32
    %14 = vector.broadcast %cst_14 : f32 to vector<128x1xf32>
    %15 = arith.divf %13, %14 : vector<128x1xf32>
    %16 = vector.broadcast %15 : vector<128x1xf32> to vector<128x32xf32>
    %17 = arith.subf %4, %16 : vector<128x32xf32>
    %18 = arith.mulf %17, %17 : vector<128x32xf32>
    %cst_15 = arith.constant dense<0.000000e+00> : vector<128xf32>
    %19 = vector.multi_reduction <add>, %18, %cst_15 [1] : vector<128x32xf32> to vector<128xf32>
    %20 = vector.shape_cast %19 : vector<128xf32> to vector<128x1xf32>
    %cst_16 = arith.constant 3.200000e+01 : f32
    %21 = vector.broadcast %cst_16 : f32 to vector<128x1xf32>
    %22 = arith.divf %20, %21 : vector<128x1xf32>
    %23 = vector.broadcast %15 : vector<128x1xf32> to vector<128x32xf32>
    %24 = arith.subf %4, %23 : vector<128x32xf32>
    %cst_17 = arith.constant 9.99999974E-6 : f32
    %25 = vector.broadcast %cst_17 : f32 to vector<128x1xf32>
    %26 = arith.addf %22, %25 : vector<128x1xf32>
    %27 = math.rsqrt %26 : vector<128x1xf32>
    %28 = vector.broadcast %27 : vector<128x1xf32> to vector<128x32xf32>
    %29 = arith.mulf %24, %28 : vector<128x32xf32>
    %30 = vector.broadcast %5 : vector<1x32xf32> to vector<128x32xf32>
    %31 = arith.mulf %29, %30 : vector<128x32xf32>
    %32 = vector.broadcast %6 : vector<1x32xf32> to vector<128x32xf32>
    %33 = arith.addf %31, %32 : vector<128x32xf32>
    %34 = arith.truncf %33 : vector<128x32xf32> to vector<128x32xbf16>
    %35 = vector.broadcast %9 : vector<1x32xf32> to vector<128x32xf32>
    %36 = arith.addf %4, %35 : vector<128x32xf32>
    %c0_18 = arith.constant 0 : index
    %c0_19 = arith.constant 0 : index
    %c0_20 = arith.constant 0 : index
    %c0_21 = arith.constant 0 : index
    %37 = vector.load %arg4[%c0_18, %c0_19, %c0_20, %c0_21] : memref<2x4x32x24xbf16, #tpu.memory_space<vmem>>, vector<1x1x32x24xbf16>
    %38 = vector.shape_cast %37 : vector<1x1x32x24xbf16> to vector<32x24xbf16>
    %cst_22 = arith.constant dense<0.000000e+00> : vector<128x24xf32>
    %39 = tpu.matmul %34, %38, %cst_22 {dimension_numbers = #tpu.dot_dimension_numbers<[1], [0], [0], [1], [0, 0, 1, 1], [], []>} : vector<128x32xbf16>, vector<32x24xbf16>, vector<128x24xf32> -> vector<128x24xf32>
    %40 = vector.extract_strided_slice %39 {offsets = [0, 0], sizes = [128, 8], strides = [1, 1]} : vector<128x24xf32> to vector<128x8xf32>
    %41 = vector.shape_cast %40 : vector<128x8xf32> to vector<2x64x8xf32>
    %42 = vector.extract_strided_slice %39 {offsets = [0, 8], sizes = [128, 8], strides = [1, 1]} : vector<128x24xf32> to vector<128x8xf32>
    %43 = vector.shape_cast %42 : vector<128x8xf32> to vector<2x64x8xf32>
    %44 = vector.extract_strided_slice %39 {offsets = [0, 16], sizes = [128, 8], strides = [1, 1]} : vector<128x24xf32> to vector<128x8xf32>
    %45 = vector.shape_cast %44 : vector<128x8xf32> to vector<2x64x8xf32>
    %46 = arith.truncf %41 : vector<2x64x8xf32> to vector<2x64x8xbf16>
    %47 = arith.truncf %43 : vector<2x64x8xf32> to vector<2x64x8xbf16>
    "tpu.trace_start"() <{level = 10 : i32, message = "bnd,bmd->bnm"}> : () -> ()
    %cst_23 = arith.constant dense<0.000000e+00> : vector<2x64x64xf32>
    %48 = tpu.matmul %46, %47, %cst_23 {dimension_numbers = #tpu.dot_dimension_numbers<[2], [2], [1], [1], [0, 0, 0, 1, 1, 1], [0], [0]>} : vector<2x64x8xbf16>, vector<2x64x8xbf16>, vector<2x64x64xf32> -> vector<2x64x64xf32>
    "tpu.trace_stop"() : () -> ()
    %cst_24 = arith.constant dense<0xFF800000> : vector<2x64xf32>
    %49 = vector.multi_reduction <maximumf>, %48, %cst_24 [2] : vector<2x64x64xf32> to vector<2x64xf32>
    %50 = vector.shape_cast %49 : vector<2x64xf32> to vector<2x64x1xf32>
    %51 = vector.broadcast %50 : vector<2x64x1xf32> to vector<2x64x64xf32>
    %52 = arith.subf %48, %51 : vector<2x64x64xf32>
    %53 = math.exp %52 : vector<2x64x64xf32>
    %cst_25 = arith.constant dense<0.000000e+00> : vector<2x64xf32>
    %54 = vector.multi_reduction <add>, %53, %cst_25 [2] : vector<2x64x64xf32> to vector<2x64xf32>
    %55 = vector.shape_cast %54 : vector<2x64xf32> to vector<2x64x1xf32>
    %56 = tpu.reciprocal %55 {approx = true} : vector<2x64x1xf32> -> vector<2x64x1xf32>
    %57 = vector.broadcast %56 : vector<2x64x1xf32> to vector<2x64x64xf32>
    %58 = arith.mulf %53, %57 : vector<2x64x64xf32>
    %59 = arith.truncf %58 : vector<2x64x64xf32> to vector<2x64x64xbf16>
    %60 = arith.truncf %45 : vector<2x64x8xf32> to vector<2x64x8xbf16>
    "tpu.trace_start"() <{level = 10 : i32, message = "bnm,bmd->bnd"}> : () -> ()
    %cst_26 = arith.constant dense<0.000000e+00> : vector<2x64x8xf32>
    %61 = tpu.matmul %59, %60, %cst_26 {dimension_numbers = #tpu.dot_dimension_numbers<[2], [1], [1], [2], [0, 0, 0, 1, 1, 2], [0], [0]>} : vector<2x64x64xbf16>, vector<2x64x8xbf16>, vector<2x64x8xf32> -> vector<2x64x8xf32>
    "tpu.trace_stop"() : () -> ()
    %62 = vector.shape_cast %61 : vector<2x64x8xf32> to vector<128x8xf32>
    %63 = arith.truncf %62 : vector<128x8xf32> to vector<128x8xbf16>
    %c0_27 = arith.constant 0 : index
    %c0_28 = arith.constant 0 : index
    %c0_29 = arith.constant 0 : index
    %c0_30 = arith.constant 0 : index
    %64 = vector.load %arg5[%c0_27, %c0_28, %c0_29, %c0_30] : memref<2x4x8x32xbf16, #tpu.memory_space<vmem>>, vector<1x1x8x32xbf16>
    %65 = vector.shape_cast %64 : vector<1x1x8x32xbf16> to vector<8x32xbf16>
    %cst_31 = arith.constant dense<0.000000e+00> : vector<128x32xf32>
    %66 = tpu.matmul %63, %65, %cst_31 {dimension_numbers = #tpu.dot_dimension_numbers<[1], [0], [0], [1], [0, 0, 1, 1], [], []>} : vector<128x8xbf16>, vector<8x32xbf16>, vector<128x32xf32> -> vector<128x32xf32>
    %67 = arith.addf %36, %66 : vector<128x32xf32>
    %c0_32 = arith.constant 0 : index
    %c1_33 = arith.constant 1 : index
    %c0_34 = arith.constant 0 : index
    %c0_35 = arith.constant 0 : index
    %68 = vector.load %arg4[%c0_32, %c1_33, %c0_34, %c0_35] : memref<2x4x32x24xbf16, #tpu.memory_space<vmem>>, vector<1x1x32x24xbf16>
    %69 = vector.shape_cast %68 : vector<1x1x32x24xbf16> to vector<32x24xbf16>
    %cst_36 = arith.constant dense<0.000000e+00> : vector<128x24xf32>
    %70 = tpu.matmul %34, %69, %cst_36 {dimension_numbers = #tpu.dot_dimension_numbers<[1], [0], [0], [1], [0, 0, 1, 1], [], []>} : vector<128x32xbf16>, vector<32x24xbf16>, vector<128x24xf32> -> vector<128x24xf32>
    %71 = vector.extract_strided_slice %70 {offsets = [0, 0], sizes = [128, 8], strides = [1, 1]} : vector<128x24xf32> to vector<128x8xf32>
    %72 = vector.shape_cast %71 : vector<128x8xf32> to vector<2x64x8xf32>
    %73 = vector.extract_strided_slice %70 {offsets = [0, 8], sizes = [128, 8], strides = [1, 1]} : vector<128x24xf32> to vector<128x8xf32>
    %74 = vector.shape_cast %73 : vector<128x8xf32> to vector<2x64x8xf32>
    %75 = vector.extract_strided_slice %70 {offsets = [0, 16], sizes = [128, 8], strides = [1, 1]} : vector<128x24xf32> to vector<128x8xf32>
    %76 = vector.shape_cast %75 : vector<128x8xf32> to vector<2x64x8xf32>
    %77 = arith.truncf %72 : vector<2x64x8xf32> to vector<2x64x8xbf16>
    %78 = arith.truncf %74 : vector<2x64x8xf32> to vector<2x64x8xbf16>
    "tpu.trace_start"() <{level = 10 : i32, message = "bnd,bmd->bnm"}> : () -> ()
    %cst_37 = arith.constant dense<0.000000e+00> : vector<2x64x64xf32>
    %79 = tpu.matmul %77, %78, %cst_37 {dimension_numbers = #tpu.dot_dimension_numbers<[2], [2], [1], [1], [0, 0, 0, 1, 1, 1], [0], [0]>} : vector<2x64x8xbf16>, vector<2x64x8xbf16>, vector<2x64x64xf32> -> vector<2x64x64xf32>
    "tpu.trace_stop"() : () -> ()
    %cst_38 = arith.constant dense<0xFF800000> : vector<2x64xf32>
    %80 = vector.multi_reduction <maximumf>, %79, %cst_38 [2] : vector<2x64x64xf32> to vector<2x64xf32>
    %81 = vector.shape_cast %80 : vector<2x64xf32> to vector<2x64x1xf32>
    %82 = vector.broadcast %81 : vector<2x64x1xf32> to vector<2x64x64xf32>
    %83 = arith.subf %79, %82 : vector<2x64x64xf32>
    %84 = math.exp %83 : vector<2x64x64xf32>
    %cst_39 = arith.constant dense<0.000000e+00> : vector<2x64xf32>
    %85 = vector.multi_reduction <add>, %84, %cst_39 [2] : vector<2x64x64xf32> to vector<2x64xf32>
    %86 = vector.shape_cast %85 : vector<2x64xf32> to vector<2x64x1xf32>
    %87 = tpu.reciprocal %86 {approx = true} : vector<2x64x1xf32> -> vector<2x64x1xf32>
    %88 = vector.broadcast %87 : vector<2x64x1xf32> to vector<2x64x64xf32>
    %89 = arith.mulf %84, %88 : vector<2x64x64xf32>
    %90 = arith.truncf %89 : vector<2x64x64xf32> to vector<2x64x64xbf16>
    %91 = arith.truncf %76 : vector<2x64x8xf32> to vector<2x64x8xbf16>
    "tpu.trace_start"() <{level = 10 : i32, message = "bnm,bmd->bnd"}> : () -> ()
    %cst_40 = arith.constant dense<0.000000e+00> : vector<2x64x8xf32>
    %92 = tpu.matmul %90, %91, %cst_40 {dimension_numbers = #tpu.dot_dimension_numbers<[2], [1], [1], [2], [0, 0, 0, 1, 1, 2], [0], [0]>} : vector<2x64x64xbf16>, vector<2x64x8xbf16>, vector<2x64x8xf32> -> vector<2x64x8xf32>
    "tpu.trace_stop"() : () -> ()
    %93 = vector.shape_cast %92 : vector<2x64x8xf32> to vector<128x8xf32>
    %94 = arith.truncf %93 : vector<128x8xf32> to vector<128x8xbf16>
    %c0_41 = arith.constant 0 : index
    %c1_42 = arith.constant 1 : index
    %c0_43 = arith.constant 0 : index
    %c0_44 = arith.constant 0 : index
    %95 = vector.load %arg5[%c0_41, %c1_42, %c0_43, %c0_44] : memref<2x4x8x32xbf16, #tpu.memory_space<vmem>>, vector<1x1x8x32xbf16>
    %96 = vector.shape_cast %95 : vector<1x1x8x32xbf16> to vector<8x32xbf16>
    %cst_45 = arith.constant dense<0.000000e+00> : vector<128x32xf32>
    %97 = tpu.matmul %94, %96, %cst_45 {dimension_numbers = #tpu.dot_dimension_numbers<[1], [0], [0], [1], [0, 0, 1, 1], [], []>} : vector<128x8xbf16>, vector<8x32xbf16>, vector<128x32xf32> -> vector<128x32xf32>
    %98 = arith.addf %67, %97 : vector<128x32xf32>
    %c0_46 = arith.constant 0 : index
    %c2_47 = arith.constant 2 : index
    %c0_48 = arith.constant 0 : index
    %c0_49 = arith.constant 0 : index
    %99 = vector.load %arg4[%c0_46, %c2_47, %c0_48, %c0_49] : memref<2x4x32x24xbf16, #tpu.memory_space<vmem>>, vector<1x1x32x24xbf16>
    %100 = vector.shape_cast %99 : vector<1x1x32x24xbf16> to vector<32x24xbf16>
    %cst_50 = arith.constant dense<0.000000e+00> : vector<128x24xf32>
    %101 = tpu.matmul %34, %100, %cst_50 {dimension_numbers = #tpu.dot_dimension_numbers<[1], [0], [0], [1], [0, 0, 1, 1], [], []>} : vector<128x32xbf16>, vector<32x24xbf16>, vector<128x24xf32> -> vector<128x24xf32>
    %102 = vector.extract_strided_slice %101 {offsets = [0, 0], sizes = [128, 8], strides = [1, 1]} : vector<128x24xf32> to vector<128x8xf32>
    %103 = vector.shape_cast %102 : vector<128x8xf32> to vector<2x64x8xf32>
    %104 = vector.extract_strided_slice %101 {offsets = [0, 8], sizes = [128, 8], strides = [1, 1]} : vector<128x24xf32> to vector<128x8xf32>
    %105 = vector.shape_cast %104 : vector<128x8xf32> to vector<2x64x8xf32>
    %106 = vector.extract_strided_slice %101 {offsets = [0, 16], sizes = [128, 8], strides = [1, 1]} : vector<128x24xf32> to vector<128x8xf32>
    %107 = vector.shape_cast %106 : vector<128x8xf32> to vector<2x64x8xf32>
    %108 = arith.truncf %103 : vector<2x64x8xf32> to vector<2x64x8xbf16>
    %109 = arith.truncf %105 : vector<2x64x8xf32> to vector<2x64x8xbf16>
    "tpu.trace_start"() <{level = 10 : i32, message = "bnd,bmd->bnm"}> : () -> ()
    %cst_51 = arith.constant dense<0.000000e+00> : vector<2x64x64xf32>
    %110 = tpu.matmul %108, %109, %cst_51 {dimension_numbers = #tpu.dot_dimension_numbers<[2], [2], [1], [1], [0, 0, 0, 1, 1, 1], [0], [0]>} : vector<2x64x8xbf16>, vector<2x64x8xbf16>, vector<2x64x64xf32> -> vector<2x64x64xf32>
    "tpu.trace_stop"() : () -> ()
    %cst_52 = arith.constant dense<0xFF800000> : vector<2x64xf32>
    %111 = vector.multi_reduction <maximumf>, %110, %cst_52 [2] : vector<2x64x64xf32> to vector<2x64xf32>
    %112 = vector.shape_cast %111 : vector<2x64xf32> to vector<2x64x1xf32>
    %113 = vector.broadcast %112 : vector<2x64x1xf32> to vector<2x64x64xf32>
    %114 = arith.subf %110, %113 : vector<2x64x64xf32>
    %115 = math.exp %114 : vector<2x64x64xf32>
    %cst_53 = arith.constant dense<0.000000e+00> : vector<2x64xf32>
    %116 = vector.multi_reduction <add>, %115, %cst_53 [2] : vector<2x64x64xf32> to vector<2x64xf32>
    %117 = vector.shape_cast %116 : vector<2x64xf32> to vector<2x64x1xf32>
    %118 = tpu.reciprocal %117 {approx = true} : vector<2x64x1xf32> -> vector<2x64x1xf32>
    %119 = vector.broadcast %118 : vector<2x64x1xf32> to vector<2x64x64xf32>
    %120 = arith.mulf %115, %119 : vector<2x64x64xf32>
    %121 = arith.truncf %120 : vector<2x64x64xf32> to vector<2x64x64xbf16>
    %122 = arith.truncf %107 : vector<2x64x8xf32> to vector<2x64x8xbf16>
    "tpu.trace_start"() <{level = 10 : i32, message = "bnm,bmd->bnd"}> : () -> ()
    %cst_54 = arith.constant dense<0.000000e+00> : vector<2x64x8xf32>
    %123 = tpu.matmul %121, %122, %cst_54 {dimension_numbers = #tpu.dot_dimension_numbers<[2], [1], [1], [2], [0, 0, 0, 1, 1, 2], [0], [0]>} : vector<2x64x64xbf16>, vector<2x64x8xbf16>, vector<2x64x8xf32> -> vector<2x64x8xf32>
    "tpu.trace_stop"() : () -> ()
    %124 = vector.shape_cast %123 : vector<2x64x8xf32> to vector<128x8xf32>
    %125 = arith.truncf %124 : vector<128x8xf32> to vector<128x8xbf16>
    %c0_55 = arith.constant 0 : index
    %c2_56 = arith.constant 2 : index
    %c0_57 = arith.constant 0 : index
    %c0_58 = arith.constant 0 : index
    %126 = vector.load %arg5[%c0_55, %c2_56, %c0_57, %c0_58] : memref<2x4x8x32xbf16, #tpu.memory_space<vmem>>, vector<1x1x8x32xbf16>
    %127 = vector.shape_cast %126 : vector<1x1x8x32xbf16> to vector<8x32xbf16>
    %cst_59 = arith.constant dense<0.000000e+00> : vector<128x32xf32>
    %128 = tpu.matmul %125, %127, %cst_59 {dimension_numbers = #tpu.dot_dimension_numbers<[1], [0], [0], [1], [0, 0, 1, 1], [], []>} : vector<128x8xbf16>, vector<8x32xbf16>, vector<128x32xf32> -> vector<128x32xf32>
    %129 = arith.addf %98, %128 : vector<128x32xf32>
    %c0_60 = arith.constant 0 : index
    %c3_61 = arith.constant 3 : index
    %c0_62 = arith.constant 0 : index
    %c0_63 = arith.constant 0 : index
    %130 = vector.load %arg4[%c0_60, %c3_61, %c0_62, %c0_63] : memref<2x4x32x24xbf16, #tpu.memory_space<vmem>>, vector<1x1x32x24xbf16>
    %131 = vector.shape_cast %130 : vector<1x1x32x24xbf16> to vector<32x24xbf16>
    %cst_64 = arith.constant dense<0.000000e+00> : vector<128x24xf32>
    %132 = tpu.matmul %34, %131, %cst_64 {dimension_numbers = #tpu.dot_dimension_numbers<[1], [0], [0], [1], [0, 0, 1, 1], [], []>} : vector<128x32xbf16>, vector<32x24xbf16>, vector<128x24xf32> -> vector<128x24xf32>
    %133 = vector.extract_strided_slice %132 {offsets = [0, 0], sizes = [128, 8], strides = [1, 1]} : vector<128x24xf32> to vector<128x8xf32>
    %134 = vector.shape_cast %133 : vector<128x8xf32> to vector<2x64x8xf32>
    %135 = vector.extract_strided_slice %132 {offsets = [0, 8], sizes = [128, 8], strides = [1, 1]} : vector<128x24xf32> to vector<128x8xf32>
    %136 = vector.shape_cast %135 : vector<128x8xf32> to vector<2x64x8xf32>
    %137 = vector.extract_strided_slice %132 {offsets = [0, 16], sizes = [128, 8], strides = [1, 1]} : vector<128x24xf32> to vector<128x8xf32>
    %138 = vector.shape_cast %137 : vector<128x8xf32> to vector<2x64x8xf32>
    %139 = arith.truncf %134 : vector<2x64x8xf32> to vector<2x64x8xbf16>
    %140 = arith.truncf %136 : vector<2x64x8xf32> to vector<2x64x8xbf16>
    "tpu.trace_start"() <{level = 10 : i32, message = "bnd,bmd->bnm"}> : () -> ()
    %cst_65 = arith.constant dense<0.000000e+00> : vector<2x64x64xf32>
    %141 = tpu.matmul %139, %140, %cst_65 {dimension_numbers = #tpu.dot_dimension_numbers<[2], [2], [1], [1], [0, 0, 0, 1, 1, 1], [0], [0]>} : vector<2x64x8xbf16>, vector<2x64x8xbf16>, vector<2x64x64xf32> -> vector<2x64x64xf32>
    "tpu.trace_stop"() : () -> ()
    %cst_66 = arith.constant dense<0xFF800000> : vector<2x64xf32>
    %142 = vector.multi_reduction <maximumf>, %141, %cst_66 [2] : vector<2x64x64xf32> to vector<2x64xf32>
    %143 = vector.shape_cast %142 : vector<2x64xf32> to vector<2x64x1xf32>
    %144 = vector.broadcast %143 : vector<2x64x1xf32> to vector<2x64x64xf32>
    %145 = arith.subf %141, %144 : vector<2x64x64xf32>
    %146 = math.exp %145 : vector<2x64x64xf32>
    %cst_67 = arith.constant dense<0.000000e+00> : vector<2x64xf32>
    %147 = vector.multi_reduction <add>, %146, %cst_67 [2] : vector<2x64x64xf32> to vector<2x64xf32>
    %148 = vector.shape_cast %147 : vector<2x64xf32> to vector<2x64x1xf32>
    %149 = tpu.reciprocal %148 {approx = true} : vector<2x64x1xf32> -> vector<2x64x1xf32>
    %150 = vector.broadcast %149 : vector<2x64x1xf32> to vector<2x64x64xf32>
    %151 = arith.mulf %146, %150 : vector<2x64x64xf32>
    %152 = arith.truncf %151 : vector<2x64x64xf32> to vector<2x64x64xbf16>
    %153 = arith.truncf %138 : vector<2x64x8xf32> to vector<2x64x8xbf16>
    "tpu.trace_start"() <{level = 10 : i32, message = "bnm,bmd->bnd"}> : () -> ()
    %cst_68 = arith.constant dense<0.000000e+00> : vector<2x64x8xf32>
    %154 = tpu.matmul %152, %153, %cst_68 {dimension_numbers = #tpu.dot_dimension_numbers<[2], [1], [1], [2], [0, 0, 0, 1, 1, 2], [0], [0]>} : vector<2x64x64xbf16>, vector<2x64x8xbf16>, vector<2x64x8xf32> -> vector<2x64x8xf32>
    "tpu.trace_stop"() : () -> ()
    %155 = vector.shape_cast %154 : vector<2x64x8xf32> to vector<128x8xf32>
    %156 = arith.truncf %155 : vector<128x8xf32> to vector<128x8xbf16>
    %c0_69 = arith.constant 0 : index
    %c3_70 = arith.constant 3 : index
    %c0_71 = arith.constant 0 : index
    %c0_72 = arith.constant 0 : index
    %157 = vector.load %arg5[%c0_69, %c3_70, %c0_71, %c0_72] : memref<2x4x8x32xbf16, #tpu.memory_space<vmem>>, vector<1x1x8x32xbf16>
    %158 = vector.shape_cast %157 : vector<1x1x8x32xbf16> to vector<8x32xbf16>
    %cst_73 = arith.constant dense<0.000000e+00> : vector<128x32xf32>
    %159 = tpu.matmul %156, %158, %cst_73 {dimension_numbers = #tpu.dot_dimension_numbers<[1], [0], [0], [1], [0, 0, 1, 1], [], []>} : vector<128x8xbf16>, vector<8x32xbf16>, vector<128x32xf32> -> vector<128x32xf32>
    %160 = arith.addf %129, %159 : vector<128x32xf32>
    %cst_74 = arith.constant dense<0.000000e+00> : vector<128xf32>
    %161 = vector.multi_reduction <add>, %160, %cst_74 [1] : vector<128x32xf32> to vector<128xf32>
    %162 = vector.shape_cast %161 : vector<128xf32> to vector<128x1xf32>
    %cst_75 = arith.constant 3.200000e+01 : f32
    %163 = vector.broadcast %cst_75 : f32 to vector<128x1xf32>
    %164 = arith.divf %162, %163 : vector<128x1xf32>
    %165 = vector.broadcast %164 : vector<128x1xf32> to vector<128x32xf32>
    %166 = arith.subf %160, %165 : vector<128x32xf32>
    %167 = arith.mulf %166, %166 : vector<128x32xf32>
    %cst_76 = arith.constant dense<0.000000e+00> : vector<128xf32>
    %168 = vector.multi_reduction <add>, %167, %cst_76 [1] : vector<128x32xf32> to vector<128xf32>
    %169 = vector.shape_cast %168 : vector<128xf32> to vector<128x1xf32>
    %cst_77 = arith.constant 3.200000e+01 : f32
    %170 = vector.broadcast %cst_77 : f32 to vector<128x1xf32>
    %171 = arith.divf %169, %170 : vector<128x1xf32>
    %172 = vector.broadcast %164 : vector<128x1xf32> to vector<128x32xf32>
    %173 = arith.subf %160, %172 : vector<128x32xf32>
    %cst_78 = arith.constant 9.99999974E-6 : f32
    %174 = vector.broadcast %cst_78 : f32 to vector<128x1xf32>
    %175 = arith.addf %171, %174 : vector<128x1xf32>
    %176 = math.rsqrt %175 : vector<128x1xf32>
    %177 = vector.broadcast %176 : vector<128x1xf32> to vector<128x32xf32>
    %178 = arith.mulf %173, %177 : vector<128x32xf32>
    %179 = vector.broadcast %7 : vector<1x32xf32> to vector<128x32xf32>
    %180 = arith.mulf %178, %179 : vector<128x32xf32>
    %181 = vector.broadcast %8 : vector<1x32xf32> to vector<128x32xf32>
    %182 = arith.addf %180, %181 : vector<128x32xf32>
    %183 = arith.truncf %182 : vector<128x32xf32> to vector<128x32xbf16>
    %c0_79 = arith.constant 0 : index
    %c0_80 = arith.constant 0 : index
    %c0_81 = arith.constant 0 : index
    %184 = vector.load %arg6[%c0_79, %c0_80, %c0_81] : memref<2x32x128xbf16, #tpu.memory_space<vmem>>, vector<1x32x128xbf16>
    %185 = vector.shape_cast %184 : vector<1x32x128xbf16> to vector<32x128xbf16>
    %cst_82 = arith.constant dense<0.000000e+00> : vector<128x128xf32>
    %186 = tpu.matmul %183, %185, %cst_82 {dimension_numbers = #tpu.dot_dimension_numbers<[1], [0], [0], [1], [0, 0, 1, 1], [], []>} : vector<128x32xbf16>, vector<32x128xbf16>, vector<128x128xf32> -> vector<128x128xf32>
    %187 = vector.broadcast %11 : vector<1x128xf32> to vector<128x128xf32>
    %188 = arith.addf %186, %187 : vector<128x128xf32>
    %189 = arith.mulf %188, %188 : vector<128x128xf32>
    %190 = arith.mulf %188, %189 : vector<128x128xf32>
    %cst_83 = arith.constant 4.471500e-02 : f32
    %191 = vector.broadcast %cst_83 : f32 to vector<128x128xf32>
    %192 = arith.mulf %191, %190 : vector<128x128xf32>
    %193 = arith.addf %188, %192 : vector<128x128xf32>
    %cst_84 = arith.constant 0.797884583 : f32
    %194 = vector.broadcast %cst_84 : f32 to vector<128x128xf32>
    %195 = arith.mulf %194, %193 : vector<128x128xf32>
    %196 = math.tanh %195 : vector<128x128xf32>
    %cst_85 = arith.constant 1.000000e+00 : f32
    %197 = vector.broadcast %cst_85 : f32 to vector<128x128xf32>
    %198 = arith.addf %197, %196 : vector<128x128xf32>
    %cst_86 = arith.constant 5.000000e-01 : f32
    %199 = vector.broadcast %cst_86 : f32 to vector<128x128xf32>
    %200 = arith.mulf %199, %198 : vector<128x128xf32>
    %201 = arith.mulf %188, %200 : vector<128x128xf32>
    %202 = arith.truncf %201 : vector<128x128xf32> to vector<128x128xbf16>
    %c0_87 = arith.constant 0 : index
    %c0_88 = arith.constant 0 : index
    %c0_89 = arith.constant 0 : index
    %203 = vector.load %arg7[%c0_87, %c0_88, %c0_89] : memref<2x128x32xbf16, #tpu.memory_space<vmem>>, vector<1x128x32xbf16>
    %204 = vector.shape_cast %203 : vector<1x128x32xbf16> to vector<128x32xbf16>
    %cst_90 = arith.constant dense<0.000000e+00> : vector<128x32xf32>
    %205 = tpu.matmul %202, %204, %cst_90 {dimension_numbers = #tpu.dot_dimension_numbers<[1], [0], [0], [1], [0, 0, 1, 1], [], []>} : vector<128x128xbf16>, vector<128x32xbf16>, vector<128x32xf32> -> vector<128x32xf32>
    %206 = arith.addf %160, %205 : vector<128x32xf32>
    %207 = vector.broadcast %10 : vector<1x32xf32> to vector<128x32xf32>
    %208 = arith.addf %206, %207 : vector<128x32xf32>
    %c7 = arith.constant 7 : index
    %c0_91 = arith.constant 0 : index
    %209 = vector.load %arg8[%c7, %c0_91] : memref<16x128xf32, #tpu.memory_space<vmem>>, vector<1x32xf32>
    %c8 = arith.constant 8 : index
    %c0_92 = arith.constant 0 : index
    %210 = vector.load %arg8[%c8, %c0_92] : memref<16x128xf32, #tpu.memory_space<vmem>>, vector<1x32xf32>
    %c9 = arith.constant 9 : index
    %c0_93 = arith.constant 0 : index
    %211 = vector.load %arg8[%c9, %c0_93] : memref<16x128xf32, #tpu.memory_space<vmem>>, vector<1x32xf32>
    %c10 = arith.constant 10 : index
    %c0_94 = arith.constant 0 : index
    %212 = vector.load %arg8[%c10, %c0_94] : memref<16x128xf32, #tpu.memory_space<vmem>>, vector<1x32xf32>
    %c11 = arith.constant 11 : index
    %c0_95 = arith.constant 0 : index
    %213 = vector.load %arg8[%c11, %c0_95] : memref<16x128xf32, #tpu.memory_space<vmem>>, vector<1x32xf32>
    %c12 = arith.constant 12 : index
    %c0_96 = arith.constant 0 : index
    %214 = vector.load %arg8[%c12, %c0_96] : memref<16x128xf32, #tpu.memory_space<vmem>>, vector<1x32xf32>
    %c13 = arith.constant 13 : index
    %c0_97 = arith.constant 0 : index
    %215 = vector.load %arg8[%c13, %c0_97] : memref<16x128xf32, #tpu.memory_space<vmem>>, vector<1x128xf32>
    %cst_98 = arith.constant dense<0.000000e+00> : vector<128xf32>
    %216 = vector.multi_reduction <add>, %208, %cst_98 [1] : vector<128x32xf32> to vector<128xf32>
    %217 = vector.shape_cast %216 : vector<128xf32> to vector<128x1xf32>
    %cst_99 = arith.constant 3.200000e+01 : f32
    %218 = vector.broadcast %cst_99 : f32 to vector<128x1xf32>
    %219 = arith.divf %217, %218 : vector<128x1xf32>
    %220 = vector.broadcast %219 : vector<128x1xf32> to vector<128x32xf32>
    %221 = arith.subf %208, %220 : vector<128x32xf32>
    %222 = arith.mulf %221, %221 : vector<128x32xf32>
    %cst_100 = arith.constant dense<0.000000e+00> : vector<128xf32>
    %223 = vector.multi_reduction <add>, %222, %cst_100 [1] : vector<128x32xf32> to vector<128xf32>
    %224 = vector.shape_cast %223 : vector<128xf32> to vector<128x1xf32>
    %cst_101 = arith.constant 3.200000e+01 : f32
    %225 = vector.broadcast %cst_101 : f32 to vector<128x1xf32>
    %226 = arith.divf %224, %225 : vector<128x1xf32>
    %227 = vector.broadcast %219 : vector<128x1xf32> to vector<128x32xf32>
    %228 = arith.subf %208, %227 : vector<128x32xf32>
    %cst_102 = arith.constant 9.99999974E-6 : f32
    %229 = vector.broadcast %cst_102 : f32 to vector<128x1xf32>
    %230 = arith.addf %226, %229 : vector<128x1xf32>
    %231 = math.rsqrt %230 : vector<128x1xf32>
    %232 = vector.broadcast %231 : vector<128x1xf32> to vector<128x32xf32>
    %233 = arith.mulf %228, %232 : vector<128x32xf32>
    %234 = vector.broadcast %209 : vector<1x32xf32> to vector<128x32xf32>
    %235 = arith.mulf %233, %234 : vector<128x32xf32>
    %236 = vector.broadcast %210 : vector<1x32xf32> to vector<128x32xf32>
    %237 = arith.addf %235, %236 : vector<128x32xf32>
    %238 = arith.truncf %237 : vector<128x32xf32> to vector<128x32xbf16>
    %239 = vector.broadcast %213 : vector<1x32xf32> to vector<128x32xf32>
    %240 = arith.addf %208, %239 : vector<128x32xf32>
    %c1_103 = arith.constant 1 : index
    %c0_104 = arith.constant 0 : index
    %c0_105 = arith.constant 0 : index
    %c0_106 = arith.constant 0 : index
    %241 = vector.load %arg4[%c1_103, %c0_104, %c0_105, %c0_106] : memref<2x4x32x24xbf16, #tpu.memory_space<vmem>>, vector<1x1x32x24xbf16>
    %242 = vector.shape_cast %241 : vector<1x1x32x24xbf16> to vector<32x24xbf16>
    %cst_107 = arith.constant dense<0.000000e+00> : vector<128x24xf32>
    %243 = tpu.matmul %238, %242, %cst_107 {dimension_numbers = #tpu.dot_dimension_numbers<[1], [0], [0], [1], [0, 0, 1, 1], [], []>} : vector<128x32xbf16>, vector<32x24xbf16>, vector<128x24xf32> -> vector<128x24xf32>
    %244 = vector.extract_strided_slice %243 {offsets = [0, 0], sizes = [128, 8], strides = [1, 1]} : vector<128x24xf32> to vector<128x8xf32>
    %245 = vector.shape_cast %244 : vector<128x8xf32> to vector<2x64x8xf32>
    %246 = vector.extract_strided_slice %243 {offsets = [0, 8], sizes = [128, 8], strides = [1, 1]} : vector<128x24xf32> to vector<128x8xf32>
    %247 = vector.shape_cast %246 : vector<128x8xf32> to vector<2x64x8xf32>
    %248 = vector.extract_strided_slice %243 {offsets = [0, 16], sizes = [128, 8], strides = [1, 1]} : vector<128x24xf32> to vector<128x8xf32>
    %249 = vector.shape_cast %248 : vector<128x8xf32> to vector<2x64x8xf32>
    %250 = arith.truncf %245 : vector<2x64x8xf32> to vector<2x64x8xbf16>
    %251 = arith.truncf %247 : vector<2x64x8xf32> to vector<2x64x8xbf16>
    "tpu.trace_start"() <{level = 10 : i32, message = "bnd,bmd->bnm"}> : () -> ()
    %cst_108 = arith.constant dense<0.000000e+00> : vector<2x64x64xf32>
    %252 = tpu.matmul %250, %251, %cst_108 {dimension_numbers = #tpu.dot_dimension_numbers<[2], [2], [1], [1], [0, 0, 0, 1, 1, 1], [0], [0]>} : vector<2x64x8xbf16>, vector<2x64x8xbf16>, vector<2x64x64xf32> -> vector<2x64x64xf32>
    "tpu.trace_stop"() : () -> ()
    %cst_109 = arith.constant dense<0xFF800000> : vector<2x64xf32>
    %253 = vector.multi_reduction <maximumf>, %252, %cst_109 [2] : vector<2x64x64xf32> to vector<2x64xf32>
    %254 = vector.shape_cast %253 : vector<2x64xf32> to vector<2x64x1xf32>
    %255 = vector.broadcast %254 : vector<2x64x1xf32> to vector<2x64x64xf32>
    %256 = arith.subf %252, %255 : vector<2x64x64xf32>
    %257 = math.exp %256 : vector<2x64x64xf32>
    %cst_110 = arith.constant dense<0.000000e+00> : vector<2x64xf32>
    %258 = vector.multi_reduction <add>, %257, %cst_110 [2] : vector<2x64x64xf32> to vector<2x64xf32>
    %259 = vector.shape_cast %258 : vector<2x64xf32> to vector<2x64x1xf32>
    %260 = tpu.reciprocal %259 {approx = true} : vector<2x64x1xf32> -> vector<2x64x1xf32>
    %261 = vector.broadcast %260 : vector<2x64x1xf32> to vector<2x64x64xf32>
    %262 = arith.mulf %257, %261 : vector<2x64x64xf32>
    %263 = arith.truncf %262 : vector<2x64x64xf32> to vector<2x64x64xbf16>
    %264 = arith.truncf %249 : vector<2x64x8xf32> to vector<2x64x8xbf16>
    "tpu.trace_start"() <{level = 10 : i32, message = "bnm,bmd->bnd"}> : () -> ()
    %cst_111 = arith.constant dense<0.000000e+00> : vector<2x64x8xf32>
    %265 = tpu.matmul %263, %264, %cst_111 {dimension_numbers = #tpu.dot_dimension_numbers<[2], [1], [1], [2], [0, 0, 0, 1, 1, 2], [0], [0]>} : vector<2x64x64xbf16>, vector<2x64x8xbf16>, vector<2x64x8xf32> -> vector<2x64x8xf32>
    "tpu.trace_stop"() : () -> ()
    %266 = vector.shape_cast %265 : vector<2x64x8xf32> to vector<128x8xf32>
    %267 = arith.truncf %266 : vector<128x8xf32> to vector<128x8xbf16>
    %c1_112 = arith.constant 1 : index
    %c0_113 = arith.constant 0 : index
    %c0_114 = arith.constant 0 : index
    %c0_115 = arith.constant 0 : index
    %268 = vector.load %arg5[%c1_112, %c0_113, %c0_114, %c0_115] : memref<2x4x8x32xbf16, #tpu.memory_space<vmem>>, vector<1x1x8x32xbf16>
    %269 = vector.shape_cast %268 : vector<1x1x8x32xbf16> to vector<8x32xbf16>
    %cst_116 = arith.constant dense<0.000000e+00> : vector<128x32xf32>
    %270 = tpu.matmul %267, %269, %cst_116 {dimension_numbers = #tpu.dot_dimension_numbers<[1], [0], [0], [1], [0, 0, 1, 1], [], []>} : vector<128x8xbf16>, vector<8x32xbf16>, vector<128x32xf32> -> vector<128x32xf32>
    %271 = arith.addf %240, %270 : vector<128x32xf32>
    %c1_117 = arith.constant 1 : index
    %c1_118 = arith.constant 1 : index
    %c0_119 = arith.constant 0 : index
    %c0_120 = arith.constant 0 : index
    %272 = vector.load %arg4[%c1_117, %c1_118, %c0_119, %c0_120] : memref<2x4x32x24xbf16, #tpu.memory_space<vmem>>, vector<1x1x32x24xbf16>
    %273 = vector.shape_cast %272 : vector<1x1x32x24xbf16> to vector<32x24xbf16>
    %cst_121 = arith.constant dense<0.000000e+00> : vector<128x24xf32>
    %274 = tpu.matmul %238, %273, %cst_121 {dimension_numbers = #tpu.dot_dimension_numbers<[1], [0], [0], [1], [0, 0, 1, 1], [], []>} : vector<128x32xbf16>, vector<32x24xbf16>, vector<128x24xf32> -> vector<128x24xf32>
    %275 = vector.extract_strided_slice %274 {offsets = [0, 0], sizes = [128, 8], strides = [1, 1]} : vector<128x24xf32> to vector<128x8xf32>
    %276 = vector.shape_cast %275 : vector<128x8xf32> to vector<2x64x8xf32>
    %277 = vector.extract_strided_slice %274 {offsets = [0, 8], sizes = [128, 8], strides = [1, 1]} : vector<128x24xf32> to vector<128x8xf32>
    %278 = vector.shape_cast %277 : vector<128x8xf32> to vector<2x64x8xf32>
    %279 = vector.extract_strided_slice %274 {offsets = [0, 16], sizes = [128, 8], strides = [1, 1]} : vector<128x24xf32> to vector<128x8xf32>
    %280 = vector.shape_cast %279 : vector<128x8xf32> to vector<2x64x8xf32>
    %281 = arith.truncf %276 : vector<2x64x8xf32> to vector<2x64x8xbf16>
    %282 = arith.truncf %278 : vector<2x64x8xf32> to vector<2x64x8xbf16>
    "tpu.trace_start"() <{level = 10 : i32, message = "bnd,bmd->bnm"}> : () -> ()
    %cst_122 = arith.constant dense<0.000000e+00> : vector<2x64x64xf32>
    %283 = tpu.matmul %281, %282, %cst_122 {dimension_numbers = #tpu.dot_dimension_numbers<[2], [2], [1], [1], [0, 0, 0, 1, 1, 1], [0], [0]>} : vector<2x64x8xbf16>, vector<2x64x8xbf16>, vector<2x64x64xf32> -> vector<2x64x64xf32>
    "tpu.trace_stop"() : () -> ()
    %cst_123 = arith.constant dense<0xFF800000> : vector<2x64xf32>
    %284 = vector.multi_reduction <maximumf>, %283, %cst_123 [2] : vector<2x64x64xf32> to vector<2x64xf32>
    %285 = vector.shape_cast %284 : vector<2x64xf32> to vector<2x64x1xf32>
    %286 = vector.broadcast %285 : vector<2x64x1xf32> to vector<2x64x64xf32>
    %287 = arith.subf %283, %286 : vector<2x64x64xf32>
    %288 = math.exp %287 : vector<2x64x64xf32>
    %cst_124 = arith.constant dense<0.000000e+00> : vector<2x64xf32>
    %289 = vector.multi_reduction <add>, %288, %cst_124 [2] : vector<2x64x64xf32> to vector<2x64xf32>
    %290 = vector.shape_cast %289 : vector<2x64xf32> to vector<2x64x1xf32>
    %291 = tpu.reciprocal %290 {approx = true} : vector<2x64x1xf32> -> vector<2x64x1xf32>
    %292 = vector.broadcast %291 : vector<2x64x1xf32> to vector<2x64x64xf32>
    %293 = arith.mulf %288, %292 : vector<2x64x64xf32>
    %294 = arith.truncf %293 : vector<2x64x64xf32> to vector<2x64x64xbf16>
    %295 = arith.truncf %280 : vector<2x64x8xf32> to vector<2x64x8xbf16>
    "tpu.trace_start"() <{level = 10 : i32, message = "bnm,bmd->bnd"}> : () -> ()
    %cst_125 = arith.constant dense<0.000000e+00> : vector<2x64x8xf32>
    %296 = tpu.matmul %294, %295, %cst_125 {dimension_numbers = #tpu.dot_dimension_numbers<[2], [1], [1], [2], [0, 0, 0, 1, 1, 2], [0], [0]>} : vector<2x64x64xbf16>, vector<2x64x8xbf16>, vector<2x64x8xf32> -> vector<2x64x8xf32>
    "tpu.trace_stop"() : () -> ()
    %297 = vector.shape_cast %296 : vector<2x64x8xf32> to vector<128x8xf32>
    %298 = arith.truncf %297 : vector<128x8xf32> to vector<128x8xbf16>
    %c1_126 = arith.constant 1 : index
    %c1_127 = arith.constant 1 : index
    %c0_128 = arith.constant 0 : index
    %c0_129 = arith.constant 0 : index
    %299 = vector.load %arg5[%c1_126, %c1_127, %c0_128, %c0_129] : memref<2x4x8x32xbf16, #tpu.memory_space<vmem>>, vector<1x1x8x32xbf16>
    %300 = vector.shape_cast %299 : vector<1x1x8x32xbf16> to vector<8x32xbf16>
    %cst_130 = arith.constant dense<0.000000e+00> : vector<128x32xf32>
    %301 = tpu.matmul %298, %300, %cst_130 {dimension_numbers = #tpu.dot_dimension_numbers<[1], [0], [0], [1], [0, 0, 1, 1], [], []>} : vector<128x8xbf16>, vector<8x32xbf16>, vector<128x32xf32> -> vector<128x32xf32>
    %302 = arith.addf %271, %301 : vector<128x32xf32>
    %c1_131 = arith.constant 1 : index
    %c2_132 = arith.constant 2 : index
    %c0_133 = arith.constant 0 : index
    %c0_134 = arith.constant 0 : index
    %303 = vector.load %arg4[%c1_131, %c2_132, %c0_133, %c0_134] : memref<2x4x32x24xbf16, #tpu.memory_space<vmem>>, vector<1x1x32x24xbf16>
    %304 = vector.shape_cast %303 : vector<1x1x32x24xbf16> to vector<32x24xbf16>
    %cst_135 = arith.constant dense<0.000000e+00> : vector<128x24xf32>
    %305 = tpu.matmul %238, %304, %cst_135 {dimension_numbers = #tpu.dot_dimension_numbers<[1], [0], [0], [1], [0, 0, 1, 1], [], []>} : vector<128x32xbf16>, vector<32x24xbf16>, vector<128x24xf32> -> vector<128x24xf32>
    %306 = vector.extract_strided_slice %305 {offsets = [0, 0], sizes = [128, 8], strides = [1, 1]} : vector<128x24xf32> to vector<128x8xf32>
    %307 = vector.shape_cast %306 : vector<128x8xf32> to vector<2x64x8xf32>
    %308 = vector.extract_strided_slice %305 {offsets = [0, 8], sizes = [128, 8], strides = [1, 1]} : vector<128x24xf32> to vector<128x8xf32>
    %309 = vector.shape_cast %308 : vector<128x8xf32> to vector<2x64x8xf32>
    %310 = vector.extract_strided_slice %305 {offsets = [0, 16], sizes = [128, 8], strides = [1, 1]} : vector<128x24xf32> to vector<128x8xf32>
    %311 = vector.shape_cast %310 : vector<128x8xf32> to vector<2x64x8xf32>
    %312 = arith.truncf %307 : vector<2x64x8xf32> to vector<2x64x8xbf16>
    %313 = arith.truncf %309 : vector<2x64x8xf32> to vector<2x64x8xbf16>
    "tpu.trace_start"() <{level = 10 : i32, message = "bnd,bmd->bnm"}> : () -> ()
    %cst_136 = arith.constant dense<0.000000e+00> : vector<2x64x64xf32>
    %314 = tpu.matmul %312, %313, %cst_136 {dimension_numbers = #tpu.dot_dimension_numbers<[2], [2], [1], [1], [0, 0, 0, 1, 1, 1], [0], [0]>} : vector<2x64x8xbf16>, vector<2x64x8xbf16>, vector<2x64x64xf32> -> vector<2x64x64xf32>
    "tpu.trace_stop"() : () -> ()
    %cst_137 = arith.constant dense<0xFF800000> : vector<2x64xf32>
    %315 = vector.multi_reduction <maximumf>, %314, %cst_137 [2] : vector<2x64x64xf32> to vector<2x64xf32>
    %316 = vector.shape_cast %315 : vector<2x64xf32> to vector<2x64x1xf32>
    %317 = vector.broadcast %316 : vector<2x64x1xf32> to vector<2x64x64xf32>
    %318 = arith.subf %314, %317 : vector<2x64x64xf32>
    %319 = math.exp %318 : vector<2x64x64xf32>
    %cst_138 = arith.constant dense<0.000000e+00> : vector<2x64xf32>
    %320 = vector.multi_reduction <add>, %319, %cst_138 [2] : vector<2x64x64xf32> to vector<2x64xf32>
    %321 = vector.shape_cast %320 : vector<2x64xf32> to vector<2x64x1xf32>
    %322 = tpu.reciprocal %321 {approx = true} : vector<2x64x1xf32> -> vector<2x64x1xf32>
    %323 = vector.broadcast %322 : vector<2x64x1xf32> to vector<2x64x64xf32>
    %324 = arith.mulf %319, %323 : vector<2x64x64xf32>
    %325 = arith.truncf %324 : vector<2x64x64xf32> to vector<2x64x64xbf16>
    %326 = arith.truncf %311 : vector<2x64x8xf32> to vector<2x64x8xbf16>
    "tpu.trace_start"() <{level = 10 : i32, message = "bnm,bmd->bnd"}> : () -> ()
    %cst_139 = arith.constant dense<0.000000e+00> : vector<2x64x8xf32>
    %327 = tpu.matmul %325, %326, %cst_139 {dimension_numbers = #tpu.dot_dimension_numbers<[2], [1], [1], [2], [0, 0, 0, 1, 1, 2], [0], [0]>} : vector<2x64x64xbf16>, vector<2x64x8xbf16>, vector<2x64x8xf32> -> vector<2x64x8xf32>
    "tpu.trace_stop"() : () -> ()
    %328 = vector.shape_cast %327 : vector<2x64x8xf32> to vector<128x8xf32>
    %329 = arith.truncf %328 : vector<128x8xf32> to vector<128x8xbf16>
    %c1_140 = arith.constant 1 : index
    %c2_141 = arith.constant 2 : index
    %c0_142 = arith.constant 0 : index
    %c0_143 = arith.constant 0 : index
    %330 = vector.load %arg5[%c1_140, %c2_141, %c0_142, %c0_143] : memref<2x4x8x32xbf16, #tpu.memory_space<vmem>>, vector<1x1x8x32xbf16>
    %331 = vector.shape_cast %330 : vector<1x1x8x32xbf16> to vector<8x32xbf16>
    %cst_144 = arith.constant dense<0.000000e+00> : vector<128x32xf32>
    %332 = tpu.matmul %329, %331, %cst_144 {dimension_numbers = #tpu.dot_dimension_numbers<[1], [0], [0], [1], [0, 0, 1, 1], [], []>} : vector<128x8xbf16>, vector<8x32xbf16>, vector<128x32xf32> -> vector<128x32xf32>
    %333 = arith.addf %302, %332 : vector<128x32xf32>
    %c1_145 = arith.constant 1 : index
    %c3_146 = arith.constant 3 : index
    %c0_147 = arith.constant 0 : index
    %c0_148 = arith.constant 0 : index
    %334 = vector.load %arg4[%c1_145, %c3_146, %c0_147, %c0_148] : memref<2x4x32x24xbf16, #tpu.memory_space<vmem>>, vector<1x1x32x24xbf16>
    %335 = vector.shape_cast %334 : vector<1x1x32x24xbf16> to vector<32x24xbf16>
    %cst_149 = arith.constant dense<0.000000e+00> : vector<128x24xf32>
    %336 = tpu.matmul %238, %335, %cst_149 {dimension_numbers = #tpu.dot_dimension_numbers<[1], [0], [0], [1], [0, 0, 1, 1], [], []>} : vector<128x32xbf16>, vector<32x24xbf16>, vector<128x24xf32> -> vector<128x24xf32>
    %337 = vector.extract_strided_slice %336 {offsets = [0, 0], sizes = [128, 8], strides = [1, 1]} : vector<128x24xf32> to vector<128x8xf32>
    %338 = vector.shape_cast %337 : vector<128x8xf32> to vector<2x64x8xf32>
    %339 = vector.extract_strided_slice %336 {offsets = [0, 8], sizes = [128, 8], strides = [1, 1]} : vector<128x24xf32> to vector<128x8xf32>
    %340 = vector.shape_cast %339 : vector<128x8xf32> to vector<2x64x8xf32>
    %341 = vector.extract_strided_slice %336 {offsets = [0, 16], sizes = [128, 8], strides = [1, 1]} : vector<128x24xf32> to vector<128x8xf32>
    %342 = vector.shape_cast %341 : vector<128x8xf32> to vector<2x64x8xf32>
    %343 = arith.truncf %338 : vector<2x64x8xf32> to vector<2x64x8xbf16>
    %344 = arith.truncf %340 : vector<2x64x8xf32> to vector<2x64x8xbf16>
    "tpu.trace_start"() <{level = 10 : i32, message = "bnd,bmd->bnm"}> : () -> ()
    %cst_150 = arith.constant dense<0.000000e+00> : vector<2x64x64xf32>
    %345 = tpu.matmul %343, %344, %cst_150 {dimension_numbers = #tpu.dot_dimension_numbers<[2], [2], [1], [1], [0, 0, 0, 1, 1, 1], [0], [0]>} : vector<2x64x8xbf16>, vector<2x64x8xbf16>, vector<2x64x64xf32> -> vector<2x64x64xf32>
    "tpu.trace_stop"() : () -> ()
    %cst_151 = arith.constant dense<0xFF800000> : vector<2x64xf32>
    %346 = vector.multi_reduction <maximumf>, %345, %cst_151 [2] : vector<2x64x64xf32> to vector<2x64xf32>
    %347 = vector.shape_cast %346 : vector<2x64xf32> to vector<2x64x1xf32>
    %348 = vector.broadcast %347 : vector<2x64x1xf32> to vector<2x64x64xf32>
    %349 = arith.subf %345, %348 : vector<2x64x64xf32>
    %350 = math.exp %349 : vector<2x64x64xf32>
    %cst_152 = arith.constant dense<0.000000e+00> : vector<2x64xf32>
    %351 = vector.multi_reduction <add>, %350, %cst_152 [2] : vector<2x64x64xf32> to vector<2x64xf32>
    %352 = vector.shape_cast %351 : vector<2x64xf32> to vector<2x64x1xf32>
    %353 = tpu.reciprocal %352 {approx = true} : vector<2x64x1xf32> -> vector<2x64x1xf32>
    %354 = vector.broadcast %353 : vector<2x64x1xf32> to vector<2x64x64xf32>
    %355 = arith.mulf %350, %354 : vector<2x64x64xf32>
    %356 = arith.truncf %355 : vector<2x64x64xf32> to vector<2x64x64xbf16>
    %357 = arith.truncf %342 : vector<2x64x8xf32> to vector<2x64x8xbf16>
    "tpu.trace_start"() <{level = 10 : i32, message = "bnm,bmd->bnd"}> : () -> ()
    %cst_153 = arith.constant dense<0.000000e+00> : vector<2x64x8xf32>
    %358 = tpu.matmul %356, %357, %cst_153 {dimension_numbers = #tpu.dot_dimension_numbers<[2], [1], [1], [2], [0, 0, 0, 1, 1, 2], [0], [0]>} : vector<2x64x64xbf16>, vector<2x64x8xbf16>, vector<2x64x8xf32> -> vector<2x64x8xf32>
    "tpu.trace_stop"() : () -> ()
    %359 = vector.shape_cast %358 : vector<2x64x8xf32> to vector<128x8xf32>
    %360 = arith.truncf %359 : vector<128x8xf32> to vector<128x8xbf16>
    %c1_154 = arith.constant 1 : index
    %c3_155 = arith.constant 3 : index
    %c0_156 = arith.constant 0 : index
    %c0_157 = arith.constant 0 : index
    %361 = vector.load %arg5[%c1_154, %c3_155, %c0_156, %c0_157] : memref<2x4x8x32xbf16, #tpu.memory_space<vmem>>, vector<1x1x8x32xbf16>
    %362 = vector.shape_cast %361 : vector<1x1x8x32xbf16> to vector<8x32xbf16>
    %cst_158 = arith.constant dense<0.000000e+00> : vector<128x32xf32>
    %363 = tpu.matmul %360, %362, %cst_158 {dimension_numbers = #tpu.dot_dimension_numbers<[1], [0], [0], [1], [0, 0, 1, 1], [], []>} : vector<128x8xbf16>, vector<8x32xbf16>, vector<128x32xf32> -> vector<128x32xf32>
    %364 = arith.addf %333, %363 : vector<128x32xf32>
    %cst_159 = arith.constant dense<0.000000e+00> : vector<128xf32>
    %365 = vector.multi_reduction <add>, %364, %cst_159 [1] : vector<128x32xf32> to vector<128xf32>
    %366 = vector.shape_cast %365 : vector<128xf32> to vector<128x1xf32>
    %cst_160 = arith.constant 3.200000e+01 : f32
    %367 = vector.broadcast %cst_160 : f32 to vector<128x1xf32>
    %368 = arith.divf %366, %367 : vector<128x1xf32>
    %369 = vector.broadcast %368 : vector<128x1xf32> to vector<128x32xf32>
    %370 = arith.subf %364, %369 : vector<128x32xf32>
    %371 = arith.mulf %370, %370 : vector<128x32xf32>
    %cst_161 = arith.constant dense<0.000000e+00> : vector<128xf32>
    %372 = vector.multi_reduction <add>, %371, %cst_161 [1] : vector<128x32xf32> to vector<128xf32>
    %373 = vector.shape_cast %372 : vector<128xf32> to vector<128x1xf32>
    %cst_162 = arith.constant 3.200000e+01 : f32
    %374 = vector.broadcast %cst_162 : f32 to vector<128x1xf32>
    %375 = arith.divf %373, %374 : vector<128x1xf32>
    %376 = vector.broadcast %368 : vector<128x1xf32> to vector<128x32xf32>
    %377 = arith.subf %364, %376 : vector<128x32xf32>
    %cst_163 = arith.constant 9.99999974E-6 : f32
    %378 = vector.broadcast %cst_163 : f32 to vector<128x1xf32>
    %379 = arith.addf %375, %378 : vector<128x1xf32>
    %380 = math.rsqrt %379 : vector<128x1xf32>
    %381 = vector.broadcast %380 : vector<128x1xf32> to vector<128x32xf32>
    %382 = arith.mulf %377, %381 : vector<128x32xf32>
    %383 = vector.broadcast %211 : vector<1x32xf32> to vector<128x32xf32>
    %384 = arith.mulf %382, %383 : vector<128x32xf32>
    %385 = vector.broadcast %212 : vector<1x32xf32> to vector<128x32xf32>
    %386 = arith.addf %384, %385 : vector<128x32xf32>
    %387 = arith.truncf %386 : vector<128x32xf32> to vector<128x32xbf16>
    %c1_164 = arith.constant 1 : index
    %c0_165 = arith.constant 0 : index
    %c0_166 = arith.constant 0 : index
    %388 = vector.load %arg6[%c1_164, %c0_165, %c0_166] : memref<2x32x128xbf16, #tpu.memory_space<vmem>>, vector<1x32x128xbf16>
    %389 = vector.shape_cast %388 : vector<1x32x128xbf16> to vector<32x128xbf16>
    %cst_167 = arith.constant dense<0.000000e+00> : vector<128x128xf32>
    %390 = tpu.matmul %387, %389, %cst_167 {dimension_numbers = #tpu.dot_dimension_numbers<[1], [0], [0], [1], [0, 0, 1, 1], [], []>} : vector<128x32xbf16>, vector<32x128xbf16>, vector<128x128xf32> -> vector<128x128xf32>
    %391 = vector.broadcast %215 : vector<1x128xf32> to vector<128x128xf32>
    %392 = arith.addf %390, %391 : vector<128x128xf32>
    %393 = arith.mulf %392, %392 : vector<128x128xf32>
    %394 = arith.mulf %392, %393 : vector<128x128xf32>
    %cst_168 = arith.constant 4.471500e-02 : f32
    %395 = vector.broadcast %cst_168 : f32 to vector<128x128xf32>
    %396 = arith.mulf %395, %394 : vector<128x128xf32>
    %397 = arith.addf %392, %396 : vector<128x128xf32>
    %cst_169 = arith.constant 0.797884583 : f32
    %398 = vector.broadcast %cst_169 : f32 to vector<128x128xf32>
    %399 = arith.mulf %398, %397 : vector<128x128xf32>
    %400 = math.tanh %399 : vector<128x128xf32>
    %cst_170 = arith.constant 1.000000e+00 : f32
    %401 = vector.broadcast %cst_170 : f32 to vector<128x128xf32>
    %402 = arith.addf %401, %400 : vector<128x128xf32>
    %cst_171 = arith.constant 5.000000e-01 : f32
    %403 = vector.broadcast %cst_171 : f32 to vector<128x128xf32>
    %404 = arith.mulf %403, %402 : vector<128x128xf32>
    %405 = arith.mulf %392, %404 : vector<128x128xf32>
    %406 = arith.truncf %405 : vector<128x128xf32> to vector<128x128xbf16>
    %c1_172 = arith.constant 1 : index
    %c0_173 = arith.constant 0 : index
    %c0_174 = arith.constant 0 : index
    %407 = vector.load %arg7[%c1_172, %c0_173, %c0_174] : memref<2x128x32xbf16, #tpu.memory_space<vmem>>, vector<1x128x32xbf16>
    %408 = vector.shape_cast %407 : vector<1x128x32xbf16> to vector<128x32xbf16>
    %cst_175 = arith.constant dense<0.000000e+00> : vector<128x32xf32>
    %409 = tpu.matmul %406, %408, %cst_175 {dimension_numbers = #tpu.dot_dimension_numbers<[1], [0], [0], [1], [0, 0, 1, 1], [], []>} : vector<128x128xbf16>, vector<128x32xbf16>, vector<128x32xf32> -> vector<128x32xf32>
    %410 = arith.addf %364, %409 : vector<128x32xf32>
    %411 = vector.broadcast %214 : vector<1x32xf32> to vector<128x32xf32>
    %412 = arith.addf %410, %411 : vector<128x32xf32>
    %c14 = arith.constant 14 : index
    %c0_176 = arith.constant 0 : index
    %413 = vector.load %arg8[%c14, %c0_176] : memref<16x128xf32, #tpu.memory_space<vmem>>, vector<1x32xf32>
    %c15 = arith.constant 15 : index
    %c0_177 = arith.constant 0 : index
    %414 = vector.load %arg8[%c15, %c0_177] : memref<16x128xf32, #tpu.memory_space<vmem>>, vector<1x32xf32>
    %cst_178 = arith.constant dense<0.000000e+00> : vector<128xf32>
    %415 = vector.multi_reduction <add>, %412, %cst_178 [1] : vector<128x32xf32> to vector<128xf32>
    %416 = vector.shape_cast %415 : vector<128xf32> to vector<128x1xf32>
    %cst_179 = arith.constant 3.200000e+01 : f32
    %417 = vector.broadcast %cst_179 : f32 to vector<128x1xf32>
    %418 = arith.divf %416, %417 : vector<128x1xf32>
    %419 = vector.broadcast %418 : vector<128x1xf32> to vector<128x32xf32>
    %420 = arith.subf %412, %419 : vector<128x32xf32>
    %421 = arith.mulf %420, %420 : vector<128x32xf32>
    %cst_180 = arith.constant dense<0.000000e+00> : vector<128xf32>
    %422 = vector.multi_reduction <add>, %421, %cst_180 [1] : vector<128x32xf32> to vector<128xf32>
    %423 = vector.shape_cast %422 : vector<128xf32> to vector<128x1xf32>
    %cst_181 = arith.constant 3.200000e+01 : f32
    %424 = vector.broadcast %cst_181 : f32 to vector<128x1xf32>
    %425 = arith.divf %423, %424 : vector<128x1xf32>
    %426 = vector.broadcast %418 : vector<128x1xf32> to vector<128x32xf32>
    %427 = arith.subf %412, %426 : vector<128x32xf32>
    %cst_182 = arith.constant 9.99999974E-6 : f32
    %428 = vector.broadcast %cst_182 : f32 to vector<128x1xf32>
    %429 = arith.addf %425, %428 : vector<128x1xf32>
    %430 = math.rsqrt %429 : vector<128x1xf32>
    %431 = vector.broadcast %430 : vector<128x1xf32> to vector<128x32xf32>
    %432 = arith.mulf %427, %431 : vector<128x32xf32>
    %433 = vector.broadcast %413 : vector<1x32xf32> to vector<128x32xf32>
    %434 = arith.mulf %432, %433 : vector<128x32xf32>
    %435 = vector.broadcast %414 : vector<1x32xf32> to vector<128x32xf32>
    %436 = arith.addf %434, %435 : vector<128x32xf32>
    %c0_183 = arith.constant 0 : index
    %c0_184 = arith.constant 0 : index
    %437 = vector.load %arg9[%c0_183, %c0_184] : memref<128x32xf32, #tpu.memory_space<vmem>>, vector<128x32xf32>
    tpu.vector_store %arg9[%c0_183, %c0_184], %436 {strides = array<i32>} : memref<128x32xf32, #tpu.memory_space<vmem>>, vector<128x32xf32>,
    return
  }
  func.func @transform_0(%arg0: i32) -> (i32, i32) {
    %c0_i32 = arith.constant 0 : i32
    %c0_i32_0 = arith.constant 0 : i32
    %c0_i32_1 = arith.constant 0 : i32
    return %c0_i32, %c0_i32_0 : i32, i32
  }
  func.func @transform_1(%arg0: i32) -> (i32, i32) {
    %c0_i32 = arith.constant 0 : i32
    %c0_i32_0 = arith.constant 0 : i32
    %c0_i32_1 = arith.constant 0 : i32
    return %c0_i32, %c0_i32_0 : i32, i32
  }
  func.func @transform_2(%arg0: i32) -> (i32, i32) {
    %c0_i32 = arith.constant 0 : i32
    %c0_i32_0 = arith.constant 0 : i32
    %c0_i32_1 = arith.constant 0 : i32
    return %c0_i32, %c0_i32_0 : i32, i32
  }
  func.func @transform_3(%arg0: i32) -> (i32, i32, i32, i32) {
    %c0_i32 = arith.constant 0 : i32
    %c0_i32_0 = arith.constant 0 : i32
    %c0_i32_1 = arith.constant 0 : i32
    %c0_i32_2 = arith.constant 0 : i32
    %c0_i32_3 = arith.constant 0 : i32
    return %c0_i32, %c0_i32_0, %c0_i32_1, %c0_i32_2 : i32, i32, i32, i32
  }
  func.func @transform_4(%arg0: i32) -> (i32, i32, i32, i32) {
    %c0_i32 = arith.constant 0 : i32
    %c0_i32_0 = arith.constant 0 : i32
    %c0_i32_1 = arith.constant 0 : i32
    %c0_i32_2 = arith.constant 0 : i32
    %c0_i32_3 = arith.constant 0 : i32
    return %c0_i32, %c0_i32_0, %c0_i32_1, %c0_i32_2 : i32, i32, i32, i32
  }
  func.func @transform_5(%arg0: i32) -> (i32, i32, i32) {
    %c0_i32 = arith.constant 0 : i32
    %c0_i32_0 = arith.constant 0 : i32
    %c0_i32_1 = arith.constant 0 : i32
    %c0_i32_2 = arith.constant 0 : i32
    return %c0_i32, %c0_i32_0, %c0_i32_1 : i32, i32, i32
  }
  func.func @transform_6(%arg0: i32) -> (i32, i32, i32) {
    %c0_i32 = arith.constant 0 : i32
    %c0_i32_0 = arith.constant 0 : i32
    %c0_i32_1 = arith.constant 0 : i32
    %c0_i32_2 = arith.constant 0 : i32
    return %c0_i32, %c0_i32_0, %c0_i32_1 : i32, i32, i32
  }
  func.func @transform_7(%arg0: i32) -> (i32, i32) {
    %c0_i32 = arith.constant 0 : i32
    %c0_i32_0 = arith.constant 0 : i32
    %c0_i32_1 = arith.constant 0 : i32
    return %c0_i32, %c0_i32_0 : i32, i32
  }
  func.func @transform_8(%arg0: i32) -> (i32, i32) {
    %c0_i32 = arith.constant 0 : i32
    %c0_i32_0 = arith.constant 0 : i32
    %c0_i32_1 = arith.constant 0 : i32
    return %c0_i32, %c0_i32_0 : i32, i32
  }
}

</mosaic_0001>

<bundles_post_ra>
// kernel: forward.1
= control target key start
LH: loop header
LB: loop body
LE: loop exit
PB: predicated region body
PF: predicated region fallthrough
CT: control target
= control target key end

     0   :  { %v12226_v0 = vmov 0   ;;  %vm230_vm0 = vcmask 523264   ;;  %vm359_vm1 = vcmask 261120   ;;  %vm794_vm2 = vcmask 64512   ;;  %s12227_s29 = smov 120   ;;  %s12228_s30 = smov 112   ;;  %s16215_s1 = inlined_call_operand.vmem [shape: bf16[192,32], index: 1, kind: input, shape index: {}]   ;;  %s16216_s0 = inlined_call_operand.vmem [shape: bf16[128,192], index: 0, kind: input, shape index: {}]   ;;  %s16217_s2 = inlined_call_operand.vmem [shape: f32[128,32], index: 2, kind: input, shape index: {}]   ;;  %s16218_s3 = inlined_call_operand.vmem [shape: bf16[2,4,32,24], index: 3, kind: input, shape index: {}]   ;;  %s16219_s7 = inlined_call_operand.vmem [shape: f32[16,128], index: 7, kind: input, shape index: {}]   ;;  %s16220_s4 = inlined_call_operand.vmem [shape: bf16[2,4,8,32], index: 4, kind: input, shape index: {}]   ;;  %s16221_s5 = inlined_call_operand.vmem [shape: bf16[2,32,128], index: 5, kind: input, shape index: {}]   ;;  %s16222_s6 = inlined_call_operand.vmem [shape: bf16[2,128,32], index: 6, kind: input, shape index: {}]   ;;  %s16223_s8 = inlined_call_operand.vmem [shape: f32[128,32], index: 8, kind: output, shape index: {}]  }
   0x1   :  { %255 = vmatprep.subr.bf16.mxu0 %v12226_v0  ;;  %v11418_v1 = vld [vmem:[%s16215_s1] sm:$0xff]   ;;  %v11419_v2 = vld [vmem:[%s16215_s1 + $0x8] sm:$0xff]   ;;  %v11420_v3 = vld [vmem:[%s16215_s1 + $0x10] sm:$0xff]   ;;  %vm1380_vm3 = vcmask 1043456  }
   0x2   :  { %256 = vmatpush1.bf16.msra.mxu0 %v11418_v1  ;;  %v11421_v4 = vld [vmem:[%s16215_s1 + $0x18] sm:$0xff]   ;;  %v11432_v5 = vld [vmem:[%s16216_s0 + $0x4] ss:$8 sps:$4 sm:$0xff]   ;;  %v11424_v8 = vld [vmem:[%s16215_s1 + $0x30] sm:$0xff]  }
   0x3   :  { %257 = vmatprep.subr.bf16.mxu0 %v12226_v0  ;;  %v11422_v6 = vld [vmem:[%s16215_s1 + $0x20] sm:$0xff]   ;;  %9448 = vmatprep.mubr.msk.bf16.mxu0 %vm230_vm0, %v11432_v5  ;;  %v11423_v7 = vld [vmem:[%s16215_s1 + $0x28] sm:$0xff]   ;;  %v11425_v9 = vld [vmem:[%s16215_s1 + $0x38] sm:$0xff]  }
   0x4   :  { %v11426_v10 = vld [vmem:[%s16215_s1 + $0x40] sm:$0xff]   ;;  %v11427_v11 = vld [vmem:[%s16215_s1 + $0x48] sm:$0xff]   ;;  %v11428_v12 = vld [vmem:[%s16215_s1 + $0x50] sm:$0xff]  }
   0x5   :  { %v11429_v13 = vld [vmem:[%s16215_s1 + $0x58] sm:$0xff]   ;;  %v11430_v14 = vld [vmem:[%s16216_s0] ss:$8 sps:$4 sm:$0xff]   ;;  %v11436_v17 = vld [vmem:[%s16216_s0 + $0x24] ss:$8 sps:$4 sm:$0xff]  }
   0x6   :  { %258 = vmatpush1.bf16.msra.mxu0 %v11419_v2  ;;  %v11433_v15 = vld [vmem:[%s16216_s0 + $0x14] ss:$8 sps:$4 sm:$0xff]   ;;  %v11435_v16 = vld [vmem:[%s16216_s0 + $0x10] ss:$8 sps:$4 sm:$0xff]   ;;  %v11438_v18 = vld [vmem:[%s16216_s0 + $0x20] ss:$8 sps:$4 sm:$0xff]  }
   0x7   :  { %259 = vmatprep.subr.bf16.mxu0 %v12226_v0  ;;  %v11439_v19 = vld [vmem:[%s16216_s0 + $0x34] ss:$8 sps:$4 sm:$0xff]   ;;  %v11441_v20 = vld [vmem:[%s16216_s0 + $0x30] ss:$8 sps:$4 sm:$0xff]   ;;  %v11442_v21 = vld [vmem:[%s16216_s0 + $0x44] ss:$8 sps:$4 sm:$0xff]  }
   0x8   :  { %v11444_v22 = vld [vmem:[%s16216_s0 + $0x40] ss:$8 sps:$4 sm:$0xff]   ;;  %v11445_v23 = vld [vmem:[%s16216_s0 + $0x54] ss:$8 sps:$4 sm:$0xff]   ;;  %v11447_v24 = vld [vmem:[%s16216_s0 + $0x50] ss:$8 sps:$4 sm:$0xff]  }
   0x9   :  { %v11448_v25 = vld [vmem:[%s16216_s0 + $0x64] ss:$8 sps:$4 sm:$0xff]   ;;  %v11450_v26 = vld [vmem:[%s16216_s0 + $0x60] ss:$8 sps:$4 sm:$0xff]   ;;  %v11451_v27 = vld [vmem:[%s16216_s0 + $0x74] ss:$8 sps:$4 sm:$0xff]  }
   0xa   :  { %260 = vmatpush1.bf16.msra.mxu0 %v11420_v3  ;;  %v11453_v28 = vld [vmem:[%s16216_s0 + $0x70] ss:$8 sps:$4 sm:$0xff]   ;;  %v70_v29 = vld [vmem:[%s16217_s2] sm:$0xff]  ;;  %v71_v31 = vld [vmem:[%s16217_s2 + $0x8] sm:$0xff] }
   0xb   :  { %261 = vmatprep.subr.bf16.mxu0 %v12226_v0  ;;  %v72_v38 = vld [vmem:[%s16217_s2 + $0x10] sm:$0xff]  ;;  %v73_v41 = vld [vmem:[%s16217_s2 + $0x18] sm:$0xff]  ;;  %v74_v48 = vld [vmem:[%s16217_s2 + $0x20] sm:$0xff] }
   0xc   :  { %v75_v51 = vld [vmem:[%s16217_s2 + $0x28] sm:$0xff]  ;;  %v76_v59 = vld [vmem:[%s16217_s2 + $0x30] sm:$0xff]  ;;  %v77_v61 = vld [vmem:[%s16217_s2 + $0x38] sm:$0xff] }
   0xd   :  { %v78_v5 = vld [vmem:[%s16217_s2 + $0x40] sm:$0xff] }
   0xe   :  { %262 = vmatpush1.bf16.msra.mxu0 %v11421_v4 }
   0xf   :  { %263 = vmatprep.subr.bf16.mxu0 %v12226_v0 }
  0x12   :  { %264 = vmatpush1.bf16.msra.mxu0 %v11422_v6 }
  0x13   :  { %265 = vmatprep.subr.bf16.mxu0 %v12226_v0 }
  0x16   :  { %266 = vmatpush1.bf16.msra.mxu0 %v11423_v7  ;;  %v79_v7 = vld [vmem:[%s16217_s2 + $0x48] sm:$0xff] }
  0x17   :  { %267 = vmatprep.subr.bf16.mxu0 %v12226_v0 }
  0x1a   :  { %268 = vmatpush1.bf16.msra.mxu0 %v11424_v8 }
  0x1b   :  { %269 = vmatprep.subr.bf16.mxu0 %v12226_v0 }
  0x1e   :  { %270 = vmatpush1.bf16.msra.mxu0 %v11425_v9 }
  0x1f   :  { %271 = vmatprep.subr.bf16.mxu0 %v12226_v0 }
  0x22   :  { %272 = vmatpush1.bf16.msra.mxu0 %v11426_v10 }
  0x23   :  { %273 = vmatprep.subr.bf16.mxu0 %v12226_v0 }
  0x26   :  { %274 = vmatpush1.bf16.msra.mxu0 %v11427_v11 }
  0x27   :  { %275 = vmatprep.subr.bf16.mxu0 %v12226_v0 }
  0x2a   :  { %276 = vmatpush1.bf16.msra.mxu0 %v11428_v12 }
  0x2b   :  { %277 = vmatprep.subr.bf16.mxu0 %v12226_v0 }
  0x2e   :  { %278 = vmatpush1.bf16.msra.mxu0 %v11429_v13 }
  0x31   :  { %288 = vmatmul.mubr.bf16.vlgmr.msra.gmra.mrb[0].mxu0 %v11430_v14 }
  0x32   :  { %9449 = vmatprep.mubr.msk.bf16.mxu0 %vm230_vm0, %v11433_v15  ;;  %v80_v15 = vld [vmem:[%s16217_s2 + $0x50] sm:$0xff] }
  0x39   :  { %296 = vmatmul.mubr.bf16.gmra.mrb[4].mxu0 %v11435_v16 }
  0x3a   :  { %9450 = vmatprep.mubr.msk.bf16.mxu0 %vm230_vm0, %v11436_v17  ;;  %v81_v17 = vld [vmem:[%s16217_s2 + $0x58] sm:$0xff] }
  0x41   :  { %304 = vmatmul.mubr.bf16.gmra.mrb[8].mxu0 %v11438_v18 }
  0x42   :  { %9451 = vmatprep.mubr.msk.bf16.mxu0 %vm230_vm0, %v11439_v19 }
  0x49   :  { %312 = vmatmul.mubr.bf16.gmra.mrb[12].mxu0 %v11441_v20 }
  0x4a   :  { %9452 = vmatprep.mubr.msk.bf16.mxu0 %vm230_vm0, %v11442_v21 }
  0x51   :  { %320 = vmatmul.mubr.bf16.gmra.mrb[16].mxu0 %v11444_v22 }
  0x52   :  { %9453 = vmatprep.mubr.msk.bf16.mxu0 %vm230_vm0, %v11445_v23 }
  0x59   :  { %328 = vmatmul.mubr.bf16.gmra.mrb[20].mxu0 %v11447_v24 }
  0x5a   :  { %9454 = vmatprep.mubr.msk.bf16.mxu0 %vm230_vm0, %v11448_v25  ;;  %v82_v25 = vld [vmem:[%s16217_s2 + $0x60] sm:$0xff] }
  0x61   :  { %336 = vmatmul.mubr.bf16.gmra.mrb[24].mxu0 %v11450_v26 }
  0x62   :  { %9455 = vmatprep.mubr.msk.bf16.mxu0 %vm230_vm0, %v11451_v27  ;;  %v83_v27 = vld [vmem:[%s16217_s2 + $0x68] sm:$0xff] }
  0x69   :  { %344 = vmatmul.mubr.bf16.gmra.mrb[28].mxu0 %v11453_v28 }
 0x104   :  { %v289_v30 = vpop.f32.mrb[0].mxu0 }
 0x105   :  { %v12372_v32 = vadd.f32 %v289_v30, %v70_v29  ;;  %v291_v33 = vpop.f32.mrb[1].mxu0 }
 0x106   :  { %v292_v34 = vpop.f32.mrb[2].mxu0 }
 0x107   :  { %v12374_v35 = vadd.f32 %v292_v34, %v71_v31  ;;  %v294_v36 = vpop.f32.mrb[3].mxu0  ;;  %v360_v37 = vsel %vm359_vm1, %v12372_v32, 0.0 }
 0x108   :  { %361 = vadd.xlane.f32.xlu0 %v360_v37  ;;  %v84_v37 = vld [vmem:[%s16217_s2 + $0x70] sm:$0xff] }
 0x109   :  { %v363_v39 = vsel %vm359_vm1, %v12374_v35, 0.0 }
 0x10c   :  { %v297_v40 = vpop.f32.mrb[4].mxu0  ;;  %364 = vadd.xlane.f32.xlu0 %v363_v39  ;;  %v85_v39 = vld [vmem:[%s16217_s2 + $0x78] sm:$0xff] }
 0x10d   :  { %v12386_v42 = vadd.f32 %v297_v40, %v72_v38  ;;  %v299_v43 = vpop.f32.mrb[5].mxu0 }
 0x10e   :  { %v300_v44 = vpop.f32.mrb[6].mxu0 }
 0x10f   :  { %v12388_v45 = vadd.f32 %v300_v44, %v73_v41  ;;  %v302_v46 = vpop.f32.mrb[7].mxu0  ;;  %v366_v47 = vsel %vm359_vm1, %v12386_v42, 0.0 }
 0x110   :  { %367 = vadd.xlane.f32.xlu1 %v366_v47 }
 0x111   :  { %v369_v49 = vsel %vm359_vm1, %v12388_v45, 0.0 }
 0x114   :  { %v305_v50 = vpop.f32.mrb[8].mxu0  ;;  %370 = vadd.xlane.f32.xlu1 %v369_v49 }
 0x115   :  { %v12400_v52 = vadd.f32 %v305_v50, %v74_v48  ;;  %v307_v53 = vpop.f32.mrb[9].mxu0 }
 0x116   :  { %v308_v54 = vpop.f32.mrb[10].mxu0 }
 0x117   :  { %v12402_v55 = vadd.f32 %v308_v54, %v75_v51  ;;  %v310_v56 = vpop.f32.mrb[11].mxu0  ;;  %v372_v57 = vsel %vm359_vm1, %v12400_v52, 0.0 }
 0x118   :  { %373 = vadd.xlane.f32.xlu0 %v372_v57 }
 0x119   :  { %v375_v58 = vsel %vm359_vm1, %v12402_v55, 0.0 }
 0x11a   :  { %376 = vadd.xlane.f32.xlu1 %v375_v58 }
 0x11c   :  { %v313_v60 = vpop.f32.mrb[12].mxu0 }
 0x11d   :  { %v12414_v62 = vadd.f32 %v313_v60, %v76_v59  ;;  %v315_v63 = vpop.f32.mrb[13].mxu0 }
 0x11e   :  { %v316_v0 = vpop.f32.mrb[14].mxu0 }
 0x11f   :  { %v12416_v1 = vadd.f32 %v316_v0, %v77_v61  ;;  %v318_v2 = vpop.f32.mrb[15].mxu0  ;;  %v378_v3 = vsel %vm359_vm1, %v12414_v62, 0.0 }
 0x120   :  { %379 = vadd.xlane.f32.xlu0 %v378_v3 }
 0x121   :  { %v381_v4 = vsel %vm359_vm1, %v12416_v1, 0.0 }
 0x122   :  { %382 = vadd.xlane.f32.xlu1 %v381_v4 }
 0x124   :  { %v321_v6 = vpop.f32.mrb[16].mxu0 }
 0x125   :  { %v12428_v8 = vadd.f32 %v321_v6, %v78_v5  ;;  %v323_v9 = vpop.f32.mrb[17].mxu0 }
 0x126   :  { %v324_v10 = vpop.f32.mrb[18].mxu0 }
 0x127   :  { %v12430_v11 = vadd.f32 %v324_v10, %v79_v7  ;;  %v326_v12 = vpop.f32.mrb[19].mxu0  ;;  %v384_v13 = vsel %vm359_vm1, %v12428_v8, 0.0 }
 0x128   :  { %385 = vadd.xlane.f32.xlu0 %v384_v13 }
 0x129   :  { %v387_v14 = vsel %vm359_vm1, %v12430_v11, 0.0 }
 0x12a   :  { %388 = vadd.xlane.f32.xlu1 %v387_v14 }
 0x12c   :  { %v329_v16 = vpop.f32.mrb[20].mxu0 }
 0x12d   :  { %v12442_v18 = vadd.f32 %v329_v16, %v80_v15  ;;  %v331_v19 = vpop.f32.mrb[21].mxu0 }
 0x12e   :  { %v332_v20 = vpop.f32.mrb[22].mxu0 }
 0x12f   :  { %v12444_v21 = vadd.f32 %v332_v20, %v81_v17  ;;  %v334_v22 = vpop.f32.mrb[23].mxu0  ;;  %v390_v23 = vsel %vm359_vm1, %v12442_v18, 0.0 }
 0x130   :  { %391 = vadd.xlane.f32.xlu0 %v390_v23 }
 0x131   :  { %v393_v24 = vsel %vm359_vm1, %v12444_v21, 0.0 }
 0x132   :  { %394 = vadd.xlane.f32.xlu1 %v393_v24 }
 0x134   :  { %v337_v26 = vpop.f32.mrb[24].mxu0 }
 0x135   :  { %v12456_v28 = vadd.f32 %v337_v26, %v82_v25  ;;  %v339_v29 = vpop.f32.mrb[25].mxu0 }
 0x136   :  { %v340_v30 = vpop.f32.mrb[26].mxu0 }
 0x137   :  { %v12458_v31 = vadd.f32 %v340_v30, %v83_v27  ;;  %v342_v33 = vpop.f32.mrb[27].mxu0  ;;  %v396_v34 = vsel %vm359_vm1, %v12456_v28, 0.0 }
 0x138   :  { %397 = vadd.xlane.f32.xlu0 %v396_v34 }
 0x139   :  { %v399_v36 = vsel %vm359_vm1, %v12458_v31, 0.0 }
 0x13a   :  { %400 = vadd.xlane.f32.xlu1 %v399_v36 }
 0x13c   :  { %v345_v38 = vpop.f32.mrb[28].mxu0 }
 0x13d   :  { %v12470_v40 = vadd.f32 %v345_v38, %v84_v37  ;;  %v347_v41 = vpop.f32.mrb[29].mxu0 }
 0x13e   :  { %v348_v43 = vpop.f32.mrb[30].mxu0 }
 0x13f   :  { %v12472_v44 = vadd.f32 %v348_v43, %v85_v39  ;;  %v350_v46 = vpop.f32.mrb[31].mxu0  ;;  %v402_v47 = vsel %vm359_vm1, %v12470_v40, 0.0 }
 0x140   :  { %403 = vadd.xlane.f32.xlu0 %v402_v47 }
 0x141   :  { %v405_v48 = vsel %vm359_vm1, %v12472_v44, 0.0 }
 0x142   :  { %406 = vadd.xlane.f32.xlu1 %v405_v48 }
 0x195   :  { %v362_v49 = vpop.xlane.xlu0 %361 }
 0x196   :  { %v409_v50 = vmul.f32 0.03125, %v362_v49 }
 0x198   :  { %v12479_v51 = vsub.f32 %v12372_v32, %v409_v50 }
 0x199   :  { %v365_v53 = vpop.xlane.xlu0 %364 }
 0x19a   :  { %v410_v54 = vmul.f32 0.03125, %v365_v53  ;;  %v441_v56 = vmul.f32 %v12479_v51, %v12479_v51 }
 0x19c   :  { %v12484_v57 = vsub.f32 %v12374_v35, %v410_v54  ;;  %v457_v58 = vsel %vm359_vm1, %v441_v56, 0.0 }
 0x19d   :  { %v368_v59 = vpop.xlane.xlu1 %367  ;;  %458 = vadd.xlane.f32.xlu0 %v457_v58 }
 0x19e   :  { %v411_v60 = vmul.f32 0.03125, %v368_v59  ;;  %v442_v61 = vmul.f32 %v12484_v57, %v12484_v57 }
 0x1a0   :  { %v12490_v63 = vsub.f32 %v12386_v42, %v411_v60  ;;  %v460_v0 = vsel %vm359_vm1, %v442_v61, 0.0 }
 0x1a1   :  { %v371_v2 = vpop.xlane.xlu1 %370  ;;  %461 = vadd.xlane.f32.xlu1 %v460_v0 }
 0x1a2   :  { %v412_v3 = vmul.f32 0.03125, %v371_v2  ;;  %v443_v4 = vmul.f32 %v12490_v63, %v12490_v63 }
 0x1a4   :  { %v12496_v5 = vsub.f32 %v12388_v45, %v412_v3  ;;  %v463_v6 = vsel %vm359_vm1, %v443_v4, 0.0  ;;  %v11454_v3 = vld [vmem:[%s16218_s3] sm:$0xff]  }
 0x1a5   :  { %464 = vadd.xlane.f32.xlu0 %v463_v6  ;;  %v374_v7 = vpop.xlane.xlu0 %373  ;;  %10295 = vmatprep.subr.bf16.mxu1 %v11454_v3 }
 0x1a6   :  { %v413_v9 = vmul.f32 0.03125, %v374_v7  ;;  %v444_v10 = vmul.f32 %v12496_v5, %v12496_v5  ;;  %10296 = vmatpush3.bf16.msra.mxu1 %v11454_v3 }
 0x1a7   :  { %v377_v12 = vpop.xlane.xlu1 %376 }
 0x1a8   :  { %v12502_v13 = vsub.f32 %v12400_v52, %v413_v9  ;;  %v414_v14 = vmul.f32 0.03125, %v377_v12  ;;  %v466_v15 = vsel %vm359_vm1, %v444_v10, 0.0 }
 0x1a9   :  { %467 = vadd.xlane.f32.xlu1 %v466_v15 }
 0x1aa   :  { %v12506_v16 = vsub.f32 %v12402_v55, %v414_v14  ;;  %v445_v17 = vmul.f32 %v12502_v13, %v12502_v13  ;;  %v11455_v14 = vld [vmem:[%s16218_s3 + $0x8] sm:$0xff]  }
 0x1ab   :  { %10297 = vmatprep.subr.bf16.mxu1 %v11455_v14 }
 0x1ac   :  { %v469_v19 = vsel %vm359_vm1, %v445_v17, 0.0  ;;  %v446_v20 = vmul.f32 %v12506_v16, %v12506_v16  ;;  %10298 = vmatpush3.bf16.msra.mxu1 %v11455_v14 }
 0x1ad   :  { %470 = vadd.xlane.f32.xlu0 %v469_v19  ;;  %v380_v22 = vpop.xlane.xlu0 %379 }
 0x1ae   :  { %v415_v23 = vmul.f32 0.03125, %v380_v22  ;;  %v472_v24 = vsel %vm359_vm1, %v446_v20, 0.0 }
 0x1af   :  { %v383_v25 = vpop.xlane.xlu1 %382  ;;  %473 = vadd.xlane.f32.xlu1 %v472_v24 }
 0x1b0   :  { %v12515_v26 = vsub.f32 %v12414_v62, %v415_v23  ;;  %v416_v27 = vmul.f32 0.03125, %v383_v25 }
 0x1b2   :  { %v12518_v29 = vsub.f32 %v12416_v1, %v416_v27  ;;  %v447_v30 = vmul.f32 %v12515_v26, %v12515_v26 }
 0x1b4   :  { %v475_v33 = vsel %vm359_vm1, %v447_v30, 0.0  ;;  %v448_v34 = vmul.f32 %v12518_v29, %v12518_v29 }
 0x1b5   :  { %476 = vadd.xlane.f32.xlu0 %v475_v33  ;;  %v386_v36 = vpop.xlane.xlu0 %385 }
 0x1b6   :  { %v417_v37 = vmul.f32 0.03125, %v386_v36  ;;  %v478_v38 = vsel %vm359_vm1, %v448_v34, 0.0 }
 0x1b7   :  { %v389_v39 = vpop.xlane.xlu1 %388  ;;  %479 = vadd.xlane.f32.xlu1 %v478_v38 }
 0x1b8   :  { %v12527_v41 = vsub.f32 %v12428_v8, %v417_v37  ;;  %v418_v43 = vmul.f32 0.03125, %v389_v39 }
 0x1ba   :  { %v12530_v46 = vsub.f32 %v12430_v11, %v418_v43  ;;  %v449_v47 = vmul.f32 %v12527_v41, %v12527_v41 }
 0x1bc   :  { %v481_v48 = vsel %vm359_vm1, %v449_v47, 0.0  ;;  %v450_v49 = vmul.f32 %v12530_v46, %v12530_v46 }
 0x1bd   :  { %482 = vadd.xlane.f32.xlu0 %v481_v48  ;;  %v392_v50 = vpop.xlane.xlu0 %391 }
 0x1be   :  { %v419_v53 = vmul.f32 0.03125, %v392_v50  ;;  %v484_v54 = vsel %vm359_vm1, %v450_v49, 0.0 }
 0x1bf   :  { %v395_v56 = vpop.xlane.xlu1 %394  ;;  %485 = vadd.xlane.f32.xlu1 %v484_v54 }
 0x1c0   :  { %v12539_v58 = vsub.f32 %v12442_v18, %v419_v53  ;;  %v420_v59 = vmul.f32 0.03125, %v395_v56 }
 0x1c2   :  { %v12542_v60 = vsub.f32 %v12444_v21, %v420_v59  ;;  %v451_v61 = vmul.f32 %v12539_v58, %v12539_v58 }
 0x1c4   :  { %v487_v0 = vsel %vm359_vm1, %v451_v61, 0.0  ;;  %v452_v2 = vmul.f32 %v12542_v60, %v12542_v60 }
 0x1c5   :  { %488 = vadd.xlane.f32.xlu0 %v487_v0  ;;  %v398_v4 = vpop.xlane.xlu0 %397 }
 0x1c6   :  { %v421_v6 = vmul.f32 0.03125, %v398_v4  ;;  %v490_v7 = vsel %vm359_vm1, %v452_v2, 0.0 }
 0x1c7   :  { %v401_v9 = vpop.xlane.xlu1 %400  ;;  %491 = vadd.xlane.f32.xlu1 %v490_v7  ;;  %v12584_v7 = vld [vmem:[%s16219_s7] ss:$0 sm:$0xff] }
 0x1c8   :  { %v12554_v10 = vsub.f32 %v12456_v28, %v421_v6  ;;  %v422_v12 = vmul.f32 0.03125, %v401_v9 }
 0x1ca   :  { %v12560_v15 = vsub.f32 %v12458_v31, %v422_v12  ;;  %v453_v17 = vmul.f32 %v12554_v10, %v12554_v10 }
 0x1cc   :  { %v493_v19 = vsel %vm359_vm1, %v453_v17, 0.0  ;;  %v454_v20 = vmul.f32 %v12560_v15, %v12560_v15 }
 0x1cd   :  { %494 = vadd.xlane.f32.xlu0 %v493_v19  ;;  %v404_v22 = vpop.xlane.xlu0 %403 }
 0x1ce   :  { %v423_v23 = vmul.f32 0.03125, %v404_v22  ;;  %v496_v24 = vsel %vm359_vm1, %v454_v20, 0.0 }
 0x1cf   :  { %v407_v25 = vpop.xlane.xlu1 %406  ;;  %497 = vadd.xlane.f32.xlu1 %v496_v24 }
 0x1d0   :  { %v12569_v27 = vsub.f32 %v12470_v40, %v423_v23  ;;  %v424_v30 = vmul.f32 0.03125, %v407_v25 }
 0x1d2   :  { %v12572_v33 = vsub.f32 %v12472_v44, %v424_v30  ;;  %v455_v34 = vmul.f32 %v12569_v27, %v12569_v27 }
 0x1d4   :  { %v499_v36 = vsel %vm359_vm1, %v455_v34, 0.0  ;;  %v456_v37 = vmul.f32 %v12572_v33, %v12572_v33 }
 0x1d5   :  { %500 = vadd.xlane.f32.xlu0 %v499_v36 }
 0x1d6   :  { %v502_v38 = vsel %vm359_vm1, %v456_v37, 0.0 }
 0x1d7   :  { %503 = vadd.xlane.f32.xlu1 %v502_v38 }
 0x22a   :  { %v459_v39 = vpop.xlane.xlu0 %458 }
 0x22b   :  { %v505_v43 = vmul.f32 0.03125, %v459_v39 }
 0x22d   :  { %v521_v47 = vadd.f32 1e-05, %v505_v43 }
 0x22e   :  { %v462_v48 = vpop.xlane.xlu1 %461 }
 0x22f   :  { %11490 = vrsqrt.f32 %v521_v47  ;;  %v506_v49 = vmul.f32 0.03125, %v462_v48 }
 0x231   :  { %v522_v50 = vadd.f32 1e-05, %v506_v49 }
 0x232   :  { %v465_v53 = vpop.xlane.xlu0 %464 }
 0x233   :  { %11492 = vrsqrt.f32 %v522_v50  ;;  %v507_v54 = vmul.f32 0.03125, %v465_v53 }
 0x235   :  { %v523_v56 = vadd.f32 1e-05, %v507_v54 }
 0x236   :  { %v468_v59 = vpop.xlane.xlu1 %467 }
 0x237   :  { %11494 = vrsqrt.f32 %v523_v56  ;;  %v508_v61 = vmul.f32 0.03125, %v468_v59 }
 0x239   :  { %v11491_v0 = vpop.eup %11490  ;;  %v524_v2 = vadd.f32 1e-05, %v508_v61 }
 0x23a   :  { %v471_v3 = vpop.xlane.xlu0 %470  ;;  %v553_v4 = vmul.f32 %v11491_v0, %v12479_v51  ;;  %v12591_v51 = vld [vmem:[%s16219_s7 + $0x1] ss:$0 sm:$0xff] }
 0x23b   :  { %11496 = vrsqrt.f32 %v524_v2  ;;  %v509_v6 = vmul.f32 0.03125, %v471_v3 }
 0x23c   :  { %v474_v9 = vpop.xlane.xlu1 %473  ;;  %v573_v20 = vmul.f32 %v12584_v7, %v553_v4 }
 0x23d   :  { %v11493_v12 = vpop.eup %11492  ;;  %v525_v14 = vadd.f32 1e-05, %v509_v6  ;;  %v510_v17 = vmul.f32 0.03125, %v474_v9 }
 0x23e   :  { %v554_v19 = vmul.f32 %v11493_v12, %v12484_v57  ;;  %v593_v30 = vadd.f32 %v12591_v51, %v573_v20 }
 0x23f   :  { %11498 = vrsqrt.f32 %v525_v14  ;;  %v526_v22 = vadd.f32 1e-05, %v510_v17 }
 0x240   :  { %v574_v23 = vmul.f32 %v12584_v7, %v554_v19 }
 0x241   :  { %v11495_v24 = vpop.eup %11494  ;;  %11500 = vrsqrt.f32 %v526_v22 }
 0x242   :  { %v477_v25 = vpop.xlane.xlu0 %476  ;;  %v594_v34 = vadd.f32 %v12591_v51, %v574_v23  ;;  %v555_v57 = vmul.f32 %v11495_v24, %v12490_v63 }
 0x243   :  { %v511_v36 = vmul.f32 0.03125, %v477_v25 }
 0x244   :  { %v480_v37 = vpop.xlane.xlu1 %479  ;;  %v12597_v38 = vpack.c.bf16 %v594_v34, %v593_v30  ;;  %v575_v49 = vmul.f32 %v12584_v7, %v555_v57 }
 0x245   :  { %v11497_v39 = vpop.eup %11496  ;;  %v527_v43 = vadd.f32 1e-05, %v511_v36  ;;  %v512_v47 = vmul.f32 0.03125, %v480_v37 }
 0x246   :  { %10299 = vmatprep.mubr.msk.bf16.mxu1 %vm359_vm1, %v12597_v38  ;;  %v556_v48 = vmul.f32 %v11497_v39, %v12496_v5  ;;  %v595_v56 = vadd.f32 %v12591_v51, %v575_v49 }
 0x247   :  { %11502 = vrsqrt.f32 %v527_v43  ;;  %v528_v50 = vadd.f32 1e-05, %v512_v47 }
 0x248   :  { %v576_v53 = vmul.f32 %v12584_v7, %v556_v48 }
 0x249   :  { %v11499_v54 = vpop.eup %11498  ;;  %11504 = vrsqrt.f32 %v528_v50 }
 0x24a   :  { %v483_v63 = vpop.xlane.xlu0 %482  ;;  %v596_v59 = vadd.f32 %v12591_v51, %v576_v53  ;;  %v557_v61 = vmul.f32 %v11499_v54, %v12502_v13 }
 0x24b   :  { %v11501_v0 = vpop.eup %11500  ;;  %v513_v2 = vmul.f32 0.03125, %v483_v63 }
 0x24c   :  { %v486_v3 = vpop.xlane.xlu1 %485  ;;  %v12607_v4 = vpack.c.bf16 %v596_v59, %v595_v56  ;;  %v558_v5 = vmul.f32 %v11501_v0, %v12506_v16  ;;  %v577_v6 = vmul.f32 %v12584_v7, %v557_v61 }
 0x24d   :  { %v529_v9 = vadd.f32 1e-05, %v513_v2  ;;  %v514_v12 = vmul.f32 0.03125, %v486_v3 }
 0x24e   :  { %10300 = vmatmul.mubr.msk.bf16.vlgmr.msra.gmra.mrb[0].mxu1 %vm359_vm1, %v12607_v4  ;;  %v578_v14 = vmul.f32 %v12584_v7, %v558_v5  ;;  %v597_v13 = vadd.f32 %v12591_v51, %v577_v6 }
 0x24f   :  { %11506 = vrsqrt.f32 %v529_v9  ;;  %v530_v17 = vadd.f32 1e-05, %v514_v12 }
 0x250   :  { %v598_v19 = vadd.f32 %v12591_v51, %v578_v14 }
 0x251   :  { %v11503_v20 = vpop.eup %11502  ;;  %11508 = vrsqrt.f32 %v530_v17 }
 0x252   :  { %v489_v22 = vpop.xlane.xlu0 %488  ;;  %v12616_v23 = vpack.c.bf16 %v598_v19, %v597_v13  ;;  %v559_v16 = vmul.f32 %v11503_v20, %v12515_v26 }
 0x253   :  { %v11505_v24 = vpop.eup %11504  ;;  %v515_v25 = vmul.f32 0.03125, %v489_v22 }
 0x254   :  { %v492_v30 = vpop.xlane.xlu1 %491  ;;  %10303 = vmatprep.mubr.msk.bf16.mxu1 %vm359_vm1, %v12616_v23  ;;  %v560_v34 = vmul.f32 %v11505_v24, %v12518_v29  ;;  %v579_v57 = vmul.f32 %v12584_v7, %v559_v16 }
 0x255   :  { %v531_v36 = vadd.f32 1e-05, %v515_v25  ;;  %v516_v37 = vmul.f32 0.03125, %v492_v30 }
 0x256   :  { %v580_v39 = vmul.f32 %v12584_v7, %v560_v34  ;;  %v599_v47 = vadd.f32 %v12591_v51, %v579_v57 }
 0x257   :  { %11510 = vrsqrt.f32 %v531_v36  ;;  %v532_v43 = vadd.f32 1e-05, %v516_v37 }
 0x258   :  { %v600_v26 = vadd.f32 %v12591_v51, %v580_v39 }
 0x259   :  { %v11507_v48 = vpop.eup %11506  ;;  %11512 = vrsqrt.f32 %v532_v43 }
 0x25a   :  { %v495_v49 = vpop.xlane.xlu0 %494  ;;  %v12626_v50 = vpack.c.bf16 %v600_v26, %v599_v47  ;;  %v561_v53 = vmul.f32 %v11507_v48, %v12527_v41 }
 0x25b   :  { %v11509_v29 = vpop.eup %11508  ;;  %v517_v54 = vmul.f32 0.03125, %v495_v49 }
 0x25c   :  { %v498_v63 = vpop.xlane.xlu1 %497  ;;  %10304 = vmatmul.mubr.msk.bf16.gmra.mrb[4].mxu1 %vm359_vm1, %v12626_v50  ;;  %v562_v56 = vmul.f32 %v11509_v29, %v12530_v46  ;;  %v581_v59 = vmul.f32 %v12584_v7, %v561_v53 }
 0x25d   :  { %v533_v61 = vadd.f32 1e-05, %v517_v54  ;;  %v518_v0 = vmul.f32 0.03125, %v498_v63 }
 0x25e   :  { %v582_v2 = vmul.f32 %v12584_v7, %v562_v56  ;;  %v601_v5 = vadd.f32 %v12591_v51, %v581_v59 }
 0x25f   :  { %11514 = vrsqrt.f32 %v533_v61  ;;  %v534_v3 = vadd.f32 1e-05, %v518_v0 }
 0x260   :  { %v602_v41 = vadd.f32 %v12591_v51, %v582_v2 }
 0x261   :  { %v11511_v6 = vpop.eup %11510  ;;  %11516 = vrsqrt.f32 %v534_v3 }
 0x262   :  { %v501_v9 = vpop.xlane.xlu0 %500  ;;  %v12636_v12 = vpack.c.bf16 %v602_v41, %v601_v5  ;;  %v563_v14 = vmul.f32 %v11511_v6, %v12539_v58 }
 0x263   :  { %v11513_v46 = vpop.eup %11512  ;;  %v519_v17 = vmul.f32 0.03125, %v501_v9 }
 0x264   :  { %v504_v13 = vpop.xlane.xlu1 %503  ;;  %10307 = vmatprep.mubr.msk.bf16.mxu1 %vm359_vm1, %v12636_v12  ;;  %v564_v19 = vmul.f32 %v11513_v46, %v12542_v60  ;;  %v583_v20 = vmul.f32 %v12584_v7, %v563_v14 }
 0x265   :  { %v535_v22 = vadd.f32 1e-05, %v519_v17  ;;  %v520_v16 = vmul.f32 0.03125, %v504_v13 }
 0x266   :  { %v584_v24 = vmul.f32 %v12584_v7, %v564_v19  ;;  %v603_v30 = vadd.f32 %v12591_v51, %v583_v20 }
 0x267   :  { %11518 = vrsqrt.f32 %v535_v22  ;;  %v536_v25 = vadd.f32 1e-05, %v520_v16 }
 0x268   :  { %v604_v58 = vadd.f32 %v12591_v51, %v584_v24 }
 0x269   :  { %v11515_v34 = vpop.eup %11514  ;;  %11520 = vrsqrt.f32 %v536_v25 }
 0x26a   :  { %v12646_v57 = vpack.c.bf16 %v604_v58, %v603_v30  ;;  %v565_v36 = vmul.f32 %v11515_v34, %v12554_v10 }
 0x26b   :  { %v11517_v37 = vpop.eup %11516 }
 0x26c   :  { %10308 = vmatmul.mubr.msk.bf16.gmra.mrb[8].mxu1 %vm359_vm1, %v12646_v57  ;;  %v566_v60 = vmul.f32 %v11517_v37, %v12560_v15  ;;  %v585_v39 = vmul.f32 %v12584_v7, %v565_v36 }
 0x26e   :  { %v586_v43 = vmul.f32 %v12584_v7, %v566_v60  ;;  %v605_v47 = vadd.f32 %v12591_v51, %v585_v39 }
 0x270   :  { %v606_v26 = vadd.f32 %v12591_v51, %v586_v43 }
 0x271   :  { %v11519_v48 = vpop.eup %11518 }
 0x272   :  { %v12656_v49 = vpack.c.bf16 %v606_v26, %v605_v47  ;;  %v567_v53 = vmul.f32 %v11519_v48, %v12569_v27 }
 0x273   :  { %v11521_v10 = vpop.eup %11520 }
 0x274   :  { %10311 = vmatprep.mubr.msk.bf16.mxu1 %vm359_vm1, %v12656_v49  ;;  %v568_v29 = vmul.f32 %v11521_v10, %v12572_v33  ;;  %v587_v15 = vmul.f32 %v12584_v7, %v567_v53 }
 0x276   :  { %v588_v54 = vmul.f32 %v12584_v7, %v568_v29  ;;  %v607_v63 = vadd.f32 %v12591_v51, %v587_v15 }
 0x278   :  { %v608_v56 = vadd.f32 %v12591_v51, %v588_v54 }
 0x27a   :  { %v12666_v59 = vpack.c.bf16 %v608_v56, %v607_v63 }
 0x27c   :  { %10312 = vmatmul.mubr.msk.bf16.gmra.mrb[12].mxu1 %vm359_vm1, %v12666_v59 }
 0x321   :  { %v10301_v27 = vpop.f32.mrb[0].mxu1 }
 0x322   :  { %v711_v61 = vpop.f32.mrb[1].mxu1 }
 0x323   :  { %v10302_v0 = vpop.f32.mrb[2].mxu1 }
 0x324   :  { %v775_v2 = vpack.c.bf16 %v10302_v0, %v10301_v27  ;;  %v714_v3 = vpop.f32.mrb[3].mxu1 }
 0x325   :  { %v774_v33 = vpack.c.bf16 %v714_v3, %v711_v61 }
 0x326   :  { %788 = vrot.lane.b32.xlu1 %v775_v2, %s12227_s29 }
 0x327   :  { %786 = vrot.lane.b32.xlu0 %v774_v33, %s12227_s29  ;;  %10323 = vmatprep.mubr.msk.bf16.mxu1 %vm794_vm2, %v774_v33 }
 0x32f   :  { %v10305_v7 = vpop.f32.mrb[4].mxu1 }
 0x330   :  { %v727_v51 = vpop.f32.mrb[5].mxu1 }
 0x331   :  { %v10306_v5 = vpop.f32.mrb[6].mxu1 }
 0x332   :  { %v12673_v41 = vpack.c.bf16 %v10306_v5, %v10305_v7  ;;  %v730_v6 = vpop.f32.mrb[7].mxu1 }
 0x333   :  { %v776_v9 = vpack.c.bf16 %v730_v6, %v727_v51 }
 0x335   :  { %790 = vrot.lane.b32.xlu1 %v776_v9, %s12227_s29 }
 0x339   :  { %792 = vrot.lane.b32.xlu1 %v12673_v41, %s12227_s29 }
 0x33f   :  { %v10309_v14 = vpop.f32.mrb[8].mxu1 }
 0x340   :  { %v743_v46 = vpop.f32.mrb[9].mxu1 }
 0x341   :  { %v10310_v17 = vpop.f32.mrb[10].mxu1 }
 0x342   :  { %v12678_v13 = vpack.c.bf16 %v10310_v17, %v10309_v14  ;;  %v746_v19 = vpop.f32.mrb[11].mxu1 }
 0x343   :  { %v12680_v20 = vpack.c.bf16 %v746_v19, %v743_v46 }
 0x344   :  { %890 = vrot.lane.b32.xlu1 %v12678_v13, %s12227_s29 }
 0x345   :  { %888 = vrot.lane.b32.xlu0 %v12680_v20, %s12227_s29 }
 0x34f   :  { %v10313_v22 = vpop.f32.mrb[12].mxu1 }
 0x350   :  { %v759_v16 = vpop.f32.mrb[13].mxu1 }
 0x351   :  { %v10314_v24 = vpop.f32.mrb[14].mxu1 }
 0x352   :  { %v12686_v25 = vpack.c.bf16 %v10314_v24, %v10313_v22  ;;  %v762_v30 = vpop.f32.mrb[15].mxu1 }
 0x353   :  { %v12688_v58 = vpack.c.bf16 %v762_v30, %v759_v16 }
 0x354   :  { %894 = vrot.lane.b32.xlu1 %v12686_v25, %s12227_s29 }
 0x355   :  { %892 = vrot.lane.b32.xlu0 %v12688_v58, %s12227_s29 }
 0x358   :  { %1171 = vrot.lane.b32.xlu1 %v775_v2, %s12228_s30 }
 0x359   :  { %1169 = vrot.lane.b32.xlu0 %v774_v33, %s12228_s30 }
 0x35d   :  { %1173 = vrot.lane.b32.xlu0 %v776_v9, %s12228_s30 }
 0x398   :  { %v789_v37 = vpop.permute.xlu1 %788 }
 0x399   :  { %v787_v34 = vpop.permute.xlu0 %786  ;;  %v811_v60 = vsel %vm794_vm2, %v789_v37, 0 }
 0x39a   :  { %11343 = vmatprep.subr.msk.bf16.mxu1 %vm794_vm2, %v787_v34  ;;  %v808_v36 = vsel %vm794_vm2, %v787_v34, 0 }
 0x39b   :  { %10316 = vmatpush3.bf16.xpose.msra.mxu1 %v808_v36 }
 0x39c   :  { %11344 = vmatprep.subr.msk.bf16.mxu1 %vm794_vm2, %v789_v37 }
 0x3a3   :  { %10318 = vmatpush3.bf16.xpose.msra.mxu1 %v811_v60 }
 0x3a7   :  { %v791_v39 = vpop.permute.xlu1 %790 }
 0x3a8   :  { %11345 = vmatprep.subr.msk.bf16.mxu1 %vm794_vm2, %v791_v39  ;;  %v814_v43 = vsel %vm794_vm2, %v791_v39, 0 }
 0x3ab   :  { %v793_v47 = vpop.permute.xlu1 %792  ;;  %10320 = vmatpush3.bf16.xpose.msra.mxu1 %v814_v43 }
 0x3ac   :  { %11346 = vmatprep.subr.msk.bf16.mxu1 %vm794_vm2, %v793_v47  ;;  %v817_v26 = vsel %vm794_vm2, %v793_v47, 0 }
 0x3b3   :  { %10322 = vmatpush3.bf16.xpose.msra.mxu1 %v817_v26 }
 0x3b6   :  { %v891_v10 = vpop.permute.xlu1 %890 }
 0x3b7   :  { %v889_v48 = vpop.permute.xlu0 %888  ;;  %v912_v29 = vsel %vm794_vm2, %v891_v10, 0 }
 0x3b8   :  { %11347 = vmatprep.subr.msk.bf16.mxu1 %vm794_vm2, %v889_v48  ;;  %v909_v53 = vsel %vm794_vm2, %v889_v48, 0 }
 0x3ba   :  { %10324 = vmatmul.mubr.msk.bf16.vlgmr.msra.gmra.mrb[16].mxu1 %vm794_vm2, %v775_v2 }
 0x3bb   :  { %10327 = vmatprep.mubr.msk.bf16.mxu1 %vm794_vm2, %v776_v9  ;;  %10332 = vmatpush3.bf16.xpose.msra.mxu1 %v909_v53 }
 0x3bc   :  { %11348 = vmatprep.subr.msk.bf16.mxu1 %vm794_vm2, %v891_v10 }
 0x3c2   :  { %10328 = vmatmul.mubr.msk.bf16.gmra.mrb[20].mxu1 %vm794_vm2, %v12673_v41 }
 0x3c3   :  { %10334 = vmatpush3.bf16.xpose.msra.mxu1 %v912_v29  ;;  %10339 = vmatprep.mubr.msk.bf16.mxu1 %vm794_vm2, %v12680_v20 }
 0x3c6   :  { %v895_v63 = vpop.permute.xlu1 %894 }
 0x3c7   :  { %v893_v15 = vpop.permute.xlu0 %892  ;;  %v918_v56 = vsel %vm794_vm2, %v895_v63, 0 }
 0x3c8   :  { %11349 = vmatprep.subr.msk.bf16.mxu1 %vm794_vm2, %v893_v15  ;;  %v915_v54 = vsel %vm794_vm2, %v893_v15, 0 }
 0x3ca   :  { %v1172_v61 = vpop.permute.xlu1 %1171 }
 0x3cb   :  { %10336 = vmatpush3.bf16.xpose.msra.mxu1 %v915_v54  ;;  %v1170_v27 = vpop.permute.xlu0 %1169 }
 0x3cc   :  { %11350 = vmatprep.subr.msk.bf16.mxu1 %vm794_vm2, %v895_v63 }
 0x3cf   :  { %v1174_v0 = vpop.permute.xlu0 %1173 }
 0x3d3   :  { %10338 = vmatpush3.bf16.xpose.msra.mxu1 %v918_v56 }
 0x3d4   :  { %10347 = vmatprep.subr.bf16.mxu1 %v1170_v27 }
 0x3da   :  { %10340 = vmatmul.mubr.msk.bf16.vlgmr.msra.gmra.mrb[24].mxu1 %vm794_vm2, %v12678_v13 }
 0x3db   :  { %10343 = vmatprep.mubr.msk.bf16.mxu1 %vm794_vm2, %v12688_v58  ;;  %10348 = vmatpush3.bf16.msra.mxu1 %v1170_v27 }
 0x3dc   :  { %10349 = vmatprep.subr.bf16.mxu1 %v1172_v61 }
 0x3df   :  { %10350 = vmatpush3.bf16.msra.mxu1 %v1172_v61 }
 0x3e0   :  { %10351 = vmatprep.subr.bf16.mxu1 %v1174_v0 }
 0x3e2   :  { %10344 = vmatmul.mubr.msk.bf16.gmra.mrb[28].mxu1 %vm794_vm2, %v12686_v25 }
 0x3e3   :  { %10352 = vmatpush3.bf16.msra.mxu1 %v1174_v0 }
 0x48d   :  { %v10325_v2 = vpop.f32.mrb[16].mxu1 }
 0x48e   :  { %v853_v3 = vpop.f32.mrb[17].mxu1  ;;  %v991_v33 = vsel %vm230_vm0, %v10325_v2, -inf }
 0x48f   :  { %992 = vmax.xlane.f32.xlu0 %v991_v33  ;;  %v10326_v7 = vpop.f32.mrb[18].mxu1  ;;  %v985_v6 = vsel %vm230_vm0, %v853_v3, -inf }
 0x490   :  { %v856_v51 = vpop.f32.mrb[19].mxu1  ;;  %v994_v46 = vsel %vm230_vm0, %v10326_v7, -inf }
 0x491   :  { %v988_v5 = vsel %vm230_vm0, %v856_v51, -inf }
 0x492   :  { %989 = vmax.xlane.f32.xlu1 %v988_v5 }
 0x493   :  { %986 = vmax.xlane.f32.xlu0 %v985_v6 }
 0x495   :  { %v12728_v9 = vpop.f32.mrb[20].mxu1 }
 0x496   :  { %v12730_v14 = vpop.f32.mrb[21].mxu1  ;;  %v1003_v16 = vsel %vm230_vm0, %v12728_v9, -inf }
 0x497   :  { %995 = vmax.xlane.f32.xlu0 %v994_v46  ;;  %v10330_v17 = vpop.f32.mrb[22].mxu1  ;;  %v997_v30 = vsel %vm230_vm0, %v12730_v14, -inf }
 0x498   :  { %v12733_v19 = vpop.f32.mrb[23].mxu1  ;;  %v1006_v22 = vsel %vm230_vm0, %v10330_v17, -inf }
 0x499   :  { %1007 = vmax.xlane.f32.xlu1 %v1006_v22  ;;  %v1000_v24 = vsel %vm230_vm0, %v12733_v19, -inf }
 0x49b   :  { %1004 = vmax.xlane.f32.xlu0 %v1003_v16 }
 0x49d   :  { %1001 = vmax.xlane.f32.xlu1 %v1000_v24 }
 0x49f   :  { %998 = vmax.xlane.f32.xlu0 %v997_v30 }
 0x4ad   :  { %v12742_v34 = vpop.f32.mrb[24].mxu1 }
 0x4ae   :  { %v12744_v36 = vpop.f32.mrb[25].mxu1  ;;  %v1015_v37 = vsel %vm230_vm0, %v12742_v34, -inf }
 0x4af   :  { %1016 = vmax.xlane.f32.xlu0 %v1015_v37  ;;  %v12748_v60 = vpop.f32.mrb[26].mxu1  ;;  %v1009_v47 = vsel %vm230_vm0, %v12744_v36, -inf }
 0x4b0   :  { %v12750_v39 = vpop.f32.mrb[27].mxu1  ;;  %v1018_v43 = vsel %vm230_vm0, %v12748_v60, -inf }
 0x4b1   :  { %1019 = vmax.xlane.f32.xlu1 %v1018_v43  ;;  %v1012_v26 = vsel %vm230_vm0, %v12750_v39, -inf }
 0x4b3   :  { %1010 = vmax.xlane.f32.xlu0 %v1009_v47 }
 0x4b5   :  { %1013 = vmax.xlane.f32.xlu1 %v1012_v26  ;;  %v12758_v48 = vpop.f32.mrb[28].mxu1 }
 0x4b6   :  { %v12760_v53 = vpop.f32.mrb[29].mxu1  ;;  %v1027_v10 = vsel %vm230_vm0, %v12758_v48, -inf }
 0x4b7   :  { %1028 = vmax.xlane.f32.xlu0 %v1027_v10  ;;  %v12764_v29 = vpop.f32.mrb[30].mxu1  ;;  %v1021_v54 = vsel %vm230_vm0, %v12760_v53, -inf }
 0x4b8   :  { %v12766_v15 = vpop.f32.mrb[31].mxu1  ;;  %v1030_v63 = vsel %vm230_vm0, %v12764_v29, -inf }
 0x4b9   :  { %v1024_v56 = vsel %vm230_vm0, %v12766_v15, -inf }
 0x4bb   :  { %1022 = vmax.xlane.f32.xlu0 %v1021_v54 }
 0x4c6   :  { %1258 = vrot.lane.b32.xlu1 %v12680_v20, %s12228_s30 }
 0x4d1   :  { %1175 = vrot.lane.b32.xlu0 %v12673_v41, %s12228_s30 }
 0x4ea   :  { %1031 = vmax.xlane.f32.xlu1 %v1030_v63 }
 0x4ee   :  { %1025 = vmax.xlane.f32.xlu1 %v1024_v56 }
 0x4ff   :  { %1260 = vrot.lane.b32.xlu1 %v12678_v13, %s12228_s30 }
 0x51c   :  { %v993_v27 = vpop.xlane.xlu0 %992 }
 0x51d   :  { %v1035_v61 = vsub.f32 %v10325_v2, %v993_v27 }
 0x51f   :  { %v1053_v0 = vmul.f32 1.442695, %v1035_v61  ;;  %v990_v33 = vpop.xlane.xlu1 %989 }
 0x520   :  { %v987_v5 = vpop.xlane.xlu0 %986  ;;  %v1034_v6 = vsub.f32 %v856_v51, %v990_v33 }
 0x521   :  { %11522 = vpow2.f32 %v1053_v0  ;;  %v1033_v20 = vsub.f32 %v853_v3, %v987_v5 }
 0x522   :  { %v1051_v24 = vmul.f32 1.442695, %v1034_v6 }
 0x523   :  { %v1049_v41 = vmul.f32 1.442695, %v1033_v20 }
 0x524   :  { %v996_v46 = vpop.xlane.xlu0 %995 }
 0x525   :  { %11524 = vpow2.f32 %v1049_v41  ;;  %v1036_v22 = vsub.f32 %v10326_v7, %v996_v46 }
 0x526   :  { %v1008_v16 = vpop.xlane.xlu1 %1007 }
 0x527   :  { %v1055_v30 = vmul.f32 1.442695, %v1036_v22  ;;  %v1040_v37 = vsub.f32 %v10330_v17, %v1008_v16 }
 0x528   :  { %v1005_v43 = vpop.xlane.xlu0 %1004 }
 0x529   :  { %11526 = vpow2.f32 %v1055_v30  ;;  %v1039_v13 = vsub.f32 %v12728_v9, %v1005_v43  ;;  %v1063_v26 = vmul.f32 1.442695, %v1040_v37 }
 0x52a   :  { %v1002_v47 = vpop.xlane.xlu1 %1001  ;;  %11528 = vpow2.f32 %v1051_v24 }
 0x52b   :  { %v12781_v2 = vpop.eup %11522  ;;  %v1061_v10 = vmul.f32 1.442695, %v1039_v13  ;;  %v1038_v3 = vsub.f32 %v12733_v19, %v1002_v47 }
 0x52c   :  { %v999_v51 = vpop.xlane.xlu0 %998  ;;  %v1087_v7 = vsel %vm230_vm0, %v12781_v2, 0.0 }
 0x52d   :  { %11530 = vpow2.f32 %v1061_v10  ;;  %v1037_v54 = vsub.f32 %v12730_v14, %v999_v51  ;;  %1088 = vadd.xlane.f32.xlu0 %v1087_v7  ;;  %v1059_v9 = vmul.f32 1.442695, %v1038_v3 }
 0x52e   :  { %11532 = vpow2.f32 %v1063_v26 }
 0x52f   :  { %v12787_v17 = vpop.eup %11524  ;;  %v1057_v63 = vmul.f32 1.442695, %v1037_v54 }
 0x530   :  { %v1081_v56 = vsel %vm230_vm0, %v12787_v17, 0.0 }
 0x531   :  { %11534 = vpow2.f32 %v1057_v63  ;;  %1082 = vadd.xlane.f32.xlu0 %v1081_v56 }
 0x532   :  { %11536 = vpow2.f32 %v1059_v9 }
 0x533   :  { %v12791_v27 = vpop.eup %11526 }
 0x534   :  { %v1090_v19 = vsel %vm230_vm0, %v12791_v27, 0.0  ;;  %v12795_v61 = vpop.eup %11528 }
 0x535   :  { %1091 = vadd.xlane.f32.xlu1 %v1090_v19  ;;  %v1084_v0 = vsel %vm230_vm0, %v12795_v61, 0.0 }
 0x537   :  { %v12797_v14 = vpop.eup %11530 }
 0x538   :  { %v1099_v33 = vsel %vm230_vm0, %v12797_v14, 0.0  ;;  %v12803_v5 = vpop.eup %11532 }
 0x539   :  { %1085 = vadd.xlane.f32.xlu1 %v1084_v0  ;;  %1100 = vadd.xlane.f32.xlu0 %v1099_v33  ;;  %v1102_v41 = vsel %vm230_vm0, %v12803_v5, 0.0 }
 0x53b   :  { %v12805_v20 = vpop.eup %11534 }
 0x53c   :  { %v1017_v6 = vpop.xlane.xlu0 %1016  ;;  %v1093_v46 = vsel %vm230_vm0, %v12805_v20, 0.0  ;;  %v12811_v22 = vpop.eup %11536 }
 0x53d   :  { %v1043_v16 = vsub.f32 %v12742_v34, %v1017_v6  ;;  %1103 = vadd.xlane.f32.xlu1 %v1102_v41  ;;  %1094 = vadd.xlane.f32.xlu0 %v1093_v46  ;;  %v1096_v13 = vsel %vm230_vm0, %v12811_v22, 0.0 }
 0x53e   :  { %v1020_v24 = vpop.xlane.xlu1 %1019 }
 0x53f   :  { %v1069_v30 = vmul.f32 1.442695, %v1043_v16  ;;  %v1044_v37 = vsub.f32 %v12748_v60, %v1020_v24 }
 0x540   :  { %v1011_v43 = vpop.xlane.xlu0 %1010 }
 0x541   :  { %11538 = vpow2.f32 %v1069_v30  ;;  %v1041_v47 = vsub.f32 %v12744_v36, %v1011_v43  ;;  %1097 = vadd.xlane.f32.xlu1 %v1096_v13  ;;  %v1071_v10 = vmul.f32 1.442695, %v1044_v37 }
 0x542   :  { %v1014_v26 = vpop.xlane.xlu1 %1013 }
 0x543   :  { %v1065_v3 = vmul.f32 1.442695, %v1041_v47  ;;  %v1042_v51 = vsub.f32 %v12750_v39, %v1014_v26 }
 0x544   :  { %v1029_v34 = vpop.xlane.xlu0 %1028 }
 0x545   :  { %11540 = vpow2.f32 %v1065_v3  ;;  %v1047_v7 = vsub.f32 %v12758_v48, %v1029_v34  ;;  %v1067_v54 = vmul.f32 1.442695, %v1042_v51 }
 0x546   :  { %11542 = vpow2.f32 %v1071_v10  ;;  %v12825_v39 = vpop.permute.xlu1 %1258 }
 0x547   :  { %v1077_v60 = vmul.f32 1.442695, %v1047_v7 }
 0x548   :  { %v1023_v9 = vpop.xlane.xlu0 %1022 }
 0x549   :  { %11544 = vpow2.f32 %v1077_v60  ;;  %v1045_v63 = vsub.f32 %v12760_v53, %v1023_v9 }
 0x54a   :  { %11546 = vpow2.f32 %v1067_v54 }
 0x54b   :  { %v12821_v56 = vpop.eup %11538  ;;  %v1073_v36 = vmul.f32 1.442695, %v1045_v63 }
 0x54c   :  { %v1176_v19 = vpop.permute.xlu0 %1175  ;;  %v1111_v0 = vsel %vm230_vm0, %v12821_v56, 0.0 }
 0x54d   :  { %11548 = vpow2.f32 %v1073_v36  ;;  %1112 = vadd.xlane.f32.xlu1 %v1111_v0  ;;  %10353 = vmatprep.subr.bf16.mxu1 %v1176_v19 }
 0x54e   :  { %10354 = vmatpush3.bf16.msra.mxu1 %v1176_v19 }
 0x54f   :  { %v12827_v48 = vpop.eup %11540  ;;  %10363 = vmatprep.subr.bf16.mxu1 %v12825_v39 }
 0x550   :  { %v1105_v53 = vsel %vm230_vm0, %v12827_v48, 0.0  ;;  %v12832_v33 = vpop.eup %11542 }
 0x551   :  { %1106 = vadd.xlane.f32.xlu1 %v1105_v53  ;;  %v1114_v41 = vsel %vm230_vm0, %v12832_v33, 0.0 }
 0x553   :  { %v12834_v6 = vpop.eup %11544 }
 0x554   :  { %v1123_v46 = vsel %vm230_vm0, %v12834_v6, 0.0  ;;  %v12840_v16 = vpop.eup %11546 }
 0x555   :  { %1115 = vadd.xlane.f32.xlu1 %v1114_v41  ;;  %1124 = vadd.xlane.f32.xlu0 %v1123_v46  ;;  %v1108_v30 = vsel %vm230_vm0, %v12840_v16, 0.0 }
 0x557   :  { %v12842_v24 = vpop.eup %11548 }
 0x558   :  { %v1117_v37 = vsel %vm230_vm0, %v12842_v24, 0.0 }
 0x559   :  { %1109 = vadd.xlane.f32.xlu1 %v1108_v30  ;;  %1118 = vadd.xlane.f32.xlu0 %v1117_v37 }
 0x577   :  { %v1032_v43 = vpop.xlane.xlu1 %1031 }
 0x578   :  { %v1048_v13 = vsub.f32 %v12764_v29, %v1032_v43 }
 0x57a   :  { %v1079_v47 = vmul.f32 1.442695, %v1048_v13 }
 0x57b   :  { %v1026_v26 = vpop.xlane.xlu1 %1025 }
 0x57c   :  { %11550 = vpow2.f32 %v1079_v47  ;;  %v1046_v10 = vsub.f32 %v12766_v15, %v1026_v26 }
 0x57e   :  { %v1075_v3 = vmul.f32 1.442695, %v1046_v10 }
 0x57f   :  { %v1261_v15 = vpop.permute.xlu1 %1260 }
 0x580   :  { %11552 = vpow2.f32 %v1075_v3 }
 0x586   :  { %v12850_v51 = vpop.eup %11550 }
 0x587   :  { %v1126_v34 = vsel %vm230_vm0, %v12850_v51, 0.0 }
 0x588   :  { %1127 = vadd.xlane.f32.xlu0 %v1126_v34 }
 0x58a   :  { %v12854_v7 = vpop.eup %11552 }
 0x58b   :  { %v1120_v54 = vsel %vm230_vm0, %v12854_v7, 0.0 }
 0x58c   :  { %1121 = vadd.xlane.f32.xlu1 %v1120_v54 }
 0x59d   :  { %1264 = vrot.lane.b32.xlu1 %v12686_v25, %s12228_s30 }
 0x59e   :  { %1262 = vrot.lane.b32.xlu0 %v12688_v58, %s12228_s30 }
 0x5ba   :  { %v1089_v29 = vpop.xlane.xlu0 %1088 }
 0x5be   :  { %v1083_v60 = vpop.xlane.xlu0 %1082 }
 0x5c2   :  { %v1092_v9 = vpop.xlane.xlu1 %1091 }
 0x5c3   :  { %11554 = vrcp.f32 %v1092_v9 }
 0x5c4   :  { %11556 = vrcp.f32 %v1083_v60 }
 0x5c5   :  { %11558 = vrcp.f32 %v1089_v29 }
 0x5c6   :  { %v1086_v63 = vpop.xlane.xlu1 %1085  ;;  %v1101_v36 = vpop.xlane.xlu0 %1100 }
 0x5c7   :  { %11560 = vrcp.f32 %v1086_v63 }
 0x5ca   :  { %v1104_v19 = vpop.xlane.xlu1 %1103  ;;  %v1095_v0 = vpop.xlane.xlu0 %1094 }
 0x5cb   :  { %11562 = vrcp.f32 %v1104_v19 }
 0x5cc   :  { %11564 = vrcp.f32 %v1095_v0 }
 0x5cd   :  { %v11555_v53 = vpop.eup %11554  ;;  %11566 = vrcp.f32 %v1101_v36 }
 0x5ce   :  { %v1098_v25 = vpop.xlane.xlu1 %1097  ;;  %v11557_v41 = vpop.eup %11556  ;;  %v1148_v30 = vmul.f32 %v11555_v53, %v12791_v27 }
 0x5cf   :  { %11568 = vrcp.f32 %v1098_v25  ;;  %v11559_v58 = vpop.eup %11558  ;;  %v1145_v37 = vmul.f32 %v11557_v41, %v12787_v17 }
 0x5d0   :  { %v1147_v13 = vmul.f32 %v11559_v58, %v12781_v2 }
 0x5d1   :  { %v11561_v46 = vpop.eup %11560 }
 0x5d2   :  { %v1146_v43 = vmul.f32 %v11561_v46, %v12795_v61  ;;  %v1162_v26 = vpack.c.bf16 %v1148_v30, %v1147_v13  ;;  %v11457_v13 = vld [vmem:[%s16218_s3 + $0x18] sm:$0xff]  }
 0x5d4   :  { %v1161_v47 = vpack.c.bf16 %v1146_v43, %v1145_v37 }
 0x5d5   :  { %v11563_v10 = vpop.eup %11562 }
 0x5d6   :  { %10355 = vmatprep.mubr.msk.bf16.mxu1 %vm230_vm0, %v1161_v47  ;;  %v11565_v3 = vpop.eup %11564  ;;  %v1152_v27 = vmul.f32 %v11563_v10, %v12803_v5 }
 0x5d7   :  { %10356 = vmatmul.mubr.msk.bf16.vlgmr.msra.gmra.mrb[32].mxu1 %vm230_vm0, %v1162_v26  ;;  %v11567_v34 = vpop.eup %11566  ;;  %v1149_v61 = vmul.f32 %v11565_v3, %v12805_v20 }
 0x5d8   :  { %10364 = vmatpush3.bf16.msra.mxu1 %v12825_v39  ;;  %v1151_v29 = vmul.f32 %v11567_v34, %v12797_v14 }
 0x5d9   :  { %v11569_v54 = vpop.eup %11568  ;;  %10365 = vmatprep.subr.bf16.mxu1 %v1261_v15 }
 0x5da   :  { %v1113_v17 = vpop.xlane.xlu1 %1112  ;;  %v1150_v2 = vmul.f32 %v11569_v54, %v12811_v22  ;;  %v1164_v9 = vpack.c.bf16 %v1152_v27, %v1151_v29 }
 0x5dc   :  { %10366 = vmatpush3.bf16.msra.mxu1 %v1261_v15  ;;  %v1163_v60 = vpack.c.bf16 %v1150_v2, %v1149_v61 }
 0x5de   :  { %v1107_v63 = vpop.xlane.xlu1 %1106  ;;  %10359 = vmatprep.mubr.msk.bf16.mxu1 %vm230_vm0, %v1163_v60 }
 0x5df   :  { %10360 = vmatmul.mubr.msk.bf16.gmra.mrb[36].mxu1 %vm230_vm0, %v1164_v9  ;;  %11570 = vrcp.f32 %v1107_v63 }
 0x5e2   :  { %v1116_v39 = vpop.xlane.xlu1 %1115  ;;  %v1125_v14 = vpop.xlane.xlu0 %1124 }
 0x5e6   :  { %v1110_v36 = vpop.xlane.xlu1 %1109  ;;  %v1119_v15 = vpop.xlane.xlu0 %1118 }
 0x5e7   :  { %11572 = vrcp.f32 %v1110_v36 }
 0x5e8   :  { %11574 = vrcp.f32 %v1116_v39 }
 0x5e9   :  { %v11571_v5 = vpop.eup %11570  ;;  %11576 = vrcp.f32 %v1113_v17 }
 0x5ea   :  { %v1153_v20 = vmul.f32 %v11571_v5, %v12827_v48 }
 0x5f1   :  { %v11573_v19 = vpop.eup %11572 }
 0x5f2   :  { %v1154_v22 = vmul.f32 %v11573_v19, %v12840_v16  ;;  %v11575_v25 = vpop.eup %11574  ;;  %v11456_v16 = vld [vmem:[%s16218_s3 + $0x10] sm:$0xff]  }
 0x5f3   :  { %v11577_v46 = vpop.eup %11576  ;;  %v1156_v48 = vmul.f32 %v11575_v25, %v12832_v33 }
 0x5f4   :  { %v1165_v0 = vpack.c.bf16 %v1154_v22, %v1153_v20  ;;  %v1155_v37 = vmul.f32 %v11577_v46, %v12821_v56 }
 0x5f6   :  { %10371 = vmatprep.mubr.msk.bf16.mxu1 %vm230_vm0, %v1165_v0  ;;  %v1166_v43 = vpack.c.bf16 %v1156_v48, %v1155_v37 }
 0x615   :  { %v1128_v53 = vpop.xlane.xlu0 %1127 }
 0x616   :  { %11578 = vrcp.f32 %v1128_v53 }
 0x617   :  { %11580 = vrcp.f32 %v1119_v15 }
 0x618   :  { %11582 = vrcp.f32 %v1125_v14 }
 0x619   :  { %v1122_v41 = vpop.xlane.xlu1 %1121  ;;  %v1263_v58 = vpop.permute.xlu0 %1262 }
 0x61a   :  { %11584 = vrcp.f32 %v1122_v41  ;;  %10367 = vmatprep.subr.bf16.mxu1 %v1263_v58 }
 0x61b   :  { %10368 = vmatpush3.bf16.msra.mxu1 %v1263_v58 }
 0x61d   :  { %v1265_v30 = vpop.permute.xlu1 %1264 }
 0x61e   :  { %10369 = vmatprep.subr.bf16.mxu1 %v1265_v30 }
 0x61f   :  { %10370 = vmatpush3.bf16.msra.mxu1 %v1265_v30 }
 0x620   :  { %10397 = vmatprep.subr.bf16.mxu1 %v11456_v16  ;;  %v11579_v47 = vpop.eup %11578 }
 0x621   :  { %v11581_v26 = vpop.eup %11580  ;;  %v1160_v3 = vmul.f32 %v11579_v47, %v12850_v51  ;;  %v1355_v51 = vld [vmem:[%s16220_s4] sm:$0xf] }
 0x622   :  { %10372 = vmatmul.mubr.msk.bf16.vlgmr.msra.gmra.mrb[40].mxu1 %vm230_vm0, %v1166_v43  ;;  %v11583_v33 = vpop.eup %11582  ;;  %v1157_v56 = vmul.f32 %v11581_v26, %v12842_v24  ;;  %11351 = vmatprep.subr.msk.bf16.mxu0 %vm1380_vm3, %v1355_v51  ;;  %v1382_v24 = vsel %vm1380_vm3, %v1355_v51, 0 }
 0x623   :  { %10398 = vmatpush3.bf16.msra.mxu1 %v11456_v16  ;;  %v1159_v54 = vmul.f32 %v11583_v33, %v12834_v6  ;;  %10380 = vmatpush3.bf16.msra.mxu0 %v1382_v24 }
 0x624   :  { %v11585_v10 = vpop.eup %11584  ;;  %10399 = vmatprep.subr.bf16.mxu1 %v11457_v13 }
 0x625   :  { %v1158_v34 = vmul.f32 %v11585_v10, %v12854_v7  ;;  %v1168_v17 = vpack.c.bf16 %v1160_v3, %v1159_v54 }
 0x627   :  { %v1167_v27 = vpack.c.bf16 %v1158_v34, %v1157_v56  ;;  %10400 = vmatpush3.bf16.msra.mxu1 %v11457_v13 }
 0x629   :  { %10375 = vmatprep.mubr.msk.bf16.mxu1 %vm230_vm0, %v1167_v27 }
 0x62a   :  { %10376 = vmatmul.mubr.msk.bf16.gmra.mrb[44].mxu1 %vm230_vm0, %v1168_v17 }
 0x62b   :  { %10401 = vmatprep.mubr.msk.bf16.mxu1 %vm359_vm1, %v12597_v38 }
 0x632   :  { %10402 = vmatmul.mubr.msk.bf16.vlgmr.msra.gmra.mrb[48].mxu1 %vm359_vm1, %v12607_v4 }
 0x633   :  { %10405 = vmatprep.mubr.msk.bf16.mxu1 %vm359_vm1, %v12616_v23 }
 0x63a   :  { %10406 = vmatmul.mubr.msk.bf16.gmra.mrb[52].mxu1 %vm359_vm1, %v12626_v50 }
 0x63b   :  { %10409 = vmatprep.mubr.msk.bf16.mxu1 %vm359_vm1, %v12636_v12 }
 0x642   :  { %10410 = vmatmul.mubr.msk.bf16.gmra.mrb[56].mxu1 %vm359_vm1, %v12646_v57 }
 0x643   :  { %10413 = vmatprep.mubr.msk.bf16.mxu1 %vm359_vm1, %v12656_v49 }
 0x64a   :  { %10414 = vmatmul.mubr.msk.bf16.gmra.mrb[60].mxu1 %vm359_vm1, %v12666_v59 }
 0x6aa   :  { %v10357_v6 = vpop.f32.mrb[32].mxu1 }
 0x6ab   :  { %v1227_v7 = vpop.f32.mrb[33].mxu1 }
 0x6ac   :  { %v10358_v61 = vpop.f32.mrb[34].mxu1 }
 0x6ad   :  { %v1348_v2 = vpack.c.bf16 %v10358_v61, %v10357_v6  ;;  %v1230_v29 = vpop.f32.mrb[35].mxu1 }
 0x6ae   :  { %v1347_v60 = vpack.c.bf16 %v1230_v29, %v1227_v7 }
 0x6b0   :  { %10381 = vmatprep.mubr.msk.bf16.mxu0 %vm794_vm2, %v1347_v60 }
 0x6b1   :  { %10382 = vmatmul.mubr.msk.bf16.vlgmr.msra.gmra.mrb[32].mxu0 %vm794_vm2, %v1348_v2 }
 0x6b2   :  { %v10361_v9 = vpop.f32.mrb[36].mxu1 }
 0x6b3   :  { %v1243_v63 = vpop.f32.mrb[37].mxu1 }
 0x6b4   :  { %v10362_v39 = vpop.f32.mrb[38].mxu1 }
 0x6b5   :  { %v1350_v36 = vpack.c.bf16 %v10362_v39, %v10361_v9  ;;  %v1246_v5 = vpop.f32.mrb[39].mxu1 }
 0x6b6   :  { %v1349_v19 = vpack.c.bf16 %v1246_v5, %v1243_v63 }
 0x6b8   :  { %10385 = vmatprep.mubr.msk.bf16.mxu0 %vm794_vm2, %v1349_v19 }
 0x6b9   :  { %10386 = vmatmul.mubr.msk.bf16.gmra.mrb[36].mxu0 %vm794_vm2, %v1350_v36 }
 0x6f5   :  { %v10373_v20 = vpop.f32.mrb[40].mxu1 }
 0x6f6   :  { %v1316_v22 = vpop.f32.mrb[41].mxu1 }
 0x6f7   :  { %v10374_v0 = vpop.f32.mrb[42].mxu1 }
 0x6f8   :  { %v1352_v14 = vpack.c.bf16 %v10374_v0, %v10373_v20  ;;  %v1319_v15 = vpop.f32.mrb[43].mxu1 }
 0x6f9   :  { %v1351_v53 = vpack.c.bf16 %v1319_v15, %v1316_v22 }
 0x6fb   :  { %10389 = vmatprep.mubr.msk.bf16.mxu0 %vm794_vm2, %v1351_v53 }
 0x6fc   :  { %10390 = vmatmul.mubr.msk.bf16.gmra.mrb[40].mxu0 %vm794_vm2, %v1352_v14 }
 0x6fd   :  { %v10377_v25 = vpop.f32.mrb[44].mxu1 }
 0x6fe   :  { %v1332_v41 = vpop.f32.mrb[45].mxu1 }
 0x6ff   :  { %v10378_v58 = vpop.f32.mrb[46].mxu1 }
 0x700   :  { %v1354_v46 = vpack.c.bf16 %v10378_v58, %v10377_v25  ;;  %v1335_v48 = vpop.f32.mrb[47].mxu1 }
 0x701   :  { %v1353_v16 = vpack.c.bf16 %v1335_v48, %v1332_v41 }
 0x703   :  { %10393 = vmatprep.mubr.msk.bf16.mxu0 %vm794_vm2, %v1353_v16 }
 0x704   :  { %10394 = vmatmul.mubr.msk.bf16.gmra.mrb[44].mxu0 %vm794_vm2, %v1354_v46 }
 0x705   :  { %v10403_v30 = vpop.f32.mrb[48].mxu1 }
 0x706   :  { %v1548_v37 = vpop.f32.mrb[49].mxu1 }
 0x707   :  { %v10404_v43 = vpop.f32.mrb[50].mxu1 }
 0x708   :  { %v1612_v13 = vpack.c.bf16 %v10404_v43, %v10403_v30  ;;  %v1551_v47 = vpop.f32.mrb[51].mxu1 }
 0x709   :  { %v1611_v26 = vpack.c.bf16 %v1551_v47, %v1548_v37 }
 0x70a   :  { %1625 = vrot.lane.b32.xlu1 %v1612_v13, %s12227_s29 }
 0x70b   :  { %1623 = vrot.lane.b32.xlu0 %v1611_v26, %s12227_s29  ;;  %10425 = vmatprep.mubr.msk.bf16.mxu0 %vm794_vm2, %v1611_v26 }
 0x70d   :  { %v10407_v33 = vpop.f32.mrb[52].mxu1 }
 0x70e   :  { %v1564_v10 = vpop.f32.mrb[53].mxu1 }
 0x70f   :  { %v10408_v3 = vpop.f32.mrb[54].mxu1 }
 0x710   :  { %v12925_v56 = vpack.c.bf16 %v10408_v3, %v10407_v33  ;;  %v1567_v34 = vpop.f32.mrb[55].mxu1 }
 0x711   :  { %v1613_v54 = vpack.c.bf16 %v1567_v34, %v1564_v10 }
 0x713   :  { %1627 = vrot.lane.b32.xlu0 %v1613_v54, %s12227_s29 }
 0x715   :  { %v10411_v27 = vpop.f32.mrb[56].mxu1 }
 0x716   :  { %v1580_v17 = vpop.f32.mrb[57].mxu1 }
 0x717   :  { %1629 = vrot.lane.b32.xlu0 %v12925_v56, %s12227_s29  ;;  %v10412_v51 = vpop.f32.mrb[58].mxu1 }
 0x718   :  { %v12930_v24 = vpack.c.bf16 %v10412_v51, %v10411_v27  ;;  %v1583_v6 = vpop.f32.mrb[59].mxu1 }
 0x719   :  { %v12932_v7 = vpack.c.bf16 %v1583_v6, %v1580_v17 }
 0x71b   :  { %1724 = vrot.lane.b32.xlu1 %v12932_v7, %s12227_s29  ;;  %10441 = vmatprep.mubr.msk.bf16.mxu1 %vm794_vm2, %v12932_v7 }
 0x71d   :  { %v10415_v61 = vpop.f32.mrb[60].mxu1 }
 0x71e   :  { %v1596_v2 = vpop.f32.mrb[61].mxu1 }
 0x71f   :  { %1726 = vrot.lane.b32.xlu1 %v12930_v24, %s12227_s29  ;;  %v10416_v29 = vpop.f32.mrb[62].mxu1 }
 0x720   :  { %v12940_v60 = vpack.c.bf16 %v10416_v29, %v10415_v61  ;;  %v1599_v9 = vpop.f32.mrb[63].mxu1 }
 0x721   :  { %v12942_v63 = vpack.c.bf16 %v1599_v9, %v1596_v2 }
 0x723   :  { %1730 = vrot.lane.b32.xlu1 %v12940_v60, %s12227_s29  ;;  %1728 = vrot.lane.b32.xlu0 %v12942_v63, %s12227_s29 }
 0x727   :  { %2007 = vrot.lane.b32.xlu1 %v1612_v13, %s12228_s30  ;;  %2005 = vrot.lane.b32.xlu0 %v1611_v26, %s12228_s30 }
 0x72b   :  { %2009 = vrot.lane.b32.xlu0 %v1613_v54, %s12228_s30 }
 0x77c   :  { %v1626_v5 = vpop.permute.xlu1 %1625 }
 0x77d   :  { %v1624_v39 = vpop.permute.xlu0 %1623  ;;  %v1647_v19 = vsel %vm794_vm2, %v1626_v5, 0 }
 0x77e   :  { %11352 = vmatprep.subr.msk.bf16.mxu0 %vm794_vm2, %v1624_v39  ;;  %v1644_v36 = vsel %vm794_vm2, %v1624_v39, 0 }
 0x77f   :  { %10418 = vmatpush3.bf16.xpose.msra.mxu0 %v1644_v36 }
 0x780   :  { %11353 = vmatprep.subr.msk.bf16.mxu0 %vm794_vm2, %v1626_v5 }
 0x785   :  { %v1628_v20 = vpop.permute.xlu0 %1627 }
 0x786   :  { %v1650_v0 = vsel %vm794_vm2, %v1628_v20, 0 }
 0x787   :  { %10420 = vmatpush3.bf16.xpose.msra.mxu0 %v1647_v19 }
 0x788   :  { %11354 = vmatprep.subr.msk.bf16.mxu0 %vm794_vm2, %v1628_v20 }
 0x789   :  { %v1630_v15 = vpop.permute.xlu0 %1629 }
 0x78a   :  { %v1653_v25 = vsel %vm794_vm2, %v1630_v15, 0 }
 0x78d   :  { %v1725_v22 = vpop.permute.xlu1 %1724 }
 0x78e   :  { %11356 = vmatprep.subr.msk.bf16.mxu1 %vm794_vm2, %v1725_v22  ;;  %v1745_v14 = vsel %vm794_vm2, %v1725_v22, 0 }
 0x78f   :  { %10422 = vmatpush3.bf16.xpose.msra.mxu0 %v1650_v0  ;;  %10434 = vmatpush3.bf16.xpose.msra.mxu1 %v1745_v14 }
 0x790   :  { %11355 = vmatprep.subr.msk.bf16.mxu0 %vm794_vm2, %v1630_v15 }
 0x791   :  { %v1727_v53 = vpop.permute.xlu1 %1726 }
 0x792   :  { %11357 = vmatprep.subr.msk.bf16.mxu1 %vm794_vm2, %v1727_v53  ;;  %v1748_v41 = vsel %vm794_vm2, %v1727_v53, 0 }
 0x795   :  { %v1729_v58 = vpop.permute.xlu0 %1728  ;;  %v1731_v48 = vpop.permute.xlu1 %1730 }
 0x796   :  { %v1751_v46 = vsel %vm794_vm2, %v1729_v58, 0  ;;  %v1754_v16 = vsel %vm794_vm2, %v1731_v48, 0 }
 0x797   :  { %10424 = vmatpush3.bf16.xpose.msra.mxu0 %v1653_v25  ;;  %10436 = vmatpush3.bf16.xpose.msra.mxu1 %v1748_v41 }
 0x798   :  { %11358 = vmatprep.subr.msk.bf16.mxu1 %vm794_vm2, %v1729_v58 }
 0x799   :  { %v2006_v30 = vpop.permute.xlu0 %2005  ;;  %v2008_v37 = vpop.permute.xlu1 %2007 }
 0x79d   :  { %v2010_v43 = vpop.permute.xlu0 %2009 }
 0x79e   :  { %10426 = vmatmul.mubr.msk.bf16.vlgmr.msra.gmra.mrb[48].mxu0 %vm794_vm2, %v1612_v13 }
 0x79f   :  { %10429 = vmatprep.mubr.msk.bf16.mxu0 %vm794_vm2, %v1613_v54  ;;  %10438 = vmatpush3.bf16.xpose.msra.mxu1 %v1751_v46 }
 0x7a0   :  { %11359 = vmatprep.subr.msk.bf16.mxu1 %vm794_vm2, %v1731_v48 }
 0x7a6   :  { %10430 = vmatmul.mubr.msk.bf16.gmra.mrb[52].mxu0 %vm794_vm2, %v12925_v56 }
 0x7a7   :  { %10440 = vmatpush3.bf16.xpose.msra.mxu1 %v1754_v16 }
 0x7a8   :  { %10449 = vmatprep.subr.bf16.mxu1 %v2006_v30 }
 0x7ae   :  { %10442 = vmatmul.mubr.msk.bf16.vlgmr.msra.gmra.mrb[64].mxu1 %vm794_vm2, %v12930_v24 }
 0x7af   :  { %10445 = vmatprep.mubr.msk.bf16.mxu1 %vm794_vm2, %v12942_v63  ;;  %10450 = vmatpush3.bf16.msra.mxu1 %v2006_v30 }
 0x7b0   :  { %10451 = vmatprep.subr.bf16.mxu1 %v2008_v37 }
 0x7b3   :  { %10452 = vmatpush3.bf16.msra.mxu1 %v2008_v37 }
 0x7b4   :  { %10453 = vmatprep.subr.bf16.mxu1 %v2010_v43 }
 0x7b6   :  { %10446 = vmatmul.mubr.msk.bf16.gmra.mrb[68].mxu1 %vm794_vm2, %v12940_v60 }
 0x7b7   :  { %10454 = vmatpush3.bf16.msra.mxu1 %v2010_v43 }
 0x871   :  { %v10427_v13 = vpop.f32.mrb[48].mxu0 }
 0x872   :  { %v1689_v47 = vpop.f32.mrb[49].mxu0  ;;  %v1827_v26 = vsel %vm230_vm0, %v10427_v13, -inf }
 0x873   :  { %1828 = vmax.xlane.f32.xlu0 %v1827_v26  ;;  %v10428_v33 = vpop.f32.mrb[50].mxu0  ;;  %v1821_v34 = vsel %vm230_vm0, %v1689_v47, -inf }
 0x874   :  { %v1692_v10 = vpop.f32.mrb[51].mxu0  ;;  %v1830_v17 = vsel %vm230_vm0, %v10428_v33, -inf }
 0x875   :  { %v1824_v3 = vsel %vm230_vm0, %v1692_v10, -inf }
 0x876   :  { %1825 = vmax.xlane.f32.xlu1 %v1824_v3 }
 0x877   :  { %1822 = vmax.xlane.f32.xlu0 %v1821_v34 }
 0x879   :  { %v12980_v54 = vpop.f32.mrb[52].mxu0 }
 0x87a   :  { %v12982_v27 = vpop.f32.mrb[53].mxu0  ;;  %v1839_v2 = vsel %vm230_vm0, %v12980_v54, -inf }
 0x87b   :  { %1831 = vmax.xlane.f32.xlu0 %v1830_v17  ;;  %v10432_v51 = vpop.f32.mrb[54].mxu0  ;;  %v1833_v36 = vsel %vm230_vm0, %v12982_v27, -inf }
 0x87c   :  { %v12985_v6 = vpop.f32.mrb[55].mxu0  ;;  %v1842_v61 = vsel %vm230_vm0, %v10432_v51, -inf }
 0x87d   :  { %1843 = vmax.xlane.f32.xlu1 %v1842_v61  ;;  %v1836_v29 = vsel %vm230_vm0, %v12985_v6, -inf }
 0x87f   :  { %1840 = vmax.xlane.f32.xlu0 %v1839_v2 }
 0x881   :  { %v12992_v9 = vpop.f32.mrb[64].mxu1  ;;  %1837 = vmax.xlane.f32.xlu1 %v1836_v29 }
 0x882   :  { %v12994_v39 = vpop.f32.mrb[65].mxu1  ;;  %v1851_v22 = vsel %vm230_vm0, %v12992_v9, -inf }
 0x883   :  { %v12998_v5 = vpop.f32.mrb[66].mxu1  ;;  %1834 = vmax.xlane.f32.xlu0 %v1833_v36  ;;  %v1845_v53 = vsel %vm230_vm0, %v12994_v39, -inf }
 0x884   :  { %v13000_v19 = vpop.f32.mrb[67].mxu1  ;;  %v1854_v20 = vsel %vm230_vm0, %v12998_v5, -inf }
 0x885   :  { %1855 = vmax.xlane.f32.xlu1 %v1854_v20  ;;  %v1848_v0 = vsel %vm230_vm0, %v13000_v19, -inf }
 0x887   :  { %1852 = vmax.xlane.f32.xlu0 %v1851_v22 }
 0x889   :  { %v13008_v14 = vpop.f32.mrb[68].mxu1  ;;  %1849 = vmax.xlane.f32.xlu1 %v1848_v0 }
 0x88a   :  { %v13010_v15 = vpop.f32.mrb[69].mxu1  ;;  %v1863_v58 = vsel %vm230_vm0, %v13008_v14, -inf }
 0x88b   :  { %v13014_v25 = vpop.f32.mrb[70].mxu1  ;;  %1846 = vmax.xlane.f32.xlu0 %v1845_v53  ;;  %v1857_v46 = vsel %vm230_vm0, %v13010_v15, -inf }
 0x88c   :  { %v13016_v41 = vpop.f32.mrb[71].mxu1  ;;  %v1866_v48 = vsel %vm230_vm0, %v13014_v25, -inf }
 0x88d   :  { %v1860_v16 = vsel %vm230_vm0, %v13016_v41, -inf }
 0x88f   :  { %1864 = vmax.xlane.f32.xlu0 %v1863_v58 }
 0x893   :  { %1858 = vmax.xlane.f32.xlu0 %v1857_v46 }
 0x89a   :  { %2094 = vrot.lane.b32.xlu1 %v12932_v7, %s12228_s30 }
 0x8a9   :  { %2011 = vrot.lane.b32.xlu0 %v12925_v56, %s12228_s30 }
 0x8be   :  { %1867 = vmax.xlane.f32.xlu1 %v1866_v48 }
 0x8c2   :  { %1861 = vmax.xlane.f32.xlu1 %v1860_v16 }
 0x8d3   :  { %2096 = vrot.lane.b32.xlu1 %v12930_v24, %s12228_s30 }
 0x900   :  { %v1829_v30 = vpop.xlane.xlu0 %1828 }
 0x901   :  { %v1871_v37 = vsub.f32 %v10427_v13, %v1829_v30 }
 0x903   :  { %v1889_v43 = vmul.f32 1.442695, %v1871_v37  ;;  %v1826_v26 = vpop.xlane.xlu1 %1825 }
 0x904   :  { %v1823_v3 = vpop.xlane.xlu0 %1822  ;;  %v1870_v34 = vsub.f32 %v1692_v10, %v1826_v26 }
 0x905   :  { %11586 = vpow2.f32 %v1889_v43  ;;  %v1869_v7 = vsub.f32 %v1689_v47, %v1823_v3 }
 0x906   :  { %v1887_v29 = vmul.f32 1.442695, %v1870_v34 }
 0x907   :  { %v1885_v56 = vmul.f32 1.442695, %v1869_v7 }
 0x908   :  { %v1832_v17 = vpop.xlane.xlu0 %1831 }
 0x909   :  { %11588 = vpow2.f32 %v1885_v56  ;;  %v1872_v61 = vsub.f32 %v10428_v33, %v1832_v17 }
 0x90a   :  { %v1844_v2 = vpop.xlane.xlu1 %1843 }
 0x90b   :  { %v1891_v36 = vmul.f32 1.442695, %v1872_v61  ;;  %v1876_v20 = vsub.f32 %v10432_v51, %v1844_v2 }
 0x90c   :  { %v1841_v22 = vpop.xlane.xlu0 %1840 }
 0x90d   :  { %11590 = vpow2.f32 %v1891_v36  ;;  %v1875_v24 = vsub.f32 %v12980_v54, %v1841_v22  ;;  %v1899_v53 = vmul.f32 1.442695, %v1876_v20 }
 0x90e   :  { %v1838_v0 = vpop.xlane.xlu1 %1837  ;;  %11592 = vpow2.f32 %v1887_v29 }
 0x90f   :  { %v13033_v13 = vpop.eup %11586  ;;  %v1897_v58 = vmul.f32 1.442695, %v1875_v24  ;;  %v1874_v47 = vsub.f32 %v12985_v6, %v1838_v0 }
 0x910   :  { %v1835_v10 = vpop.xlane.xlu0 %1834  ;;  %v1923_v33 = vsel %vm230_vm0, %v13033_v13, 0.0 }
 0x911   :  { %11594 = vpow2.f32 %v1897_v58  ;;  %v1873_v46 = vsub.f32 %v12982_v27, %v1835_v10  ;;  %1924 = vadd.xlane.f32.xlu0 %v1923_v33  ;;  %v1895_v54 = vmul.f32 1.442695, %v1874_v47 }
 0x912   :  { %11596 = vpow2.f32 %v1899_v53  ;;  %v1856_v37 = vpop.xlane.xlu1 %1855 }
 0x913   :  { %v13039_v51 = vpop.eup %11588  ;;  %v1893_v48 = vmul.f32 1.442695, %v1873_v46  ;;  %v1880_v17 = vsub.f32 %v12998_v5, %v1856_v37 }
 0x914   :  { %v1853_v16 = vpop.xlane.xlu0 %1852  ;;  %v1917_v30 = vsel %vm230_vm0, %v13039_v51, 0.0 }
 0x915   :  { %11598 = vpow2.f32 %v1893_v48  ;;  %v1879_v6 = vsub.f32 %v12992_v9, %v1853_v16  ;;  %1918 = vadd.xlane.f32.xlu0 %v1917_v30  ;;  %v1907_v24 = vmul.f32 1.442695, %v1880_v17 }
 0x916   :  { %11600 = vpow2.f32 %v1895_v54  ;;  %v1850_v61 = vpop.xlane.xlu1 %1849 }
 0x917   :  { %v13044_v43 = vpop.eup %11590  ;;  %v1905_v26 = vmul.f32 1.442695, %v1879_v6  ;;  %v1878_v5 = vsub.f32 %v13000_v19, %v1850_v61 }
 0x918   :  { %v1847_v27 = vpop.xlane.xlu0 %1846  ;;  %v1926_v3 = vsel %vm230_vm0, %v13044_v43, 0.0  ;;  %v13048_v7 = vpop.eup %11592 }
 0x919   :  { %v1877_v34 = vsub.f32 %v12994_v39, %v1847_v27  ;;  %1927 = vadd.xlane.f32.xlu1 %v1926_v3  ;;  %11602 = vpow2.f32 %v1905_v26  ;;  %v1920_v36 = vsel %vm230_vm0, %v13048_v7, 0.0  ;;  %v1903_v33 = vmul.f32 1.442695, %v1878_v5 }
 0x91a   :  { %v13075_v16 = vpop.permute.xlu1 %2094 }
 0x91b   :  { %v13051_v56 = vpop.eup %11594  ;;  %v1901_v9 = vmul.f32 1.442695, %v1877_v34 }
 0x91c   :  { %v1865_v2 = vpop.xlane.xlu0 %1864  ;;  %v1935_v29 = vsel %vm230_vm0, %v13051_v56, 0.0  ;;  %v13058_v20 = vpop.eup %11596 }
 0x91d   :  { %v1883_v22 = vsub.f32 %v13008_v14, %v1865_v2  ;;  %1936 = vadd.xlane.f32.xlu0 %v1935_v29  ;;  %1921 = vadd.xlane.f32.xlu1 %v1920_v36  ;;  %11604 = vpow2.f32 %v1901_v9  ;;  %v1938_v47 = vsel %vm230_vm0, %v13058_v20, 0.0 }
 0x91f   :  { %v13061_v39 = vpop.eup %11598  ;;  %v1913_v0 = vmul.f32 1.442695, %v1883_v22 }
 0x920   :  { %v1859_v53 = vpop.xlane.xlu0 %1858  ;;  %v1929_v58 = vsel %vm230_vm0, %v13061_v39, 0.0  ;;  %v13068_v10 = vpop.eup %11600 }
 0x921   :  { %11606 = vpow2.f32 %v1913_v0  ;;  %v1881_v14 = vsub.f32 %v13010_v15, %v1859_v53  ;;  %1930 = vadd.xlane.f32.xlu0 %v1929_v58  ;;  %1939 = vadd.xlane.f32.xlu1 %v1938_v47  ;;  %v1932_v54 = vsel %vm230_vm0, %v13068_v10, 0.0 }
 0x922   :  { %11608 = vpow2.f32 %v1907_v24 }
 0x923   :  { %v1909_v46 = vmul.f32 1.442695, %v1881_v14  ;;  %v13073_v48 = vpop.eup %11602 }
 0x924   :  { %v2012_v19 = vpop.permute.xlu0 %2011  ;;  %v1947_v15 = vsel %vm230_vm0, %v13073_v48, 0.0 }
 0x925   :  { %11610 = vpow2.f32 %v1909_v46  ;;  %10455 = vmatprep.subr.bf16.mxu1 %v2012_v19  ;;  %1933 = vadd.xlane.f32.xlu1 %v1932_v54 }
 0x926   :  { %10456 = vmatpush3.bf16.msra.mxu1 %v2012_v19  ;;  %11612 = vpow2.f32 %v1903_v33 }
 0x927   :  { %10465 = vmatprep.subr.bf16.mxu1 %v13075_v16  ;;  %v13080_v30 = vpop.eup %11604 }
 0x928   :  { %v1941_v26 = vsel %vm230_vm0, %v13080_v30, 0.0 }
 0x929   :  { %1948 = vadd.xlane.f32.xlu1 %v1947_v15 }
 0x92b   :  { %v13082_v6 = vpop.eup %11606 }
 0x92c   :  { %v1959_v37 = vsel %vm230_vm0, %v13082_v6, 0.0  ;;  %v13088_v27 = vpop.eup %11608 }
 0x92d   :  { %1960 = vadd.xlane.f32.xlu0 %v1959_v37  ;;  %1942 = vadd.xlane.f32.xlu1 %v1941_v26  ;;  %v1950_v17 = vsel %vm230_vm0, %v13088_v27, 0.0 }
 0x92f   :  { %v13090_v3 = vpop.eup %11610 }
 0x930   :  { %v1953_v34 = vsel %vm230_vm0, %v13090_v3, 0.0  ;;  %v13096_v9 = vpop.eup %11612 }
 0x931   :  { %1954 = vadd.xlane.f32.xlu0 %v1953_v34  ;;  %1951 = vadd.xlane.f32.xlu1 %v1950_v17  ;;  %v1944_v61 = vsel %vm230_vm0, %v13096_v9, 0.0 }
 0x935   :  { %1945 = vadd.xlane.f32.xlu1 %v1944_v61 }
 0x94b   :  { %v1868_v2 = vpop.xlane.xlu1 %1867 }
 0x94c   :  { %v1884_v29 = vsub.f32 %v13014_v25, %v1868_v2 }
 0x94e   :  { %v1915_v36 = vmul.f32 1.442695, %v1884_v29 }
 0x94f   :  { %v1862_v22 = vpop.xlane.xlu1 %1861 }
 0x950   :  { %11614 = vpow2.f32 %v1915_v36  ;;  %v1882_v24 = vsub.f32 %v13016_v41, %v1862_v22 }
 0x952   :  { %v1911_v5 = vmul.f32 1.442695, %v1882_v24 }
 0x953   :  { %v2097_v41 = vpop.permute.xlu1 %2096 }
 0x954   :  { %11616 = vpow2.f32 %v1911_v5 }
 0x95a   :  { %v13102_v0 = vpop.eup %11614 }
 0x95b   :  { %v1962_v53 = vsel %vm230_vm0, %v13102_v0, 0.0 }
 0x95c   :  { %1963 = vadd.xlane.f32.xlu0 %v1962_v53 }
 0x95e   :  { %v13106_v58 = vpop.eup %11616 }
 0x95f   :  { %v1956_v47 = vsel %vm230_vm0, %v13106_v58, 0.0 }
 0x960   :  { %1957 = vadd.xlane.f32.xlu1 %v1956_v47 }
 0x971   :  { %2100 = vrot.lane.b32.xlu1 %v12940_v60, %s12228_s30 }
 0x972   :  { %2098 = vrot.lane.b32.xlu0 %v12942_v63, %s12228_s30 }
 0x99e   :  { %v1925_v25 = vpop.xlane.xlu0 %1924 }
 0x9a2   :  { %v1919_v14 = vpop.xlane.xlu0 %1918 }
 0x9a6   :  { %v1928_v33 = vpop.xlane.xlu1 %1927 }
 0x9a7   :  { %11618 = vrcp.f32 %v1928_v33 }
 0x9a8   :  { %11620 = vrcp.f32 %v1919_v14 }
 0x9a9   :  { %11622 = vrcp.f32 %v1925_v25 }
 0x9aa   :  { %v1937_v46 = vpop.xlane.xlu0 %1936  ;;  %v1922_v19 = vpop.xlane.xlu1 %1921 }
 0x9ab   :  { %11624 = vrcp.f32 %v1922_v19 }
 0x9ae   :  { %v1931_v54 = vpop.xlane.xlu0 %1930  ;;  %v1940_v15 = vpop.xlane.xlu1 %1939 }
 0x9af   :  { %11626 = vrcp.f32 %v1931_v54 }
 0x9b0   :  { %11628 = vrcp.f32 %v1940_v15 }
 0x9b1   :  { %11630 = vrcp.f32 %v1937_v46  ;;  %v11619_v60 = vpop.eup %11618 }
 0x9b2   :  { %v1934_v37 = vpop.xlane.xlu1 %1933  ;;  %v11621_v26 = vpop.eup %11620  ;;  %v1984_v17 = vmul.f32 %v11619_v60, %v13044_v43 }
 0x9b3   :  { %11632 = vrcp.f32 %v1934_v37  ;;  %v11623_v63 = vpop.eup %11622  ;;  %v1981_v2 = vmul.f32 %v11621_v26, %v13039_v51 }
 0x9b4   :  { %v1983_v36 = vmul.f32 %v11623_v63, %v13033_v13 }
 0x9b5   :  { %v11625_v34 = vpop.eup %11624 }
 0x9b6   :  { %v1949_v61 = vpop.xlane.xlu1 %1948  ;;  %v1982_v29 = vmul.f32 %v11625_v34, %v13048_v7  ;;  %v1998_v5 = vpack.c.bf16 %v1984_v17, %v1983_v36 }
 0x9b8   :  { %v1997_v22 = vpack.c.bf16 %v1982_v29, %v1981_v2  ;;  %v11459_v29 = vld [vmem:[%s16218_s3 + $0x28] sm:$0xff]  }
 0x9b9   :  { %v11627_v24 = vpop.eup %11626 }
 0x9ba   :  { %v1943_v53 = vpop.xlane.xlu1 %1942  ;;  %v11629_v47 = vpop.eup %11628  ;;  %10457 = vmatprep.mubr.msk.bf16.mxu1 %vm230_vm0, %v1997_v22  ;;  %v1985_v51 = vmul.f32 %v11627_v24, %v13061_v39 }
 0x9bb   :  { %v11631_v25 = vpop.eup %11630  ;;  %10458 = vmatmul.mubr.msk.bf16.vlgmr.msra.gmra.mrb[72].mxu1 %vm230_vm0, %v1998_v5  ;;  %v1988_v13 = vmul.f32 %v11629_v47, %v13058_v20  ;;  %11634 = vrcp.f32 %v1943_v53  ;;  %v1961_v20 = vpop.xlane.xlu0 %1960 }
 0x9bc   :  { %10466 = vmatpush3.bf16.msra.mxu1 %v13075_v16  ;;  %v1987_v46 = vmul.f32 %v11631_v25, %v13051_v56 }
 0x9bd   :  { %v11633_v14 = vpop.eup %11632  ;;  %10467 = vmatprep.subr.bf16.mxu1 %v2097_v41 }
 0x9be   :  { %v1952_v43 = vpop.xlane.xlu1 %1951  ;;  %v1986_v7 = vmul.f32 %v11633_v14, %v13068_v10  ;;  %v2000_v54 = vpack.c.bf16 %v1988_v13, %v1987_v46 }
 0x9bf   :  { %v1955_v56 = vpop.xlane.xlu0 %1954 }
 0x9c0   :  { %v1999_v33 = vpack.c.bf16 %v1986_v7, %v1985_v51  ;;  %10468 = vmatpush3.bf16.msra.mxu1 %v2097_v41 }
 0x9c2   :  { %10461 = vmatprep.mubr.msk.bf16.mxu1 %vm230_vm0, %v1999_v33  ;;  %v1946_v19 = vpop.xlane.xlu1 %1945 }
 0x9c3   :  { %11636 = vrcp.f32 %v1946_v19  ;;  %10462 = vmatmul.mubr.msk.bf16.gmra.mrb[76].mxu1 %vm230_vm0, %v2000_v54 }
 0x9c4   :  { %11638 = vrcp.f32 %v1952_v43 }
 0x9c5   :  { %v11635_v16 = vpop.eup %11634  ;;  %11640 = vrcp.f32 %v1949_v61 }
 0x9c6   :  { %v1989_v39 = vmul.f32 %v11635_v16, %v13080_v30 }
 0x9cd   :  { %v11637_v15 = vpop.eup %11636 }
 0x9ce   :  { %v1990_v10 = vmul.f32 %v11637_v15, %v13096_v9  ;;  %v11639_v60 = vpop.eup %11638  ;;  %v11458_v9 = vld [vmem:[%s16218_s3 + $0x20] sm:$0xff]  }
 0x9cf   :  { %v11641_v34 = vpop.eup %11640  ;;  %v1992_v30 = vmul.f32 %v11639_v60, %v13088_v27 }
 0x9d0   :  { %v2001_v37 = vpack.c.bf16 %v1990_v10, %v1989_v39  ;;  %v1991_v61 = vmul.f32 %v11641_v34, %v13073_v48 }
 0x9d2   :  { %10473 = vmatprep.mubr.msk.bf16.mxu1 %vm230_vm0, %v2001_v37  ;;  %v2002_v2 = vpack.c.bf16 %v1992_v30, %v1991_v61 }
 0x9e9   :  { %v1964_v41 = vpop.xlane.xlu0 %1963 }
 0x9ea   :  { %11642 = vrcp.f32 %v1964_v41 }
 0x9eb   :  { %11644 = vrcp.f32 %v1955_v56 }
 0x9ec   :  { %11646 = vrcp.f32 %v1961_v20 }
 0x9ed   :  { %v2099_v26 = vpop.permute.xlu0 %2098  ;;  %v1958_v63 = vpop.xlane.xlu1 %1957 }
 0x9ee   :  { %11648 = vrcp.f32 %v1958_v63  ;;  %10469 = vmatprep.subr.bf16.mxu1 %v2099_v26 }
 0x9ef   :  { %10470 = vmatpush3.bf16.msra.mxu1 %v2099_v26 }
 0x9f1   :  { %v2101_v17 = vpop.permute.xlu1 %2100 }
 0x9f2   :  { %10471 = vmatprep.subr.bf16.mxu1 %v2101_v17 }
 0x9f3   :  { %10472 = vmatpush3.bf16.msra.mxu1 %v2101_v17 }
 0x9f4   :  { %10499 = vmatprep.subr.bf16.mxu1 %v11458_v9  ;;  %v11643_v36 = vpop.eup %11642 }
 0x9f5   :  { %v11645_v22 = vpop.eup %11644  ;;  %v1996_v5 = vmul.f32 %v11643_v36, %v13102_v0 }
 0x9f6   :  { %10474 = vmatmul.mubr.msk.bf16.vlgmr.msra.gmra.mrb[80].mxu1 %vm230_vm0, %v2002_v2  ;;  %v11647_v27 = vpop.eup %11646  ;;  %v1993_v48 = vmul.f32 %v11645_v22, %v13090_v3 }
 0x9f7   :  { %10500 = vmatpush3.bf16.msra.mxu1 %v11458_v9  ;;  %v1995_v47 = vmul.f32 %v11647_v27, %v13082_v6  ;;  %v9523_v6 = vld [vmem:[%s16220_s4 + $0x4] sm:$0xf] }
 0x9f8   :  { %v11649_v24 = vpop.eup %11648  ;;  %10501 = vmatprep.subr.bf16.mxu1 %v11459_v29  ;;  %11360 = vmatprep.subr.msk.bf16.mxu0 %vm1380_vm3, %v9523_v6  ;;  %v2218_v3 = vsel %vm1380_vm3, %v9523_v6, 0 }
 0x9f9   :  { %v1994_v53 = vmul.f32 %v11649_v24, %v13106_v58  ;;  %v2004_v14 = vpack.c.bf16 %v1996_v5, %v1995_v47  ;;  %10482 = vmatpush3.bf16.msra.mxu0 %v2218_v3 }
 0x9fb   :  { %v2003_v25 = vpack.c.bf16 %v1994_v53, %v1993_v48  ;;  %10502 = vmatpush3.bf16.msra.mxu1 %v11459_v29 }
 0x9fd   :  { %10477 = vmatprep.mubr.msk.bf16.mxu1 %vm230_vm0, %v2003_v25 }
 0x9fe   :  { %10478 = vmatmul.mubr.msk.bf16.gmra.mrb[84].mxu1 %vm230_vm0, %v2004_v14 }
 0x9ff   :  { %10503 = vmatprep.mubr.msk.bf16.mxu1 %vm359_vm1, %v12597_v38 }
 0xa06   :  { %10504 = vmatmul.mubr.msk.bf16.vlgmr.msra.gmra.mrb[88].mxu1 %vm359_vm1, %v12607_v4 }
 0xa07   :  { %10507 = vmatprep.mubr.msk.bf16.mxu1 %vm359_vm1, %v12616_v23 }
 0xa0e   :  { %10508 = vmatmul.mubr.msk.bf16.gmra.mrb[92].mxu1 %vm359_vm1, %v12626_v50 }
 0xa0f   :  { %10511 = vmatprep.mubr.msk.bf16.mxu1 %vm359_vm1, %v12636_v12 }
 0xa16   :  { %10512 = vmatmul.mubr.msk.bf16.gmra.mrb[96].mxu1 %vm359_vm1, %v12646_v57 }
 0xa17   :  { %10515 = vmatprep.mubr.msk.bf16.mxu1 %vm359_vm1, %v12656_v49 }
 0xa1e   :  { %10516 = vmatmul.mubr.msk.bf16.gmra.mrb[100].mxu1 %vm359_vm1, %v12666_v59 }
 0xa8e   :  { %v10459_v0 = vpop.f32.mrb[72].mxu1 }
 0xa8f   :  { %v2063_v58 = vpop.f32.mrb[73].mxu1 }
 0xa90   :  { %v10460_v43 = vpop.f32.mrb[74].mxu1 }
 0xa91   :  { %v2184_v51 = vpack.c.bf16 %v10460_v43, %v10459_v0  ;;  %v2066_v7 = vpop.f32.mrb[75].mxu1 }
 0xa92   :  { %v2183_v13 = vpack.c.bf16 %v2066_v7, %v2063_v58 }
 0xa94   :  { %10483 = vmatprep.mubr.msk.bf16.mxu0 %vm794_vm2, %v2183_v13 }
 0xa95   :  { %10484 = vmatmul.mubr.msk.bf16.vlgmr.msra.gmra.mrb[32].mxu0 %vm794_vm2, %v2184_v51 }
 0xa96   :  { %v10463_v33 = vpop.f32.mrb[76].mxu1 }
 0xa97   :  { %v2079_v46 = vpop.f32.mrb[77].mxu1 }
 0xa98   :  { %v10464_v19 = vpop.f32.mrb[78].mxu1 }
 0xa99   :  { %v2186_v54 = vpack.c.bf16 %v10464_v19, %v10463_v33  ;;  %v2082_v16 = vpop.f32.mrb[79].mxu1 }
 0xa9a   :  { %v2185_v15 = vpack.c.bf16 %v2082_v16, %v2079_v46 }
 0xa9c   :  { %10487 = vmatprep.mubr.msk.bf16.mxu0 %vm794_vm2, %v2185_v15 }
 0xa9d   :  { %10488 = vmatmul.mubr.msk.bf16.gmra.mrb[36].mxu0 %vm794_vm2, %v2186_v54 }
 0xac9   :  { %v10475_v39 = vpop.f32.mrb[80].mxu1 }
 0xaca   :  { %v2152_v10 = vpop.f32.mrb[81].mxu1 }
 0xacb   :  { %v10476_v37 = vpop.f32.mrb[82].mxu1 }
 0xacc   :  { %v2188_v20 = vpack.c.bf16 %v10476_v37, %v10475_v39  ;;  %v2155_v56 = vpop.f32.mrb[83].mxu1 }
 0xacd   :  { %v2187_v41 = vpack.c.bf16 %v2155_v56, %v2152_v10 }
 0xacf   :  { %10491 = vmatprep.mubr.msk.bf16.mxu0 %vm794_vm2, %v2187_v41 }
 0xad0   :  { %10492 = vmatmul.mubr.msk.bf16.gmra.mrb[40].mxu0 %vm794_vm2, %v2188_v20 }
 0xad1   :  { %v10479_v60 = vpop.f32.mrb[84].mxu1 }
 0xad2   :  { %v2168_v26 = vpop.f32.mrb[85].mxu1 }
 0xad3   :  { %v10480_v63 = vpop.f32.mrb[86].mxu1 }
 0xad4   :  { %v2190_v34 = vpack.c.bf16 %v10480_v63, %v10479_v60  ;;  %v2171_v30 = vpop.f32.mrb[87].mxu1 }
 0xad5   :  { %v2189_v9 = vpack.c.bf16 %v2171_v30, %v2168_v26 }
 0xad7   :  { %10495 = vmatprep.mubr.msk.bf16.mxu0 %vm794_vm2, %v2189_v9 }
 0xad8   :  { %10496 = vmatmul.mubr.msk.bf16.gmra.mrb[44].mxu0 %vm794_vm2, %v2190_v34 }
 0xad9   :  { %v10505_v17 = vpop.f32.mrb[88].mxu1 }
 0xada   :  { %v2384_v61 = vpop.f32.mrb[89].mxu1 }
 0xadb   :  { %v10506_v2 = vpop.f32.mrb[90].mxu1 }
 0xadc   :  { %v13174_v29 = vpack.c.bf16 %v10506_v2, %v10505_v17  ;;  %v2387_v36 = vpop.f32.mrb[91].mxu1 }
 0xadd   :  { %v13176_v22 = vpack.c.bf16 %v2387_v36, %v2384_v61 }
 0xadf   :  { %10527 = vmatprep.mubr.msk.bf16.mxu0 %vm794_vm2, %v13176_v22 }
 0xae1   :  { %v10509_v27 = vpop.f32.mrb[92].mxu1 }
 0xae2   :  { %v2400_v24 = vpop.f32.mrb[93].mxu1 }
 0xae3   :  { %v10510_v5 = vpop.f32.mrb[94].mxu1 }
 0xae4   :  { %v13180_v48 = vpack.c.bf16 %v10510_v5, %v10509_v27  ;;  %v2403_v53 = vpop.f32.mrb[95].mxu1 }
 0xae5   :  { %v13182_v47 = vpack.c.bf16 %v2403_v53, %v2400_v24 }
 0xae9   :  { %v10513_v25 = vpop.f32.mrb[96].mxu1 }
 0xaea   :  { %v2416_v14 = vpop.f32.mrb[97].mxu1 }
 0xaeb   :  { %v10514_v6 = vpop.f32.mrb[98].mxu1 }
 0xaec   :  { %v13184_v3 = vpack.c.bf16 %v10514_v6, %v10513_v25  ;;  %v2419_v0 = vpop.f32.mrb[99].mxu1 }
 0xaed   :  { %v13186_v58 = vpack.c.bf16 %v2419_v0, %v2416_v14 }
 0xaee   :  { %2562 = vrot.lane.b32.xlu1 %v13184_v3, %s12227_s29 }
 0xaef   :  { %2560 = vrot.lane.b32.xlu0 %v13186_v58, %s12227_s29  ;;  %10543 = vmatprep.mubr.msk.bf16.mxu1 %vm794_vm2, %v13186_v58 }
 0xaf1   :  { %v10517_v43 = vpop.f32.mrb[100].mxu1 }
 0xaf2   :  { %v2432_v51 = vpop.f32.mrb[101].mxu1 }
 0xaf3   :  { %v10518_v7 = vpop.f32.mrb[102].mxu1 }
 0xaf4   :  { %v13194_v13 = vpack.c.bf16 %v10518_v7, %v10517_v43  ;;  %v2435_v33 = vpop.f32.mrb[103].mxu1 }
 0xaf5   :  { %v13196_v46 = vpack.c.bf16 %v2435_v33, %v2432_v51 }
 0xaf6   :  { %2566 = vrot.lane.b32.xlu1 %v13194_v13, %s12227_s29 }
 0xaf7   :  { %2564 = vrot.lane.b32.xlu0 %v13196_v46, %s12227_s29 }
 0xafa   :  { %2461 = vrot.lane.b32.xlu1 %v13174_v29, %s12227_s29 }
 0xafb   :  { %2459 = vrot.lane.b32.xlu0 %v13176_v22, %s12227_s29 }
 0xafe   :  { %2465 = vrot.lane.b32.xlu1 %v13180_v48, %s12227_s29 }
 0xaff   :  { %2463 = vrot.lane.b32.xlu0 %v13182_v47, %s12227_s29 }
 0xb60   :  { %v2563_v16 = vpop.permute.xlu1 %2562 }
 0xb61   :  { %v2561_v19 = vpop.permute.xlu0 %2560  ;;  %v2584_v10 = vsel %vm794_vm2, %v2563_v16, 0 }
 0xb62   :  { %11365 = vmatprep.subr.msk.bf16.mxu1 %vm794_vm2, %v2561_v19  ;;  %v2581_v54 = vsel %vm794_vm2, %v2561_v19, 0 }
 0xb63   :  { %10536 = vmatpush3.bf16.xpose.msra.mxu1 %v2581_v54 }
 0xb64   :  { %11366 = vmatprep.subr.msk.bf16.mxu1 %vm794_vm2, %v2563_v16 }
 0xb68   :  { %v2567_v15 = vpop.permute.xlu1 %2566 }
 0xb69   :  { %v2565_v39 = vpop.permute.xlu0 %2564  ;;  %v2590_v63 = vsel %vm794_vm2, %v2567_v15, 0 }
 0xb6a   :  { %v2587_v41 = vsel %vm794_vm2, %v2565_v39, 0 }
 0xb6b   :  { %10538 = vmatpush3.bf16.xpose.msra.mxu1 %v2584_v10 }
 0xb6c   :  { %11367 = vmatprep.subr.msk.bf16.mxu1 %vm794_vm2, %v2565_v39  ;;  %v2462_v56 = vpop.permute.xlu1 %2461 }
 0xb6d   :  { %v2460_v37 = vpop.permute.xlu0 %2459  ;;  %v2483_v60 = vsel %vm794_vm2, %v2462_v56, 0 }
 0xb6e   :  { %11361 = vmatprep.subr.msk.bf16.mxu0 %vm794_vm2, %v2460_v37  ;;  %v2480_v20 = vsel %vm794_vm2, %v2460_v37, 0 }
 0xb6f   :  { %10520 = vmatpush3.bf16.xpose.msra.mxu0 %v2480_v20 }
 0xb70   :  { %11362 = vmatprep.subr.msk.bf16.mxu0 %vm794_vm2, %v2462_v56  ;;  %v2466_v30 = vpop.permute.xlu1 %2465 }
 0xb71   :  { %v2464_v26 = vpop.permute.xlu0 %2463  ;;  %v2489_v9 = vsel %vm794_vm2, %v2466_v30, 0 }
 0xb72   :  { %v2486_v34 = vsel %vm794_vm2, %v2464_v26, 0 }
 0xb73   :  { %10540 = vmatpush3.bf16.xpose.msra.mxu1 %v2587_v41 }
 0xb74   :  { %11368 = vmatprep.subr.msk.bf16.mxu1 %vm794_vm2, %v2567_v15 }
 0xb77   :  { %10522 = vmatpush3.bf16.xpose.msra.mxu0 %v2483_v60 }
 0xb78   :  { %11363 = vmatprep.subr.msk.bf16.mxu0 %vm794_vm2, %v2464_v26 }
 0xb7b   :  { %10542 = vmatpush3.bf16.xpose.msra.mxu1 %v2590_v63 }
 0xb7f   :  { %10524 = vmatpush3.bf16.xpose.msra.mxu0 %v2486_v34 }
 0xb80   :  { %11364 = vmatprep.subr.msk.bf16.mxu0 %vm794_vm2, %v2466_v30 }
 0xb82   :  { %10544 = vmatmul.mubr.msk.bf16.vlgmr.msra.gmra.mrb[104].mxu1 %vm794_vm2, %v13184_v3 }
 0xb83   :  { %10547 = vmatprep.mubr.msk.bf16.mxu1 %vm794_vm2, %v13196_v46 }
 0xb87   :  { %10526 = vmatpush3.bf16.xpose.msra.mxu0 %v2489_v9 }
 0xb8a   :  { %10548 = vmatmul.mubr.msk.bf16.gmra.mrb[108].mxu1 %vm794_vm2, %v13194_v13 }
 0xb8e   :  { %10528 = vmatmul.mubr.msk.bf16.vlgmr.msra.gmra.mrb[56].mxu0 %vm794_vm2, %v13174_v29 }
 0xb8f   :  { %10531 = vmatprep.mubr.msk.bf16.mxu0 %vm794_vm2, %v13182_v47 }
 0xb96   :  { %10532 = vmatmul.mubr.msk.bf16.gmra.mrb[60].mxu0 %vm794_vm2, %v13180_v48 }
 0xc55   :  { %v10545_v17 = vpop.f32.mrb[104].mxu1 }
 0xc56   :  { %v2626_v61 = vpop.f32.mrb[105].mxu1  ;;  %v2687_v2 = vsel %vm230_vm0, %v10545_v17, -inf }
 0xc57   :  { %2688 = vmax.xlane.f32.xlu0 %v2687_v2  ;;  %v10546_v36 = vpop.f32.mrb[106].mxu1  ;;  %v2681_v5 = vsel %vm230_vm0, %v2626_v61, -inf }
 0xc58   :  { %v2629_v27 = vpop.f32.mrb[107].mxu1  ;;  %v2690_v14 = vsel %vm230_vm0, %v10546_v36, -inf }
 0xc59   :  { %v2684_v24 = vsel %vm230_vm0, %v2629_v27, -inf }
 0xc5a   :  { %2685 = vmax.xlane.f32.xlu1 %v2684_v24 }
 0xc5b   :  { %2682 = vmax.xlane.f32.xlu0 %v2681_v5 }
 0xc5d   :  { %v13241_v53 = vpop.f32.mrb[108].mxu1 }
 0xc5e   :  { %v2642_v25 = vpop.f32.mrb[109].mxu1  ;;  %v2699_v16 = vsel %vm230_vm0, %v13241_v53, -inf }
 0xc5f   :  { %2691 = vmax.xlane.f32.xlu0 %v2690_v14  ;;  %v13244_v6 = vpop.f32.mrb[110].mxu1  ;;  %v2693_v7 = vsel %vm230_vm0, %v2642_v25, -inf }
 0xc60   :  { %v13246_v0 = vpop.f32.mrb[111].mxu1  ;;  %v2702_v26 = vsel %vm230_vm0, %v13244_v6, -inf }
 0xc61   :  { %v13248_v43 = vpop.f32.mrb[56].mxu0  ;;  %v2696_v34 = vsel %vm230_vm0, %v13246_v0, -inf }
 0xc62   :  { %v13250_v51 = vpop.f32.mrb[57].mxu0  ;;  %v2663_v60 = vsel %vm230_vm0, %v13248_v43, -inf }
 0xc63   :  { %2694 = vmax.xlane.f32.xlu0 %v2693_v7  ;;  %v13253_v33 = vpop.f32.mrb[58].mxu0  ;;  %v2657_v37 = vsel %vm230_vm0, %v13250_v51, -inf }
 0xc64   :  { %v13255_v19 = vpop.f32.mrb[59].mxu0  ;;  %v2666_v39 = vsel %vm230_vm0, %v13253_v33, -inf }
 0xc65   :  { %v2660_v54 = vsel %vm230_vm0, %v13255_v19, -inf }
 0xc66   :  { %2661 = vmax.xlane.f32.xlu1 %v2660_v54 }
 0xc67   :  { %2700 = vmax.xlane.f32.xlu0 %v2699_v16 }
 0xc69   :  { %v13261_v15 = vpop.f32.mrb[60].mxu0 }
 0xc6a   :  { %2667 = vmax.xlane.f32.xlu1 %v2666_v39  ;;  %v13265_v10 = vpop.f32.mrb[61].mxu0  ;;  %v2675_v30 = vsel %vm230_vm0, %v13261_v15, -inf }
 0xc6b   :  { %2658 = vmax.xlane.f32.xlu0 %v2657_v37  ;;  %v13269_v20 = vpop.f32.mrb[62].mxu0  ;;  %v2669_v63 = vsel %vm230_vm0, %v13265_v10, -inf }
 0xc6c   :  { %v13271_v56 = vpop.f32.mrb[63].mxu0  ;;  %v2678_v9 = vsel %vm230_vm0, %v13269_v20, -inf }
 0xc6d   :  { %v2672_v41 = vsel %vm230_vm0, %v13271_v56, -inf }
 0xc6e   :  { %2673 = vmax.xlane.f32.xlu1 %v2672_v41 }
 0xc6f   :  { %2664 = vmax.xlane.f32.xlu0 %v2663_v60 }
 0xc72   :  { %2703 = vmax.xlane.f32.xlu1 %v2702_v26 }
 0xc73   :  { %2670 = vmax.xlane.f32.xlu0 %v2669_v63 }
 0xc76   :  { %2697 = vmax.xlane.f32.xlu1 %v2696_v34 }
 0xc77   :  { %2676 = vmax.xlane.f32.xlu0 %v2675_v30 }
 0xc7a   :  { %2679 = vmax.xlane.f32.xlu1 %v2678_v9 }
 0xce4   :  { %v2689_v2 = vpop.xlane.xlu0 %2688 }
 0xce5   :  { %v2715_v24 = vsub.f32 %v10545_v17, %v2689_v2 }
 0xce7   :  { %v2741_v5 = vmul.f32 1.442695, %v2715_v24  ;;  %v2686_v14 = vpop.xlane.xlu1 %2685 }
 0xce8   :  { %v2683_v7 = vpop.xlane.xlu0 %2682  ;;  %v2714_v16 = vsub.f32 %v2629_v27, %v2686_v14 }
 0xce9   :  { %11650 = vpow2.f32 %v2741_v5  ;;  %v2713_v54 = vsub.f32 %v2626_v61, %v2683_v7 }
 0xcea   :  { %v2739_v60 = vmul.f32 1.442695, %v2714_v16 }
 0xceb   :  { %v2737_v39 = vmul.f32 1.442695, %v2713_v54 }
 0xcec   :  { %v2692_v37 = vpop.xlane.xlu0 %2691 }
 0xced   :  { %11652 = vpow2.f32 %v2737_v39  ;;  %v2716_v41 = vsub.f32 %v10546_v36, %v2692_v37 }
 0xcef   :  { %v2743_v26 = vmul.f32 1.442695, %v2716_v41 }
 0xcf0   :  { %v2695_v63 = vpop.xlane.xlu0 %2694 }
 0xcf1   :  { %11654 = vpow2.f32 %v2743_v26  ;;  %v2717_v30 = vsub.f32 %v2642_v25, %v2695_v63 }
 0xcf2   :  { %11656 = vpow2.f32 %v2739_v60 }
 0xcf3   :  { %v13287_v34 = vpop.eup %11650  ;;  %v2745_v27 = vmul.f32 1.442695, %v2717_v30  ;;  %v2662_v37 = vpop.xlane.xlu1 %2661 }
 0xcf4   :  { %v2701_v9 = vpop.xlane.xlu0 %2700  ;;  %v2783_v17 = vsel %vm230_vm0, %v13287_v34, 0.0 }
 0xcf5   :  { %v2719_v2 = vsub.f32 %v13241_v53, %v2701_v9  ;;  %2784 = vadd.xlane.f32.xlu0 %v2783_v17 }
 0xcf7   :  { %v13292_v61 = vpop.eup %11652  ;;  %v2749_v24 = vmul.f32 1.442695, %v2719_v2  ;;  %v2668_v41 = vpop.xlane.xlu1 %2667 }
 0xcf8   :  { %v2777_v36 = vsel %vm230_vm0, %v13292_v61, 0.0  ;;  %v2659_v63 = vpop.xlane.xlu0 %2658 }
 0xcf9   :  { %11658 = vpow2.f32 %v2749_v24  ;;  %2778 = vadd.xlane.f32.xlu0 %v2777_v36  ;;  %v2705_v17 = vsub.f32 %v13250_v51, %v2659_v63 }
 0xcfa   :  { %11660 = vpow2.f32 %v2745_v27 }
 0xcfb   :  { %v13296_v5 = vpop.eup %11654  ;;  %v2674_v60 = vpop.xlane.xlu1 %2673 }
 0xcfc   :  { %v2786_v25 = vsel %vm230_vm0, %v13296_v5, 0.0  ;;  %v13300_v14 = vpop.eup %11656  ;;  %v2665_v24 = vpop.xlane.xlu0 %2664 }
 0xcfd   :  { %2787 = vadd.xlane.f32.xlu1 %v2786_v25  ;;  %v2780_v53 = vsel %vm230_vm0, %v13300_v14, 0.0  ;;  %v2707_v36 = vsub.f32 %v13248_v43, %v2665_v24 }
 0xcff   :  { %v2704_v26 = vpop.xlane.xlu1 %2703 }
 0xd00   :  { %v2720_v30 = vsub.f32 %v13244_v6, %v2704_v26  ;;  %v2671_v25 = vpop.xlane.xlu0 %2670 }
 0xd01   :  { %2781 = vadd.xlane.f32.xlu1 %v2780_v53  ;;  %v2708_v53 = vsub.f32 %v13253_v33, %v2668_v41  ;;  %v2709_v6 = vsub.f32 %v13265_v10, %v2671_v25 }
 0xd02   :  { %v2751_v2 = vmul.f32 1.442695, %v2720_v30 }
 0xd03   :  { %v13304_v7 = vpop.eup %11658  ;;  %v2698_v9 = vpop.xlane.xlu1 %2697 }
 0xd04   :  { %v2795_v54 = vsel %vm230_vm0, %v13304_v7, 0.0  ;;  %v13308_v16 = vpop.eup %11660  ;;  %v2718_v27 = vsub.f32 %v13246_v0, %v2698_v9  ;;  %11662 = vpow2.f32 %v2751_v2  ;;  %v2677_v51 = vpop.xlane.xlu0 %2676  ;;  %v2729_v0 = vmul.f32 1.442695, %v2709_v6 }
 0xd05   :  { %2796 = vadd.xlane.f32.xlu0 %v2795_v54  ;;  %v2789_v39 = vsel %vm230_vm0, %v13308_v16, 0.0  ;;  %v2727_v54 = vmul.f32 1.442695, %v2708_v53  ;;  %v2711_v26 = vsub.f32 %v13261_v15, %v2677_v51  ;;  %v2710_v53 = vsub.f32 %v13271_v56, %v2674_v60 }
 0xd07   :  { %v2733_v33 = vmul.f32 1.442695, %v2711_v26 }
 0xd09   :  { %2790 = vadd.xlane.f32.xlu0 %v2789_v39 }
 0xd0e   :  { %v13324_v39 = vpop.eup %11662 }
 0xd0f   :  { %v2798_v63 = vsel %vm230_vm0, %v13324_v39, 0.0 }
 0xd12   :  { %2932 = vrot.lane.b32.xlu1 %v13184_v3, %s12228_s30  ;;  %v2721_v3 = vmul.f32 1.442695, %v2705_v17 }
 0xd14   :  { %11664 = vpow2.f32 %v2721_v3 }
 0xd16   :  { %2934 = vrot.lane.b32.xlu1 %v13196_v46, %s12228_s30  ;;  %v2747_v46 = vmul.f32 1.442695, %v2718_v27 }
 0xd18   :  { %11666 = vpow2.f32 %v2747_v46  ;;  %v2706_v46 = vsub.f32 %v13255_v19, %v2662_v37 }
 0xd1a   :  { %v2723_v25 = vmul.f32 1.442695, %v2706_v46 }
 0xd1e   :  { %v13327_v43 = vpop.eup %11664 }
 0xd1f   :  { %2930 = vrot.lane.b32.xlu0 %v13186_v58, %s12228_s30  ;;  %v2725_v58 = vmul.f32 1.442695, %v2707_v36  ;;  %v2753_v10 = vsel %vm230_vm0, %v13327_v43, 0.0 }
 0xd21   :  { %11668 = vpow2.f32 %v2725_v58  ;;  %v2680_v58 = vpop.xlane.xlu1 %2679 }
 0xd22   :  { %11670 = vpow2.f32 %v2727_v54  ;;  %v13331_v30 = vpop.eup %11666  ;;  %v2731_v54 = vmul.f32 1.442695, %v2710_v53  ;;  %v2712_v6 = vsub.f32 %v13269_v20, %v2680_v58 }
 0xd23   :  { %11672 = vpow2.f32 %v2729_v0  ;;  %v2792_v41 = vsel %vm230_vm0, %v13331_v30, 0.0 }
 0xd24   :  { %11674 = vpow2.f32 %v2733_v33  ;;  %v2735_v51 = vmul.f32 1.442695, %v2712_v6 }
 0xd25   :  { %11676 = vpow2.f32 %v2723_v25 }
 0xd26   :  { %11678 = vpow2.f32 %v2731_v54  ;;  %v11460_v54 = vld [vmem:[%s16218_s3 + $0x30] sm:$0xff]  }
 0xd27   :  { %11680 = vpow2.f32 %v2735_v51 }
 0xd2b   :  { %v13337_v9 = vpop.eup %11668 }
 0xd2c   :  { %v2759_v15 = vsel %vm230_vm0, %v13337_v9, 0.0  ;;  %v13341_v17 = vpop.eup %11670 }
 0xd2d   :  { %v2762_v2 = vsel %vm230_vm0, %v13341_v17, 0.0  ;;  %v13345_v27 = vpop.eup %11672 }
 0xd2e   :  { %v2765_v24 = vsel %vm230_vm0, %v13345_v27, 0.0  ;;  %v13349_v3 = vpop.eup %11674 }
 0xd2f   :  { %v2771_v36 = vsel %vm230_vm0, %v13349_v3, 0.0  ;;  %v13360_v0 = vpop.eup %11676 }
 0xd30   :  { %v13364_v19 = vpop.eup %11678 }
 0xd31   :  { %v2768_v56 = vsel %vm230_vm0, %v13364_v19, 0.0  ;;  %v13368_v37 = vpop.eup %11680 }
 0xd3a   :  { %2799 = vadd.xlane.f32.xlu1 %v2798_v63 }
 0xd3e   :  { %2754 = vadd.xlane.f32.xlu0 %v2753_v10  ;;  %2793 = vadd.xlane.f32.xlu1 %v2792_v41 }
 0xd42   :  { %2760 = vadd.xlane.f32.xlu0 %v2759_v15 }
 0xd46   :  { %2763 = vadd.xlane.f32.xlu0 %v2762_v2 }
 0xd4a   :  { %2766 = vadd.xlane.f32.xlu0 %v2765_v24 }
 0xd4e   :  { %2772 = vadd.xlane.f32.xlu0 %v2771_v36 }
 0xd4f   :  { %2936 = vrot.lane.b32.xlu1 %v13194_v13, %s12228_s30  ;;  %v2756_v13 = vsel %vm230_vm0, %v13360_v0, 0.0 }
 0xd64   :  { %2841 = vrot.lane.b32.xlu0 %v13176_v22, %s12228_s30  ;;  %v2774_v22 = vsel %vm230_vm0, %v13368_v37, 0.0 }
 0xd73   :  { %2757 = vadd.xlane.f32.xlu1 %v2756_v13 }
 0xd77   :  { %2769 = vadd.xlane.f32.xlu1 %v2768_v56 }
 0xd7b   :  { %2775 = vadd.xlane.f32.xlu1 %v2774_v22  ;;  %v11461_v22 = vld [vmem:[%s16218_s3 + $0x38] sm:$0xff]  }
 0xd82   :  { %v2785_v20 = vpop.xlane.xlu0 %2784 }
 0xd86   :  { %v2779_v60 = vpop.xlane.xlu0 %2778 }
 0xd87   :  { %11682 = vrcp.f32 %v2779_v60 }
 0xd8a   :  { %v2788_v26 = vpop.xlane.xlu1 %2787 }
 0xd8c   :  { %2843 = vrot.lane.b32.xlu1 %v13174_v29, %s12228_s30 }
 0xd8e   :  { %v2782_v63 = vpop.xlane.xlu1 %2781 }
 0xd8f   :  { %11684 = vrcp.f32 %v2782_v63 }
 0xd90   :  { %2845 = vrot.lane.b32.xlu1 %v13182_v47, %s12228_s30  ;;  %11686 = vrcp.f32 %v2788_v26 }
 0xd91   :  { %v11683_v41 = vpop.eup %11682  ;;  %11688 = vrcp.f32 %v2785_v20 }
 0xd92   :  { %v2797_v33 = vpop.xlane.xlu0 %2796  ;;  %v2933_v2 = vpop.permute.xlu1 %2932  ;;  %v2825_v36 = vmul.f32 %v11683_v41, %v13292_v61 }
 0xd94   :  { %2847 = vrot.lane.b32.xlu1 %v13180_v48, %s12228_s30 }
 0xd96   :  { %v2791_v10 = vpop.xlane.xlu0 %2790  ;;  %v2935_v47 = vpop.permute.xlu1 %2934 }
 0xd99   :  { %v11685_v15 = vpop.eup %11684 }
 0xd9a   :  { %v2931_v24 = vpop.permute.xlu0 %2930  ;;  %v2826_v46 = vmul.f32 %v11685_v15, %v13300_v14  ;;  %v11687_v25 = vpop.eup %11686 }
 0xd9b   :  { %10567 = vmatprep.subr.bf16.mxu1 %v2931_v24  ;;  %v11689_v14 = vpop.eup %11688  ;;  %v2828_v58 = vmul.f32 %v11687_v25, %v13296_v5 }
 0xd9c   :  { %10568 = vmatpush3.bf16.msra.mxu1 %v2931_v24  ;;  %v2837_v29 = vpack.c.bf16 %v2826_v46, %v2825_v36  ;;  %v2827_v13 = vmul.f32 %v11689_v14, %v13287_v34 }
 0xd9d   :  { %10569 = vmatprep.subr.bf16.mxu1 %v2933_v2 }
 0xd9e   :  { %10575 = vmatprep.mubr.msk.bf16.mxu1 %vm230_vm0, %v2837_v29  ;;  %v2838_v56 = vpack.c.bf16 %v2828_v58, %v2827_v13 }
 0xda0   :  { %10570 = vmatpush3.bf16.msra.mxu1 %v2933_v2 }
 0xda1   :  { %10571 = vmatprep.subr.bf16.mxu1 %v2935_v47 }
 0xda4   :  { %10572 = vmatpush3.bf16.msra.mxu1 %v2935_v47 }
 0xdc7   :  { %v2800_v48 = vpop.xlane.xlu1 %2799 }
 0xdc8   :  { %11690 = vrcp.f32 %v2800_v48 }
 0xdc9   :  { %11692 = vrcp.f32 %v2791_v10 }
 0xdca   :  { %11694 = vrcp.f32 %v2797_v33 }
 0xdcb   :  { %v2755_v53 = vpop.xlane.xlu0 %2754  ;;  %v2794_v61 = vpop.xlane.xlu1 %2793 }
 0xdcc   :  { %11696 = vrcp.f32 %v2794_v61 }
 0xdcd   :  { %11698 = vrcp.f32 %v2755_v53 }
 0xdcf   :  { %v2761_v6 = vpop.xlane.xlu0 %2760  ;;  %v2937_v51 = vpop.permute.xlu1 %2936 }
 0xdd0   :  { %10573 = vmatprep.subr.bf16.mxu1 %v2937_v51 }
 0xdd1   :  { %10574 = vmatpush3.bf16.msra.mxu1 %v2937_v51 }
 0xdd2   :  { %10601 = vmatprep.subr.bf16.mxu1 %v11460_v54  ;;  %v11691_v60 = vpop.eup %11690 }
 0xdd3   :  { %v2764_v20 = vpop.xlane.xlu0 %2763  ;;  %v11693_v5 = vpop.eup %11692  ;;  %v2832_v34 = vmul.f32 %v11691_v60, %v13324_v39 }
 0xdd4   :  { %10576 = vmatmul.mubr.msk.bf16.vlgmr.msra.gmra.mrb[112].mxu1 %vm230_vm0, %v2838_v56  ;;  %v11695_v26 = vpop.eup %11694  ;;  %v2829_v10 = vmul.f32 %v11693_v5, %v13308_v16 }
 0xdd5   :  { %10602 = vmatpush3.bf16.msra.mxu1 %v11460_v54  ;;  %v2831_v15 = vmul.f32 %v11695_v26, %v13304_v7 }
 0xdd6   :  { %10603 = vmatprep.subr.bf16.mxu1 %v11461_v22  ;;  %v11697_v63 = vpop.eup %11696 }
 0xdd7   :  { %v2767_v33 = vpop.xlane.xlu0 %2766  ;;  %v2830_v41 = vmul.f32 %v11697_v63, %v13331_v30  ;;  %v2840_v36 = vpack.c.bf16 %v2832_v34, %v2831_v15 }
 0xdd9   :  { %10604 = vmatpush3.bf16.msra.mxu1 %v11461_v22  ;;  %v2839_v2 = vpack.c.bf16 %v2830_v41, %v2829_v10 }
 0xddb   :  { %v2773_v24 = vpop.xlane.xlu0 %2772  ;;  %10579 = vmatprep.mubr.msk.bf16.mxu1 %vm230_vm0, %v2839_v2 }
 0xddc   :  { %10580 = vmatmul.mubr.msk.bf16.gmra.mrb[116].mxu1 %vm230_vm0, %v2840_v36 }
 0xddd   :  { %10605 = vmatprep.mubr.msk.bf16.mxu1 %vm359_vm1, %v12597_v38 }
 0xddf   :  { %v2842_v46 = vpop.permute.xlu0 %2841 }
 0xde0   :  { %10551 = vmatprep.subr.bf16.mxu0 %v2842_v46 }
 0xde1   :  { %10552 = vmatpush3.bf16.msra.mxu0 %v2842_v46 }
 0xde4   :  { %10606 = vmatmul.mubr.msk.bf16.vlgmr.msra.gmra.mrb[120].mxu1 %vm359_vm1, %v12607_v4 }
 0xde5   :  { %10609 = vmatprep.mubr.msk.bf16.mxu1 %vm359_vm1, %v12616_v23 }
 0xdec   :  { %10610 = vmatmul.mubr.msk.bf16.gmra.mrb[124].mxu1 %vm359_vm1, %v12626_v50  ;;  %v11699_v50 = vpop.eup %11698 }
 0xded   :  { %10613 = vmatprep.mubr.msk.bf16.mxu1 %vm359_vm1, %v12636_v12 }
 0xdf4   :  { %10614 = vmatmul.mubr.msk.bf16.gmra.mrb[128].mxu1 %vm359_vm1, %v12646_v57  ;;  %v2817_v57 = vmul.f32 %v11699_v50, %v13327_v43 }
 0xdf5   :  { %10617 = vmatprep.mubr.msk.bf16.mxu1 %vm359_vm1, %v12656_v49 }
 0xdfc   :  { %10618 = vmatmul.mubr.msk.bf16.gmra.mrb[132].mxu1 %vm359_vm1, %v12666_v59 }
 0xe00   :  { %v2758_v38 = vpop.xlane.xlu1 %2757 }
 0xe01   :  { %11700 = vrcp.f32 %v2758_v38 }
 0xe02   :  { %11702 = vrcp.f32 %v2764_v20 }
 0xe04   :  { %v2770_v4 = vpop.xlane.xlu1 %2769 }
 0xe05   :  { %11704 = vrcp.f32 %v2770_v4 }
 0xe06   :  { %11706 = vrcp.f32 %v2761_v6 }
 0xe07   :  { %11708 = vrcp.f32 %v2767_v33 }
 0xe08   :  { %v2776_v23 = vpop.xlane.xlu1 %2775 }
 0xe09   :  { %11710 = vrcp.f32 %v2776_v23 }
 0xe0a   :  { %11712 = vrcp.f32 %v2773_v24 }
 0xe0b   :  { %v11701_v12 = vpop.eup %11700 }
 0xe0c   :  { %v2844_v7 = vpop.permute.xlu1 %2843  ;;  %v2818_v16 = vmul.f32 %v11701_v12, %v13360_v0  ;;  %v11703_v59 = vpop.eup %11702 }
 0xe0d   :  { %10553 = vmatprep.subr.bf16.mxu0 %v2844_v7  ;;  %v2820_v48 = vmul.f32 %v11703_v59, %v13341_v17 }
 0xe0e   :  { %10554 = vmatpush3.bf16.msra.mxu0 %v2844_v7  ;;  %v2833_v49 = vpack.c.bf16 %v2818_v16, %v2817_v57 }
 0xe0f   :  { %v11705_v30 = vpop.eup %11704 }
 0xe10   :  { %10559 = vmatprep.mubr.msk.bf16.mxu0 %vm230_vm0, %v2833_v49  ;;  %v2846_v39 = vpop.permute.xlu1 %2845  ;;  %v11707_v29 = vpop.eup %11706  ;;  %v2822_v43 = vmul.f32 %v11705_v30, %v13364_v19 }
 0xe11   :  { %10555 = vmatprep.subr.bf16.mxu0 %v2846_v39  ;;  %v11709_v47 = vpop.eup %11708  ;;  %v2819_v0 = vmul.f32 %v11707_v29, %v13337_v9  ;;  %v9562_v9 = vld [vmem:[%s16220_s4 + $0x8] sm:$0xf] }
 0xe12   :  { %10556 = vmatpush3.bf16.msra.mxu0 %v2846_v39  ;;  %v2821_v53 = vmul.f32 %v11709_v47, %v13345_v27  ;;  %v3054_v27 = vsel %vm1380_vm3, %v9562_v9, 0 }
 0xe13   :  { %v2834_v61 = vpack.c.bf16 %v2820_v48, %v2819_v0  ;;  %v11711_v14 = vpop.eup %11710 }
 0xe14   :  { %v2848_v25 = vpop.permute.xlu1 %2847  ;;  %v2835_v58 = vpack.c.bf16 %v2822_v43, %v2821_v53  ;;  %v11713_v54 = vpop.eup %11712  ;;  %v2824_v6 = vmul.f32 %v11711_v14, %v13368_v37 }
 0xe15   :  { %10557 = vmatprep.subr.bf16.mxu0 %v2848_v25  ;;  %v2823_v17 = vmul.f32 %v11713_v54, %v13349_v3 }
 0xe16   :  { %10558 = vmatpush3.bf16.msra.mxu0 %v2848_v25 }
 0xe17   :  { %v2836_v51 = vpack.c.bf16 %v2824_v6, %v2823_v17  ;;  %11369 = vmatprep.subr.msk.bf16.mxu0 %vm1380_vm3, %v9562_v9 }
 0xe19   :  { %10560 = vmatmul.mubr.msk.bf16.vlgmr.msra.gmra.mrb[64].mxu0 %vm230_vm0, %v2834_v61 }
 0xe1a   :  { %10563 = vmatprep.mubr.msk.bf16.mxu0 %vm230_vm0, %v2835_v58  ;;  %10584 = vmatpush3.bf16.msra.mxu0 %v3054_v27 }
 0xe21   :  { %10564 = vmatmul.mubr.msk.bf16.gmra.mrb[68].mxu0 %vm230_vm0, %v2836_v51 }
 0xea7   :  { %v13429_v19 = vpop.f32.mrb[112].mxu1 }
 0xea8   :  { %v13431_v13 = vpop.f32.mrb[113].mxu1 }
 0xea9   :  { %v13433_v56 = vpop.f32.mrb[114].mxu1 }
 0xeaa   :  { %v3024_v3 = vpack.c.bf16 %v13433_v56, %v13429_v19  ;;  %v2991_v37 = vpop.f32.mrb[115].mxu1 }
 0xeab   :  { %v3023_v22 = vpack.c.bf16 %v2991_v37, %v13431_v13 }
 0xeaf   :  { %v13438_v20 = vpop.f32.mrb[116].mxu1 }
 0xeb0   :  { %v3004_v60 = vpop.f32.mrb[117].mxu1 }
 0xeb1   :  { %v10582_v5 = vpop.f32.mrb[118].mxu1 }
 0xeb2   :  { %v3026_v26 = vpack.c.bf16 %v10582_v5, %v13438_v20  ;;  %v3007_v63 = vpop.f32.mrb[119].mxu1 }
 0xeb3   :  { %v3025_v33 = vpack.c.bf16 %v3007_v63, %v3004_v60 }
 0xeb7   :  { %v10607_v34 = vpop.f32.mrb[120].mxu1 }
 0xeb8   :  { %v3220_v10 = vpop.f32.mrb[121].mxu1 }
 0xeb9   :  { %v10608_v41 = vpop.f32.mrb[122].mxu1 }
 0xeba   :  { %v13441_v15 = vpack.c.bf16 %v10608_v41, %v10607_v34  ;;  %v3223_v2 = vpop.f32.mrb[123].mxu1 }
 0xebb   :  { %v3283_v24 = vpack.c.bf16 %v3223_v2, %v3220_v10 }
 0xebc   :  { %3297 = vrot.lane.b32.xlu1 %v13441_v15, %s12227_s29 }
 0xebd   :  { %3295 = vrot.lane.b32.xlu0 %v3283_v24, %s12227_s29 }
 0xebf   :  { %v10611_v36 = vpop.f32.mrb[124].mxu1 }
 0xec0   :  { %v3236_v46 = vpop.f32.mrb[125].mxu1 }
 0xec1   :  { %v10612_v38 = vpop.f32.mrb[126].mxu1 }
 0xec2   :  { %v13446_v4 = vpack.c.bf16 %v10612_v38, %v10611_v36  ;;  %v3239_v23 = vpop.f32.mrb[127].mxu1 }
 0xec3   :  { %v13448_v50 = vpack.c.bf16 %v3239_v23, %v3236_v46 }
 0xec5   :  { %3299 = vrot.lane.b32.xlu0 %v13448_v50, %s12227_s29 }
 0xec7   :  { %v10615_v12 = vpop.f32.mrb[128].mxu1 }
 0xec8   :  { %v3252_v7 = vpop.f32.mrb[129].mxu1 }
 0xec9   :  { %3301 = vrot.lane.b32.xlu0 %v13446_v4, %s12227_s29  ;;  %v10616_v57 = vpop.f32.mrb[130].mxu1 }
 0xeca   :  { %v13454_v16 = vpack.c.bf16 %v10616_v57, %v10615_v12  ;;  %v3255_v49 = vpop.f32.mrb[131].mxu1 }
 0xecb   :  { %v13456_v59 = vpack.c.bf16 %v3255_v49, %v3252_v7 }
 0xecd   :  { %3396 = vrot.lane.b32.xlu1 %v13456_v59, %s12227_s29  ;;  %10645 = vmatprep.mubr.msk.bf16.mxu1 %vm794_vm2, %v13456_v59 }
 0xecf   :  { %v10619_v39 = vpop.f32.mrb[132].mxu1 }
 0xed0   :  { %v3268_v30 = vpop.f32.mrb[133].mxu1 }
 0xed1   :  { %3398 = vrot.lane.b32.xlu1 %v13454_v16, %s12227_s29  ;;  %v10620_v29 = vpop.f32.mrb[134].mxu1 }
 0xed2   :  { %v13464_v47 = vpack.c.bf16 %v10620_v29, %v10619_v39  ;;  %v3271_v48 = vpop.f32.mrb[135].mxu1 }
 0xed3   :  { %v13466_v25 = vpack.c.bf16 %v3271_v48, %v3268_v30 }
 0xed5   :  { %3402 = vrot.lane.b32.xlu1 %v13464_v47, %s12227_s29  ;;  %3400 = vrot.lane.b32.xlu0 %v13466_v25, %s12227_s29 }
 0xed9   :  { %3679 = vrot.lane.b32.xlu1 %v13441_v15, %s12228_s30  ;;  %3677 = vrot.lane.b32.xlu0 %v3283_v24, %s12228_s30 }
 0xedd   :  { %3681 = vrot.lane.b32.xlu0 %v13448_v50, %s12228_s30 }
 0xee1   :  { %3683 = vrot.lane.b32.xlu0 %v13446_v4, %s12228_s30 }
 0xeec   :  { %v10561_v43 = vpop.f32.mrb[64].mxu0 }
 0xeed   :  { %v2899_v0 = vpop.f32.mrb[65].mxu0 }
 0xeee   :  { %v10562_v53 = vpop.f32.mrb[66].mxu0 }
 0xeef   :  { %v3020_v61 = vpack.c.bf16 %v10562_v53, %v10561_v43  ;;  %v2902_v14 = vpop.f32.mrb[67].mxu0 }
 0xef0   :  { %v3019_v58 = vpack.c.bf16 %v2902_v14, %v2899_v0 }
 0xef2   :  { %10585 = vmatprep.mubr.msk.bf16.mxu0 %vm794_vm2, %v3019_v58 }
 0xef3   :  { %10586 = vmatmul.mubr.msk.bf16.vlgmr.msra.gmra.mrb[32].mxu0 %vm794_vm2, %v3020_v61 }
 0xef4   :  { %v10565_v54 = vpop.f32.mrb[68].mxu0 }
 0xef5   :  { %v2915_v6 = vpop.f32.mrb[69].mxu0 }
 0xef6   :  { %v10566_v17 = vpop.f32.mrb[70].mxu0 }
 0xef7   :  { %v3022_v51 = vpack.c.bf16 %v10566_v17, %v10565_v54  ;;  %v2918_v9 = vpop.f32.mrb[71].mxu0 }
 0xef8   :  { %v3021_v27 = vpack.c.bf16 %v2918_v9, %v2915_v6 }
 0xefa   :  { %10589 = vmatprep.mubr.msk.bf16.mxu0 %vm794_vm2, %v3021_v27 }
 0xefb   :  { %10590 = vmatmul.mubr.msk.bf16.gmra.mrb[36].mxu0 %vm794_vm2, %v3022_v51 }
 0xefc   :  { %10593 = vmatprep.mubr.msk.bf16.mxu0 %vm794_vm2, %v3023_v22 }
 0xf03   :  { %10594 = vmatmul.mubr.msk.bf16.gmra.mrb[40].mxu0 %vm794_vm2, %v3024_v3 }
 0xf04   :  { %10597 = vmatprep.mubr.msk.bf16.mxu0 %vm794_vm2, %v3025_v33 }
 0xf0b   :  { %10598 = vmatmul.mubr.msk.bf16.gmra.mrb[44].mxu0 %vm794_vm2, %v3026_v26 }
 0xf0c   :  { %10629 = vmatprep.mubr.msk.bf16.mxu0 %vm794_vm2, %v3283_v24 }
 0xf2e   :  { %v3298_v20 = vpop.permute.xlu1 %3297 }
 0xf2f   :  { %v3296_v13 = vpop.permute.xlu0 %3295  ;;  %v3319_v22 = vsel %vm794_vm2, %v3298_v20, 0 }
 0xf30   :  { %11370 = vmatprep.subr.msk.bf16.mxu0 %vm794_vm2, %v3296_v13  ;;  %v3316_v37 = vsel %vm794_vm2, %v3296_v13, 0 }
 0xf31   :  { %10622 = vmatpush3.bf16.xpose.msra.mxu0 %v3316_v37 }
 0xf32   :  { %11371 = vmatprep.subr.msk.bf16.mxu0 %vm794_vm2, %v3298_v20 }
 0xf37   :  { %v3300_v19 = vpop.permute.xlu0 %3299 }
 0xf38   :  { %v3322_v3 = vsel %vm794_vm2, %v3300_v19, 0 }
 0xf39   :  { %10624 = vmatpush3.bf16.xpose.msra.mxu0 %v3319_v22 }
 0xf3a   :  { %11372 = vmatprep.subr.msk.bf16.mxu0 %vm794_vm2, %v3300_v19 }
 0xf3b   :  { %v3302_v5 = vpop.permute.xlu0 %3301 }
 0xf3c   :  { %v3325_v33 = vsel %vm794_vm2, %v3302_v5, 0 }
 0xf3f   :  { %v3397_v56 = vpop.permute.xlu1 %3396 }
 0xf40   :  { %11374 = vmatprep.subr.msk.bf16.mxu1 %vm794_vm2, %v3397_v56  ;;  %v3417_v60 = vsel %vm794_vm2, %v3397_v56, 0 }
 0xf41   :  { %10626 = vmatpush3.bf16.xpose.msra.mxu0 %v3322_v3  ;;  %10638 = vmatpush3.bf16.xpose.msra.mxu1 %v3417_v60 }
 0xf42   :  { %11373 = vmatprep.subr.msk.bf16.mxu0 %vm794_vm2, %v3302_v5 }
 0xf43   :  { %v3399_v26 = vpop.permute.xlu1 %3398 }
 0xf44   :  { %11375 = vmatprep.subr.msk.bf16.mxu1 %vm794_vm2, %v3399_v26  ;;  %v3420_v34 = vsel %vm794_vm2, %v3399_v26, 0 }
 0xf47   :  { %v3401_v63 = vpop.permute.xlu0 %3400  ;;  %v3403_v41 = vpop.permute.xlu1 %3402 }
 0xf48   :  { %v3423_v2 = vsel %vm794_vm2, %v3401_v63, 0  ;;  %v3426_v46 = vsel %vm794_vm2, %v3403_v41, 0 }
 0xf49   :  { %10628 = vmatpush3.bf16.xpose.msra.mxu0 %v3325_v33  ;;  %10640 = vmatpush3.bf16.xpose.msra.mxu1 %v3420_v34 }
 0xf4a   :  { %11376 = vmatprep.subr.msk.bf16.mxu1 %vm794_vm2, %v3401_v63 }
 0xf4b   :  { %v3678_v10 = vpop.permute.xlu0 %3677  ;;  %v3680_v24 = vpop.permute.xlu1 %3679 }
 0xf4c   :  { %10653 = vmatprep.subr.bf16.mxu0 %v3678_v10 }
 0xf4f   :  { %v3682_v36 = vpop.permute.xlu0 %3681 }
 0xf50   :  { %10630 = vmatmul.mubr.msk.bf16.vlgmr.msra.gmra.mrb[72].mxu0 %vm794_vm2, %v13441_v15 }
 0xf51   :  { %10633 = vmatprep.mubr.msk.bf16.mxu0 %vm794_vm2, %v13448_v50  ;;  %10642 = vmatpush3.bf16.xpose.msra.mxu1 %v3423_v2 }
 0xf52   :  { %10654 = vmatpush3.bf16.msra.mxu0 %v3678_v10  ;;  %11377 = vmatprep.subr.msk.bf16.mxu1 %vm794_vm2, %v3403_v41 }
 0xf53   :  { %10655 = vmatprep.subr.bf16.mxu0 %v3680_v24  ;;  %v3684_v15 = vpop.permute.xlu0 %3683 }
 0xf56   :  { %10656 = vmatpush3.bf16.msra.mxu0 %v3680_v24 }
 0xf57   :  { %10657 = vmatprep.subr.bf16.mxu0 %v3682_v36 }
 0xf58   :  { %10634 = vmatmul.mubr.msk.bf16.gmra.mrb[76].mxu0 %vm794_vm2, %v13446_v4 }
 0xf59   :  { %10644 = vmatpush3.bf16.xpose.msra.mxu1 %v3426_v46 }
 0xf5a   :  { %10658 = vmatpush3.bf16.msra.mxu0 %v3682_v36 }
 0xf5b   :  { %10659 = vmatprep.subr.bf16.mxu0 %v3684_v15 }
 0xf5e   :  { %10660 = vmatpush3.bf16.msra.mxu0 %v3684_v15 }
 0xf60   :  { %10646 = vmatmul.mubr.msk.bf16.vlgmr.msra.gmra.mrb[136].mxu1 %vm794_vm2, %v13454_v16 }
 0xf61   :  { %10649 = vmatprep.mubr.msk.bf16.mxu1 %vm794_vm2, %v13466_v25 }
 0xf68   :  { %10650 = vmatmul.mubr.msk.bf16.gmra.mrb[140].mxu1 %vm794_vm2, %v13464_v47 }
0x1023   :  { %v10631_v38 = vpop.f32.mrb[72].mxu0 }
0x1024   :  { %v3361_v23 = vpop.f32.mrb[73].mxu0  ;;  %v3499_v4 = vsel %vm230_vm0, %v10631_v38, -inf }
0x1025   :  { %3500 = vmax.xlane.f32.xlu0 %v3499_v4  ;;  %v10632_v50 = vpop.f32.mrb[74].mxu0  ;;  %v3493_v57 = vsel %vm230_vm0, %v3361_v23, -inf }
0x1026   :  { %v3364_v12 = vpop.f32.mrb[75].mxu0  ;;  %v3502_v30 = vsel %vm230_vm0, %v10632_v50, -inf }
0x1027   :  { %v3496_v7 = vsel %vm230_vm0, %v3364_v12, -inf }
0x1028   :  { %3497 = vmax.xlane.f32.xlu1 %v3496_v7 }
0x1029   :  { %3494 = vmax.xlane.f32.xlu0 %v3493_v57 }
0x102b   :  { %v13522_v49 = vpop.f32.mrb[76].mxu0 }
0x102c   :  { %v13524_v39 = vpop.f32.mrb[77].mxu0  ;;  %v3511_v0 = vsel %vm230_vm0, %v13522_v49, -inf }
0x102d   :  { %3503 = vmax.xlane.f32.xlu0 %v3502_v30  ;;  %v10636_v29 = vpop.f32.mrb[78].mxu0  ;;  %v3505_v58 = vsel %vm230_vm0, %v13524_v39, -inf }
0x102e   :  { %v13527_v48 = vpop.f32.mrb[79].mxu0  ;;  %v3514_v43 = vsel %vm230_vm0, %v10636_v29, -inf }
0x102f   :  { %3515 = vmax.xlane.f32.xlu1 %v3514_v43  ;;  %v3508_v53 = vsel %vm230_vm0, %v13527_v48, -inf }
0x1031   :  { %3512 = vmax.xlane.f32.xlu0 %v3511_v0 }
0x1033   :  { %3509 = vmax.xlane.f32.xlu1 %v3508_v53  ;;  %v13534_v61 = vpop.f32.mrb[136].mxu1 }
0x1034   :  { %v13536_v14 = vpop.f32.mrb[137].mxu1  ;;  %v3523_v51 = vsel %vm230_vm0, %v13534_v61, -inf }
0x1035   :  { %3506 = vmax.xlane.f32.xlu0 %v3505_v58  ;;  %v13540_v54 = vpop.f32.mrb[138].mxu1  ;;  %v3517_v37 = vsel %vm230_vm0, %v13536_v14, -inf }
0x1036   :  { %v13542_v6 = vpop.f32.mrb[139].mxu1  ;;  %v3526_v17 = vsel %vm230_vm0, %v13540_v54, -inf }
0x1037   :  { %3527 = vmax.xlane.f32.xlu1 %v3526_v17  ;;  %v3520_v9 = vsel %vm230_vm0, %v13542_v6, -inf }
0x1039   :  { %3524 = vmax.xlane.f32.xlu0 %v3523_v51 }
0x103b   :  { %3521 = vmax.xlane.f32.xlu1 %v3520_v9  ;;  %v13550_v27 = vpop.f32.mrb[140].mxu1 }
0x103c   :  { %v13552_v13 = vpop.f32.mrb[141].mxu1  ;;  %v3535_v56 = vsel %vm230_vm0, %v13550_v27, -inf }
0x103d   :  { %3518 = vmax.xlane.f32.xlu0 %v3517_v37  ;;  %v13556_v20 = vpop.f32.mrb[142].mxu1  ;;  %v3529_v60 = vsel %vm230_vm0, %v13552_v13, -inf }
0x103e   :  { %v13558_v22 = vpop.f32.mrb[143].mxu1  ;;  %v3538_v19 = vsel %vm230_vm0, %v13556_v20, -inf }
0x103f   :  { %3539 = vmax.xlane.f32.xlu1 %v3538_v19  ;;  %v3532_v3 = vsel %vm230_vm0, %v13558_v22, -inf }
0x1041   :  { %3536 = vmax.xlane.f32.xlu0 %v3535_v56 }
0x1043   :  { %3533 = vmax.xlane.f32.xlu1 %v3532_v3 }
0x1045   :  { %3530 = vmax.xlane.f32.xlu0 %v3529_v60 }
0x1054   :  { %3768 = vrot.lane.b32.xlu1 %v13454_v16, %s12228_s30 }
0x105b   :  { %3766 = vrot.lane.b32.xlu0 %v13456_v59, %s12228_s30 }
0x10b2   :  { %v3501_v5 = vpop.xlane.xlu0 %3500 }
0x10b3   :  { %v3543_v26 = vsub.f32 %v10631_v38, %v3501_v5 }
0x10b5   :  { %v3561_v63 = vmul.f32 1.442695, %v3543_v26  ;;  %v3498_v33 = vpop.xlane.xlu1 %3497 }
0x10b6   :  { %v3495_v34 = vpop.xlane.xlu0 %3494  ;;  %v3542_v41 = vsub.f32 %v3364_v12, %v3498_v33 }
0x10b7   :  { %11714 = vpow2.f32 %v3561_v63  ;;  %v3541_v10 = vsub.f32 %v3361_v23, %v3495_v34 }
0x10b8   :  { %v3559_v15 = vmul.f32 1.442695, %v3542_v41 }
0x10b9   :  { %v3557_v2 = vmul.f32 1.442695, %v3541_v10 }
0x10ba   :  { %v3504_v24 = vpop.xlane.xlu0 %3503 }
0x10bb   :  { %11716 = vpow2.f32 %v3557_v2  ;;  %v3544_v36 = vsub.f32 %v10632_v50, %v3504_v24 }
0x10bc   :  { %v3516_v46 = vpop.xlane.xlu1 %3515 }
0x10bd   :  { %v3563_v4 = vmul.f32 1.442695, %v3544_v36  ;;  %v3548_v7 = vsub.f32 %v10636_v29, %v3516_v46 }
0x10be   :  { %v3513_v16 = vpop.xlane.xlu0 %3512 }
0x10bf   :  { %11718 = vpow2.f32 %v3563_v4  ;;  %v3547_v59 = vsub.f32 %v13522_v49, %v3513_v16  ;;  %v3571_v30 = vmul.f32 1.442695, %v3548_v7 }
0x10c0   :  { %v3510_v57 = vpop.xlane.xlu1 %3509  ;;  %11720 = vpow2.f32 %v3559_v15 }
0x10c1   :  { %v13573_v38 = vpop.eup %11714  ;;  %v3569_v43 = vmul.f32 1.442695, %v3547_v59  ;;  %v3546_v23 = vsub.f32 %v13527_v48, %v3510_v57 }
0x10c2   :  { %v3507_v12 = vpop.xlane.xlu0 %3506  ;;  %v3595_v50 = vsel %vm230_vm0, %v13573_v38, 0.0 }
0x10c3   :  { %11722 = vpow2.f32 %v3569_v43  ;;  %v3545_v0 = vsub.f32 %v13524_v39, %v3507_v12  ;;  %3596 = vadd.xlane.f32.xlu0 %v3595_v50  ;;  %v3567_v49 = vmul.f32 1.442695, %v3546_v23 }
0x10c4   :  { %v3528_v29 = vpop.xlane.xlu1 %3527  ;;  %11724 = vpow2.f32 %v3571_v30 }
0x10c5   :  { %v13579_v53 = vpop.eup %11716  ;;  %v3565_v58 = vmul.f32 1.442695, %v3545_v0  ;;  %v3552_v5 = vsub.f32 %v13540_v54, %v3528_v29 }
0x10c6   :  { %v3525_v17 = vpop.xlane.xlu0 %3524  ;;  %v3589_v51 = vsel %vm230_vm0, %v13579_v53, 0.0 }
0x10c7   :  { %11726 = vpow2.f32 %v3565_v58  ;;  %v3551_v48 = vsub.f32 %v13534_v61, %v3525_v17  ;;  %3590 = vadd.xlane.f32.xlu0 %v3589_v51  ;;  %v3579_v54 = vmul.f32 1.442695, %v3552_v5 }
0x10c8   :  { %v3522_v9 = vpop.xlane.xlu1 %3521  ;;  %11728 = vpow2.f32 %v3567_v49 }
0x10c9   :  { %v13584_v37 = vpop.eup %11718  ;;  %v3577_v39 = vmul.f32 1.442695, %v3551_v48  ;;  %v3550_v24 = vsub.f32 %v13542_v6, %v3522_v9 }
0x10ca   :  { %v3519_v19 = vpop.xlane.xlu0 %3518  ;;  %v3598_v56 = vsel %vm230_vm0, %v13584_v37, 0.0  ;;  %v13588_v3 = vpop.eup %11720 }
0x10cb   :  { %v3549_v60 = vsub.f32 %v13536_v14, %v3519_v19  ;;  %3599 = vadd.xlane.f32.xlu1 %v3598_v56  ;;  %11730 = vpow2.f32 %v3577_v39  ;;  %v3592_v41 = vsel %vm230_vm0, %v13588_v3, 0.0  ;;  %v3575_v6 = vmul.f32 1.442695, %v3550_v24 }
0x10cc   :  { %v3540_v26 = vpop.xlane.xlu1 %3539 }
0x10cd   :  { %v13592_v63 = vpop.eup %11722  ;;  %v3573_v61 = vmul.f32 1.442695, %v3549_v60  ;;  %v3556_v33 = vsub.f32 %v13556_v20, %v3540_v26 }
0x10ce   :  { %v3537_v34 = vpop.xlane.xlu0 %3536  ;;  %v3607_v10 = vsel %vm230_vm0, %v13592_v63, 0.0  ;;  %v13599_v2 = vpop.eup %11724 }
0x10cf   :  { %v3555_v14 = vsub.f32 %v13550_v27, %v3537_v34  ;;  %3608 = vadd.xlane.f32.xlu0 %v3607_v10  ;;  %3593 = vadd.xlane.f32.xlu1 %v3592_v41  ;;  %11732 = vpow2.f32 %v3573_v61  ;;  %v3587_v20 = vmul.f32 1.442695, %v3556_v33  ;;  %v3610_v27 = vsel %vm230_vm0, %v13599_v2, 0.0  ;;  %v13654_v61 = vld [vmem:[%s16220_s4 + $0xc] sm:$0xf] }
0x10d0   :  { %v3534_v36 = vpop.xlane.xlu1 %3533  ;;  %11378 = vmatprep.subr.msk.bf16.mxu0 %vm1380_vm3, %v13654_v61 }
0x10d1   :  { %v13603_v46 = vpop.eup %11726  ;;  %v3585_v15 = vmul.f32 1.442695, %v3555_v14  ;;  %v3554_v4 = vsub.f32 %v13558_v22, %v3534_v36 }
0x10d2   :  { %v3531_v7 = vpop.xlane.xlu0 %3530  ;;  %v3601_v16 = vsel %vm230_vm0, %v13603_v46, 0.0  ;;  %v13610_v59 = vpop.eup %11728 }
0x10d3   :  { %11734 = vpow2.f32 %v3585_v15  ;;  %3602 = vadd.xlane.f32.xlu0 %v3601_v16  ;;  %3611 = vadd.xlane.f32.xlu1 %v3610_v27  ;;  %v3583_v57 = vmul.f32 1.442695, %v3554_v4  ;;  %v3553_v30 = vsub.f32 %v13552_v13, %v3531_v7  ;;  %v3604_v22 = vsel %vm230_vm0, %v13610_v59, 0.0 }
0x10d4   :  { %11736 = vpow2.f32 %v3579_v54  ;;  %v3769_v12 = vpop.permute.xlu1 %3768 }
0x10d5   :  { %11738 = vpow2.f32 %v3587_v20  ;;  %v13615_v23 = vpop.eup %11730  ;;  %v3581_v50 = vmul.f32 1.442695, %v3553_v30 }
0x10d6   :  { %v3767_v43 = vpop.permute.xlu0 %3766  ;;  %11740 = vpow2.f32 %v3575_v6  ;;  %v3619_v0 = vsel %vm230_vm0, %v13615_v23, 0.0 }
0x10d7   :  { %10669 = vmatprep.subr.bf16.mxu1 %v3767_v43  ;;  %3605 = vadd.xlane.f32.xlu1 %v3604_v22  ;;  %11742 = vpow2.f32 %v3583_v57 }
0x10d8   :  { %10670 = vmatpush3.bf16.msra.mxu1 %v3767_v43  ;;  %11744 = vpow2.f32 %v3581_v50 }
0x10d9   :  { %10671 = vmatprep.subr.bf16.mxu1 %v3769_v12  ;;  %v13619_v29 = vpop.eup %11732 }
0x10da   :  { %v3613_v17 = vsel %vm230_vm0, %v13619_v29, 0.0 }
0x10db   :  { %3620 = vadd.xlane.f32.xlu1 %v3619_v0 }
0x10dc   :  { %10672 = vmatpush3.bf16.msra.mxu1 %v3769_v12 }
0x10dd   :  { %v13621_v13 = vpop.eup %11734 }
0x10de   :  { %v13623_v49 = vpop.eup %11736  ;;  %v3631_v58 = vsel %vm230_vm0, %v13621_v13, 0.0 }
0x10df   :  { %v13629_v51 = vpop.eup %11738  ;;  %3632 = vadd.xlane.f32.xlu0 %v3631_v58  ;;  %3614 = vadd.xlane.f32.xlu1 %v3613_v17  ;;  %v3622_v9 = vsel %vm230_vm0, %v13623_v49, 0.0 }
0x10e0   :  { %v13631_v48 = vpop.eup %11740  ;;  %v3634_v39 = vsel %vm230_vm0, %v13629_v51, 0.0 }
0x10e1   :  { %v13637_v19 = vpop.eup %11742  ;;  %v3616_v56 = vsel %vm230_vm0, %v13631_v48, 0.0 }
0x10e2   :  { %v3628_v60 = vsel %vm230_vm0, %v13637_v19, 0.0  ;;  %v13643_v5 = vpop.eup %11744 }
0x10e3   :  { %3623 = vadd.xlane.f32.xlu1 %v3622_v9  ;;  %3635 = vadd.xlane.f32.xlu0 %v3634_v39  ;;  %v3625_v26 = vsel %vm230_vm0, %v13643_v5, 0.0 }
0x10e7   :  { %3617 = vadd.xlane.f32.xlu1 %v3616_v56  ;;  %3629 = vadd.xlane.f32.xlu0 %v3628_v60 }
0x10eb   :  { %3626 = vadd.xlane.f32.xlu1 %v3625_v26 }
0x10fc   :  { %3772 = vrot.lane.b32.xlu1 %v13464_v47, %s12228_s30 }
0x10fd   :  { %3770 = vrot.lane.b32.xlu0 %v13466_v25, %s12228_s30 }
0x1150   :  { %v3597_v33 = vpop.xlane.xlu0 %3596 }
0x1154   :  { %v3591_v34 = vpop.xlane.xlu0 %3590 }
0x1158   :  { %v3600_v10 = vpop.xlane.xlu1 %3599 }
0x1159   :  { %11746 = vrcp.f32 %v3600_v10 }
0x115a   :  { %11748 = vrcp.f32 %v3591_v34 }
0x115b   :  { %11750 = vrcp.f32 %v3597_v33 }
0x115c   :  { %v3609_v41 = vpop.xlane.xlu0 %3608  ;;  %v3594_v14 = vpop.xlane.xlu1 %3593 }
0x115d   :  { %11752 = vrcp.f32 %v3594_v14 }
0x1160   :  { %v3603_v47 = vpop.xlane.xlu0 %3602  ;;  %v3612_v54 = vpop.xlane.xlu1 %3611 }
0x1161   :  { %11754 = vrcp.f32 %v3603_v47 }
0x1162   :  { %11756 = vrcp.f32 %v3612_v54 }
0x1163   :  { %11758 = vrcp.f32 %v3609_v41  ;;  %v11747_v24 = vpop.eup %11746 }
0x1164   :  { %v3606_v25 = vpop.xlane.xlu1 %3605  ;;  %v11749_v36 = vpop.eup %11748  ;;  %v3656_v4 = vmul.f32 %v11747_v24, %v13584_v37 }
0x1165   :  { %11760 = vrcp.f32 %v3606_v25  ;;  %v11751_v20 = vpop.eup %11750  ;;  %v3653_v16 = vmul.f32 %v11749_v36, %v13579_v53 }
0x1166   :  { %v3655_v6 = vmul.f32 %v11751_v20, %v13573_v38 }
0x1167   :  { %v11753_v15 = vpop.eup %11752 }
0x1168   :  { %v3621_v7 = vpop.xlane.xlu1 %3620  ;;  %v3654_v27 = vmul.f32 %v11753_v15, %v13588_v3  ;;  %v3670_v43 = vpack.c.bf16 %v3656_v4, %v3655_v6 }
0x116a   :  { %v3669_v57 = vpack.c.bf16 %v3654_v27, %v3653_v16 }
0x116b   :  { %v11755_v30 = vpop.eup %11754 }
0x116c   :  { %v3633_v22 = vpop.xlane.xlu0 %3632  ;;  %v3615_v12 = vpop.xlane.xlu1 %3614  ;;  %10661 = vmatprep.mubr.msk.bf16.mxu0 %vm230_vm0, %v3669_v57  ;;  %v3657_v53 = vmul.f32 %v11755_v30, %v13603_v46 }
0x116d   :  { %v11757_v50 = vpop.eup %11756  ;;  %10662 = vmatmul.mubr.msk.bf16.vlgmr.msra.gmra.mrb[80].mxu0 %vm230_vm0, %v3670_v43 }
0x116e   :  { %v11759_v0 = vpop.eup %11758  ;;  %v3660_v38 = vmul.f32 %v11757_v50, %v13599_v2 }
0x116f   :  { %v11761_v58 = vpop.eup %11760  ;;  %v3659_v39 = vmul.f32 %v11759_v0, %v13592_v63 }
0x1170   :  { %v3636_v37 = vpop.xlane.xlu0 %3635  ;;  %v3624_v17 = vpop.xlane.xlu1 %3623  ;;  %v3658_v3 = vmul.f32 %v11761_v58, %v13610_v59 }
0x1171   :  { %11762 = vrcp.f32 %v3624_v17  ;;  %v3672_v26 = vpack.c.bf16 %v3660_v38, %v3659_v39 }
0x1172   :  { %v3671_v9 = vpack.c.bf16 %v3658_v3, %v3657_v53  ;;  %11764 = vrcp.f32 %v3615_v12 }
0x1173   :  { %11766 = vrcp.f32 %v3621_v7 }
0x1174   :  { %v3630_v56 = vpop.xlane.xlu0 %3629  ;;  %10665 = vmatprep.mubr.msk.bf16.mxu0 %vm230_vm0, %v3671_v9  ;;  %v3618_v60 = vpop.xlane.xlu1 %3617 }
0x1175   :  { %11768 = vrcp.f32 %v3618_v60  ;;  %10666 = vmatmul.mubr.msk.bf16.gmra.mrb[84].mxu0 %vm230_vm0, %v3672_v26 }
0x1176   :  { %11770 = vrcp.f32 %v3630_v56 }
0x1178   :  { %v3771_v46 = vpop.permute.xlu0 %3770  ;;  %v3627_v33 = vpop.xlane.xlu1 %3626 }
0x1179   :  { %11772 = vrcp.f32 %v3627_v33  ;;  %10673 = vmatprep.subr.bf16.mxu1 %v3771_v46 }
0x117a   :  { %10674 = vmatpush3.bf16.msra.mxu1 %v3771_v46  ;;  %11774 = vrcp.f32 %v3636_v37  ;;  %v13695_v46 = vld [vmem:[%s16219_s7 + $0x4] ss:$0 sm:$0xff] }
0x117b   :  { %v11763_v63 = vpop.eup %11762  ;;  %11776 = vrcp.f32 %v3633_v22 }
0x117c   :  { %v3773_v2 = vpop.permute.xlu1 %3772  ;;  %v11765_v59 = vpop.eup %11764  ;;  %v3664_v41 = vmul.f32 %v11763_v63, %v13623_v49 }
0x117d   :  { %10675 = vmatprep.subr.bf16.mxu1 %v3773_v2  ;;  %v11767_v34 = vpop.eup %11766  ;;  %v3661_v47 = vmul.f32 %v11765_v59, %v13619_v29 }
0x117e   :  { %10676 = vmatpush3.bf16.msra.mxu1 %v3773_v2  ;;  %v3663_v25 = vmul.f32 %v11767_v34, %v13615_v23  ;;  %v621_v2 = vadd.f32 %v13695_v46, %v12372_v32  ;;  %v624_v34 = vadd.f32 %v13695_v46, %v12388_v45 }
0x117f   :  { %v11769_v10 = vpop.eup %11768 }
0x1180   :  { %v11771_v14 = vpop.eup %11770  ;;  %v3662_v54 = vmul.f32 %v11769_v10, %v13631_v48  ;;  %v3674_v20 = vpack.c.bf16 %v3664_v41, %v3663_v25  ;;  %v622_v41 = vadd.f32 %v13695_v46, %v12374_v35 }
0x1181   :  { %v3666_v4 = vmul.f32 %v11771_v14, %v13637_v19 }
0x1182   :  { %v3673_v36 = vpack.c.bf16 %v3662_v54, %v3661_v47  ;;  %v623_v47 = vadd.f32 %v13695_v46, %v12386_v42  ;;  %v625_v42 = vadd.f32 %v13695_v46, %v12400_v52 }
0x1183   :  { %v11773_v24 = vpop.eup %11772 }
0x1184   :  { %v3665_v15 = vmul.f32 %v11773_v24, %v13643_v5  ;;  %v11775_v7 = vpop.eup %11774  ;;  %10677 = vmatprep.mubr.msk.bf16.mxu1 %vm230_vm0, %v3673_v36  ;;  %v3890_v5 = vsel %vm1380_vm3, %v13654_v61, 0 }
0x1185   :  { %10678 = vmatmul.mubr.msk.bf16.vlgmr.msra.gmra.mrb[144].mxu1 %vm230_vm0, %v3674_v20  ;;  %v11777_v16 = vpop.eup %11776  ;;  %v3668_v29 = vmul.f32 %v11775_v7, %v13629_v51  ;;  %10686 = vmatpush3.bf16.msra.mxu0 %v3890_v5 }
0x1186   :  { %v3675_v49 = vpack.c.bf16 %v3666_v4, %v3665_v15  ;;  %v3667_v23 = vmul.f32 %v11777_v16, %v13621_v13 }
0x1188   :  { %10681 = vmatprep.mubr.msk.bf16.mxu1 %vm230_vm0, %v3675_v49  ;;  %v3676_v48 = vpack.c.bf16 %v3668_v29, %v3667_v23  ;;  %v626_v49 = vadd.f32 %v13695_v46, %v12402_v55  ;;  %v627_v29 = vadd.f32 %v13695_v46, %v12414_v62  ;;  %v628_v23 = vadd.f32 %v13695_v46, %v12416_v1 }
0x118d   :  { %10682 = vmatmul.mubr.msk.bf16.gmra.mrb[148].mxu1 %vm230_vm0, %v3676_v48 }
0x1240   :  { %v10663_v19 = vpop.f32.mrb[80].mxu0 }
0x1241   :  { %v3735_v27 = vpop.f32.mrb[81].mxu0 }
0x1242   :  { %v10664_v6 = vpop.f32.mrb[82].mxu0 }
0x1243   :  { %v3856_v57 = vpack.c.bf16 %v10664_v6, %v10663_v19  ;;  %v3738_v30 = vpop.f32.mrb[83].mxu0  ;;  %v629_v6 = vadd.f32 %v13695_v46, %v12428_v8 }
0x1244   :  { %v3855_v43 = vpack.c.bf16 %v3738_v30, %v3735_v27  ;;  %v631_v30 = vadd.f32 %v13695_v46, %v12442_v18 }
0x1246   :  { %10687 = vmatprep.mubr.msk.bf16.mxu0 %vm794_vm2, %v3855_v43 }
0x1247   :  { %10688 = vmatmul.mubr.msk.bf16.vlgmr.msra.gmra.mrb[32].mxu0 %vm794_vm2, %v3856_v57 }
0x1248   :  { %v10667_v51 = vpop.f32.mrb[84].mxu0 }
0x1249   :  { %v3751_v22 = vpop.f32.mrb[85].mxu0 }
0x124a   :  { %v10668_v13 = vpop.f32.mrb[86].mxu0 }
0x124b   :  { %v3858_v12 = vpack.c.bf16 %v10668_v13, %v10667_v51  ;;  %v3754_v50 = vpop.f32.mrb[87].mxu0 }
0x124c   :  { %v3857_v0 = vpack.c.bf16 %v3754_v50, %v3751_v22  ;;  %v630_v22 = vadd.f32 %v13695_v46, %v12430_v11  ;;  %v632_v50 = vadd.f32 %v13695_v46, %v12444_v21 }
0x124e   :  { %10691 = vmatprep.mubr.msk.bf16.mxu0 %vm794_vm2, %v3857_v0 }
0x124f   :  { %10692 = vmatmul.mubr.msk.bf16.gmra.mrb[36].mxu0 %vm794_vm2, %v3858_v12 }
0x1258   :  { %v10679_v61 = vpop.f32.mrb[144].mxu1 }
0x1259   :  { %v3824_v58 = vpop.f32.mrb[145].mxu1 }
0x125a   :  { %v10680_v37 = vpop.f32.mrb[146].mxu1 }
0x125b   :  { %v3860_v17 = vpack.c.bf16 %v10680_v37, %v10679_v61  ;;  %v3827_v53 = vpop.f32.mrb[147].mxu1  ;;  %v633_v37 = vadd.f32 %v13695_v46, %v12456_v28  ;;  %v636_v28 = vadd.f32 %v13695_v46, %v12472_v44 }
0x125c   :  { %v3859_v3 = vpack.c.bf16 %v3827_v53, %v3824_v58 }
0x125e   :  { %10695 = vmatprep.mubr.msk.bf16.mxu0 %vm794_vm2, %v3859_v3 }
0x125f   :  { %10696 = vmatmul.mubr.msk.bf16.gmra.mrb[40].mxu0 %vm794_vm2, %v3860_v17  ;;  %v635_v17 = vadd.f32 %v13695_v46, %v12470_v40 }
0x1260   :  { %v10683_v38 = vpop.f32.mrb[148].mxu1 }
0x1261   :  { %v3840_v9 = vpop.f32.mrb[149].mxu1 }
0x1262   :  { %v10684_v39 = vpop.f32.mrb[150].mxu1 }
0x1263   :  { %v3862_v56 = vpack.c.bf16 %v10684_v39, %v10683_v38  ;;  %v3843_v60 = vpop.f32.mrb[151].mxu1 }
0x1264   :  { %v3861_v26 = vpack.c.bf16 %v3843_v60, %v3840_v9  ;;  %v634_v9 = vadd.f32 %v13695_v46, %v12458_v31 }
0x1266   :  { %10699 = vmatprep.mubr.msk.bf16.mxu0 %vm794_vm2, %v3861_v26 }
0x1267   :  { %10700 = vmatmul.mubr.msk.bf16.gmra.mrb[44].mxu0 %vm794_vm2, %v3862_v56 }
0x131a   :  { %v10689_v33 = vpop.f32.mrb[32].mxu0 }
0x131b   :  { %v3926_v63 = vpop.f32.mrb[33].mxu0  ;;  %v13713_v24 = vadd.f32 %v10689_v33, %v623_v47 }
0x131c   :  { %v13699_v59 = vadd.f32 %v3926_v63, %v621_v2  ;;  %v10690_v10 = vpop.f32.mrb[34].mxu0 }
0x131d   :  { %v3929_v14 = vpop.f32.mrb[35].mxu0  ;;  %v13707_v54 = vadd.f32 %v10690_v10, %v624_v34  ;;  %v4011_v7 = vsel %vm359_vm1, %v13713_v24, 0.0 }
0x131e   :  { %v13709_v25 = vadd.f32 %v3929_v14, %v622_v41  ;;  %v4005_v32 = vsel %vm359_vm1, %v13699_v59, 0.0 }
0x131f   :  { %4006 = vadd.xlane.f32.xlu1 %v4005_v32  ;;  %v4014_v35 = vsel %vm359_vm1, %v13707_v54, 0.0 }
0x1320   :  { %v4008_v45 = vsel %vm359_vm1, %v13709_v25, 0.0 }
0x1321   :  { %4009 = vadd.xlane.f32.xlu0 %v4008_v45 }
0x1322   :  { %v10693_v36 = vpop.f32.mrb[36].mxu0 }
0x1323   :  { %4015 = vadd.xlane.f32.xlu1 %v4014_v35  ;;  %v3942_v20 = vpop.f32.mrb[37].mxu0  ;;  %v13733_v48 = vadd.f32 %v10693_v36, %v627_v29 }
0x1324   :  { %v13721_v15 = vadd.f32 %v3942_v20, %v625_v42  ;;  %v10694_v4 = vpop.f32.mrb[38].mxu0 }
0x1325   :  { %4012 = vadd.xlane.f32.xlu0 %v4011_v7  ;;  %v3945_v16 = vpop.f32.mrb[39].mxu0  ;;  %v13735_v5 = vadd.f32 %v10694_v4, %v628_v23  ;;  %v4023_v62 = vsel %vm359_vm1, %v13733_v48, 0.0 }
0x1326   :  { %v13731_v52 = vadd.f32 %v3945_v16, %v626_v49  ;;  %v4017_v19 = vsel %vm359_vm1, %v13721_v15, 0.0 }
0x1327   :  { %v4026_v1 = vsel %vm359_vm1, %v13735_v5, 0.0 }
0x1328   :  { %v4020_v55 = vsel %vm359_vm1, %v13731_v52, 0.0 }
0x1329   :  { %4018 = vadd.xlane.f32.xlu0 %v4017_v19  ;;  %4021 = vadd.xlane.f32.xlu1 %v4020_v55 }
0x132d   :  { %4024 = vadd.xlane.f32.xlu0 %v4023_v62  ;;  %4027 = vadd.xlane.f32.xlu1 %v4026_v1 }
0x1332   :  { %v10697_v27 = vpop.f32.mrb[40].mxu0 }
0x1333   :  { %v3958_v57 = vpop.f32.mrb[41].mxu0  ;;  %v13753_v12 = vadd.f32 %v10697_v27, %v631_v30 }
0x1334   :  { %v13749_v43 = vadd.f32 %v3958_v57, %v629_v6  ;;  %v10698_v51 = vpop.f32.mrb[42].mxu0 }
0x1335   :  { %v3961_v13 = vpop.f32.mrb[43].mxu0  ;;  %v13761_v61 = vadd.f32 %v10698_v51, %v632_v50  ;;  %v4035_v11 = vsel %vm359_vm1, %v13753_v12, 0.0 }
0x1336   :  { %v13757_v0 = vadd.f32 %v3961_v13, %v630_v22  ;;  %v4029_v8 = vsel %vm359_vm1, %v13749_v43, 0.0 }
0x1337   :  { %4030 = vadd.xlane.f32.xlu0 %v4029_v8  ;;  %v4038_v38 = vsel %vm359_vm1, %v13761_v61, 0.0 }
0x1338   :  { %v4032_v18 = vsel %vm359_vm1, %v13757_v0, 0.0 }
0x1339   :  { %4033 = vadd.xlane.f32.xlu1 %v4032_v18 }
0x133a   :  { %v10701_v58 = vpop.f32.mrb[44].mxu0 }
0x133b   :  { %4036 = vadd.xlane.f32.xlu0 %v4035_v11  ;;  %v3974_v21 = vpop.f32.mrb[45].mxu0  ;;  %v13777_v56 = vadd.f32 %v10701_v58, %v635_v17 }
0x133c   :  { %v13771_v53 = vadd.f32 %v3974_v21, %v633_v37  ;;  %v10702_v3 = vpop.f32.mrb[46].mxu0 }
0x133d   :  { %4039 = vadd.xlane.f32.xlu1 %v4038_v38  ;;  %v3977_v39 = vpop.f32.mrb[47].mxu0  ;;  %v13785_v26 = vadd.f32 %v10702_v3, %v636_v28  ;;  %v4047_v31 = vsel %vm359_vm1, %v13777_v56, 0.0 }
0x133e   :  { %v13781_v60 = vadd.f32 %v3977_v39, %v634_v9  ;;  %v4041_v40 = vsel %vm359_vm1, %v13771_v53, 0.0 }
0x133f   :  { %4042 = vadd.xlane.f32.xlu0 %v4041_v40  ;;  %v4050_v2 = vsel %vm359_vm1, %v13785_v26, 0.0 }
0x1340   :  { %v4044_v33 = vsel %vm359_vm1, %v13781_v60, 0.0 }
0x1341   :  { %4045 = vadd.xlane.f32.xlu1 %v4044_v33 }
0x1343   :  { %4048 = vadd.xlane.f32.xlu0 %v4047_v31 }
0x1345   :  { %4051 = vadd.xlane.f32.xlu1 %v4050_v2 }
0x13ac   :  { %v4007_v44 = vpop.xlane.xlu1 %4006 }
0x13ad   :  { %v4053_v46 = vmul.f32 0.03125, %v4007_v44 }
0x13ae   :  { %v4010_v63 = vpop.xlane.xlu0 %4009 }
0x13af   :  { %v13794_v34 = vsub.f32 %v13699_v59, %v4053_v46  ;;  %v4054_v10 = vmul.f32 0.03125, %v4010_v63 }
0x13b0   :  { %v4016_v41 = vpop.xlane.xlu1 %4015 }
0x13b1   :  { %v13797_v14 = vsub.f32 %v13709_v25, %v4054_v10  ;;  %v4056_v47 = vmul.f32 0.03125, %v4016_v41  ;;  %v4085_v32 = vmul.f32 %v13794_v34, %v13794_v34 }
0x13b2   :  { %v4013_v45 = vpop.xlane.xlu0 %4012 }
0x13b3   :  { %v13802_v36 = vsub.f32 %v13707_v54, %v4056_v47  ;;  %v4055_v35 = vmul.f32 0.03125, %v4013_v45  ;;  %v4101_v42 = vsel %vm359_vm1, %v4085_v32, 0.0  ;;  %v4086_v20 = vmul.f32 %v13797_v14, %v13797_v14 }
0x13b4   :  { %4102 = vadd.xlane.f32.xlu0 %v4101_v42 }
0x13b5   :  { %v13808_v4 = vsub.f32 %v13713_v24, %v4055_v35  ;;  %v4104_v7 = vsel %vm359_vm1, %v4086_v20, 0.0  ;;  %v4088_v49 = vmul.f32 %v13802_v36, %v13802_v36 }
0x13b6   :  { %v4019_v16 = vpop.xlane.xlu0 %4018  ;;  %4105 = vadd.xlane.f32.xlu1 %v4104_v7  ;;  %v4022_v29 = vpop.xlane.xlu1 %4021 }
0x13b7   :  { %v4057_v23 = vmul.f32 0.03125, %v4019_v16  ;;  %v4058_v19 = vmul.f32 0.03125, %v4022_v29  ;;  %v4087_v55 = vmul.f32 %v13808_v4, %v13808_v4  ;;  %v4110_v6 = vsel %vm359_vm1, %v4088_v49, 0.0 }
0x13b9   :  { %v13816_v62 = vsub.f32 %v13721_v15, %v4057_v23  ;;  %v13819_v1 = vsub.f32 %v13731_v52, %v4058_v19  ;;  %v4107_v27 = vsel %vm359_vm1, %v4087_v55, 0.0 }
0x13ba   :  { %v4025_v57 = vpop.xlane.xlu0 %4024  ;;  %4108 = vadd.xlane.f32.xlu0 %v4107_v27  ;;  %4111 = vadd.xlane.f32.xlu1 %v4110_v6  ;;  %v4028_v30 = vpop.xlane.xlu1 %4027 }
0x13bb   :  { %v4059_v51 = vmul.f32 0.03125, %v4025_v57  ;;  %v4060_v22 = vmul.f32 0.03125, %v4028_v30  ;;  %v4089_v13 = vmul.f32 %v13816_v62, %v13816_v62  ;;  %v4090_v50 = vmul.f32 %v13819_v1, %v13819_v1 }
0x13bd   :  { %v13828_v8 = vsub.f32 %v13733_v48, %v4059_v51  ;;  %v13831_v18 = vsub.f32 %v13735_v5, %v4060_v22  ;;  %v4113_v58 = vsel %vm359_vm1, %v4089_v13, 0.0  ;;  %v4116_v11 = vsel %vm359_vm1, %v4090_v50, 0.0 }
0x13be   :  { %4114 = vadd.xlane.f32.xlu0 %v4113_v58  ;;  %4117 = vadd.xlane.f32.xlu1 %v4116_v11 }
0x13bf   :  { %v4091_v37 = vmul.f32 %v13828_v8, %v13828_v8  ;;  %v4092_v21 = vmul.f32 %v13831_v18, %v13831_v18 }
0x13c1   :  { %v4119_v17 = vsel %vm359_vm1, %v4091_v37, 0.0  ;;  %v4122_v3 = vsel %vm359_vm1, %v4092_v21, 0.0  ;;  %v11462_v21 = vld [vmem:[%s16221_s5] sm:$0xff]  }
0x13c2   :  { %4120 = vadd.xlane.f32.xlu0 %v4119_v17  ;;  %4123 = vadd.xlane.f32.xlu1 %v4122_v3 }
0x13c3   :  { %10703 = vmatprep.subr.bf16.mxu1 %v11462_v21 }
0x13c4   :  { %v4031_v38 = vpop.xlane.xlu0 %4030  ;;  %10704 = vmatpush3.bf16.msra.mxu1 %v11462_v21 }
0x13c5   :  { %v4061_v9 = vmul.f32 0.03125, %v4031_v38 }
0x13c6   :  { %v4034_v39 = vpop.xlane.xlu1 %4033 }
0x13c7   :  { %v13842_v28 = vsub.f32 %v13749_v43, %v4061_v9  ;;  %v4062_v40 = vmul.f32 0.03125, %v4034_v39  ;;  %v11463_v9 = vld [vmem:[%s16221_s5 + $0x8] sm:$0xff]  }
0x13c8   :  { %v4037_v33 = vpop.xlane.xlu0 %4036  ;;  %10705 = vmatprep.subr.bf16.mxu1 %v11463_v9 }
0x13c9   :  { %v13845_v31 = vsub.f32 %v13757_v0, %v4062_v40  ;;  %v4063_v2 = vmul.f32 0.03125, %v4037_v33  ;;  %v4093_v44 = vmul.f32 %v13842_v28, %v13842_v28  ;;  %10706 = vmatpush3.bf16.msra.mxu1 %v11463_v9 }
0x13ca   :  { %v4040_v46 = vpop.xlane.xlu1 %4039 }
0x13cb   :  { %v13850_v63 = vsub.f32 %v13753_v12, %v4063_v2  ;;  %v4064_v10 = vmul.f32 0.03125, %v4040_v46  ;;  %v4125_v41 = vsel %vm359_vm1, %v4093_v44, 0.0  ;;  %v4094_v47 = vmul.f32 %v13845_v31, %v13845_v31 }
0x13cc   :  { %v4043_v32 = vpop.xlane.xlu0 %4042  ;;  %4126 = vadd.xlane.f32.xlu0 %v4125_v41 }
0x13cd   :  { %v13856_v45 = vsub.f32 %v13761_v61, %v4064_v10  ;;  %v4065_v35 = vmul.f32 0.03125, %v4043_v32  ;;  %v4128_v42 = vsel %vm359_vm1, %v4094_v47, 0.0  ;;  %v4095_v20 = vmul.f32 %v13850_v63, %v13850_v63 }
0x13ce   :  { %4129 = vadd.xlane.f32.xlu1 %v4128_v42  ;;  %v4046_v7 = vpop.xlane.xlu1 %4045 }
0x13cf   :  { %v13862_v49 = vsub.f32 %v13771_v53, %v4065_v35  ;;  %v4066_v16 = vmul.f32 0.03125, %v4046_v7  ;;  %v4131_v29 = vsel %vm359_vm1, %v4095_v20, 0.0  ;;  %v4096_v23 = vmul.f32 %v13856_v45, %v13856_v45 }
0x13d0   :  { %v4049_v19 = vpop.xlane.xlu0 %4048  ;;  %4132 = vadd.xlane.f32.xlu0 %v4131_v29 }
0x13d1   :  { %v13868_v55 = vsub.f32 %v13781_v60, %v4066_v16  ;;  %v4067_v27 = vmul.f32 0.03125, %v4049_v19  ;;  %v4134_v6 = vsel %vm359_vm1, %v4096_v23, 0.0  ;;  %v4097_v57 = vmul.f32 %v13862_v49, %v13862_v49 }
0x13d2   :  { %4135 = vadd.xlane.f32.xlu1 %v4134_v6  ;;  %v4052_v30 = vpop.xlane.xlu1 %4051 }
0x13d3   :  { %v13874_v51 = vsub.f32 %v13777_v56, %v4067_v27  ;;  %v4068_v22 = vmul.f32 0.03125, %v4052_v30  ;;  %v4137_v13 = vsel %vm359_vm1, %v4097_v57, 0.0  ;;  %v4098_v50 = vmul.f32 %v13868_v55, %v13868_v55  ;;  %v13898_v30 = vld [vmem:[%s16219_s7 + $0x2] ss:$0 sm:$0xff] }
0x13d4   :  { %4138 = vadd.xlane.f32.xlu0 %v4137_v13 }
0x13d5   :  { %v13880_v58 = vsub.f32 %v13785_v26, %v4068_v22  ;;  %v4140_v11 = vsel %vm359_vm1, %v4098_v50, 0.0  ;;  %v4099_v37 = vmul.f32 %v13874_v51, %v13874_v51 }
0x13d6   :  { %4141 = vadd.xlane.f32.xlu1 %v4140_v11 }
0x13d7   :  { %v4143_v17 = vsel %vm359_vm1, %v4099_v37, 0.0  ;;  %v4100_v3 = vmul.f32 %v13880_v58, %v13880_v58 }
0x13d8   :  { %4144 = vadd.xlane.f32.xlu0 %v4143_v17 }
0x13d9   :  { %v4146_v38 = vsel %vm359_vm1, %v4100_v3, 0.0 }
0x13da   :  { %4147 = vadd.xlane.f32.xlu1 %v4146_v38  ;;  %v13906_v38 = vld [vmem:[%s16219_s7 + $0x3] ss:$0 sm:$0xff] }
0x1441   :  { %v4103_v39 = vpop.xlane.xlu0 %4102 }
0x1442   :  { %v4149_v40 = vmul.f32 0.03125, %v4103_v39 }
0x1443   :  { %v4106_v33 = vpop.xlane.xlu1 %4105 }
0x1444   :  { %v4165_v2 = vadd.f32 1e-05, %v4149_v40  ;;  %v4150_v44 = vmul.f32 0.03125, %v4106_v33 }
0x1446   :  { %11778 = vrsqrt.f32 %v4165_v2  ;;  %v4166_v46 = vadd.f32 1e-05, %v4150_v44 }
0x1447   :  { %v4109_v10 = vpop.xlane.xlu0 %4108  ;;  %v4112_v41 = vpop.xlane.xlu1 %4111 }
0x1448   :  { %11780 = vrsqrt.f32 %v4166_v46  ;;  %v4151_v47 = vmul.f32 0.03125, %v4109_v10  ;;  %v4152_v32 = vmul.f32 0.03125, %v4112_v41 }
0x144a   :  { %v4167_v35 = vadd.f32 1e-05, %v4151_v47  ;;  %v4168_v42 = vadd.f32 1e-05, %v4152_v32 }
0x144b   :  { %v4115_v20 = vpop.xlane.xlu0 %4114  ;;  %v4118_v7 = vpop.xlane.xlu1 %4117 }
0x144c   :  { %11782 = vrsqrt.f32 %v4167_v35  ;;  %v4153_v16 = vmul.f32 0.03125, %v4115_v20  ;;  %v4154_v29 = vmul.f32 0.03125, %v4118_v7 }
0x144d   :  { %11784 = vrsqrt.f32 %v4168_v42 }
0x144e   :  { %v4169_v23 = vadd.f32 1e-05, %v4153_v16  ;;  %v4170_v19 = vadd.f32 1e-05, %v4154_v29 }
0x144f   :  { %v4121_v27 = vpop.xlane.xlu0 %4120  ;;  %v4124_v6 = vpop.xlane.xlu1 %4123 }
0x1450   :  { %v11779_v57 = vpop.eup %11778  ;;  %11786 = vrsqrt.f32 %v4169_v23  ;;  %v4155_v22 = vmul.f32 0.03125, %v4121_v27  ;;  %v4156_v13 = vmul.f32 0.03125, %v4124_v6 }
0x1451   :  { %11788 = vrsqrt.f32 %v4170_v19  ;;  %v4197_v50 = vmul.f32 %v11779_v57, %v13794_v34 }
0x1452   :  { %v11781_v11 = vpop.eup %11780  ;;  %v4171_v37 = vadd.f32 1e-05, %v4155_v22  ;;  %v4172_v21 = vadd.f32 1e-05, %v4156_v13 }
0x1453   :  { %v4198_v17 = vmul.f32 %v11781_v11, %v13797_v14  ;;  %v4217_v3 = vmul.f32 %v13898_v30, %v4197_v50 }
0x1454   :  { %11790 = vrsqrt.f32 %v4171_v37 }
0x1455   :  { %11792 = vrsqrt.f32 %v4172_v21  ;;  %v4218_v9 = vmul.f32 %v13898_v30, %v4198_v17  ;;  %v4237_v33 = vadd.f32 %v13906_v38, %v4217_v3 }
0x1456   :  { %v11783_v39 = vpop.eup %11782 }
0x1457   :  { %v11785_v40 = vpop.eup %11784  ;;  %v4199_v34 = vmul.f32 %v11783_v39, %v13808_v4  ;;  %v4238_v2 = vadd.f32 %v13906_v38, %v4218_v9 }
0x1458   :  { %v4200_v14 = vmul.f32 %v11785_v40, %v13802_v36 }
0x1459   :  { %v4219_v44 = vmul.f32 %v13898_v30, %v4199_v34  ;;  %v4127_v46 = vpop.xlane.xlu0 %4126  ;;  %v4253_v10 = vpack.c.bf16 %v4238_v2, %v4237_v33 }
0x145a   :  { %v11787_v41 = vpop.eup %11786  ;;  %v4220_v47 = vmul.f32 %v13898_v30, %v4200_v14  ;;  %v4157_v32 = vmul.f32 0.03125, %v4127_v46 }
0x145b   :  { %v11789_v35 = vpop.eup %11788  ;;  %v4239_v42 = vadd.f32 %v13906_v38, %v4219_v44  ;;  %10707 = vmatprep.mubr.msk.bf16.mxu1 %vm359_vm1, %v4253_v10  ;;  %v4130_v4 = vpop.xlane.xlu1 %4129  ;;  %v4201_v20 = vmul.f32 %v11787_v41, %v13816_v62 }
0x145c   :  { %v4240_v7 = vadd.f32 %v13906_v38, %v4220_v47  ;;  %v4173_v16 = vadd.f32 1e-05, %v4157_v32  ;;  %v4158_v36 = vmul.f32 0.03125, %v4130_v4  ;;  %v4202_v29 = vmul.f32 %v11789_v35, %v13819_v1 }
0x145d   :  { %v4133_v23 = vpop.xlane.xlu0 %4132  ;;  %v4221_v19 = vmul.f32 %v13898_v30, %v4201_v20 }
0x145e   :  { %v11791_v27 = vpop.eup %11790  ;;  %11794 = vrsqrt.f32 %v4173_v16  ;;  %v4174_v6 = vadd.f32 1e-05, %v4158_v36  ;;  %v4159_v57 = vmul.f32 0.03125, %v4133_v23  ;;  %v4254_v22 = vpack.c.bf16 %v4240_v7, %v4239_v42 }
0x145f   :  { %v11793_v13 = vpop.eup %11792  ;;  %v4136_v50 = vpop.xlane.xlu1 %4135  ;;  %v4222_v11 = vmul.f32 %v13898_v30, %v4202_v29  ;;  %v4241_v62 = vadd.f32 %v13906_v38, %v4221_v19  ;;  %v4203_v37 = vmul.f32 %v11791_v27, %v13828_v8 }
0x1460   :  { %11796 = vrsqrt.f32 %v4174_v6  ;;  %v4175_v21 = vadd.f32 1e-05, %v4159_v57  ;;  %10708 = vmatmul.mubr.msk.bf16.vlgmr.msra.gmra.mrb[152].mxu1 %vm359_vm1, %v4254_v22  ;;  %v4160_v1 = vmul.f32 0.03125, %v4136_v50  ;;  %v4204_v17 = vmul.f32 %v11793_v13, %v13831_v18 }
0x1461   :  { %v4139_v3 = vpop.xlane.xlu0 %4138  ;;  %v4242_v9 = vadd.f32 %v13906_v38, %v4222_v11  ;;  %v4223_v39 = vmul.f32 %v13898_v30, %v4203_v37 }
0x1462   :  { %11798 = vrsqrt.f32 %v4175_v21  ;;  %v4176_v40 = vadd.f32 1e-05, %v4160_v1  ;;  %v4161_v34 = vmul.f32 0.03125, %v4139_v3  ;;  %v4224_v33 = vmul.f32 %v13898_v30, %v4204_v17 }
0x1463   :  { %v4255_v2 = vpack.c.bf16 %v4242_v9, %v4241_v62  ;;  %v4142_v14 = vpop.xlane.xlu1 %4141  ;;  %v4243_v8 = vadd.f32 %v13906_v38, %v4223_v39 }
0x1464   :  { %11800 = vrsqrt.f32 %v4176_v40  ;;  %v4177_v44 = vadd.f32 1e-05, %v4161_v34  ;;  %v4162_v46 = vmul.f32 0.03125, %v4142_v14  ;;  %v4244_v10 = vadd.f32 %v13906_v38, %v4224_v33 }
0x1465   :  { %10711 = vmatprep.mubr.msk.bf16.mxu1 %vm359_vm1, %v4255_v2  ;;  %v4145_v18 = vpop.xlane.xlu0 %4144 }
0x1466   :  { %11802 = vrsqrt.f32 %v4177_v44  ;;  %v4178_v41 = vadd.f32 1e-05, %v4162_v46  ;;  %v4163_v47 = vmul.f32 0.03125, %v4145_v18  ;;  %v4256_v32 = vpack.c.bf16 %v4244_v10, %v4243_v8  ;;  %v11464_v10 = vld [vmem:[%s16222_s6] sm:$0xff]  }
0x1467   :  { %v4148_v35 = vpop.xlane.xlu1 %4147  ;;  %10723 = vmatprep.subr.bf16.mxu0 %v11464_v10  ;;  %v11468_v18 = vld [vmem:[%s16222_s6 + $0x20] sm:$0xff]  }
0x1468   :  { %v11795_v42 = vpop.eup %11794  ;;  %11804 = vrsqrt.f32 %v4178_v41  ;;  %v4179_v4 = vadd.f32 1e-05, %v4163_v47  ;;  %10712 = vmatmul.mubr.msk.bf16.gmra.mrb[156].mxu1 %vm359_vm1, %v4256_v32  ;;  %v4164_v20 = vmul.f32 0.03125, %v4148_v35  ;;  %10724 = vmatpush3.bf16.msra.mxu0 %v11464_v10  ;;  %v11469_v41 = vld [vmem:[%s16222_s6 + $0x28] sm:$0xff]   ;;  %v11470_v47 = vld [vmem:[%s16222_s6 + $0x30] sm:$0xff]   ;;  %v11471_v32 = vld [vmem:[%s16222_s6 + $0x38] sm:$0xff]  }
0x1469   :  { %v4205_v7 = vmul.f32 %v11795_v42, %v13842_v28  ;;  %v13988_v35 = vld [vmem:[%s16219_s7 + $0x6] ss:$0 sm:$0xff] }
0x146a   :  { %v11797_v16 = vpop.eup %11796  ;;  %11806 = vrsqrt.f32 %v4179_v4  ;;  %v4180_v36 = vadd.f32 1e-05, %v4164_v20 }
0x146b   :  { %v4206_v29 = vmul.f32 %v11797_v16, %v13845_v31  ;;  %v4225_v23 = vmul.f32 %v13898_v30, %v4205_v7 }
0x146c   :  { %v11799_v19 = vpop.eup %11798  ;;  %11808 = vrsqrt.f32 %v4180_v36 }
0x146d   :  { %v4226_v27 = vmul.f32 %v13898_v30, %v4206_v29  ;;  %v4207_v6 = vmul.f32 %v11799_v19, %v13850_v63  ;;  %v4245_v22 = vadd.f32 %v13906_v38, %v4225_v23 }
0x146e   :  { %v11801_v57 = vpop.eup %11800 }
0x146f   :  { %v4246_v13 = vadd.f32 %v13906_v38, %v4226_v27  ;;  %v4208_v28 = vmul.f32 %v11801_v57, %v13856_v45  ;;  %v4227_v50 = vmul.f32 %v13898_v30, %v4207_v6 }
0x1470   :  { %v11803_v11 = vpop.eup %11802 }
0x1471   :  { %v4257_v62 = vpack.c.bf16 %v4246_v13, %v4245_v22  ;;  %v4228_v31 = vmul.f32 %v13898_v30, %v4208_v28  ;;  %v4209_v37 = vmul.f32 %v11803_v11, %v13862_v49  ;;  %v4247_v63 = vadd.f32 %v13906_v38, %v4227_v50 }
0x1472   :  { %v11805_v21 = vpop.eup %11804 }
0x1473   :  { %10715 = vmatprep.mubr.msk.bf16.mxu1 %vm359_vm1, %v4257_v62  ;;  %v4248_v1 = vadd.f32 %v13906_v38, %v4228_v31  ;;  %v4210_v17 = vmul.f32 %v11805_v21, %v13868_v55  ;;  %v4229_v3 = vmul.f32 %v13898_v30, %v4209_v37 }
0x1474   :  { %v11807_v45 = vpop.eup %11806 }
0x1475   :  { %v4258_v9 = vpack.c.bf16 %v4248_v1, %v4247_v63  ;;  %v4230_v39 = vmul.f32 %v13898_v30, %v4210_v17  ;;  %v4211_v40 = vmul.f32 %v11807_v45, %v13874_v51  ;;  %v4249_v49 = vadd.f32 %v13906_v38, %v4229_v3 }
0x1476   :  { %v11809_v34 = vpop.eup %11808 }
0x1477   :  { %10716 = vmatmul.mubr.msk.bf16.gmra.mrb[160].mxu1 %vm359_vm1, %v4258_v9  ;;  %v4250_v33 = vadd.f32 %v13906_v38, %v4230_v39  ;;  %v4212_v2 = vmul.f32 %v11809_v34, %v13880_v58  ;;  %v4231_v14 = vmul.f32 %v13898_v30, %v4211_v40  ;;  %v11465_v58 = vld [vmem:[%s16222_s6 + $0x8] sm:$0xff]  }
0x1478   :  { %10725 = vmatprep.subr.bf16.mxu0 %v11465_v58 }
0x1479   :  { %v4259_v55 = vpack.c.bf16 %v4250_v33, %v4249_v49  ;;  %v4232_v8 = vmul.f32 %v13898_v30, %v4212_v2  ;;  %v4251_v44 = vadd.f32 %v13906_v38, %v4231_v14  ;;  %10726 = vmatpush3.bf16.msra.mxu0 %v11465_v58  ;;  %v11466_v30 = vld [vmem:[%s16222_s6 + $0x10] sm:$0xff]  }
0x147a   :  { %10727 = vmatprep.subr.bf16.mxu0 %v11466_v30 }
0x147b   :  { %10719 = vmatprep.mubr.msk.bf16.mxu1 %vm359_vm1, %v4259_v55  ;;  %v4252_v51 = vadd.f32 %v13906_v38, %v4232_v8  ;;  %v11467_v38 = vld [vmem:[%s16222_s6 + $0x18] sm:$0xff]  }
0x147d   :  { %v4260_v46 = vpack.c.bf16 %v4252_v51, %v4251_v44  ;;  %10728 = vmatpush3.bf16.msra.mxu0 %v11466_v30 }
0x147e   :  { %10729 = vmatprep.subr.bf16.mxu0 %v11467_v38 }
0x147f   :  { %10720 = vmatmul.mubr.msk.bf16.gmra.mrb[164].mxu1 %vm359_vm1, %v4260_v46 }
0x1481   :  { %10730 = vmatpush3.bf16.msra.mxu0 %v11467_v38 }
0x1482   :  { %10731 = vmatprep.subr.bf16.mxu0 %v11468_v18 }
0x1485   :  { %10732 = vmatpush3.bf16.msra.mxu0 %v11468_v18 }
0x1486   :  { %10733 = vmatprep.subr.bf16.mxu0 %v11469_v41 }
0x1489   :  { %10734 = vmatpush3.bf16.msra.mxu0 %v11469_v41 }
0x148a   :  { %10735 = vmatprep.subr.bf16.mxu0 %v11470_v47 }
0x148d   :  { %10736 = vmatpush3.bf16.msra.mxu0 %v11470_v47 }
0x148e   :  { %10737 = vmatprep.subr.bf16.mxu0 %v11471_v32 }
0x1491   :  { %10738 = vmatpush3.bf16.msra.mxu0 %v11471_v32 }
0x1533   :  { %v10709_v42 = vpop.f32.mrb[152].mxu1 }
0x1534   :  { %v13991_v4 = vadd.f32 %v10709_v42, %v13988_v35  ;;  %v4339_v20 = vpop.f32.mrb[153].mxu1 }
0x1535   :  { %v13994_v7 = vadd.f32 %v13988_v35, %v4339_v20  ;;  %v10710_v16 = vpop.f32.mrb[154].mxu1 }
0x1536   :  { %v4404_v36 = vmul.f32 %v13991_v4, %v13991_v4  ;;  %v13999_v29 = vadd.f32 %v10710_v16, %v13988_v35  ;;  %v4342_v23 = vpop.f32.mrb[155].mxu1 }
0x1537   :  { %v4402_v19 = vmul.f32 %v13994_v7, %v13994_v7  ;;  %v14004_v27 = vadd.f32 %v13988_v35, %v4342_v23 }
0x1538   :  { %v4420_v6 = vmul.f32 %v4404_v36, %v13991_v4  ;;  %v4405_v57 = vmul.f32 %v13999_v29, %v13999_v29 }
0x1539   :  { %v4418_v22 = vmul.f32 %v4402_v19, %v13994_v7  ;;  %v4403_v13 = vmul.f32 %v14004_v27, %v14004_v27 }
0x153a   :  { %v4436_v28 = vmul.f32 0.044715, %v4420_v6  ;;  %v4421_v50 = vmul.f32 %v4405_v57, %v13999_v29 }
0x153b   :  { %v4434_v11 = vmul.f32 0.044715, %v4418_v22  ;;  %v4419_v62 = vmul.f32 %v4403_v13, %v14004_v27  ;;  %v10713_v31 = vpop.f32.mrb[156].mxu1 }
0x153c   :  { %v4452_v37 = vadd.f32 %v4436_v28, %v13991_v4  ;;  %v4437_v21 = vmul.f32 0.044715, %v4421_v50  ;;  %v14016_v63 = vadd.f32 %v10713_v31, %v13988_v35  ;;  %v4355_v1 = vpop.f32.mrb[157].mxu1 }
0x153d   :  { %v4450_v17 = vadd.f32 %v4434_v11, %v13994_v7  ;;  %v4435_v3 = vmul.f32 0.044715, %v4419_v62  ;;  %v14020_v45 = vadd.f32 %v13988_v35, %v4355_v1  ;;  %v10714_v9 = vpop.f32.mrb[158].mxu1 }
0x153e   :  { %v4468_v39 = vmul.f32 0.7978846, %v4452_v37  ;;  %v4453_v40 = vadd.f32 %v4437_v21, %v13999_v29  ;;  %v4408_v34 = vmul.f32 %v14016_v63, %v14016_v63  ;;  %v14026_v49 = vadd.f32 %v10714_v9, %v13988_v35  ;;  %v4358_v33 = vpop.f32.mrb[159].mxu1 }
0x153f   :  { %v4466_v2 = vmul.f32 0.7978846, %v4450_v17  ;;  %v4451_v14 = vadd.f32 %v4435_v3, %v14004_v27  ;;  %v4406_v55 = vmul.f32 %v14020_v45, %v14020_v45  ;;  %v14032_v8 = vadd.f32 %v13988_v35, %v4358_v33 }
0x1540   :  { %11810 = vtanh.f32 %v4468_v39  ;;  %v4469_v44 = vmul.f32 0.7978846, %v4453_v40  ;;  %v4424_v51 = vmul.f32 %v4408_v34, %v14016_v63  ;;  %v4409_v46 = vmul.f32 %v14026_v49, %v14026_v49 }
0x1541   :  { %11812 = vtanh.f32 %v4466_v2  ;;  %v4467_v10 = vmul.f32 0.7978846, %v4451_v14  ;;  %v4422_v58 = vmul.f32 %v4406_v55, %v14020_v45  ;;  %v4407_v30 = vmul.f32 %v14032_v8, %v14032_v8 }
0x1542   :  { %11814 = vtanh.f32 %v4469_v44  ;;  %v4440_v38 = vmul.f32 0.044715, %v4424_v51  ;;  %v4425_v18 = vmul.f32 %v4409_v46, %v14026_v49 }
0x1543   :  { %11816 = vtanh.f32 %v4467_v10  ;;  %v4438_v41 = vmul.f32 0.044715, %v4422_v58  ;;  %v4423_v47 = vmul.f32 %v4407_v30, %v14032_v8 }
0x1544   :  { %v4456_v32 = vadd.f32 %v4440_v38, %v14016_v63  ;;  %v4441_v42 = vmul.f32 0.044715, %v4425_v18 }
0x1545   :  { %v4454_v20 = vadd.f32 %v4438_v41, %v14020_v45  ;;  %v4439_v16 = vmul.f32 0.044715, %v4423_v47 }
0x1546   :  { %v4472_v36 = vmul.f32 0.7978846, %v4456_v32  ;;  %v4457_v19 = vadd.f32 %v4441_v42, %v14026_v49 }
0x1547   :  { %v4470_v23 = vmul.f32 0.7978846, %v4454_v20  ;;  %v4455_v6 = vadd.f32 %v4439_v16, %v14032_v8 }
0x1548   :  { %11818 = vtanh.f32 %v4472_v36  ;;  %v4473_v11 = vmul.f32 0.7978846, %v4457_v19 }
0x1549   :  { %v4471_v57 = vmul.f32 0.7978846, %v4455_v6  ;;  %11820 = vtanh.f32 %v4470_v23 }
0x154a   :  { %v11811_v22 = vpop.eup %11810  ;;  %v10717_v13 = vpop.f32.mrb[160].mxu1 }
0x154b   :  { %v11813_v28 = vpop.eup %11812  ;;  %v4500_v50 = vadd.f32 1.0, %v11811_v22  ;;  %v14047_v62 = vadd.f32 %v10717_v13, %v13988_v35  ;;  %v4371_v31 = vpop.f32.mrb[161].mxu1  ;;  %11822 = vtanh.f32 %v4471_v57 }
0x154c   :  { %v11815_v37 = vpop.eup %11814  ;;  %v14050_v21 = vadd.f32 %v13988_v35, %v4371_v31  ;;  %v10718_v1 = vpop.f32.mrb[162].mxu1  ;;  %v4498_v17 = vadd.f32 1.0, %v11813_v28  ;;  %11824 = vtanh.f32 %v4473_v11 }
0x154d   :  { %v11817_v3 = vpop.eup %11816  ;;  %v4516_v9 = vmul.f32 0.5, %v4500_v50  ;;  %v4501_v39 = vadd.f32 1.0, %v11815_v37  ;;  %v4412_v40 = vmul.f32 %v14047_v62, %v14047_v62  ;;  %v14055_v34 = vadd.f32 %v10718_v1, %v13988_v35  ;;  %v4374_v33 = vpop.f32.mrb[163].mxu1 }
0x154e   :  { %v4410_v2 = vmul.f32 %v14050_v21, %v14050_v21  ;;  %v14060_v14 = vadd.f32 %v13988_v35, %v4374_v33  ;;  %v4499_v55 = vadd.f32 1.0, %v11817_v3  ;;  %v4514_v44 = vmul.f32 0.5, %v4498_v17 }
0x154f   :  { %v4517_v51 = vmul.f32 0.5, %v4501_v39  ;;  %v4428_v46 = vmul.f32 %v4412_v40, %v14047_v62  ;;  %v4413_v10 = vmul.f32 %v14055_v34, %v14055_v34  ;;  %v4532_v18 = vmul.f32 %v4516_v9, %v13991_v4 }
0x1550   :  { %v4426_v58 = vmul.f32 %v4410_v2, %v14050_v21  ;;  %v4411_v30 = vmul.f32 %v14060_v14, %v14060_v14  ;;  %v4515_v38 = vmul.f32 0.5, %v4499_v55  ;;  %v4530_v36 = vmul.f32 %v4514_v44, %v13994_v7 }
0x1551   :  { %v4533_v41 = vmul.f32 %v4517_v51, %v13999_v29  ;;  %v4444_v47 = vmul.f32 0.044715, %v4428_v46  ;;  %v4429_v32 = vmul.f32 %v4413_v10, %v14055_v34 }
0x1552   :  { %v4442_v42 = vmul.f32 0.044715, %v4426_v58  ;;  %v4427_v20 = vmul.f32 %v4411_v30, %v14060_v14  ;;  %v10721_v16 = vpop.f32.mrb[164].mxu1  ;;  %v4531_v23 = vmul.f32 %v4515_v38, %v14004_v27  ;;  %v11819_v29 = vpop.eup %11818 }
0x1553   :  { %v4547_v19 = vpack.c.bf16 %v4533_v41, %v4532_v18  ;;  %v4460_v6 = vadd.f32 %v4444_v47, %v14047_v62  ;;  %v4445_v57 = vmul.f32 0.044715, %v4429_v32  ;;  %v14076_v22 = vadd.f32 %v10721_v16, %v13988_v35  ;;  %v4387_v4 = vpop.f32.mrb[165].mxu1  ;;  %v11821_v7 = vpop.eup %11820 }
0x1554   :  { %v4458_v13 = vadd.f32 %v4442_v42, %v14050_v21  ;;  %v4443_v28 = vmul.f32 0.044715, %v4427_v20  ;;  %v14080_v50 = vadd.f32 %v13988_v35, %v4387_v4  ;;  %v10722_v11 = vpop.f32.mrb[166].mxu1  ;;  %v4546_v31 = vpack.c.bf16 %v4531_v23, %v4530_v36 }
0x1555   :  { %v4476_v37 = vmul.f32 0.7978846, %v4460_v6  ;;  %v4461_v27 = vadd.f32 %v4445_v57, %v14055_v34  ;;  %v4416_v1 = vmul.f32 %v14076_v22, %v14076_v22  ;;  %v14086_v17 = vadd.f32 %v10722_v11, %v13988_v35  ;;  %v4390_v3 = vpop.f32.mrb[167].mxu1  ;;  %v11823_v9 = vpop.eup %11822 }
0x1556   :  { %v4474_v39 = vmul.f32 0.7978846, %v4458_v13  ;;  %v4459_v40 = vadd.f32 %v4443_v28, %v14060_v14  ;;  %v4414_v33 = vmul.f32 %v14080_v50, %v14080_v50  ;;  %v14092_v2 = vadd.f32 %v13988_v35, %v4390_v3  ;;  %10739 = vmatprep.mubr.bf16.mxu0 %v4546_v31  ;;  %v11825_v30 = vpop.eup %11824 }
0x1557   :  { %11826 = vtanh.f32 %v4476_v37  ;;  %v4477_v55 = vmul.f32 0.7978846, %v4461_v27  ;;  %v4432_v44 = vmul.f32 %v4416_v1, %v14076_v22  ;;  %v4417_v51 = vmul.f32 %v14086_v17, %v14086_v17  ;;  %10740 = vmatmul.mubr.bf16.vlgmr.msra.gmra.mrb[88].mxu0 %v4547_v19 }
0x1558   :  { %11828 = vtanh.f32 %v4474_v39  ;;  %v4475_v46 = vmul.f32 0.7978846, %v4459_v40  ;;  %v4430_v10 = vmul.f32 %v4414_v33, %v14080_v50  ;;  %v4415_v58 = vmul.f32 %v14092_v2, %v14092_v2 }
0x1559   :  { %11830 = vtanh.f32 %v4477_v55  ;;  %v4448_v35 = vmul.f32 0.044715, %v4432_v44  ;;  %v4433_v38 = vmul.f32 %v4417_v51, %v14086_v17  ;;  %v4502_v18 = vadd.f32 1.0, %v11821_v7 }
0x155a   :  { %11832 = vtanh.f32 %v4475_v46  ;;  %v4446_v41 = vmul.f32 0.044715, %v4430_v10  ;;  %v4431_v47 = vmul.f32 %v4415_v58, %v14092_v2  ;;  %v4503_v32 = vadd.f32 1.0, %v11823_v9 }
0x155b   :  { %v4464_v42 = vadd.f32 %v4448_v35, %v14076_v22  ;;  %v4449_v20 = vmul.f32 0.044715, %v4433_v38  ;;  %v4518_v16 = vmul.f32 0.5, %v4502_v18  ;;  %v4504_v36 = vadd.f32 1.0, %v11819_v29 }
0x155c   :  { %v4462_v23 = vadd.f32 %v4446_v41, %v14080_v50  ;;  %v4447_v19 = vmul.f32 0.044715, %v4431_v47  ;;  %v4519_v6 = vmul.f32 0.5, %v4503_v32  ;;  %v4505_v57 = vadd.f32 1.0, %v11825_v30 }
0x155d   :  { %v4480_v4 = vmul.f32 0.7978846, %v4464_v42  ;;  %v4465_v13 = vadd.f32 %v4449_v20, %v14086_v17  ;;  %v4534_v28 = vmul.f32 %v4518_v16, %v14020_v45  ;;  %v4520_v11 = vmul.f32 0.5, %v4504_v36 }
0x155e   :  { %v4478_v31 = vmul.f32 0.7978846, %v4462_v23  ;;  %v4463_v7 = vadd.f32 %v4447_v19, %v14092_v2  ;;  %v4535_v37 = vmul.f32 %v4519_v6, %v14032_v8  ;;  %v4521_v27 = vmul.f32 0.5, %v4505_v57 }
0x155f   :  { %11834 = vtanh.f32 %v4480_v4  ;;  %v4481_v1 = vmul.f32 0.7978846, %v4465_v13  ;;  %v4536_v29 = vmul.f32 %v4520_v11, %v14016_v63 }
0x1560   :  { %11836 = vtanh.f32 %v4478_v31  ;;  %v4479_v3 = vmul.f32 0.7978846, %v4463_v7  ;;  %v4548_v9 = vpack.c.bf16 %v4535_v37, %v4534_v28  ;;  %v4537_v39 = vmul.f32 %v4521_v27, %v14026_v49  ;;  %v14121_v27 = vld [vmem:[%s16219_s7 + $0x5] ss:$0 sm:$0xff] }
0x1561   :  { %v11827_v40 = vpop.eup %11826  ;;  %11838 = vtanh.f32 %v4481_v1 }
0x1562   :  { %v11829_v33 = vpop.eup %11828  ;;  %11840 = vtanh.f32 %v4479_v3  ;;  %10743 = vmatprep.mubr.bf16.mxu0 %v4548_v9  ;;  %v4549_v45 = vpack.c.bf16 %v4537_v39, %v4536_v29  ;;  %v4508_v55 = vadd.f32 1.0, %v11827_v40 }
0x1563   :  { %v11831_v44 = vpop.eup %11830  ;;  %v4506_v51 = vadd.f32 1.0, %v11829_v33 }
0x1564   :  { %v11833_v8 = vpop.eup %11832  ;;  %10744 = vmatmul.mubr.bf16.gmra.mrb[92].mxu0 %v4549_v45  ;;  %v4509_v46 = vadd.f32 1.0, %v11831_v44  ;;  %v4524_v10 = vmul.f32 0.5, %v4508_v55 }
0x1565   :  { %v4507_v58 = vadd.f32 1.0, %v11833_v8  ;;  %v4522_v63 = vmul.f32 0.5, %v4506_v51 }
0x1566   :  { %v4525_v30 = vmul.f32 0.5, %v4509_v46  ;;  %v4540_v38 = vmul.f32 %v4524_v10, %v14047_v62 }
0x1567   :  { %v4523_v35 = vmul.f32 0.5, %v4507_v58  ;;  %v4538_v41 = vmul.f32 %v4522_v63, %v14050_v21 }
0x1568   :  { %v4541_v49 = vmul.f32 %v4525_v30, %v14055_v34 }
0x1569   :  { %v11835_v18 = vpop.eup %11834  ;;  %v4539_v47 = vmul.f32 %v4523_v35, %v14060_v14 }
0x156a   :  { %v11837_v32 = vpop.eup %11836  ;;  %v4551_v42 = vpack.c.bf16 %v4541_v49, %v4540_v38  ;;  %v4512_v20 = vadd.f32 1.0, %v11835_v18 }
0x156b   :  { %v11839_v16 = vpop.eup %11838  ;;  %v4550_v36 = vpack.c.bf16 %v4539_v47, %v4538_v41  ;;  %v4510_v23 = vadd.f32 1.0, %v11837_v32 }
0x156c   :  { %v11841_v19 = vpop.eup %11840  ;;  %v4513_v6 = vadd.f32 1.0, %v11839_v16  ;;  %v4528_v57 = vmul.f32 0.5, %v4512_v20 }
0x156d   :  { %10747 = vmatprep.mubr.bf16.mxu0 %v4550_v36  ;;  %v4511_v4 = vadd.f32 1.0, %v11841_v19  ;;  %v4526_v13 = vmul.f32 0.5, %v4510_v23 }
0x156e   :  { %10748 = vmatmul.mubr.bf16.gmra.mrb[96].mxu0 %v4551_v42  ;;  %v4529_v62 = vmul.f32 0.5, %v4513_v6  ;;  %v4544_v28 = vmul.f32 %v4528_v57, %v14076_v22 }
0x156f   :  { %v4527_v34 = vmul.f32 0.5, %v4511_v4  ;;  %v4542_v14 = vmul.f32 %v4526_v13, %v14080_v50 }
0x1570   :  { %v4545_v21 = vmul.f32 %v4529_v62, %v14086_v17 }
0x1571   :  { %v4543_v11 = vmul.f32 %v4527_v34, %v14092_v2 }
0x1572   :  { %v4553_v31 = vpack.c.bf16 %v4545_v21, %v4544_v28 }
0x1573   :  { %v4552_v7 = vpack.c.bf16 %v4543_v11, %v4542_v14 }
0x1575   :  { %10751 = vmatprep.mubr.bf16.mxu0 %v4552_v7 }
0x1576   :  { %10752 = vmatmul.mubr.bf16.gmra.mrb[100].mxu0 %v4553_v31 }
0x162a   :  { %v10741_v37 = vpop.f32.mrb[88].mxu0 }
0x162b   :  { %v4652_v1 = vpop.f32.mrb[89].mxu0  ;;  %v4717_v29 = vadd.f32 %v13713_v24, %v10741_v37 }
0x162c   :  { %v4715_v22 = vadd.f32 %v13699_v59, %v4652_v1  ;;  %v10742_v17 = vpop.f32.mrb[90].mxu0 }
0x162d   :  { %v4655_v3 = vpop.f32.mrb[91].mxu0  ;;  %v4718_v2 = vadd.f32 %v13707_v54, %v10742_v17  ;;  %v14131_v39 = vadd.f32 %v14121_v27, %v4717_v29 }
0x162e   :  { %v14126_v50 = vadd.f32 %v14121_v27, %v4715_v22  ;;  %v4716_v9 = vadd.f32 %v13709_v25, %v4655_v3 }
0x162f   :  { %v14139_v59 = vadd.f32 %v14121_v27, %v4718_v2  ;;  %v4764_v54 = vsel %vm359_vm1, %v14131_v39, 0.0 }
0x1630   :  { %v14134_v40 = vadd.f32 %v14121_v27, %v4716_v9  ;;  %v4758_v24 = vsel %vm359_vm1, %v14126_v50, 0.0 }
0x1631   :  { %4759 = vadd.xlane.f32.xlu0 %v4758_v24  ;;  %v4767_v25 = vsel %vm359_vm1, %v14139_v59, 0.0 }
0x1632   :  { %v4761_v33 = vsel %vm359_vm1, %v14134_v40, 0.0 }
0x1633   :  { %4762 = vadd.xlane.f32.xlu1 %v4761_v33 }
0x1635   :  { %4765 = vadd.xlane.f32.xlu0 %v4764_v54 }
0x1637   :  { %v10745_v45 = vpop.f32.mrb[92].mxu0  ;;  %4768 = vadd.xlane.f32.xlu1 %v4767_v25 }
0x1638   :  { %v4668_v55 = vpop.f32.mrb[93].mxu0  ;;  %v4721_v44 = vadd.f32 %v13733_v48, %v10745_v45 }
0x1639   :  { %v4719_v51 = vadd.f32 %v13721_v15, %v4668_v55  ;;  %v10746_v8 = vpop.f32.mrb[94].mxu0 }
0x163a   :  { %v4671_v46 = vpop.f32.mrb[95].mxu0  ;;  %v4722_v58 = vadd.f32 %v13735_v5, %v10746_v8  ;;  %v14155_v30 = vadd.f32 %v14121_v27, %v4721_v44 }
0x163b   :  { %v14150_v10 = vadd.f32 %v14121_v27, %v4719_v51  ;;  %v4720_v63 = vadd.f32 %v13731_v52, %v4671_v46 }
0x163c   :  { %v14163_v15 = vadd.f32 %v14121_v27, %v4722_v58  ;;  %v4776_v52 = vsel %vm359_vm1, %v14155_v30, 0.0 }
0x163d   :  { %v14158_v35 = vadd.f32 %v14121_v27, %v4720_v63  ;;  %v4770_v48 = vsel %vm359_vm1, %v14150_v10, 0.0 }
0x163e   :  { %4771 = vadd.xlane.f32.xlu0 %v4770_v48  ;;  %v4779_v18 = vsel %vm359_vm1, %v14163_v15, 0.0 }
0x163f   :  { %v4773_v38 = vsel %vm359_vm1, %v14158_v35, 0.0 }
0x1640   :  { %4774 = vadd.xlane.f32.xlu1 %v4773_v38 }
0x1641   :  { %v10749_v5 = vpop.f32.mrb[96].mxu0 }
0x1642   :  { %4777 = vadd.xlane.f32.xlu0 %v4776_v52  ;;  %v4684_v49 = vpop.f32.mrb[97].mxu0  ;;  %v4725_v41 = vadd.f32 %v13753_v12, %v10749_v5 }
0x1643   :  { %v4723_v47 = vadd.f32 %v13749_v43, %v4684_v49  ;;  %v10750_v32 = vpop.f32.mrb[98].mxu0 }
0x1644   :  { %4780 = vadd.xlane.f32.xlu1 %v4779_v18  ;;  %v4687_v42 = vpop.f32.mrb[99].mxu0  ;;  %v4726_v16 = vadd.f32 %v13761_v61, %v10750_v32  ;;  %v14179_v23 = vadd.f32 %v14121_v27, %v4725_v41 }
0x1645   :  { %v14174_v20 = vadd.f32 %v14121_v27, %v4723_v47  ;;  %v4724_v36 = vadd.f32 %v13757_v0, %v4687_v42 }
0x1646   :  { %v14187_v43 = vadd.f32 %v14121_v27, %v4726_v16  ;;  %v4788_v62 = vsel %vm359_vm1, %v14179_v23, 0.0 }
0x1647   :  { %v14182_v19 = vadd.f32 %v14121_v27, %v4724_v36  ;;  %v4782_v12 = vsel %vm359_vm1, %v14174_v20, 0.0 }
0x1648   :  { %4783 = vadd.xlane.f32.xlu0 %v4782_v12  ;;  %v4791_v11 = vsel %vm359_vm1, %v14187_v43, 0.0 }
0x1649   :  { %v10753_v6 = vpop.f32.mrb[100].mxu0  ;;  %v4785_v57 = vsel %vm359_vm1, %v14182_v19, 0.0 }
0x164a   :  { %4786 = vadd.xlane.f32.xlu1 %v4785_v57  ;;  %v4700_v61 = vpop.f32.mrb[101].mxu0  ;;  %v4729_v0 = vadd.f32 %v13777_v56, %v10753_v6 }
0x164b   :  { %v4727_v4 = vadd.f32 %v13771_v53, %v4700_v61  ;;  %v10754_v13 = vpop.f32.mrb[102].mxu0 }
0x164c   :  { %4789 = vadd.xlane.f32.xlu0 %v4788_v62  ;;  %v4703_v34 = vpop.f32.mrb[103].mxu0  ;;  %v4730_v21 = vadd.f32 %v13785_v26, %v10754_v13  ;;  %v14203_v56 = vadd.f32 %v14121_v27, %v4729_v0 }
0x164d   :  { %v14196_v28 = vadd.f32 %v14121_v27, %v4727_v4  ;;  %v4728_v14 = vadd.f32 %v13781_v60, %v4703_v34 }
0x164e   :  { %4792 = vadd.xlane.f32.xlu1 %v4791_v11  ;;  %v14211_v7 = vadd.f32 %v14121_v27, %v4730_v21  ;;  %v4800_v26 = vsel %vm359_vm1, %v14203_v56, 0.0 }
0x164f   :  { %v14206_v53 = vadd.f32 %v14121_v27, %v4728_v14  ;;  %v4794_v31 = vsel %vm359_vm1, %v14196_v28, 0.0 }
0x1650   :  { %4795 = vadd.xlane.f32.xlu0 %v4794_v31  ;;  %v4803_v37 = vsel %vm359_vm1, %v14211_v7, 0.0 }
0x1651   :  { %16225 = vst [vmem:[#allocation2_spill] sm:$0xff] %v14206_v53  ;;  %v4797_v60 = vsel %vm359_vm1, %v14206_v53, 0.0 }
0x1652   :  { %4798 = vadd.xlane.f32.xlu1 %v4797_v60 }
0x1654   :  { %4801 = vadd.xlane.f32.xlu0 %v4800_v26 }
0x1656   :  { %4804 = vadd.xlane.f32.xlu1 %v4803_v37 }
0x16be   :  { %v4760_v1 = vpop.xlane.xlu0 %4759 }
0x16bf   :  { %v4806_v29 = vmul.f32 0.03125, %v4760_v1 }
0x16c0   :  { %v4763_v22 = vpop.xlane.xlu1 %4762 }
0x16c1   :  { %v14220_v17 = vsub.f32 %v14126_v50, %v4806_v29  ;;  %v4807_v27 = vmul.f32 0.03125, %v4763_v22 }
0x16c2   :  { %v4766_v3 = vpop.xlane.xlu0 %4765 }
0x16c3   :  { %v14223_v2 = vsub.f32 %v14134_v40, %v4807_v27  ;;  %v4808_v9 = vmul.f32 0.03125, %v4766_v3  ;;  %v4838_v24 = vmul.f32 %v14220_v17, %v14220_v17 }
0x16c4   :  { %v4769_v33 = vpop.xlane.xlu1 %4768 }
0x16c5   :  { %v14228_v54 = vsub.f32 %v14131_v39, %v4808_v9  ;;  %v4809_v25 = vmul.f32 0.03125, %v4769_v33  ;;  %v4854_v45 = vsel %vm359_vm1, %v4838_v24, 0.0  ;;  %v4839_v55 = vmul.f32 %v14223_v2, %v14223_v2 }
0x16c6   :  { %4855 = vadd.xlane.f32.xlu0 %v4854_v45 }
0x16c7   :  { %v14234_v44 = vsub.f32 %v14139_v59, %v4809_v25  ;;  %v4857_v51 = vsel %vm359_vm1, %v4839_v55, 0.0  ;;  %v4840_v8 = vmul.f32 %v14228_v54, %v14228_v54 }
0x16c8   :  { %4858 = vadd.xlane.f32.xlu1 %v4857_v51 }
0x16c9   :  { %v4860_v46 = vsel %vm359_vm1, %v4840_v8, 0.0  ;;  %v4841_v58 = vmul.f32 %v14234_v44, %v14234_v44 }
0x16ca   :  { %4861 = vadd.xlane.f32.xlu0 %v4860_v46 }
0x16cb   :  { %v4772_v63 = vpop.xlane.xlu0 %4771  ;;  %v4863_v48 = vsel %vm359_vm1, %v4841_v58, 0.0 }
0x16cc   :  { %v4810_v38 = vmul.f32 0.03125, %v4772_v63  ;;  %4864 = vadd.xlane.f32.xlu1 %v4863_v48 }
0x16cd   :  { %v4775_v52 = vpop.xlane.xlu1 %4774 }
0x16ce   :  { %v14244_v5 = vsub.f32 %v14150_v10, %v4810_v38  ;;  %v4811_v49 = vmul.f32 0.03125, %v4775_v52 }
0x16cf   :  { %v4778_v18 = vpop.xlane.xlu0 %4777 }
0x16d0   :  { %v14247_v41 = vsub.f32 %v14158_v35, %v4811_v49  ;;  %v4812_v47 = vmul.f32 0.03125, %v4778_v18  ;;  %v4842_v32 = vmul.f32 %v14244_v5, %v14244_v5 }
0x16d1   :  { %v4781_v42 = vpop.xlane.xlu1 %4780 }
0x16d2   :  { %v14252_v16 = vsub.f32 %v14155_v30, %v4812_v47  ;;  %v4813_v36 = vmul.f32 0.03125, %v4781_v42  ;;  %v4866_v12 = vsel %vm359_vm1, %v4842_v32, 0.0  ;;  %v4843_v6 = vmul.f32 %v14247_v41, %v14247_v41 }
0x16d3   :  { %4867 = vadd.xlane.f32.xlu0 %v4866_v12 }
0x16d4   :  { %v14258_v57 = vsub.f32 %v14163_v15, %v4813_v36  ;;  %v4869_v61 = vsel %vm359_vm1, %v4843_v6, 0.0  ;;  %v4844_v0 = vmul.f32 %v14252_v16, %v14252_v16 }
0x16d5   :  { %4870 = vadd.xlane.f32.xlu1 %v4869_v61  ;;  %v4784_v4 = vpop.xlane.xlu0 %4783 }
0x16d6   :  { %v4872_v13 = vsel %vm359_vm1, %v4844_v0, 0.0  ;;  %v4845_v62 = vmul.f32 %v14258_v57, %v14258_v57  ;;  %v4814_v34 = vmul.f32 0.03125, %v4784_v4 }
0x16d7   :  { %4873 = vadd.xlane.f32.xlu0 %v4872_v13  ;;  %v4787_v21 = vpop.xlane.xlu1 %4786 }
0x16d8   :  { %v4875_v14 = vsel %vm359_vm1, %v4845_v62, 0.0  ;;  %v14268_v11 = vsub.f32 %v14174_v20, %v4814_v34  ;;  %v4815_v31 = vmul.f32 0.03125, %v4787_v21  ;;  %v11472_v34 = vld [vmem:[%s16218_s3 + $0x40] sm:$0xff]   ;;  %v11473_v21 = vld [vmem:[%s16218_s3 + $0x48] sm:$0xff]  }
0x16d9   :  { %4876 = vadd.xlane.f32.xlu1 %v4875_v14  ;;  %v4790_v60 = vpop.xlane.xlu0 %4789  ;;  %10755 = vmatprep.subr.bf16.mxu1 %v11472_v34 }
0x16da   :  { %v14271_v26 = vsub.f32 %v14182_v19, %v4815_v31  ;;  %v4816_v37 = vmul.f32 0.03125, %v4790_v60  ;;  %v4846_v1 = vmul.f32 %v14268_v11, %v14268_v11  ;;  %10756 = vmatpush3.bf16.msra.mxu1 %v11472_v34 }
0x16db   :  { %v4793_v29 = vpop.xlane.xlu1 %4792  ;;  %10757 = vmatprep.subr.bf16.mxu1 %v11473_v21 }
0x16dc   :  { %v14276_v22 = vsub.f32 %v14179_v23, %v4816_v37  ;;  %v4817_v27 = vmul.f32 0.03125, %v4793_v29  ;;  %v4878_v3 = vsel %vm359_vm1, %v4846_v1, 0.0  ;;  %v4847_v9 = vmul.f32 %v14271_v26, %v14271_v26 }
0x16dd   :  { %4879 = vadd.xlane.f32.xlu0 %v4878_v3  ;;  %v4796_v24 = vpop.xlane.xlu0 %4795 }
0x16de   :  { %v14282_v33 = vsub.f32 %v14187_v43, %v4817_v27  ;;  %v4818_v25 = vmul.f32 0.03125, %v4796_v24  ;;  %v4881_v45 = vsel %vm359_vm1, %v4847_v9, 0.0  ;;  %v4848_v55 = vmul.f32 %v14276_v22, %v14276_v22  ;;  %10758 = vmatpush3.bf16.msra.mxu1 %v11473_v21 }
0x16df   :  { %4882 = vadd.xlane.f32.xlu1 %v4881_v45  ;;  %v4799_v51 = vpop.xlane.xlu1 %4798 }
0x16e0   :  { %v14288_v8 = vsub.f32 %v14196_v28, %v4818_v25  ;;  %v4819_v46 = vmul.f32 0.03125, %v4799_v51  ;;  %v4884_v58 = vsel %vm359_vm1, %v4848_v55, 0.0  ;;  %v4849_v63 = vmul.f32 %v14282_v33, %v14282_v33 }
0x16e1   :  { %4885 = vadd.xlane.f32.xlu0 %v4884_v58  ;;  %v4802_v48 = vpop.xlane.xlu0 %4801 }
0x16e2   :  { %v14294_v38 = vsub.f32 %v14206_v53, %v4819_v46  ;;  %v4820_v52 = vmul.f32 0.03125, %v4802_v48  ;;  %v4887_v49 = vsel %vm359_vm1, %v4849_v63, 0.0  ;;  %v4850_v18 = vmul.f32 %v14288_v8, %v14288_v8  ;;  %v14324_v63 = vld [vmem:[%s16219_s7 + $0x7] ss:$0 sm:$0xff] }
0x16e3   :  { %4888 = vadd.xlane.f32.xlu1 %v4887_v49  ;;  %v4805_v47 = vpop.xlane.xlu1 %4804 }
0x16e4   :  { %v14300_v32 = vsub.f32 %v14203_v56, %v4820_v52  ;;  %v4821_v42 = vmul.f32 0.03125, %v4805_v47  ;;  %v4890_v36 = vsel %vm359_vm1, %v4850_v18, 0.0  ;;  %v4851_v12 = vmul.f32 %v14294_v38, %v14294_v38 }
0x16e5   :  { %4891 = vadd.xlane.f32.xlu0 %v4890_v36 }
0x16e6   :  { %v14306_v6 = vsub.f32 %v14211_v7, %v4821_v42  ;;  %v4893_v61 = vsel %vm359_vm1, %v4851_v12, 0.0  ;;  %v4852_v0 = vmul.f32 %v14300_v32, %v14300_v32 }
0x16e7   :  { %4894 = vadd.xlane.f32.xlu1 %v4893_v61 }
0x16e8   :  { %v4896_v4 = vsel %vm359_vm1, %v4852_v0, 0.0  ;;  %v4853_v13 = vmul.f32 %v14306_v6, %v14306_v6 }
0x16e9   :  { %4897 = vadd.xlane.f32.xlu0 %v4896_v4 }
0x16ea   :  { %v4899_v62 = vsel %vm359_vm1, %v4853_v13, 0.0  ;;  %v14332_v13 = vld [vmem:[%s16219_s7 + $0x8] ss:$0 sm:$0xff] }
0x16eb   :  { %4900 = vadd.xlane.f32.xlu1 %v4899_v62 }
0x1753   :  { %v4856_v14 = vpop.xlane.xlu0 %4855 }
0x1754   :  { %v4902_v31 = vmul.f32 0.03125, %v4856_v14 }
0x1755   :  { %v4859_v60 = vpop.xlane.xlu1 %4858 }
0x1756   :  { %v4918_v37 = vadd.f32 1e-05, %v4902_v31  ;;  %v4903_v1 = vmul.f32 0.03125, %v4859_v60 }
0x1757   :  { %v4862_v29 = vpop.xlane.xlu0 %4861 }
0x1758   :  { %11842 = vrsqrt.f32 %v4918_v37  ;;  %v4919_v27 = vadd.f32 1e-05, %v4903_v1  ;;  %v4904_v3 = vmul.f32 0.03125, %v4862_v29 }
0x1759   :  { %v4865_v9 = vpop.xlane.xlu1 %4864 }
0x175a   :  { %11844 = vrsqrt.f32 %v4919_v27  ;;  %v4920_v24 = vadd.f32 1e-05, %v4904_v3  ;;  %v4905_v25 = vmul.f32 0.03125, %v4865_v9 }
0x175c   :  { %11846 = vrsqrt.f32 %v4920_v24  ;;  %v4921_v45 = vadd.f32 1e-05, %v4905_v25 }
0x175e   :  { %11848 = vrsqrt.f32 %v4921_v45 }
0x1760   :  { %v4868_v55 = vpop.xlane.xlu0 %4867 }
0x1761   :  { %v4906_v51 = vmul.f32 0.03125, %v4868_v55 }
0x1762   :  { %v11843_v46 = vpop.eup %11842  ;;  %v4871_v58 = vpop.xlane.xlu1 %4870 }
0x1763   :  { %v4922_v48 = vadd.f32 1e-05, %v4906_v51  ;;  %v4907_v52 = vmul.f32 0.03125, %v4871_v58  ;;  %v4950_v49 = vmul.f32 %v11843_v46, %v14220_v17 }
0x1764   :  { %v11845_v18 = vpop.eup %11844  ;;  %v4874_v47 = vpop.xlane.xlu0 %4873 }
0x1765   :  { %11850 = vrsqrt.f32 %v4922_v48  ;;  %v4923_v42 = vadd.f32 1e-05, %v4907_v52  ;;  %v4908_v36 = vmul.f32 0.03125, %v4874_v47  ;;  %v4951_v12 = vmul.f32 %v11845_v18, %v14223_v2 }
0x1766   :  { %v11847_v61 = vpop.eup %11846  ;;  %v4877_v0 = vpop.xlane.xlu1 %4876  ;;  %v4970_v4 = vmul.f32 %v14324_v63, %v4950_v49 }
0x1767   :  { %v4952_v62 = vmul.f32 %v11847_v61, %v14228_v54  ;;  %11852 = vrsqrt.f32 %v4923_v42  ;;  %v4924_v17 = vadd.f32 1e-05, %v4908_v36  ;;  %v4909_v34 = vmul.f32 0.03125, %v4877_v0 }
0x1768   :  { %v11849_v21 = vpop.eup %11848  ;;  %v4971_v14 = vmul.f32 %v14324_v63, %v4951_v12  ;;  %v4990_v1 = vadd.f32 %v14332_v13, %v4970_v4 }
0x1769   :  { %v4972_v31 = vmul.f32 %v14324_v63, %v4952_v62  ;;  %v4953_v2 = vmul.f32 %v11849_v21, %v14234_v44  ;;  %11854 = vrsqrt.f32 %v4924_v17  ;;  %v4925_v60 = vadd.f32 1e-05, %v4909_v34 }
0x176a   :  { %v4880_v37 = vpop.xlane.xlu0 %4879  ;;  %v4991_v29 = vadd.f32 %v14332_v13, %v4971_v14 }
0x176b   :  { %v4973_v27 = vmul.f32 %v14324_v63, %v4953_v2  ;;  %11856 = vrsqrt.f32 %v4925_v60  ;;  %v4910_v54 = vmul.f32 0.03125, %v4880_v37  ;;  %v4992_v24 = vadd.f32 %v14332_v13, %v4972_v31 }
0x176c   :  { %v14341_v3 = vpack.c.bf16 %v4991_v29, %v4990_v1  ;;  %v4883_v9 = vpop.xlane.xlu1 %4882 }
0x176d   :  { %v4993_v25 = vadd.f32 %v14332_v13, %v4973_v27  ;;  %v4926_v45 = vadd.f32 1e-05, %v4910_v54  ;;  %v4911_v44 = vmul.f32 0.03125, %v4883_v9 }
0x176e   :  { %10759 = vmatprep.mubr.msk.bf16.mxu1 %vm359_vm1, %v14341_v3  ;;  %v4886_v55 = vpop.xlane.xlu0 %4885 }
0x176f   :  { %v11851_v51 = vpop.eup %11850  ;;  %11858 = vrsqrt.f32 %v4926_v45  ;;  %v4927_v46 = vadd.f32 1e-05, %v4911_v44  ;;  %v4912_v58 = vmul.f32 0.03125, %v4886_v55  ;;  %v14347_v48 = vpack.c.bf16 %v4993_v25, %v4992_v24 }
0x1770   :  { %v4889_v52 = vpop.xlane.xlu1 %4888  ;;  %v4954_v49 = vmul.f32 %v11851_v51, %v14244_v5 }
0x1771   :  { %v11853_v18 = vpop.eup %11852  ;;  %11860 = vrsqrt.f32 %v4927_v46  ;;  %v4928_v47 = vadd.f32 1e-05, %v4912_v58  ;;  %10760 = vmatmul.mubr.msk.bf16.vlgmr.msra.gmra.mrb[168].mxu1 %vm359_vm1, %v14347_v48  ;;  %v4913_v42 = vmul.f32 0.03125, %v4889_v52 }
0x1772   :  { %v4892_v36 = vpop.xlane.xlu0 %4891  ;;  %v4955_v12 = vmul.f32 %v11853_v18, %v14247_v41  ;;  %v4974_v61 = vmul.f32 %v14324_v63, %v4954_v49 }
0x1773   :  { %v11855_v0 = vpop.eup %11854  ;;  %11862 = vrsqrt.f32 %v4928_v47  ;;  %v4929_v4 = vadd.f32 1e-05, %v4913_v42  ;;  %v4914_v62 = vmul.f32 0.03125, %v4892_v36 }
0x1774   :  { %v4975_v17 = vmul.f32 %v14324_v63, %v4955_v12  ;;  %v4895_v34 = vpop.xlane.xlu1 %4894  ;;  %v4956_v5 = vmul.f32 %v11855_v0, %v14252_v16  ;;  %v4994_v2 = vadd.f32 %v14332_v13, %v4974_v61 }
0x1775   :  { %v11857_v21 = vpop.eup %11856  ;;  %11864 = vrsqrt.f32 %v4929_v4  ;;  %v4930_v14 = vadd.f32 1e-05, %v4914_v62  ;;  %v4915_v31 = vmul.f32 0.03125, %v4895_v34 }
0x1776   :  { %v4995_v60 = vadd.f32 %v14332_v13, %v4975_v17  ;;  %v4898_v41 = vpop.xlane.xlu0 %4897  ;;  %v4957_v37 = vmul.f32 %v11857_v21, %v14258_v57  ;;  %v4976_v1 = vmul.f32 %v14324_v63, %v4956_v5 }
0x1777   :  { %11866 = vrsqrt.f32 %v4930_v14  ;;  %v4931_v29 = vadd.f32 1e-05, %v4915_v31  ;;  %v4916_v27 = vmul.f32 0.03125, %v4898_v41 }
0x1778   :  { %v14360_v54 = vpack.c.bf16 %v4995_v60, %v4994_v2  ;;  %v4977_v16 = vmul.f32 %v14324_v63, %v4957_v37  ;;  %v4901_v9 = vpop.xlane.xlu1 %4900  ;;  %v4996_v44 = vadd.f32 %v14332_v13, %v4976_v1 }
0x1779   :  { %v11859_v24 = vpop.eup %11858  ;;  %11868 = vrsqrt.f32 %v4931_v29  ;;  %v4932_v25 = vadd.f32 1e-05, %v4916_v27  ;;  %v4917_v45 = vmul.f32 0.03125, %v4901_v9 }
0x177a   :  { %10763 = vmatprep.mubr.msk.bf16.mxu1 %vm359_vm1, %v14360_v54  ;;  %v4997_v57 = vadd.f32 %v14332_v13, %v4977_v16  ;;  %v4958_v55 = vmul.f32 %v11859_v24, %v14268_v11 }
0x177b   :  { %v11861_v51 = vpop.eup %11860  ;;  %11870 = vrsqrt.f32 %v4932_v25  ;;  %v4933_v46 = vadd.f32 1e-05, %v4917_v45 }
0x177c   :  { %v14368_v58 = vpack.c.bf16 %v4997_v57, %v4996_v44  ;;  %v4959_v52 = vmul.f32 %v11861_v51, %v14271_v26  ;;  %v4978_v49 = vmul.f32 %v14324_v63, %v4958_v55 }
0x177d   :  { %v11863_v18 = vpop.eup %11862  ;;  %11872 = vrsqrt.f32 %v4933_v46 }
0x177e   :  { %10764 = vmatmul.mubr.msk.bf16.gmra.mrb[172].mxu1 %vm359_vm1, %v14368_v58  ;;  %v4979_v47 = vmul.f32 %v14324_v63, %v4959_v52  ;;  %v4960_v42 = vmul.f32 %v11863_v18, %v14276_v22  ;;  %v4998_v11 = vadd.f32 %v14332_v13, %v4978_v49 }
0x177f   :  { %v11865_v36 = vpop.eup %11864 }
0x1780   :  { %v4999_v12 = vadd.f32 %v14332_v13, %v4979_v47  ;;  %v4961_v61 = vmul.f32 %v11865_v36, %v14282_v33  ;;  %v4980_v26 = vmul.f32 %v14324_v63, %v4960_v42 }
0x1781   :  { %v11867_v0 = vpop.eup %11866 }
0x1782   :  { %v14380_v4 = vpack.c.bf16 %v4999_v12, %v4998_v11  ;;  %v4981_v62 = vmul.f32 %v14324_v63, %v4961_v61  ;;  %v4962_v17 = vmul.f32 %v11867_v0, %v14288_v8  ;;  %v5000_v22 = vadd.f32 %v14332_v13, %v4980_v26 }
0x1783   :  { %v11869_v34 = vpop.eup %11868 }
0x1784   :  { %10767 = vmatprep.mubr.msk.bf16.mxu1 %vm359_vm1, %v14380_v4  ;;  %v5001_v5 = vadd.f32 %v14332_v13, %v4981_v62  ;;  %v4963_v21 = vmul.f32 %v11869_v34, %v14294_v38  ;;  %v4982_v33 = vmul.f32 %v14324_v63, %v4962_v17 }
0x1785   :  { %v11871_v14 = vpop.eup %11870 }
0x1786   :  { %v14390_v31 = vpack.c.bf16 %v5001_v5, %v5000_v22  ;;  %v4983_v2 = vmul.f32 %v14324_v63, %v4963_v21  ;;  %v4964_v60 = vmul.f32 %v11871_v14, %v14300_v32  ;;  %v5002_v41 = vadd.f32 %v14332_v13, %v4982_v33 }
0x1787   :  { %v11873_v8 = vpop.eup %11872 }
0x1788   :  { %10768 = vmatmul.mubr.msk.bf16.gmra.mrb[176].mxu1 %vm359_vm1, %v14390_v31  ;;  %v5003_v37 = vadd.f32 %v14332_v13, %v4983_v2  ;;  %v4965_v1 = vmul.f32 %v11873_v8, %v14306_v6  ;;  %v4984_v38 = vmul.f32 %v14324_v63, %v4964_v60 }
0x178a   :  { %v14400_v29 = vpack.c.bf16 %v5003_v37, %v5002_v41  ;;  %v4985_v27 = vmul.f32 %v14324_v63, %v4965_v1  ;;  %v5004_v32 = vadd.f32 %v14332_v13, %v4984_v38 }
0x178c   :  { %10771 = vmatprep.mubr.msk.bf16.mxu1 %vm359_vm1, %v14400_v29  ;;  %v5005_v16 = vadd.f32 %v14332_v13, %v4985_v27 }
0x178e   :  { %v14407_v9 = vpack.c.bf16 %v5005_v16, %v5004_v32 }
0x1790   :  { %10772 = vmatmul.mubr.msk.bf16.gmra.mrb[180].mxu1 %vm359_vm1, %v14407_v9 }
0x1844   :  { %v10761_v24 = vpop.f32.mrb[168].mxu1 }
0x1845   :  { %v5109_v6 = vpop.f32.mrb[169].mxu1 }
0x1846   :  { %v10762_v25 = vpop.f32.mrb[170].mxu1 }
0x1847   :  { %v14411_v45 = vpack.c.bf16 %v10762_v25, %v10761_v24  ;;  %v5112_v44 = vpop.f32.mrb[171].mxu1 }
0x1848   :  { %v14413_v57 = vpack.c.bf16 %v5112_v44, %v5109_v6 }
0x184a   :  { %10783 = vmatprep.mubr.msk.bf16.mxu0 %vm794_vm2, %v14413_v57 }
0x1851   :  { %v10765_v63 = vpop.f32.mrb[172].mxu1 }
0x1852   :  { %v5125_v55 = vpop.f32.mrb[173].mxu1 }
0x1853   :  { %v10766_v51 = vpop.f32.mrb[174].mxu1 }
0x1854   :  { %v14417_v13 = vpack.c.bf16 %v10766_v51, %v10765_v63  ;;  %v5128_v46 = vpop.f32.mrb[175].mxu1 }
0x1855   :  { %v14419_v52 = vpack.c.bf16 %v5128_v46, %v5125_v55 }
0x185b   :  { %v10769_v49 = vpop.f32.mrb[176].mxu1 }
0x185c   :  { %v5141_v18 = vpop.f32.mrb[177].mxu1 }
0x185d   :  { %v10770_v47 = vpop.f32.mrb[178].mxu1 }
0x185e   :  { %v14421_v42 = vpack.c.bf16 %v10770_v47, %v10769_v49  ;;  %v5144_v36 = vpop.f32.mrb[179].mxu1 }
0x185f   :  { %v14423_v11 = vpack.c.bf16 %v5144_v36, %v5141_v18 }
0x1860   :  { %5287 = vrot.lane.b32.xlu1 %v14421_v42, %s12227_s29 }
0x1861   :  { %5285 = vrot.lane.b32.xlu0 %v14423_v11, %s12227_s29  ;;  %10799 = vmatprep.mubr.msk.bf16.mxu1 %vm794_vm2, %v14423_v11 }
0x1863   :  { %v10773_v12 = vpop.f32.mrb[180].mxu1 }
0x1864   :  { %v5157_v61 = vpop.f32.mrb[181].mxu1 }
0x1865   :  { %5184 = vrot.lane.b32.xlu0 %v14413_v57, %s12227_s29  ;;  %v10774_v26 = vpop.f32.mrb[182].mxu1 }
0x1866   :  { %v14433_v0 = vpack.c.bf16 %v10774_v26, %v10773_v12  ;;  %v5160_v62 = vpop.f32.mrb[183].mxu1 }
0x1867   :  { %v14435_v17 = vpack.c.bf16 %v5160_v62, %v5157_v61 }
0x1869   :  { %5188 = vrot.lane.b32.xlu0 %v14419_v52, %s12227_s29  ;;  %5289 = vrot.lane.b32.xlu1 %v14435_v17, %s12227_s29 }
0x186d   :  { %5291 = vrot.lane.b32.xlu1 %v14433_v0, %s12227_s29 }
0x1871   :  { %5186 = vrot.lane.b32.xlu1 %v14411_v45, %s12227_s29 }
0x1875   :  { %5190 = vrot.lane.b32.xlu1 %v14417_v13, %s12227_s29 }
0x18d2   :  { %v5288_v5 = vpop.permute.xlu1 %5287 }
0x18d3   :  { %v5286_v34 = vpop.permute.xlu0 %5285  ;;  %v5309_v2 = vsel %vm794_vm2, %v5288_v5, 0 }
0x18d4   :  { %11383 = vmatprep.subr.msk.bf16.mxu1 %vm794_vm2, %v5286_v34  ;;  %v5306_v22 = vsel %vm794_vm2, %v5286_v34, 0 }
0x18d5   :  { %10792 = vmatpush3.bf16.xpose.msra.mxu1 %v5306_v22 }
0x18d6   :  { %11384 = vmatprep.subr.msk.bf16.mxu1 %vm794_vm2, %v5288_v5 }
0x18d7   :  { %v5185_v21 = vpop.permute.xlu0 %5184 }
0x18d8   :  { %11379 = vmatprep.subr.msk.bf16.mxu0 %vm794_vm2, %v5185_v21  ;;  %v5205_v33 = vsel %vm794_vm2, %v5185_v21, 0 }
0x18d9   :  { %10776 = vmatpush3.bf16.xpose.msra.mxu0 %v5205_v33 }
0x18db   :  { %v5290_v14 = vpop.permute.xlu1 %5289  ;;  %v5189_v1 = vpop.permute.xlu0 %5188 }
0x18dc   :  { %v5312_v37 = vsel %vm794_vm2, %v5290_v14, 0  ;;  %v5211_v38 = vsel %vm794_vm2, %v5189_v1, 0 }
0x18dd   :  { %10794 = vmatpush3.bf16.xpose.msra.mxu1 %v5309_v2 }
0x18de   :  { %11385 = vmatprep.subr.msk.bf16.mxu1 %vm794_vm2, %v5290_v14 }
0x18df   :  { %v5292_v60 = vpop.permute.xlu1 %5291 }
0x18e0   :  { %v5315_v27 = vsel %vm794_vm2, %v5292_v60, 0 }
0x18e3   :  { %v5187_v8 = vpop.permute.xlu1 %5186 }
0x18e4   :  { %11380 = vmatprep.subr.msk.bf16.mxu0 %vm794_vm2, %v5187_v8  ;;  %v5208_v41 = vsel %vm794_vm2, %v5187_v8, 0 }
0x18e5   :  { %10778 = vmatpush3.bf16.xpose.msra.mxu0 %v5208_v41  ;;  %10796 = vmatpush3.bf16.xpose.msra.mxu1 %v5312_v37 }
0x18e6   :  { %11381 = vmatprep.subr.msk.bf16.mxu0 %vm794_vm2, %v5189_v1  ;;  %11386 = vmatprep.subr.msk.bf16.mxu1 %vm794_vm2, %v5292_v60 }
0x18e7   :  { %v5191_v32 = vpop.permute.xlu1 %5190 }
0x18e8   :  { %v5214_v16 = vsel %vm794_vm2, %v5191_v32, 0 }
0x18ed   :  { %10780 = vmatpush3.bf16.xpose.msra.mxu0 %v5211_v38  ;;  %10798 = vmatpush3.bf16.xpose.msra.mxu1 %v5315_v27 }
0x18ee   :  { %11382 = vmatprep.subr.msk.bf16.mxu0 %vm794_vm2, %v5191_v32 }
0x18f4   :  { %10800 = vmatmul.mubr.msk.bf16.vlgmr.msra.gmra.mrb[184].mxu1 %vm794_vm2, %v14421_v42 }
0x18f5   :  { %10782 = vmatpush3.bf16.xpose.msra.mxu0 %v5214_v16  ;;  %10803 = vmatprep.mubr.msk.bf16.mxu1 %vm794_vm2, %v14435_v17 }
0x18fc   :  { %10784 = vmatmul.mubr.msk.bf16.vlgmr.msra.gmra.mrb[104].mxu0 %vm794_vm2, %v14411_v45  ;;  %10804 = vmatmul.mubr.msk.bf16.gmra.mrb[188].mxu1 %vm794_vm2, %v14433_v0 }
0x18fd   :  { %10787 = vmatprep.mubr.msk.bf16.mxu0 %vm794_vm2, %v14419_v52 }
0x1904   :  { %10788 = vmatmul.mubr.msk.bf16.gmra.mrb[108].mxu0 %vm794_vm2, %v14417_v13 }
0x19c7   :  { %v10801_v24 = vpop.f32.mrb[184].mxu1 }
0x19c8   :  { %v5351_v6 = vpop.f32.mrb[185].mxu1  ;;  %v5412_v51 = vsel %vm230_vm0, %v10801_v24, -inf }
0x19c9   :  { %v10802_v25 = vpop.f32.mrb[186].mxu1  ;;  %v5406_v44 = vsel %vm230_vm0, %v5351_v6, -inf }
0x19ca   :  { %5407 = vmax.xlane.f32.xlu0 %v5406_v44  ;;  %v5354_v63 = vpop.f32.mrb[187].mxu1  ;;  %v5415_v61 = vsel %vm230_vm0, %v10802_v25, -inf }
0x19cb   :  { %v5409_v55 = vsel %vm230_vm0, %v5354_v63, -inf }
0x19cc   :  { %5410 = vmax.xlane.f32.xlu1 %v5409_v55 }
0x19ce   :  { %5413 = vmax.xlane.f32.xlu0 %v5412_v51 }
0x19cf   :  { %v14478_v46 = vpop.f32.mrb[104].mxu0  ;;  %v10805_v49 = vpop.f32.mrb[188].mxu1 }
0x19d0   :  { %v14480_v18 = vpop.f32.mrb[105].mxu0  ;;  %v5367_v47 = vpop.f32.mrb[189].mxu1  ;;  %v5424_v2 = vsel %vm230_vm0, %v10805_v49, -inf }
0x19d1   :  { %v14482_v36 = vpop.f32.mrb[106].mxu0  ;;  %v14484_v12 = vpop.f32.mrb[190].mxu1  ;;  %v5418_v22 = vsel %vm230_vm0, %v5367_v47, -inf }
0x19d2   :  { %5416 = vmax.xlane.f32.xlu0 %v5415_v61  ;;  %v14487_v26 = vpop.f32.mrb[107].mxu0  ;;  %v14489_v62 = vpop.f32.mrb[191].mxu1  ;;  %v5427_v21 = vsel %vm230_vm0, %v14484_v12, -inf }
0x19d3   :  { %v5421_v34 = vsel %vm230_vm0, %v14489_v62, -inf }
0x19d4   :  { %5422 = vmax.xlane.f32.xlu1 %v5421_v34 }
0x19d6   :  { %5419 = vmax.xlane.f32.xlu0 %v5418_v22 }
0x19d7   :  { %v14494_v5 = vpop.f32.mrb[108].mxu0 }
0x19d8   :  { %5428 = vmax.xlane.f32.xlu1 %v5427_v21  ;;  %v14498_v33 = vpop.f32.mrb[109].mxu0 }
0x19d9   :  { %v14500_v14 = vpop.f32.mrb[110].mxu0 }
0x19da   :  { %5425 = vmax.xlane.f32.xlu0 %v5424_v2  ;;  %v14503_v60 = vpop.f32.mrb[111].mxu0 }
0x1a57   :  { %v5408_v8 = vpop.xlane.xlu0 %5407 }
0x1a58   :  { %v5438_v41 = vsub.f32 %v5351_v6, %v5408_v8 }
0x1a59   :  { %v5411_v37 = vpop.xlane.xlu1 %5410 }
0x1a5a   :  { %v5462_v27 = vmul.f32 1.442695, %v5438_v41  ;;  %v5439_v32 = vsub.f32 %v5354_v63, %v5411_v37 }
0x1a5b   :  { %v5414_v1 = vpop.xlane.xlu0 %5413 }
0x1a5c   :  { %v5440_v38 = vsub.f32 %v10801_v24, %v5414_v1  ;;  %v5464_v51 = vmul.f32 1.442695, %v5439_v32 }
0x1a5e   :  { %v5466_v16 = vmul.f32 1.442695, %v5440_v38 }
0x1a5f   :  { %v5417_v44 = vpop.xlane.xlu0 %5416 }
0x1a60   :  { %11874 = vpow2.f32 %v5466_v16  ;;  %v5441_v55 = vsub.f32 %v10802_v25, %v5417_v44 }
0x1a61   :  { %11876 = vpow2.f32 %v5462_v27  ;;  %v5423_v16 = vpop.xlane.xlu1 %5422 }
0x1a62   :  { %v5468_v61 = vmul.f32 1.442695, %v5441_v55 }
0x1a63   :  { %v5420_v34 = vpop.xlane.xlu0 %5419 }
0x1a64   :  { %11878 = vpow2.f32 %v5468_v61  ;;  %v5442_v22 = vsub.f32 %v5367_v47, %v5420_v34 }
0x1a65   :  { %11880 = vpow2.f32 %v5464_v51  ;;  %v5429_v44 = vpop.xlane.xlu1 %5428  ;;  %v5443_v51 = vsub.f32 %v14489_v62, %v5423_v16  ;;  %v5391_v62 = vsel %vm230_vm0, %v14482_v36, -inf }
0x1a66   :  { %v5470_v6 = vmul.f32 1.442695, %v5442_v22  ;;  %v5445_v55 = vsub.f32 %v14484_v12, %v5429_v44  ;;  %v5388_v12 = vsel %vm230_vm0, %v14478_v46, -inf }
0x1a67   :  { %v5426_v21 = vpop.xlane.xlu0 %5425  ;;  %v5472_v34 = vmul.f32 1.442695, %v5443_v51 }
0x1a68   :  { %v5444_v2 = vsub.f32 %v10805_v49, %v5426_v21  ;;  %v5476_v61 = vmul.f32 1.442695, %v5445_v55 }
0x1a6a   :  { %v14505_v53 = vpop.eup %11874  ;;  %v5474_v8 = vmul.f32 1.442695, %v5444_v2  ;;  %v5394_v2 = vsel %vm230_vm0, %v14498_v33, -inf }
0x1a6b   :  { %v5508_v24 = vsel %vm230_vm0, %v14505_v53, 0.0  ;;  %v14509_v63 = vpop.eup %11876 }
0x1a6c   :  { %11882 = vpow2.f32 %v5474_v8  ;;  %5509 = vadd.xlane.f32.xlu0 %v5508_v24  ;;  %v5502_v41 = vsel %vm230_vm0, %v14509_v63, 0.0  ;;  %v5385_v8 = vsel %vm230_vm0, %v14487_v26, -inf  ;;  %v5397_v24 = vsel %vm230_vm0, %v14503_v60, -inf }
0x1a6d   :  { %11884 = vpow2.f32 %v5470_v6  ;;  %v5400_v6 = vsel %vm230_vm0, %v14494_v5, -inf }
0x1a6e   :  { %v14511_v25 = vpop.eup %11878  ;;  %11886 = vpow2.f32 %v5476_v61 }
0x1a6f   :  { %v5511_v49 = vsel %vm230_vm0, %v14511_v25, 0.0  ;;  %v11881_v47 = vpop.eup %11880  ;;  %11888 = vpow2.f32 %v5472_v34 }
0x1a70   :  { %5503 = vadd.xlane.f32.xlu0 %v5502_v41  ;;  %5512 = vadd.xlane.f32.xlu1 %v5511_v49  ;;  %v5505_v37 = vsel %vm230_vm0, %v11881_v47, 0.0  ;;  %v5403_v41 = vsel %vm230_vm0, %v14500_v14, -inf }
0x1a74   :  { %5506 = vadd.xlane.f32.xlu1 %v5505_v37 }
0x1a76   :  { %v14518_v1 = vpop.eup %11882 }
0x1a77   :  { %v5520_v38 = vsel %vm230_vm0, %v14518_v1, 0.0  ;;  %v14522_v27 = vpop.eup %11884 }
0x1a78   :  { %5521 = vadd.xlane.f32.xlu0 %v5520_v38  ;;  %v5514_v32 = vsel %vm230_vm0, %v14522_v27, 0.0  ;;  %v14534_v22 = vpop.eup %11886 }
0x1a79   :  { %v14538_v21 = vpop.eup %11888 }
0x1a7c   :  { %5515 = vadd.xlane.f32.xlu0 %v5514_v32 }
0x1a85   :  { %5657 = vrot.lane.b32.xlu1 %v14421_v42, %s12228_s30  ;;  %v5523_v42 = vsel %vm230_vm0, %v14534_v22, 0.0 }
0x1a89   :  { %5659 = vrot.lane.b32.xlu1 %v14435_v17, %s12228_s30  ;;  %v5517_v17 = vsel %vm230_vm0, %v14538_v21, 0.0 }
0x1a92   :  { %5655 = vrot.lane.b32.xlu0 %v14423_v11, %s12228_s30  ;;  %v5382_v11 = vsel %vm230_vm0, %v14480_v18, -inf }
0x1aad   :  { %5524 = vadd.xlane.f32.xlu1 %v5523_v42 }
0x1ab1   :  { %5383 = vmax.xlane.f32.xlu0 %v5382_v11  ;;  %5518 = vadd.xlane.f32.xlu1 %v5517_v17 }
0x1ab5   :  { %5389 = vmax.xlane.f32.xlu0 %v5388_v12 }
0x1ab9   :  { %5392 = vmax.xlane.f32.xlu0 %v5391_v62 }
0x1abd   :  { %5395 = vmax.xlane.f32.xlu0 %v5394_v2 }
0x1ac1   :  { %5401 = vmax.xlane.f32.xlu0 %v5400_v6 }
0x1ac2   :  { %5661 = vrot.lane.b32.xlu1 %v14433_v0, %s12228_s30 }
0x1ae6   :  { %5386 = vmax.xlane.f32.xlu1 %v5385_v8 }
0x1aea   :  { %5398 = vmax.xlane.f32.xlu1 %v5397_v24 }
0x1aee   :  { %5404 = vmax.xlane.f32.xlu1 %v5403_v41  ;;  %v11474_v41 = vld [vmem:[%s16218_s3 + $0x50] sm:$0xff]  }
0x1af9   :  { %v5510_v49 = vpop.xlane.xlu0 %5509 }
0x1afd   :  { %v5504_v37 = vpop.xlane.xlu0 %5503  ;;  %v5513_v38 = vpop.xlane.xlu1 %5512 }
0x1afe   :  { %11890 = vrcp.f32 %v5504_v37 }
0x1b01   :  { %v5507_v32 = vpop.xlane.xlu1 %5506 }
0x1b02   :  { %11892 = vrcp.f32 %v5507_v32 }
0x1b03   :  { %11894 = vrcp.f32 %v5513_v38 }
0x1b04   :  { %11896 = vrcp.f32 %v5510_v49 }
0x1b05   :  { %v5522_v16 = vpop.xlane.xlu0 %5521  ;;  %v5658_v51 = vpop.permute.xlu1 %5657 }
0x1b08   :  { %v11891_v44 = vpop.eup %11890 }
0x1b09   :  { %v5516_v0 = vpop.xlane.xlu0 %5515  ;;  %v5550_v34 = vmul.f32 %v11891_v44, %v14509_v63  ;;  %v5660_v17 = vpop.permute.xlu1 %5659 }
0x1b0c   :  { %v11893_v55 = vpop.eup %11892 }
0x1b0d   :  { %v5656_v61 = vpop.permute.xlu0 %5655  ;;  %v5551_v42 = vmul.f32 %v11893_v55, %v11881_v47  ;;  %v11895_v62 = vpop.eup %11894 }
0x1b0e   :  { %10823 = vmatprep.subr.bf16.mxu1 %v5656_v61  ;;  %v11897_v6 = vpop.eup %11896  ;;  %v5553_v8 = vmul.f32 %v11895_v62, %v14511_v25  ;;  %v11475_v25 = vld [vmem:[%s16218_s3 + $0x58] sm:$0xff]  }
0x1b0f   :  { %10824 = vmatpush3.bf16.msra.mxu1 %v5656_v61  ;;  %v5562_v11 = vpack.c.bf16 %v5551_v42, %v5550_v34  ;;  %v5552_v38 = vmul.f32 %v11897_v6, %v14505_v53 }
0x1b10   :  { %10825 = vmatprep.subr.bf16.mxu1 %v5658_v51 }
0x1b11   :  { %10831 = vmatprep.mubr.msk.bf16.mxu1 %vm230_vm0, %v5562_v11 }
0x1b13   :  { %10826 = vmatpush3.bf16.msra.mxu1 %v5658_v51 }
0x1b14   :  { %10827 = vmatprep.subr.bf16.mxu1 %v5660_v17 }
0x1b17   :  { %10828 = vmatpush3.bf16.msra.mxu1 %v5660_v17 }
0x1b3a   :  { %v5525_v12 = vpop.xlane.xlu1 %5524 }
0x1b3b   :  { %11898 = vrcp.f32 %v5525_v12 }
0x1b3c   :  { %11900 = vrcp.f32 %v5516_v0 }
0x1b3d   :  { %11902 = vrcp.f32 %v5522_v16  ;;  %v5563_v16 = vpack.c.bf16 %v5553_v8, %v5552_v38 }
0x1b3e   :  { %v5384_v2 = vpop.xlane.xlu0 %5383  ;;  %v5519_v63 = vpop.xlane.xlu1 %5518 }
0x1b3f   :  { %v5430_v47 = vsub.f32 %v14480_v18, %v5384_v2  ;;  %11904 = vrcp.f32 %v5519_v63 }
0x1b41   :  { %v5446_v24 = vmul.f32 1.442695, %v5430_v47 }
0x1b42   :  { %v5390_v37 = vpop.xlane.xlu0 %5389  ;;  %v5662_v49 = vpop.permute.xlu1 %5661 }
0x1b43   :  { %11906 = vpow2.f32 %v5446_v24  ;;  %v5432_v32 = vsub.f32 %v14478_v46, %v5390_v37  ;;  %10829 = vmatprep.subr.bf16.mxu1 %v5662_v49 }
0x1b44   :  { %10830 = vmatpush3.bf16.msra.mxu1 %v5662_v49 }
0x1b45   :  { %v5450_v18 = vmul.f32 1.442695, %v5432_v32  ;;  %10857 = vmatprep.subr.bf16.mxu1 %v11474_v41  ;;  %v11899_v0 = vpop.eup %11898 }
0x1b46   :  { %v5393_v44 = vpop.xlane.xlu0 %5392  ;;  %v11901_v55 = vpop.eup %11900  ;;  %v5557_v46 = vmul.f32 %v11899_v0, %v14534_v22 }
0x1b47   :  { %11908 = vpow2.f32 %v5450_v18  ;;  %10832 = vmatmul.mubr.msk.bf16.vlgmr.msra.gmra.mrb[192].mxu1 %vm230_vm0, %v5563_v16  ;;  %v11903_v51 = vpop.eup %11902  ;;  %v5554_v34 = vmul.f32 %v11901_v55, %v14522_v27 }
0x1b48   :  { %10858 = vmatpush3.bf16.msra.mxu1 %v11474_v41  ;;  %v5556_v17 = vmul.f32 %v11903_v51, %v14518_v1  ;;  %v5433_v41 = vsub.f32 %v14482_v36, %v5393_v44 }
0x1b49   :  { %v11905_v53 = vpop.eup %11904  ;;  %10859 = vmatprep.subr.bf16.mxu1 %v11475_v25 }
0x1b4a   :  { %v5396_v61 = vpop.xlane.xlu0 %5395  ;;  %v5555_v42 = vmul.f32 %v11905_v53, %v14538_v21  ;;  %v5565_v63 = vpack.c.bf16 %v5557_v46, %v5556_v17  ;;  %v5452_v38 = vmul.f32 1.442695, %v5433_v41 }
0x1b4b   :  { %v5434_v11 = vsub.f32 %v14498_v33, %v5396_v61 }
0x1b4c   :  { %v5564_v12 = vpack.c.bf16 %v5555_v42, %v5554_v34  ;;  %10860 = vmatpush3.bf16.msra.mxu1 %v11475_v25 }
0x1b4d   :  { %v14578_v62 = vpop.eup %11906  ;;  %v5454_v2 = vmul.f32 1.442695, %v5434_v11 }
0x1b4e   :  { %v5402_v47 = vpop.xlane.xlu0 %5401  ;;  %10835 = vmatprep.mubr.msk.bf16.mxu1 %vm230_vm0, %v5564_v12  ;;  %v5478_v22 = vsel %vm230_vm0, %v14578_v62, 0.0 }
0x1b4f   :  { %11910 = vpow2.f32 %v5454_v2  ;;  %v5436_v27 = vsub.f32 %v14494_v5, %v5402_v47  ;;  %5479 = vadd.xlane.f32.xlu0 %v5478_v22  ;;  %10836 = vmatmul.mubr.msk.bf16.gmra.mrb[196].mxu1 %vm230_vm0, %v5565_v63 }
0x1b50   :  { %10861 = vmatprep.mubr.msk.bf16.mxu1 %vm359_vm1, %v14341_v3 }
0x1b51   :  { %v14587_v33 = vpop.eup %11908  ;;  %v5458_v1 = vmul.f32 1.442695, %v5436_v27 }
0x1b52   :  { %v5484_v21 = vsel %vm230_vm0, %v14587_v33, 0.0 }
0x1b53   :  { %11912 = vpow2.f32 %v5458_v1  ;;  %5485 = vadd.xlane.f32.xlu0 %v5484_v21 }
0x1b57   :  { %10862 = vmatmul.mubr.msk.bf16.vlgmr.msra.gmra.mrb[200].mxu1 %vm359_vm1, %v14347_v48 }
0x1b58   :  { %10865 = vmatprep.mubr.msk.bf16.mxu1 %vm359_vm1, %v14360_v54 }
0x1b59   :  { %v14595_v5 = vpop.eup %11910 }
0x1b5a   :  { %v5490_v6 = vsel %vm230_vm0, %v14595_v5, 0.0 }
0x1b5b   :  { %5491 = vadd.xlane.f32.xlu0 %v5490_v6 }
0x1b5d   :  { %v14599_v8 = vpop.eup %11912 }
0x1b5e   :  { %v5496_v24 = vsel %vm230_vm0, %v14599_v8, 0.0 }
0x1b5f   :  { %5497 = vadd.xlane.f32.xlu0 %v5496_v24  ;;  %10866 = vmatmul.mubr.msk.bf16.gmra.mrb[204].mxu1 %vm359_vm1, %v14368_v58 }
0x1b60   :  { %10869 = vmatprep.mubr.msk.bf16.mxu1 %vm359_vm1, %v14380_v4 }
0x1b67   :  { %10870 = vmatmul.mubr.msk.bf16.gmra.mrb[208].mxu1 %vm359_vm1, %v14390_v31 }
0x1b68   :  { %10873 = vmatprep.mubr.msk.bf16.mxu1 %vm359_vm1, %v14400_v29 }
0x1b6f   :  { %10874 = vmatmul.mubr.msk.bf16.gmra.mrb[212].mxu1 %vm359_vm1, %v14407_v9 }
0x1b73   :  { %v5387_v37 = vpop.xlane.xlu1 %5386 }
0x1b74   :  { %v5431_v49 = vsub.f32 %v14487_v26, %v5387_v37 }
0x1b75   :  { %5566 = vrot.lane.b32.xlu0 %v14413_v57, %s12228_s30 }
0x1b76   :  { %v5448_v32 = vmul.f32 1.442695, %v5431_v49 }
0x1b77   :  { %v5399_v16 = vpop.xlane.xlu1 %5398 }
0x1b78   :  { %11914 = vpow2.f32 %v5448_v32  ;;  %v5435_v18 = vsub.f32 %v14503_v60, %v5399_v16 }
0x1b79   :  { %11916 = vpow2.f32 %v5452_v38 }
0x1b7a   :  { %v5456_v25 = vmul.f32 1.442695, %v5435_v18 }
0x1b7b   :  { %v5405_v0 = vpop.xlane.xlu1 %5404 }
0x1b7c   :  { %v5437_v55 = vsub.f32 %v14500_v14, %v5405_v0  ;;  %11918 = vpow2.f32 %v5456_v25 }
0x1b7e   :  { %v5460_v51 = vmul.f32 1.442695, %v5437_v55 }
0x1b80   :  { %11920 = vpow2.f32 %v5460_v51 }
0x1b82   :  { %v11915_v36 = vpop.eup %11914 }
0x1b83   :  { %v5481_v26 = vsel %vm230_vm0, %v11915_v36, 0.0  ;;  %v11917_v44 = vpop.eup %11916 }
0x1b84   :  { %5482 = vadd.xlane.f32.xlu1 %v5481_v26  ;;  %v5487_v57 = vsel %vm230_vm0, %v11917_v44, 0.0 }
0x1b86   :  { %v11919_v53 = vpop.eup %11918 }
0x1b87   :  { %v5493_v46 = vsel %vm230_vm0, %v11919_v53, 0.0 }
0x1b88   :  { %5488 = vadd.xlane.f32.xlu1 %v5487_v57 }
0x1b8a   :  { %v14622_v60 = vpop.eup %11920 }
0x1b8b   :  { %v5499_v14 = vsel %vm230_vm0, %v14622_v60, 0.0 }
0x1b8c   :  { %5494 = vadd.xlane.f32.xlu1 %v5493_v46 }
0x1b90   :  { %5500 = vadd.xlane.f32.xlu1 %v5499_v14 }
0x1ba1   :  { %5568 = vrot.lane.b32.xlu1 %v14411_v45, %s12228_s30 }
0x1ba5   :  { %5570 = vrot.lane.b32.xlu1 %v14419_v52, %s12228_s30 }
0x1ba9   :  { %5572 = vrot.lane.b32.xlu1 %v14417_v13, %s12228_s30 }
0x1bdc   :  { %v5480_v61 = vpop.xlane.xlu0 %5479 }
0x1bdd   :  { %11922 = vrcp.f32 %v5480_v61 }
0x1be0   :  { %v5486_v34 = vpop.xlane.xlu0 %5485 }
0x1be7   :  { %v11923_v47 = vpop.eup %11922 }
0x1be8   :  { %v5492_v42 = vpop.xlane.xlu0 %5491  ;;  %v5542_v6 = vmul.f32 %v11923_v47, %v14578_v62 }
0x1bec   :  { %v5498_v11 = vpop.xlane.xlu0 %5497 }
0x1bf0   :  { %v5567_v17 = vpop.permute.xlu0 %5566 }
0x1bf1   :  { %10807 = vmatprep.subr.bf16.mxu0 %v5567_v17 }
0x1bf2   :  { %10808 = vmatpush3.bf16.msra.mxu0 %v5567_v17 }
0x1c11   :  { %v5483_v12 = vpop.xlane.xlu1 %5482 }
0x1c12   :  { %11924 = vrcp.f32 %v5483_v12 }
0x1c15   :  { %v5489_v2 = vpop.xlane.xlu1 %5488 }
0x1c16   :  { %11926 = vrcp.f32 %v5489_v2 }
0x1c19   :  { %v5495_v63 = vpop.xlane.xlu1 %5494 }
0x1c1a   :  { %v14632_v45 = vpop.f32.mrb[192].mxu1  ;;  %11928 = vrcp.f32 %v5495_v63 }
0x1c1b   :  { %v14634_v52 = vpop.f32.mrb[193].mxu1  ;;  %11930 = vrcp.f32 %v5486_v34 }
0x1c1c   :  { %v11925_v22 = vpop.eup %11924  ;;  %v14636_v13 = vpop.f32.mrb[194].mxu1  ;;  %11932 = vrcp.f32 %v5492_v42 }
0x1c1d   :  { %v5749_v27 = vpack.c.bf16 %v14636_v13, %v14632_v45  ;;  %v14640_v1 = vpop.f32.mrb[195].mxu1  ;;  %v5501_v21 = vpop.xlane.xlu1 %5500  ;;  %v5543_v24 = vmul.f32 %v11925_v22, %v11915_v36 }
0x1c1e   :  { %v5748_v41 = vpack.c.bf16 %v14640_v1, %v14634_v52  ;;  %11934 = vrcp.f32 %v5501_v21 }
0x1c1f   :  { %v5558_v37 = vpack.c.bf16 %v5543_v24, %v5542_v6  ;;  %11936 = vrcp.f32 %v5498_v11 }
0x1c20   :  { %v11927_v18 = vpop.eup %11926 }
0x1c21   :  { %10815 = vmatprep.mubr.msk.bf16.mxu0 %vm230_vm0, %v5558_v37  ;;  %v5569_v49 = vpop.permute.xlu1 %5568  ;;  %v5545_v57 = vmul.f32 %v11927_v18, %v11917_v44 }
0x1c22   :  { %10809 = vmatprep.subr.bf16.mxu0 %v5569_v49  ;;  %v14646_v38 = vpop.f32.mrb[196].mxu1 }
0x1c23   :  { %10810 = vmatpush3.bf16.msra.mxu0 %v5569_v49  ;;  %v14648_v32 = vpop.f32.mrb[197].mxu1 }
0x1c24   :  { %v14650_v16 = vpop.f32.mrb[198].mxu1  ;;  %v11929_v55 = vpop.eup %11928 }
0x1c25   :  { %v5751_v62 = vpack.c.bf16 %v14650_v16, %v14646_v38  ;;  %v14654_v25 = vpop.f32.mrb[199].mxu1  ;;  %v5571_v0 = vpop.permute.xlu1 %5570  ;;  %v5547_v14 = vmul.f32 %v11929_v55, %v11919_v53 }
0x1c26   :  { %v5750_v51 = vpack.c.bf16 %v14654_v25, %v14648_v32  ;;  %10811 = vmatprep.subr.bf16.mxu0 %v5571_v0  ;;  %v11931_v36 = vpop.eup %11930 }
0x1c27   :  { %10812 = vmatpush3.bf16.msra.mxu0 %v5571_v0  ;;  %v11933_v26 = vpop.eup %11932  ;;  %v5544_v61 = vmul.f32 %v11931_v36, %v14587_v33 }
0x1c28   :  { %v5546_v11 = vmul.f32 %v11933_v26, %v14595_v5  ;;  %v11935_v2 = vpop.eup %11934 }
0x1c29   :  { %v5573_v46 = vpop.permute.xlu1 %5572  ;;  %v5559_v17 = vpack.c.bf16 %v5545_v57, %v5544_v61  ;;  %v11937_v44 = vpop.eup %11936  ;;  %v5549_v33 = vmul.f32 %v11935_v2, %v14622_v60  ;;  %v9665_v60 = vld [vmem:[%s16220_s4 + $0x10] sm:$0xf] }
0x1c2a   :  { %10813 = vmatprep.subr.bf16.mxu0 %v5573_v46  ;;  %v10863_v34 = vpop.f32.mrb[200].mxu1  ;;  %v5560_v22 = vpack.c.bf16 %v5547_v14, %v5546_v11  ;;  %v5548_v6 = vmul.f32 %v11937_v44, %v14599_v8  ;;  %v5779_v14 = vsel %vm1380_vm3, %v9665_v60, 0 }
0x1c2b   :  { %10814 = vmatpush3.bf16.msra.mxu0 %v5573_v46  ;;  %v5945_v42 = vpop.f32.mrb[201].mxu1 }
0x1c2c   :  { %v10864_v12 = vpop.f32.mrb[202].mxu1  ;;  %v5561_v37 = vpack.c.bf16 %v5549_v33, %v5548_v6  ;;  %11387 = vmatprep.subr.msk.bf16.mxu0 %vm1380_vm3, %v9665_v60 }
0x1c2d   :  { %v14660_v63 = vpack.c.bf16 %v10864_v12, %v10863_v34  ;;  %v5948_v47 = vpop.f32.mrb[203].mxu1 }
0x1c2e   :  { %v14662_v21 = vpack.c.bf16 %v5948_v47, %v5945_v42  ;;  %10816 = vmatmul.mubr.msk.bf16.vlgmr.msra.gmra.mrb[112].mxu0 %vm230_vm0, %v5559_v17 }
0x1c2f   :  { %10819 = vmatprep.mubr.msk.bf16.mxu0 %vm230_vm0, %v5560_v22  ;;  %10840 = vmatpush3.bf16.msra.mxu0 %v5779_v14 }
0x1c32   :  { %v10867_v53 = vpop.f32.mrb[204].mxu1 }
0x1c33   :  { %v5961_v5 = vpop.f32.mrb[205].mxu1 }
0x1c34   :  { %v10868_v24 = vpop.f32.mrb[206].mxu1 }
0x1c35   :  { %v14668_v49 = vpack.c.bf16 %v10868_v24, %v10867_v53  ;;  %v5964_v18 = vpop.f32.mrb[207].mxu1 }
0x1c36   :  { %v14670_v0 = vpack.c.bf16 %v5964_v18, %v5961_v5  ;;  %10820 = vmatmul.mubr.msk.bf16.gmra.mrb[116].mxu0 %vm230_vm0, %v5561_v37 }
0x1c3a   :  { %v10871_v55 = vpop.f32.mrb[208].mxu1 }
0x1c3b   :  { %v5977_v36 = vpop.f32.mrb[209].mxu1 }
0x1c3c   :  { %v10872_v26 = vpop.f32.mrb[210].mxu1 }
0x1c3d   :  { %v14676_v57 = vpack.c.bf16 %v10872_v26, %v10871_v55  ;;  %v5980_v8 = vpop.f32.mrb[211].mxu1 }
0x1c3e   :  { %v14679_v46 = vpack.c.bf16 %v5980_v8, %v5977_v36 }
0x1c3f   :  { %6123 = vrot.lane.b32.xlu1 %v14676_v57, %s12227_s29 }
0x1c40   :  { %6121 = vrot.lane.b32.xlu0 %v14679_v46, %s12227_s29  ;;  %10901 = vmatprep.mubr.msk.bf16.mxu1 %vm794_vm2, %v14679_v46 }
0x1c42   :  { %v10875_v61 = vpop.f32.mrb[212].mxu1 }
0x1c43   :  { %v5993_v34 = vpop.f32.mrb[213].mxu1 }
0x1c44   :  { %v10876_v42 = vpop.f32.mrb[214].mxu1 }
0x1c45   :  { %v14688_v11 = vpack.c.bf16 %v10876_v42, %v10875_v61  ;;  %v5996_v17 = vpop.f32.mrb[215].mxu1 }
0x1c46   :  { %v14690_v12 = vpack.c.bf16 %v5996_v17, %v5993_v34 }
0x1c47   :  { %6127 = vrot.lane.b32.xlu1 %v14688_v11, %s12227_s29 }
0x1c48   :  { %6125 = vrot.lane.b32.xlu0 %v14690_v12, %s12227_s29 }
0x1c4b   :  { %6022 = vrot.lane.b32.xlu1 %v14660_v63, %s12227_s29 }
0x1c4c   :  { %6020 = vrot.lane.b32.xlu0 %v14662_v21, %s12227_s29 }
0x1c4f   :  { %6026 = vrot.lane.b32.xlu1 %v14668_v49, %s12227_s29 }
0x1c50   :  { %6024 = vrot.lane.b32.xlu0 %v14670_v0, %s12227_s29 }
0x1cb1   :  { %v6124_v22 = vpop.permute.xlu1 %6123 }
0x1cb2   :  { %v6122_v2 = vpop.permute.xlu0 %6121  ;;  %v6145_v33 = vsel %vm794_vm2, %v6124_v22, 0 }
0x1cb3   :  { %11392 = vmatprep.subr.msk.bf16.mxu1 %vm794_vm2, %v6122_v2  ;;  %v6142_v47 = vsel %vm794_vm2, %v6122_v2, 0 }
0x1cb4   :  { %10894 = vmatpush3.bf16.xpose.msra.mxu1 %v6142_v47 }
0x1cb5   :  { %11393 = vmatprep.subr.msk.bf16.mxu1 %vm794_vm2, %v6124_v22 }
0x1cb9   :  { %v6128_v5 = vpop.permute.xlu1 %6127 }
0x1cba   :  { %v6126_v44 = vpop.permute.xlu0 %6125  ;;  %v6151_v24 = vsel %vm794_vm2, %v6128_v5, 0 }
0x1cbb   :  { %v6148_v6 = vsel %vm794_vm2, %v6126_v44, 0 }
0x1cbc   :  { %10896 = vmatpush3.bf16.xpose.msra.mxu1 %v6145_v33 }
0x1cbd   :  { %11394 = vmatprep.subr.msk.bf16.mxu1 %vm794_vm2, %v6126_v44  ;;  %v6023_v14 = vpop.permute.xlu1 %6022 }
0x1cbe   :  { %v6021_v53 = vpop.permute.xlu0 %6020  ;;  %v6044_v22 = vsel %vm794_vm2, %v6023_v14, 0 }
0x1cbf   :  { %11388 = vmatprep.subr.msk.bf16.mxu0 %vm794_vm2, %v6021_v53  ;;  %v6041_v8 = vsel %vm794_vm2, %v6021_v53, 0 }
0x1cc1   :  { %v6027_v53 = vpop.permute.xlu1 %6026 }
0x1cc2   :  { %v6025_v44 = vpop.permute.xlu0 %6024  ;;  %v6050_v45 = vsel %vm794_vm2, %v6027_v53, 0 }
0x1cc3   :  { %v6047_v33 = vsel %vm794_vm2, %v6025_v44, 0 }
0x1cc4   :  { %10898 = vmatpush3.bf16.xpose.msra.mxu1 %v6148_v6 }
0x1cc5   :  { %11395 = vmatprep.subr.msk.bf16.mxu1 %vm794_vm2, %v6128_v5 }
0x1ccc   :  { %10900 = vmatpush3.bf16.xpose.msra.mxu1 %v6151_v24 }
0x1cd3   :  { %10902 = vmatmul.mubr.msk.bf16.vlgmr.msra.gmra.mrb[216].mxu1 %vm794_vm2, %v14676_v57 }
0x1cd4   :  { %10905 = vmatprep.mubr.msk.bf16.mxu1 %vm794_vm2, %v14690_v12 }
0x1cdb   :  { %10906 = vmatmul.mubr.msk.bf16.gmra.mrb[220].mxu1 %vm794_vm2, %v14688_v11 }
0x1d01   :  { %v10817_v37 = vpop.f32.mrb[112].mxu0 }
0x1d02   :  { %v5624_v18 = vpop.f32.mrb[113].mxu0 }
0x1d03   :  { %v10818_v55 = vpop.f32.mrb[114].mxu0 }
0x1d04   :  { %v5745_v36 = vpack.c.bf16 %v10818_v55, %v10817_v37  ;;  %v5627_v26 = vpop.f32.mrb[115].mxu0 }
0x1d05   :  { %v5744_v60 = vpack.c.bf16 %v5627_v26, %v5624_v18 }
0x1d07   :  { %10841 = vmatprep.mubr.msk.bf16.mxu0 %vm794_vm2, %v5744_v60 }
0x1d08   :  { %10842 = vmatmul.mubr.msk.bf16.vlgmr.msra.gmra.mrb[120].mxu0 %vm794_vm2, %v5745_v36 }
0x1d09   :  { %10878 = vmatpush3.bf16.xpose.msra.mxu0 %v6041_v8  ;;  %v10821_v61 = vpop.f32.mrb[116].mxu0 }
0x1d0a   :  { %11389 = vmatprep.subr.msk.bf16.mxu0 %vm794_vm2, %v6023_v14  ;;  %v5640_v34 = vpop.f32.mrb[117].mxu0 }
0x1d0b   :  { %v10822_v42 = vpop.f32.mrb[118].mxu0 }
0x1d0c   :  { %v5747_v17 = vpack.c.bf16 %v10822_v42, %v10821_v61  ;;  %v5643_v2 = vpop.f32.mrb[119].mxu0 }
0x1d0d   :  { %v5746_v47 = vpack.c.bf16 %v5643_v2, %v5640_v34 }
0x1d0f   :  { %10845 = vmatprep.mubr.msk.bf16.mxu0 %vm794_vm2, %v5746_v47 }
0x1d10   :  { %10846 = vmatmul.mubr.msk.bf16.gmra.mrb[124].mxu0 %vm794_vm2, %v5747_v17 }
0x1d11   :  { %10880 = vmatpush3.bf16.xpose.msra.mxu0 %v6044_v22  ;;  %10849 = vmatprep.mubr.msk.bf16.mxu0 %vm794_vm2, %v5748_v41 }
0x1d12   :  { %11390 = vmatprep.subr.msk.bf16.mxu0 %vm794_vm2, %v6025_v44 }
0x1d18   :  { %10850 = vmatmul.mubr.msk.bf16.gmra.mrb[128].mxu0 %vm794_vm2, %v5749_v27 }
0x1d19   :  { %10882 = vmatpush3.bf16.xpose.msra.mxu0 %v6047_v33  ;;  %10853 = vmatprep.mubr.msk.bf16.mxu0 %vm794_vm2, %v5750_v51 }
0x1d1a   :  { %11391 = vmatprep.subr.msk.bf16.mxu0 %vm794_vm2, %v6027_v53 }
0x1d20   :  { %10854 = vmatmul.mubr.msk.bf16.gmra.mrb[132].mxu0 %vm794_vm2, %v5751_v62 }
0x1d21   :  { %10884 = vmatpush3.bf16.xpose.msra.mxu0 %v6050_v45  ;;  %10885 = vmatprep.mubr.msk.bf16.mxu0 %vm794_vm2, %v14662_v21 }
0x1d28   :  { %10886 = vmatmul.mubr.msk.bf16.vlgmr.msra.gmra.mrb[136].mxu0 %vm794_vm2, %v14660_v63 }
0x1d29   :  { %10889 = vmatprep.mubr.msk.bf16.mxu0 %vm794_vm2, %v14670_v0 }
0x1d30   :  { %10890 = vmatmul.mubr.msk.bf16.gmra.mrb[140].mxu0 %vm794_vm2, %v14668_v49 }
0x1da6   :  { %v10903_v52 = vpop.f32.mrb[216].mxu1 }
0x1da7   :  { %v6187_v13 = vpop.f32.mrb[217].mxu1  ;;  %v6248_v32 = vsel %vm230_vm0, %v10903_v52, -inf }
0x1da8   :  { %v10904_v27 = vpop.f32.mrb[218].mxu1  ;;  %v6242_v1 = vsel %vm230_vm0, %v6187_v13, -inf }
0x1da9   :  { %6243 = vmax.xlane.f32.xlu0 %v6242_v1  ;;  %v6190_v41 = vpop.f32.mrb[219].mxu1  ;;  %v6251_v51 = vsel %vm230_vm0, %v10904_v27, -inf }
0x1daa   :  { %v6245_v38 = vsel %vm230_vm0, %v6190_v41, -inf }
0x1dab   :  { %6246 = vmax.xlane.f32.xlu1 %v6245_v38 }
0x1dad   :  { %6249 = vmax.xlane.f32.xlu0 %v6248_v32 }
0x1dae   :  { %v10907_v16 = vpop.f32.mrb[220].mxu1 }
0x1daf   :  { %v6203_v62 = vpop.f32.mrb[221].mxu1  ;;  %v6260_v18 = vsel %vm230_vm0, %v10907_v16, -inf }
0x1db0   :  { %v14757_v25 = vpop.f32.mrb[222].mxu1  ;;  %v6254_v24 = vsel %vm230_vm0, %v6203_v62, -inf }
0x1db1   :  { %6252 = vmax.xlane.f32.xlu0 %v6251_v51  ;;  %v14760_v6 = vpop.f32.mrb[223].mxu1  ;;  %v6263_v37 = vsel %vm230_vm0, %v14757_v25, -inf }
0x1db2   :  { %v6257_v5 = vsel %vm230_vm0, %v14760_v6, -inf }
0x1db3   :  { %6258 = vmax.xlane.f32.xlu1 %v6257_v5 }
0x1db5   :  { %6255 = vmax.xlane.f32.xlu0 %v6254_v24 }
0x1db7   :  { %6264 = vmax.xlane.f32.xlu1 %v6263_v37 }
0x1db9   :  { %6261 = vmax.xlane.f32.xlu0 %v6260_v18 }
0x1dfb   :  { %v14768_v55 = vpop.f32.mrb[136].mxu0 }
0x1dfc   :  { %v14770_v36 = vpop.f32.mrb[137].mxu0 }
0x1dfd   :  { %v14772_v26 = vpop.f32.mrb[138].mxu0 }
0x1dfe   :  { %v14774_v60 = vpop.f32.mrb[139].mxu0 }
0x1e03   :  { %v14776_v8 = vpop.f32.mrb[140].mxu0 }
0x1e04   :  { %v14778_v14 = vpop.f32.mrb[141].mxu0 }
0x1e05   :  { %v14780_v61 = vpop.f32.mrb[142].mxu0 }
0x1e06   :  { %v14782_v34 = vpop.f32.mrb[143].mxu0 }
0x1e36   :  { %v6244_v42 = vpop.xlane.xlu0 %6243 }
0x1e37   :  { %v6274_v17 = vsub.f32 %v6187_v13, %v6244_v42 }
0x1e38   :  { %v6247_v2 = vpop.xlane.xlu1 %6246 }
0x1e39   :  { %v6298_v44 = vmul.f32 1.442695, %v6274_v17  ;;  %v6275_v33 = vsub.f32 %v6190_v41, %v6247_v2 }
0x1e3a   :  { %v6250_v47 = vpop.xlane.xlu0 %6249 }
0x1e3b   :  { %v6276_v22 = vsub.f32 %v10903_v52, %v6250_v47  ;;  %v6300_v38 = vmul.f32 1.442695, %v6275_v33 }
0x1e3d   :  { %v6302_v53 = vmul.f32 1.442695, %v6276_v22 }
0x1e3e   :  { %v6253_v45 = vpop.xlane.xlu0 %6252 }
0x1e3f   :  { %11938 = vpow2.f32 %v6302_v53  ;;  %v6277_v1 = vsub.f32 %v10904_v27, %v6253_v45 }
0x1e40   :  { %11940 = vpow2.f32 %v6298_v44  ;;  %v6259_v53 = vpop.xlane.xlu1 %6258 }
0x1e41   :  { %v6304_v32 = vmul.f32 1.442695, %v6277_v1 }
0x1e42   :  { %v6256_v51 = vpop.xlane.xlu0 %6255 }
0x1e43   :  { %11942 = vpow2.f32 %v6304_v32  ;;  %v6278_v5 = vsub.f32 %v6203_v62, %v6256_v51 }
0x1e44   :  { %11944 = vpow2.f32 %v6300_v38  ;;  %v6265_v45 = vpop.xlane.xlu1 %6264  ;;  %v6279_v38 = vsub.f32 %v14760_v6, %v6259_v53  ;;  %v6227_v6 = vsel %vm230_vm0, %v14772_v26, -inf }
0x1e45   :  { %v6306_v13 = vmul.f32 1.442695, %v6278_v5  ;;  %v6281_v1 = vsub.f32 %v14757_v25, %v6265_v45  ;;  %v6224_v25 = vsel %vm230_vm0, %v14768_v55, -inf }
0x1e46   :  { %v6262_v24 = vpop.xlane.xlu0 %6261  ;;  %v6308_v51 = vmul.f32 1.442695, %v6279_v38 }
0x1e47   :  { %v6280_v37 = vsub.f32 %v10907_v16, %v6262_v24  ;;  %v6312_v32 = vmul.f32 1.442695, %v6281_v1 }
0x1e49   :  { %v14784_v18 = vpop.eup %11938  ;;  %v6310_v42 = vmul.f32 1.442695, %v6280_v37  ;;  %v6230_v37 = vsel %vm230_vm0, %v14778_v14, -inf }
0x1e4a   :  { %v6344_v52 = vsel %vm230_vm0, %v14784_v18, 0.0  ;;  %v14788_v41 = vpop.eup %11940 }
0x1e4b   :  { %11946 = vpow2.f32 %v6310_v42  ;;  %6345 = vadd.xlane.f32.xlu0 %v6344_v52  ;;  %v6338_v17 = vsel %vm230_vm0, %v14788_v41, 0.0  ;;  %v6221_v42 = vsel %vm230_vm0, %v14774_v60, -inf  ;;  %v6233_v52 = vsel %vm230_vm0, %v14782_v34, -inf }
0x1e4c   :  { %11948 = vpow2.f32 %v6306_v13  ;;  %v6236_v13 = vsel %vm230_vm0, %v14776_v8, -inf }
0x1e4d   :  { %v14790_v27 = vpop.eup %11942  ;;  %11950 = vpow2.f32 %v6312_v32 }
0x1e4e   :  { %v6347_v16 = vsel %vm230_vm0, %v14790_v27, 0.0  ;;  %v11945_v62 = vpop.eup %11944  ;;  %11952 = vpow2.f32 %v6308_v51 }
0x1e4f   :  { %6339 = vadd.xlane.f32.xlu0 %v6338_v17  ;;  %6348 = vadd.xlane.f32.xlu1 %v6347_v16  ;;  %v6341_v2 = vsel %vm230_vm0, %v11945_v62, 0.0  ;;  %v6239_v17 = vsel %vm230_vm0, %v14780_v61, -inf }
0x1e53   :  { %6342 = vadd.xlane.f32.xlu1 %v6341_v2 }
0x1e55   :  { %v14797_v47 = vpop.eup %11946 }
0x1e56   :  { %v6356_v22 = vsel %vm230_vm0, %v14797_v47, 0.0  ;;  %v14801_v44 = vpop.eup %11948 }
0x1e57   :  { %6357 = vadd.xlane.f32.xlu0 %v6356_v22  ;;  %v6350_v33 = vsel %vm230_vm0, %v14801_v44, 0.0  ;;  %v14813_v5 = vpop.eup %11950 }
0x1e58   :  { %v14817_v24 = vpop.eup %11952 }
0x1e5b   :  { %6351 = vadd.xlane.f32.xlu0 %v6350_v33 }
0x1e64   :  { %6493 = vrot.lane.b32.xlu1 %v14676_v57, %s12228_s30  ;;  %v6359_v57 = vsel %vm230_vm0, %v14813_v5, 0.0 }
0x1e68   :  { %6495 = vrot.lane.b32.xlu1 %v14690_v12, %s12228_s30  ;;  %v6353_v12 = vsel %vm230_vm0, %v14817_v24, 0.0 }
0x1e71   :  { %6491 = vrot.lane.b32.xlu0 %v14679_v46, %s12228_s30  ;;  %v6218_v46 = vsel %vm230_vm0, %v14770_v36, -inf }
0x1e8c   :  { %6360 = vadd.xlane.f32.xlu1 %v6359_v57 }
0x1e90   :  { %6219 = vmax.xlane.f32.xlu0 %v6218_v46  ;;  %6354 = vadd.xlane.f32.xlu1 %v6353_v12 }
0x1e94   :  { %6225 = vmax.xlane.f32.xlu0 %v6224_v25 }
0x1e98   :  { %6228 = vmax.xlane.f32.xlu0 %v6227_v6 }
0x1e9c   :  { %6231 = vmax.xlane.f32.xlu0 %v6230_v37 }
0x1ea0   :  { %6237 = vmax.xlane.f32.xlu0 %v6236_v13 }
0x1ea1   :  { %6497 = vrot.lane.b32.xlu1 %v14688_v11, %s12228_s30 }
0x1ec5   :  { %6222 = vmax.xlane.f32.xlu1 %v6221_v42 }
0x1ec9   :  { %6234 = vmax.xlane.f32.xlu1 %v6233_v52 }
0x1ecd   :  { %6240 = vmax.xlane.f32.xlu1 %v6239_v17  ;;  %v11476_v17 = vld [vmem:[%s16218_s3 + $0x60] sm:$0xff]  }
0x1ed8   :  { %v6346_v16 = vpop.xlane.xlu0 %6345 }
0x1edc   :  { %v6340_v2 = vpop.xlane.xlu0 %6339  ;;  %v6349_v22 = vpop.xlane.xlu1 %6348 }
0x1edd   :  { %11954 = vrcp.f32 %v6340_v2 }
0x1ee0   :  { %v6343_v33 = vpop.xlane.xlu1 %6342 }
0x1ee1   :  { %11956 = vrcp.f32 %v6343_v33 }
0x1ee2   :  { %11958 = vrcp.f32 %v6349_v22 }
0x1ee3   :  { %11960 = vrcp.f32 %v6346_v16 }
0x1ee4   :  { %v6358_v53 = vpop.xlane.xlu0 %6357  ;;  %v6494_v38 = vpop.permute.xlu1 %6493 }
0x1ee7   :  { %v11955_v45 = vpop.eup %11954 }
0x1ee8   :  { %v6352_v11 = vpop.xlane.xlu0 %6351  ;;  %v6386_v51 = vmul.f32 %v11955_v45, %v14788_v41  ;;  %v6496_v12 = vpop.permute.xlu1 %6495 }
0x1eeb   :  { %v11957_v1 = vpop.eup %11956 }
0x1eec   :  { %v6492_v32 = vpop.permute.xlu0 %6491  ;;  %v6387_v57 = vmul.f32 %v11957_v1, %v11945_v62  ;;  %v11959_v6 = vpop.eup %11958 }
0x1eed   :  { %10925 = vmatprep.subr.bf16.mxu1 %v6492_v32  ;;  %v11961_v13 = vpop.eup %11960  ;;  %v6389_v42 = vmul.f32 %v11959_v6, %v14790_v27  ;;  %v11477_v27 = vld [vmem:[%s16218_s3 + $0x68] sm:$0xff]  }
0x1eee   :  { %10926 = vmatpush3.bf16.msra.mxu1 %v6492_v32  ;;  %v6398_v46 = vpack.c.bf16 %v6387_v57, %v6386_v51  ;;  %v6388_v22 = vmul.f32 %v11961_v13, %v14784_v18 }
0x1eef   :  { %10927 = vmatprep.subr.bf16.mxu1 %v6494_v38 }
0x1ef0   :  { %10933 = vmatprep.mubr.msk.bf16.mxu1 %vm230_vm0, %v6398_v46 }
0x1ef2   :  { %10928 = vmatpush3.bf16.msra.mxu1 %v6494_v38 }
0x1ef3   :  { %10929 = vmatprep.subr.bf16.mxu1 %v6496_v12 }
0x1ef6   :  { %10930 = vmatpush3.bf16.msra.mxu1 %v6496_v12 }
0x1f19   :  { %v6361_v25 = vpop.xlane.xlu1 %6360 }
0x1f1a   :  { %11962 = vrcp.f32 %v6361_v25 }
0x1f1b   :  { %11964 = vrcp.f32 %v6352_v11 }
0x1f1c   :  { %11966 = vrcp.f32 %v6358_v53  ;;  %v6399_v53 = vpack.c.bf16 %v6389_v42, %v6388_v22 }
0x1f1d   :  { %v6220_v37 = vpop.xlane.xlu0 %6219  ;;  %v6355_v41 = vpop.xlane.xlu1 %6354 }
0x1f1e   :  { %v6266_v62 = vsub.f32 %v14770_v36, %v6220_v37  ;;  %11968 = vrcp.f32 %v6355_v41 }
0x1f20   :  { %v6282_v52 = vmul.f32 1.442695, %v6266_v62 }
0x1f21   :  { %v6226_v2 = vpop.xlane.xlu0 %6225  ;;  %v6498_v16 = vpop.permute.xlu1 %6497 }
0x1f22   :  { %11970 = vpow2.f32 %v6282_v52  ;;  %v6268_v33 = vsub.f32 %v14768_v55, %v6226_v2  ;;  %10931 = vmatprep.subr.bf16.mxu1 %v6498_v16 }
0x1f23   :  { %10932 = vmatpush3.bf16.msra.mxu1 %v6498_v16 }
0x1f24   :  { %v6286_v36 = vmul.f32 1.442695, %v6268_v33  ;;  %10959 = vmatprep.subr.bf16.mxu1 %v11476_v17  ;;  %v11963_v11 = vpop.eup %11962 }
0x1f25   :  { %v6229_v45 = vpop.xlane.xlu0 %6228  ;;  %v11965_v1 = vpop.eup %11964  ;;  %v6393_v55 = vmul.f32 %v11963_v11, %v14813_v5 }
0x1f26   :  { %11972 = vpow2.f32 %v6286_v36  ;;  %10934 = vmatmul.mubr.msk.bf16.vlgmr.msra.gmra.mrb[224].mxu1 %vm230_vm0, %v6399_v53  ;;  %v11967_v38 = vpop.eup %11966  ;;  %v6390_v51 = vmul.f32 %v11965_v1, %v14801_v44 }
0x1f27   :  { %10960 = vmatpush3.bf16.msra.mxu1 %v11476_v17  ;;  %v6392_v12 = vmul.f32 %v11967_v38, %v14797_v47  ;;  %v6269_v17 = vsub.f32 %v14772_v26, %v6229_v45 }
0x1f28   :  { %v11969_v18 = vpop.eup %11968  ;;  %10961 = vmatprep.subr.bf16.mxu1 %v11477_v27 }
0x1f29   :  { %v6232_v32 = vpop.xlane.xlu0 %6231  ;;  %v6391_v57 = vmul.f32 %v11969_v18, %v14817_v24  ;;  %v6401_v41 = vpack.c.bf16 %v6393_v55, %v6392_v12  ;;  %v6288_v22 = vmul.f32 1.442695, %v6269_v17 }
0x1f2a   :  { %v6270_v46 = vsub.f32 %v14778_v14, %v6232_v32 }
0x1f2b   :  { %v6400_v25 = vpack.c.bf16 %v6391_v57, %v6390_v51  ;;  %10962 = vmatpush3.bf16.msra.mxu1 %v11477_v27 }
0x1f2c   :  { %v14857_v6 = vpop.eup %11970  ;;  %v6290_v37 = vmul.f32 1.442695, %v6270_v46 }
0x1f2d   :  { %v6238_v62 = vpop.xlane.xlu0 %6237  ;;  %10937 = vmatprep.mubr.msk.bf16.mxu1 %vm230_vm0, %v6400_v25  ;;  %v6314_v5 = vsel %vm230_vm0, %v14857_v6, 0.0 }
0x1f2e   :  { %11974 = vpow2.f32 %v6290_v37  ;;  %v6272_v44 = vsub.f32 %v14776_v8, %v6238_v62  ;;  %6315 = vadd.xlane.f32.xlu0 %v6314_v5  ;;  %10938 = vmatmul.mubr.msk.bf16.gmra.mrb[228].mxu1 %vm230_vm0, %v6401_v41 }
0x1f2f   :  { %10963 = vmatprep.mubr.msk.bf16.mxu1 %vm359_vm1, %v14341_v3 }
0x1f30   :  { %v14866_v14 = vpop.eup %11972  ;;  %v6294_v47 = vmul.f32 1.442695, %v6272_v44 }
0x1f31   :  { %v6320_v24 = vsel %vm230_vm0, %v14866_v14, 0.0 }
0x1f32   :  { %11976 = vpow2.f32 %v6294_v47  ;;  %6321 = vadd.xlane.f32.xlu0 %v6320_v24 }
0x1f36   :  { %10964 = vmatmul.mubr.msk.bf16.vlgmr.msra.gmra.mrb[232].mxu1 %vm359_vm1, %v14347_v48 }
0x1f37   :  { %10967 = vmatprep.mubr.msk.bf16.mxu1 %vm359_vm1, %v14360_v54 }
0x1f38   :  { %v14874_v8 = vpop.eup %11974 }
0x1f39   :  { %v6326_v13 = vsel %vm230_vm0, %v14874_v8, 0.0 }
0x1f3a   :  { %6327 = vadd.xlane.f32.xlu0 %v6326_v13 }
0x1f3c   :  { %v14878_v42 = vpop.eup %11976 }
0x1f3d   :  { %v6332_v52 = vsel %vm230_vm0, %v14878_v42, 0.0 }
0x1f3e   :  { %6333 = vadd.xlane.f32.xlu0 %v6332_v52  ;;  %10968 = vmatmul.mubr.msk.bf16.gmra.mrb[236].mxu1 %vm359_vm1, %v14368_v58 }
0x1f3f   :  { %10971 = vmatprep.mubr.msk.bf16.mxu1 %vm359_vm1, %v14380_v4 }
0x1f46   :  { %10972 = vmatmul.mubr.msk.bf16.gmra.mrb[240].mxu1 %vm359_vm1, %v14390_v31 }
0x1f47   :  { %10975 = vmatprep.mubr.msk.bf16.mxu1 %vm359_vm1, %v14400_v29 }
0x1f4e   :  { %10976 = vmatmul.mubr.msk.bf16.gmra.mrb[244].mxu1 %vm359_vm1, %v14407_v9 }
0x1f52   :  { %v6223_v2 = vpop.xlane.xlu1 %6222 }
0x1f53   :  { %v6267_v16 = vsub.f32 %v14774_v60, %v6223_v2 }
0x1f54   :  { %6402 = vrot.lane.b32.xlu0 %v14662_v21, %s12228_s30 }
0x1f55   :  { %v6284_v33 = vmul.f32 1.442695, %v6267_v16 }
0x1f56   :  { %v6235_v53 = vpop.xlane.xlu1 %6234 }
0x1f57   :  { %11978 = vpow2.f32 %v6284_v33  ;;  %v6271_v36 = vsub.f32 %v14782_v34, %v6235_v53 }
0x1f58   :  { %11980 = vpow2.f32 %v6288_v22 }
0x1f59   :  { %v6292_v27 = vmul.f32 1.442695, %v6271_v36 }
0x1f5a   :  { %v6241_v11 = vpop.xlane.xlu1 %6240 }
0x1f5b   :  { %v6273_v1 = vsub.f32 %v14780_v61, %v6241_v11  ;;  %11982 = vpow2.f32 %v6292_v27 }
0x1f5d   :  { %v6296_v38 = vmul.f32 1.442695, %v6273_v1 }
0x1f5f   :  { %11984 = vpow2.f32 %v6296_v38 }
0x1f61   :  { %v11979_v26 = vpop.eup %11978 }
0x1f62   :  { %v6317_v60 = vsel %vm230_vm0, %v11979_v26, 0.0  ;;  %v11981_v45 = vpop.eup %11980 }
0x1f63   :  { %6318 = vadd.xlane.f32.xlu1 %v6317_v60  ;;  %v6323_v21 = vsel %vm230_vm0, %v11981_v45, 0.0 }
0x1f65   :  { %v11983_v18 = vpop.eup %11982 }
0x1f66   :  { %v6329_v55 = vsel %vm230_vm0, %v11983_v18, 0.0 }
0x1f67   :  { %6324 = vadd.xlane.f32.xlu1 %v6323_v21 }
0x1f69   :  { %v14901_v34 = vpop.eup %11984 }
0x1f6a   :  { %v6335_v61 = vsel %vm230_vm0, %v14901_v34, 0.0 }
0x1f6b   :  { %6330 = vadd.xlane.f32.xlu1 %v6329_v55 }
0x1f6f   :  { %6336 = vadd.xlane.f32.xlu1 %v6335_v61 }
0x1f80   :  { %6404 = vrot.lane.b32.xlu1 %v14660_v63, %s12228_s30 }
0x1f84   :  { %6406 = vrot.lane.b32.xlu1 %v14670_v0, %s12228_s30 }
0x1f88   :  { %6408 = vrot.lane.b32.xlu1 %v14668_v49, %s12228_s30 }
0x1fbb   :  { %v6316_v32 = vpop.xlane.xlu0 %6315 }
0x1fbc   :  { %11986 = vrcp.f32 %v6316_v32 }
0x1fbf   :  { %v6322_v51 = vpop.xlane.xlu0 %6321 }
0x1fc6   :  { %v11987_v62 = vpop.eup %11986 }
0x1fc7   :  { %v6328_v57 = vpop.xlane.xlu0 %6327  ;;  %v6378_v13 = vmul.f32 %v11987_v62, %v14857_v6 }
0x1fcb   :  { %v6334_v46 = vpop.xlane.xlu0 %6333 }
0x1fcf   :  { %v6403_v12 = vpop.permute.xlu0 %6402 }
0x1fd0   :  { %10909 = vmatprep.subr.bf16.mxu0 %v6403_v12 }
0x1fd1   :  { %10910 = vmatpush3.bf16.msra.mxu0 %v6403_v12 }
0x1ff0   :  { %v6319_v25 = vpop.xlane.xlu1 %6318 }
0x1ff1   :  { %11988 = vrcp.f32 %v6319_v25 }
0x1ff4   :  { %v6325_v37 = vpop.xlane.xlu1 %6324 }
0x1ff5   :  { %11990 = vrcp.f32 %v6325_v37 }
0x1ff8   :  { %v6331_v41 = vpop.xlane.xlu1 %6330 }
0x1ff9   :  { %v14911_v63 = vpop.f32.mrb[224].mxu1  ;;  %11992 = vrcp.f32 %v6331_v41 }
0x1ffa   :  { %v14913_v0 = vpop.f32.mrb[225].mxu1  ;;  %11994 = vrcp.f32 %v6322_v51 }
0x1ffb   :  { %v11989_v5 = vpop.eup %11988  ;;  %v14915_v49 = vpop.f32.mrb[226].mxu1  ;;  %11996 = vrcp.f32 %v6328_v57 }
0x1ffc   :  { %v6585_v44 = vpack.c.bf16 %v14915_v49, %v14911_v63  ;;  %v14919_v47 = vpop.f32.mrb[227].mxu1  ;;  %v6337_v24 = vpop.xlane.xlu1 %6336  ;;  %v6379_v52 = vmul.f32 %v11989_v5, %v11979_v26 }
0x1ffd   :  { %v6584_v17 = vpack.c.bf16 %v14919_v47, %v14913_v0  ;;  %11998 = vrcp.f32 %v6337_v24 }
0x1ffe   :  { %v6394_v2 = vpack.c.bf16 %v6379_v52, %v6378_v13  ;;  %12000 = vrcp.f32 %v6334_v46 }
0x1fff   :  { %v11991_v36 = vpop.eup %11990 }
0x2000   :  { %10917 = vmatprep.mubr.msk.bf16.mxu0 %vm230_vm0, %v6394_v2  ;;  %v6405_v16 = vpop.permute.xlu1 %6404  ;;  %v6381_v21 = vmul.f32 %v11991_v36, %v11981_v45 }
0x2001   :  { %10911 = vmatprep.subr.bf16.mxu0 %v6405_v16  ;;  %v14925_v22 = vpop.f32.mrb[228].mxu1 }
0x2002   :  { %10912 = vmatpush3.bf16.msra.mxu0 %v6405_v16  ;;  %v14927_v33 = vpop.f32.mrb[229].mxu1 }
0x2003   :  { %v14929_v53 = vpop.f32.mrb[230].mxu1  ;;  %v11993_v1 = vpop.eup %11992 }
0x2004   :  { %v6587_v6 = vpack.c.bf16 %v14929_v53, %v14925_v22  ;;  %v14933_v27 = vpop.f32.mrb[231].mxu1  ;;  %v6407_v11 = vpop.permute.xlu1 %6406  ;;  %v6383_v61 = vmul.f32 %v11993_v1, %v11983_v18 }
0x2005   :  { %v6586_v38 = vpack.c.bf16 %v14933_v27, %v14927_v33  ;;  %10913 = vmatprep.subr.bf16.mxu0 %v6407_v11  ;;  %v11995_v26 = vpop.eup %11994 }
0x2006   :  { %10914 = vmatpush3.bf16.msra.mxu0 %v6407_v11  ;;  %v11997_v60 = vpop.eup %11996  ;;  %v6380_v32 = vmul.f32 %v11995_v26, %v14866_v14 }
0x2007   :  { %v6382_v46 = vmul.f32 %v11997_v60, %v14874_v8  ;;  %v11999_v37 = vpop.eup %11998 }
0x2008   :  { %v6409_v55 = vpop.permute.xlu1 %6408  ;;  %v6395_v12 = vpack.c.bf16 %v6381_v21, %v6380_v32  ;;  %v12001_v45 = vpop.eup %12000  ;;  %v6385_v14 = vmul.f32 %v11999_v37, %v14901_v34  ;;  %v9704_v34 = vld [vmem:[%s16220_s4 + $0x14] sm:$0xf] }
0x2009   :  { %10915 = vmatprep.subr.bf16.mxu0 %v6409_v55  ;;  %v10965_v51 = vpop.f32.mrb[232].mxu1  ;;  %v6396_v5 = vpack.c.bf16 %v6383_v61, %v6382_v46  ;;  %v6384_v13 = vmul.f32 %v12001_v45, %v14878_v42  ;;  %v6615_v61 = vsel %vm1380_vm3, %v9704_v34, 0 }
0x200a   :  { %10916 = vmatpush3.bf16.msra.mxu0 %v6409_v55  ;;  %v6781_v57 = vpop.f32.mrb[233].mxu1 }
0x200b   :  { %v10966_v25 = vpop.f32.mrb[234].mxu1  ;;  %v6397_v2 = vpack.c.bf16 %v6385_v14, %v6384_v13  ;;  %11396 = vmatprep.subr.msk.bf16.mxu0 %vm1380_vm3, %v9704_v34 }
0x200c   :  { %v14939_v41 = vpack.c.bf16 %v10966_v25, %v10965_v51  ;;  %v6784_v62 = vpop.f32.mrb[235].mxu1 }
0x200d   :  { %v14941_v24 = vpack.c.bf16 %v6784_v62, %v6781_v57  ;;  %10918 = vmatmul.mubr.msk.bf16.vlgmr.msra.gmra.mrb[144].mxu0 %vm230_vm0, %v6395_v12 }
0x200e   :  { %10921 = vmatprep.mubr.msk.bf16.mxu0 %vm230_vm0, %v6396_v5  ;;  %10942 = vmatpush3.bf16.msra.mxu0 %v6615_v61 }
0x2011   :  { %v10969_v18 = vpop.f32.mrb[236].mxu1 }
0x2012   :  { %v6797_v8 = vpop.f32.mrb[237].mxu1 }
0x2013   :  { %v10970_v52 = vpop.f32.mrb[238].mxu1 }
0x2014   :  { %v14947_v16 = vpack.c.bf16 %v10970_v52, %v10969_v18  ;;  %v6800_v36 = vpop.f32.mrb[239].mxu1 }
0x2015   :  { %v14949_v11 = vpack.c.bf16 %v6800_v36, %v6797_v8  ;;  %10922 = vmatmul.mubr.msk.bf16.gmra.mrb[148].mxu0 %vm230_vm0, %v6397_v2 }
0x2019   :  { %v10973_v1 = vpop.f32.mrb[240].mxu1 }
0x201a   :  { %v6813_v26 = vpop.f32.mrb[241].mxu1 }
0x201b   :  { %v10974_v60 = vpop.f32.mrb[242].mxu1 }
0x201c   :  { %v14955_v21 = vpack.c.bf16 %v10974_v60, %v10973_v1  ;;  %v6816_v42 = vpop.f32.mrb[243].mxu1 }
0x201d   :  { %v14958_v55 = vpack.c.bf16 %v6816_v42, %v6813_v26 }
0x201e   :  { %6959 = vrot.lane.b32.xlu1 %v14955_v21, %s12227_s29 }
0x201f   :  { %6957 = vrot.lane.b32.xlu0 %v14958_v55, %s12227_s29  ;;  %11003 = vmatprep.mubr.msk.bf16.mxu1 %vm794_vm2, %v14958_v55 }
0x2021   :  { %v10977_v32 = vpop.f32.mrb[244].mxu1 }
0x2022   :  { %v6829_v51 = vpop.f32.mrb[245].mxu1 }
0x2023   :  { %v10978_v57 = vpop.f32.mrb[246].mxu1 }
0x2024   :  { %v14967_v46 = vpack.c.bf16 %v10978_v57, %v10977_v32  ;;  %v6832_v12 = vpop.f32.mrb[247].mxu1 }
0x2025   :  { %v14969_v25 = vpack.c.bf16 %v6832_v12, %v6829_v51 }
0x2026   :  { %6963 = vrot.lane.b32.xlu1 %v14967_v46, %s12227_s29 }
0x2027   :  { %6961 = vrot.lane.b32.xlu0 %v14969_v25, %s12227_s29 }
0x202a   :  { %6858 = vrot.lane.b32.xlu1 %v14939_v41, %s12227_s29 }
0x202b   :  { %6856 = vrot.lane.b32.xlu0 %v14941_v24, %s12227_s29 }
0x202e   :  { %6862 = vrot.lane.b32.xlu1 %v14947_v16, %s12227_s29 }
0x202f   :  { %6860 = vrot.lane.b32.xlu0 %v14949_v11, %s12227_s29 }
0x2090   :  { %v6960_v5 = vpop.permute.xlu1 %6959 }
0x2091   :  { %v6958_v37 = vpop.permute.xlu0 %6957  ;;  %v6981_v14 = vsel %vm794_vm2, %v6960_v5, 0 }
0x2092   :  { %11401 = vmatprep.subr.msk.bf16.mxu1 %vm794_vm2, %v6958_v37  ;;  %v6978_v62 = vsel %vm794_vm2, %v6958_v37, 0 }
0x2093   :  { %10996 = vmatpush3.bf16.xpose.msra.mxu1 %v6978_v62 }
0x2094   :  { %11402 = vmatprep.subr.msk.bf16.mxu1 %vm794_vm2, %v6960_v5 }
0x2098   :  { %v6964_v8 = vpop.permute.xlu1 %6963 }
0x2099   :  { %v6962_v45 = vpop.permute.xlu0 %6961  ;;  %v6987_v52 = vsel %vm794_vm2, %v6964_v8, 0 }
0x209a   :  { %v6984_v13 = vsel %vm794_vm2, %v6962_v45, 0 }
0x209b   :  { %10998 = vmatpush3.bf16.xpose.msra.mxu1 %v6981_v14 }
0x209c   :  { %11403 = vmatprep.subr.msk.bf16.mxu1 %vm794_vm2, %v6962_v45  ;;  %v6859_v61 = vpop.permute.xlu1 %6858 }
0x209d   :  { %v6857_v18 = vpop.permute.xlu0 %6856  ;;  %v6880_v5 = vsel %vm794_vm2, %v6859_v61, 0 }
0x209e   :  { %11397 = vmatprep.subr.msk.bf16.mxu0 %vm794_vm2, %v6857_v18  ;;  %v6877_v42 = vsel %vm794_vm2, %v6857_v18, 0 }
0x20a0   :  { %v6863_v18 = vpop.permute.xlu1 %6862 }
0x20a1   :  { %v6861_v45 = vpop.permute.xlu0 %6860  ;;  %v6886_v63 = vsel %vm794_vm2, %v6863_v18, 0 }
0x20a2   :  { %v6883_v14 = vsel %vm794_vm2, %v6861_v45, 0 }
0x20a3   :  { %11000 = vmatpush3.bf16.xpose.msra.mxu1 %v6984_v13 }
0x20a4   :  { %11404 = vmatprep.subr.msk.bf16.mxu1 %vm794_vm2, %v6964_v8 }
0x20ab   :  { %11002 = vmatpush3.bf16.xpose.msra.mxu1 %v6987_v52 }
0x20b2   :  { %11004 = vmatmul.mubr.msk.bf16.vlgmr.msra.gmra.mrb[248].mxu1 %vm794_vm2, %v14955_v21 }
0x20b3   :  { %11007 = vmatprep.mubr.msk.bf16.mxu1 %vm794_vm2, %v14969_v25 }
0x20ba   :  { %11008 = vmatmul.mubr.msk.bf16.gmra.mrb[252].mxu1 %vm794_vm2, %v14967_v46 }
0x20e0   :  { %v10919_v2 = vpop.f32.mrb[144].mxu0 }
0x20e1   :  { %v6460_v36 = vpop.f32.mrb[145].mxu0 }
0x20e2   :  { %v10920_v1 = vpop.f32.mrb[146].mxu0 }
0x20e3   :  { %v6581_v26 = vpack.c.bf16 %v10920_v1, %v10919_v2  ;;  %v6463_v60 = vpop.f32.mrb[147].mxu0 }
0x20e4   :  { %v6580_v34 = vpack.c.bf16 %v6463_v60, %v6460_v36 }
0x20e6   :  { %10943 = vmatprep.mubr.msk.bf16.mxu0 %vm794_vm2, %v6580_v34 }
0x20e7   :  { %10944 = vmatmul.mubr.msk.bf16.vlgmr.msra.gmra.mrb[120].mxu0 %vm794_vm2, %v6581_v26 }
0x20e8   :  { %10980 = vmatpush3.bf16.xpose.msra.mxu0 %v6877_v42  ;;  %v10923_v32 = vpop.f32.mrb[148].mxu0 }
0x20e9   :  { %11398 = vmatprep.subr.msk.bf16.mxu0 %vm794_vm2, %v6859_v61  ;;  %v6476_v51 = vpop.f32.mrb[149].mxu0 }
0x20ea   :  { %v10924_v57 = vpop.f32.mrb[150].mxu0 }
0x20eb   :  { %v6583_v12 = vpack.c.bf16 %v10924_v57, %v10923_v32  ;;  %v6479_v37 = vpop.f32.mrb[151].mxu0 }
0x20ec   :  { %v6582_v62 = vpack.c.bf16 %v6479_v37, %v6476_v51 }
0x20ee   :  { %10947 = vmatprep.mubr.msk.bf16.mxu0 %vm794_vm2, %v6582_v62 }
0x20ef   :  { %10948 = vmatmul.mubr.msk.bf16.gmra.mrb[124].mxu0 %vm794_vm2, %v6583_v12 }
0x20f0   :  { %10982 = vmatpush3.bf16.xpose.msra.mxu0 %v6880_v5  ;;  %10951 = vmatprep.mubr.msk.bf16.mxu0 %vm794_vm2, %v6584_v17 }
0x20f1   :  { %11399 = vmatprep.subr.msk.bf16.mxu0 %vm794_vm2, %v6861_v45 }
0x20f7   :  { %10952 = vmatmul.mubr.msk.bf16.gmra.mrb[128].mxu0 %vm794_vm2, %v6585_v44 }
0x20f8   :  { %10984 = vmatpush3.bf16.xpose.msra.mxu0 %v6883_v14  ;;  %10955 = vmatprep.mubr.msk.bf16.mxu0 %vm794_vm2, %v6586_v38 }
0x20f9   :  { %11400 = vmatprep.subr.msk.bf16.mxu0 %vm794_vm2, %v6863_v18 }
0x20ff   :  { %10956 = vmatmul.mubr.msk.bf16.gmra.mrb[132].mxu0 %vm794_vm2, %v6587_v6 }
0x2100   :  { %10986 = vmatpush3.bf16.xpose.msra.mxu0 %v6886_v63  ;;  %10987 = vmatprep.mubr.msk.bf16.mxu0 %vm794_vm2, %v14941_v24 }
0x2107   :  { %10988 = vmatmul.mubr.msk.bf16.vlgmr.msra.gmra.mrb[152].mxu0 %vm794_vm2, %v14939_v41 }
0x2108   :  { %10991 = vmatprep.mubr.msk.bf16.mxu0 %vm794_vm2, %v14949_v11 }
0x210f   :  { %10992 = vmatmul.mubr.msk.bf16.gmra.mrb[156].mxu0 %vm794_vm2, %v14947_v16 }
0x2185   :  { %v11005_v0 = vpop.f32.mrb[248].mxu1 }
0x2186   :  { %v7023_v49 = vpop.f32.mrb[249].mxu1  ;;  %v7084_v44 = vsel %vm230_vm0, %v11005_v0, -inf }
0x2187   :  { %7085 = vmax.xlane.f32.xlu0 %v7084_v44  ;;  %v11006_v47 = vpop.f32.mrb[250].mxu1  ;;  %v7078_v33 = vsel %vm230_vm0, %v7023_v49, -inf }
0x2188   :  { %v7026_v17 = vpop.f32.mrb[251].mxu1  ;;  %v7087_v27 = vsel %vm230_vm0, %v11006_v47, -inf }
0x2189   :  { %v7081_v22 = vsel %vm230_vm0, %v7026_v17, -inf }
0x218a   :  { %7082 = vmax.xlane.f32.xlu1 %v7081_v22 }
0x218b   :  { %7079 = vmax.xlane.f32.xlu0 %v7078_v33 }
0x218d   :  { %v15036_v53 = vpop.f32.mrb[252].mxu1 }
0x218e   :  { %v7039_v6 = vpop.f32.mrb[253].mxu1  ;;  %v7096_v52 = vsel %vm230_vm0, %v15036_v53, -inf }
0x218f   :  { %7088 = vmax.xlane.f32.xlu0 %v7087_v27  ;;  %v15039_v38 = vpop.f32.mrb[254].mxu1  ;;  %v7090_v8 = vsel %vm230_vm0, %v7039_v6, -inf }
0x2190   :  { %v15041_v13 = vpop.f32.mrb[255].mxu1  ;;  %v7099_v45 = vsel %vm230_vm0, %v15039_v38, -inf }
0x2191   :  { %v7093_v14 = vsel %vm230_vm0, %v15041_v13, -inf }
0x2193   :  { %7091 = vmax.xlane.f32.xlu0 %v7090_v8 }
0x2197   :  { %7097 = vmax.xlane.f32.xlu0 %v7096_v52 }
0x21da   :  { %v15046_v2 = vpop.f32.mrb[152].mxu0 }
0x21db   :  { %v15048_v36 = vpop.f32.mrb[153].mxu0  ;;  %v7060_v42 = vsel %vm230_vm0, %v15046_v2, -inf }
0x21dc   :  { %v15050_v1 = vpop.f32.mrb[154].mxu0  ;;  %v7054_v26 = vsel %vm230_vm0, %v15048_v36, -inf }
0x21dd   :  { %7055 = vmax.xlane.f32.xlu0 %v7054_v26  ;;  %v15054_v60 = vpop.f32.mrb[155].mxu0  ;;  %v7063_v32 = vsel %vm230_vm0, %v15050_v1, -inf }
0x21de   :  { %v7057_v34 = vsel %vm230_vm0, %v15054_v60, -inf }
0x21df   :  { %7058 = vmax.xlane.f32.xlu1 %v7057_v34 }
0x21e1   :  { %7061 = vmax.xlane.f32.xlu0 %v7060_v42 }
0x21e2   :  { %v15060_v61 = vpop.f32.mrb[156].mxu0 }
0x21e3   :  { %7064 = vmax.xlane.f32.xlu1 %v7063_v32  ;;  %v15064_v51 = vpop.f32.mrb[157].mxu0  ;;  %v7072_v5 = vsel %vm230_vm0, %v15060_v61, -inf }
0x21e4   :  { %v15066_v57 = vpop.f32.mrb[158].mxu0  ;;  %v7066_v12 = vsel %vm230_vm0, %v15064_v51, -inf }
0x21e5   :  { %7067 = vmax.xlane.f32.xlu0 %v7066_v12  ;;  %v15070_v37 = vpop.f32.mrb[159].mxu0  ;;  %v7075_v18 = vsel %vm230_vm0, %v15066_v57, -inf }
0x21e6   :  { %v7069_v62 = vsel %vm230_vm0, %v15070_v37, -inf }
0x21e7   :  { %7070 = vmax.xlane.f32.xlu1 %v7069_v62 }
0x21e9   :  { %7073 = vmax.xlane.f32.xlu0 %v7072_v5 }
0x21eb   :  { %7100 = vmax.xlane.f32.xlu1 %v7099_v45 }
0x21ef   :  { %7094 = vmax.xlane.f32.xlu1 %v7093_v14 }
0x21f3   :  { %7076 = vmax.xlane.f32.xlu1 %v7075_v18 }
0x2214   :  { %v7086_v63 = vpop.xlane.xlu0 %7085 }
0x2215   :  { %v7112_v44 = vsub.f32 %v11005_v0, %v7086_v63 }
0x2217   :  { %v7138_v22 = vmul.f32 1.442695, %v7112_v44  ;;  %v7083_v33 = vpop.xlane.xlu1 %7082 }
0x2218   :  { %v7080_v27 = vpop.xlane.xlu0 %7079  ;;  %v7111_v52 = vsub.f32 %v7026_v17, %v7083_v33 }
0x2219   :  { %12002 = vpow2.f32 %v7138_v22  ;;  %v7110_v8 = vsub.f32 %v7023_v49, %v7080_v27 }
0x221a   :  { %v7136_v32 = vmul.f32 1.442695, %v7111_v52 }
0x221b   :  { %v7134_v26 = vmul.f32 1.442695, %v7110_v8 }
0x221c   :  { %v7089_v34 = vpop.xlane.xlu0 %7088 }
0x221d   :  { %12004 = vpow2.f32 %v7134_v26  ;;  %v7113_v42 = vsub.f32 %v11006_v47, %v7089_v34 }
0x221f   :  { %v7140_v12 = vmul.f32 1.442695, %v7113_v42 }
0x2220   :  { %v7092_v62 = vpop.xlane.xlu0 %7091 }
0x2221   :  { %12006 = vpow2.f32 %v7140_v12  ;;  %v7114_v45 = vsub.f32 %v7039_v6, %v7092_v62 }
0x2222   :  { %12008 = vpow2.f32 %v7136_v32 }
0x2223   :  { %v15082_v5 = vpop.eup %12002  ;;  %v7142_v17 = vmul.f32 1.442695, %v7114_v45 }
0x2224   :  { %v7098_v14 = vpop.xlane.xlu0 %7097  ;;  %v7180_v0 = vsel %vm230_vm0, %v15082_v5, 0.0 }
0x2225   :  { %v7116_v18 = vsub.f32 %v15036_v53, %v7098_v14  ;;  %7181 = vadd.xlane.f32.xlu0 %v7180_v0 }
0x2227   :  { %v15087_v49 = vpop.eup %12004  ;;  %v7146_v63 = vmul.f32 1.442695, %v7116_v18 }
0x2228   :  { %v7174_v47 = vsel %vm230_vm0, %v15087_v49, 0.0 }
0x2229   :  { %12010 = vpow2.f32 %v7146_v63  ;;  %7175 = vadd.xlane.f32.xlu0 %v7174_v47 }
0x222a   :  { %12012 = vpow2.f32 %v7142_v17 }
0x222b   :  { %v15091_v44 = vpop.eup %12006 }
0x222c   :  { %v7183_v6 = vsel %vm230_vm0, %v15091_v44, 0.0  ;;  %v15095_v22 = vpop.eup %12008 }
0x222d   :  { %7184 = vadd.xlane.f32.xlu1 %v7183_v6  ;;  %v7177_v53 = vsel %vm230_vm0, %v15095_v22, 0.0 }
0x2231   :  { %7178 = vadd.xlane.f32.xlu1 %v7177_v53 }
0x2233   :  { %v15099_v33 = vpop.eup %12010 }
0x2234   :  { %v7192_v27 = vsel %vm230_vm0, %v15099_v33, 0.0  ;;  %v15103_v8 = vpop.eup %12012 }
0x2235   :  { %7193 = vadd.xlane.f32.xlu0 %v7192_v27  ;;  %v7186_v52 = vsel %vm230_vm0, %v15103_v8, 0.0 }
0x2239   :  { %7187 = vadd.xlane.f32.xlu0 %v7186_v52 }
0x2242   :  { %7329 = vrot.lane.b32.xlu1 %v14955_v21, %s12228_s30 }
0x2246   :  { %7331 = vrot.lane.b32.xlu1 %v14969_v25, %s12228_s30 }
0x224f   :  { %7327 = vrot.lane.b32.xlu0 %v14958_v55, %s12228_s30 }
0x226a   :  { %v7056_v26 = vpop.xlane.xlu0 %7055 }
0x226b   :  { %v7102_v34 = vsub.f32 %v15048_v36, %v7056_v26 }
0x226c   :  { %v7059_v42 = vpop.xlane.xlu1 %7058 }
0x226d   :  { %v7118_v32 = vmul.f32 1.442695, %v7102_v34 }
0x226e   :  { %v7062_v12 = vpop.xlane.xlu0 %7061 }
0x226f   :  { %12014 = vpow2.f32 %v7118_v32  ;;  %v7104_v62 = vsub.f32 %v15046_v2, %v7062_v12 }
0x2270   :  { %v7065_v45 = vpop.xlane.xlu1 %7064 }
0x2271   :  { %v7122_v14 = vmul.f32 1.442695, %v7104_v62  ;;  %v7105_v0 = vsub.f32 %v15050_v1, %v7065_v45 }
0x2272   :  { %v7068_v21 = vpop.xlane.xlu0 %7067 }
0x2273   :  { %12016 = vpow2.f32 %v7122_v14  ;;  %v7124_v18 = vmul.f32 1.442695, %v7105_v0  ;;  %v7106_v25 = vsub.f32 %v15064_v51, %v7068_v21 }
0x2274   :  { %v7071_v17 = vpop.xlane.xlu1 %7070 }
0x2275   :  { %12018 = vpow2.f32 %v7124_v18  ;;  %v7126_v55 = vmul.f32 1.442695, %v7106_v25  ;;  %v7103_v25 = vsub.f32 %v15054_v60, %v7059_v42 }
0x2276   :  { %v7074_v63 = vpop.xlane.xlu0 %7073 }
0x2277   :  { %v7108_v36 = vsub.f32 %v15060_v61, %v7074_v63  ;;  %12020 = vpow2.f32 %v7126_v55  ;;  %v7120_v55 = vmul.f32 1.442695, %v7103_v25  ;;  %v7107_v63 = vsub.f32 %v15070_v37, %v7071_v17 }
0x2278   :  { %v7101_v47 = vpop.xlane.xlu1 %7100 }
0x2279   :  { %v15118_v6 = vpop.eup %12014  ;;  %v7130_v2 = vmul.f32 1.442695, %v7108_v36  ;;  %v7117_v53 = vsub.f32 %v15039_v38, %v7101_v47  ;;  %v7128_v47 = vmul.f32 1.442695, %v7107_v63 }
0x227a   :  { %v7150_v1 = vsel %vm230_vm0, %v15118_v6, 0.0 }
0x227b   :  { %v7148_v27 = vmul.f32 1.442695, %v7117_v53  ;;  %7151 = vadd.xlane.f32.xlu0 %v7150_v1  ;;  %12022 = vpow2.f32 %v7130_v2 }
0x227c   :  { %v7095_v51 = vpop.xlane.xlu1 %7094 }
0x227d   :  { %v15123_v52 = vpop.eup %12016  ;;  %12024 = vpow2.f32 %v7148_v27  ;;  %v7115_v26 = vsub.f32 %v15041_v13, %v7095_v51 }
0x227e   :  { %v7156_v61 = vsel %vm230_vm0, %v15123_v52, 0.0 }
0x227f   :  { %v15128_v34 = vpop.eup %12018  ;;  %v7144_v32 = vmul.f32 1.442695, %v7115_v26  ;;  %7157 = vadd.xlane.f32.xlu0 %v7156_v61 }
0x2280   :  { %v7159_v38 = vsel %vm230_vm0, %v15128_v34, 0.0  ;;  %v7077_v36 = vpop.xlane.xlu1 %7076 }
0x2281   :  { %12026 = vpow2.f32 %v7144_v32  ;;  %v15132_v12 = vpop.eup %12020  ;;  %v7109_v2 = vsub.f32 %v15066_v57, %v7077_v36 }
0x2282   :  { %v7162_v45 = vsel %vm230_vm0, %v15132_v12, 0.0  ;;  %12028 = vpow2.f32 %v7120_v55 }
0x2283   :  { %7160 = vadd.xlane.f32.xlu0 %v7159_v38  ;;  %12030 = vpow2.f32 %v7128_v47  ;;  %v7132_v1 = vmul.f32 1.442695, %v7109_v2 }
0x2285   :  { %v15134_v62 = vpop.eup %12022  ;;  %12032 = vpow2.f32 %v7132_v1 }
0x2286   :  { %v7168_v0 = vsel %vm230_vm0, %v15134_v62, 0.0 }
0x2287   :  { %v15138_v13 = vpop.eup %12024  ;;  %7163 = vadd.xlane.f32.xlu0 %v7162_v45 }
0x2288   :  { %v7195_v14 = vsel %vm230_vm0, %v15138_v13, 0.0 }
0x2289   :  { %7196 = vadd.xlane.f32.xlu1 %v7195_v14 }
0x228b   :  { %v15144_v21 = vpop.eup %12026  ;;  %7169 = vadd.xlane.f32.xlu0 %v7168_v0 }
0x228c   :  { %v7189_v18 = vsel %vm230_vm0, %v15144_v21, 0.0 }
0x228d   :  { %7190 = vadd.xlane.f32.xlu1 %v7189_v18 }
0x229e   :  { %7333 = vrot.lane.b32.xlu1 %v14967_v46, %s12228_s30  ;;  %v15155_v46 = vpop.eup %12028 }
0x229f   :  { %v7153_v60 = vsel %vm230_vm0, %v15155_v46, 0.0  ;;  %v15159_v37 = vpop.eup %12030 }
0x22a0   :  { %v7165_v57 = vsel %vm230_vm0, %v15159_v37, 0.0  ;;  %v15163_v17 = vpop.eup %12032 }
0x22a1   :  { %7238 = vrot.lane.b32.xlu0 %v14941_v24, %s12228_s30  ;;  %v7171_v38 = vsel %vm230_vm0, %v15163_v17, 0.0 }
0x22b2   :  { %v7182_v53 = vpop.xlane.xlu0 %7181 }
0x22b6   :  { %v7176_v27 = vpop.xlane.xlu0 %7175 }
0x22b7   :  { %12034 = vrcp.f32 %v7176_v27 }
0x22ba   :  { %v7185_v51 = vpop.xlane.xlu1 %7184 }
0x22be   :  { %v7179_v24 = vpop.xlane.xlu1 %7178 }
0x22bf   :  { %12036 = vrcp.f32 %v7179_v24 }
0x22c0   :  { %12038 = vrcp.f32 %v7185_v51 }
0x22c1   :  { %v12035_v61 = vpop.eup %12034  ;;  %12040 = vrcp.f32 %v7182_v53 }
0x22c2   :  { %v7194_v42 = vpop.xlane.xlu0 %7193  ;;  %7154 = vadd.xlane.f32.xlu1 %v7153_v60  ;;  %v7330_v45 = vpop.permute.xlu1 %7329  ;;  %v7222_v0 = vmul.f32 %v12035_v61, %v15087_v49 }
0x22c6   :  { %v7188_v26 = vpop.xlane.xlu0 %7187  ;;  %7166 = vadd.xlane.f32.xlu1 %v7165_v57  ;;  %v7332_v55 = vpop.permute.xlu1 %7331 }
0x22c9   :  { %v12037_v32 = vpop.eup %12036 }
0x22ca   :  { %v7328_v14 = vpop.permute.xlu0 %7327  ;;  %7172 = vadd.xlane.f32.xlu1 %v7171_v38  ;;  %v7223_v18 = vmul.f32 %v12037_v32, %v15095_v22  ;;  %v12039_v1 = vpop.eup %12038 }
0x22cb   :  { %11027 = vmatprep.subr.bf16.mxu1 %v7328_v14 }
0x22cc   :  { %11028 = vmatpush3.bf16.msra.mxu1 %v7328_v14  ;;  %v7234_v25 = vpack.c.bf16 %v7223_v18, %v7222_v0 }
0x22cd   :  { %11029 = vmatprep.subr.bf16.mxu1 %v7330_v45 }
0x22ce   :  { %11035 = vmatprep.mubr.msk.bf16.mxu1 %vm230_vm0, %v7234_v25 }
0x22d0   :  { %11030 = vmatpush3.bf16.msra.mxu1 %v7330_v45 }
0x22d1   :  { %11031 = vmatprep.subr.bf16.mxu1 %v7332_v55 }
0x22d4   :  { %11032 = vmatpush3.bf16.msra.mxu1 %v7332_v55 }
0x22db   :  { %7240 = vrot.lane.b32.xlu1 %v14939_v41, %s12228_s30  ;;  %v12041_v41 = vpop.eup %12040 }
0x22dc   :  { %v7224_v51 = vmul.f32 %v12041_v41, %v15082_v5 }
0x22df   :  { %7242 = vrot.lane.b32.xlu1 %v14949_v11, %s12228_s30  ;;  %v7225_v11 = vmul.f32 %v12039_v1, %v15091_v44 }
0x22e1   :  { %v7235_v60 = vpack.c.bf16 %v7225_v11, %v7224_v51 }
0x22e3   :  { %7244 = vrot.lane.b32.xlu1 %v14947_v16, %s12228_s30  ;;  %v11478_v16 = vld [vmem:[%s16218_s3 + $0x70] sm:$0xff]  }
0x2308   :  { %v7152_v49 = vpop.xlane.xlu0 %7151 }
0x230c   :  { %v7158_v22 = vpop.xlane.xlu0 %7157 }
0x2310   :  { %v7161_v63 = vpop.xlane.xlu0 %7160 }
0x2314   :  { %v7164_v36 = vpop.xlane.xlu0 %7163 }
0x2316   :  { %v7197_v47 = vpop.xlane.xlu1 %7196 }
0x2317   :  { %12042 = vrcp.f32 %v7197_v47 }
0x2318   :  { %v7170_v2 = vpop.xlane.xlu0 %7169  ;;  %12044 = vrcp.f32 %v7188_v26 }
0x2319   :  { %12046 = vrcp.f32 %v7194_v42  ;;  %v11479_v42 = vld [vmem:[%s16218_s3 + $0x78] sm:$0xff]  }
0x231a   :  { %v7191_v27 = vpop.xlane.xlu1 %7190 }
0x231b   :  { %12048 = vrcp.f32 %v7191_v27 }
0x231c   :  { %v7239_v24 = vpop.permute.xlu0 %7238  ;;  %12050 = vrcp.f32 %v7152_v49 }
0x231d   :  { %11011 = vmatprep.subr.bf16.mxu0 %v7239_v24 }
0x231e   :  { %11012 = vmatpush3.bf16.msra.mxu0 %v7239_v24  ;;  %v7334_v53 = vpop.permute.xlu1 %7333 }
0x231f   :  { %11033 = vmatprep.subr.bf16.mxu1 %v7334_v53 }
0x2320   :  { %11034 = vmatpush3.bf16.msra.mxu1 %v7334_v53 }
0x2321   :  { %11061 = vmatprep.subr.bf16.mxu1 %v11478_v16  ;;  %v12043_v57 = vpop.eup %12042 }
0x2322   :  { %v12045_v26 = vpop.eup %12044  ;;  %v7229_v32 = vmul.f32 %v12043_v57, %v15138_v13 }
0x2323   :  { %11036 = vmatmul.mubr.msk.bf16.vlgmr.msra.gmra.mrb[0].mxu1 %vm230_vm0, %v7235_v60  ;;  %v12047_v44 = vpop.eup %12046  ;;  %v7226_v5 = vmul.f32 %v12045_v26, %v15103_v8 }
0x2324   :  { %11062 = vmatpush3.bf16.msra.mxu1 %v11478_v16  ;;  %v7228_v45 = vmul.f32 %v12047_v44, %v15099_v33 }
0x2325   :  { %v12049_v61 = vpop.eup %12048  ;;  %11063 = vmatprep.subr.bf16.mxu1 %v11479_v42 }
0x2326   :  { %v7227_v38 = vmul.f32 %v12049_v61, %v15144_v21  ;;  %v7237_v0 = vpack.c.bf16 %v7229_v32, %v7228_v45 }
0x2328   :  { %v7236_v14 = vpack.c.bf16 %v7227_v38, %v7226_v5  ;;  %11064 = vmatpush3.bf16.msra.mxu1 %v11479_v42 }
0x232a   :  { %11039 = vmatprep.mubr.msk.bf16.mxu1 %vm230_vm0, %v7236_v14 }
0x232b   :  { %11040 = vmatmul.mubr.msk.bf16.gmra.mrb[4].mxu1 %vm230_vm0, %v7237_v0 }
0x232c   :  { %11065 = vmatprep.mubr.msk.bf16.mxu1 %vm359_vm1, %v14341_v3 }
0x2333   :  { %11066 = vmatmul.mubr.msk.bf16.vlgmr.msra.gmra.mrb[8].mxu1 %vm359_vm1, %v14347_v48 }
0x2334   :  { %11069 = vmatprep.mubr.msk.bf16.mxu1 %vm359_vm1, %v14360_v54 }
0x233b   :  { %11070 = vmatmul.mubr.msk.bf16.gmra.mrb[12].mxu1 %vm359_vm1, %v14368_v58  ;;  %v12051_v58 = vpop.eup %12050 }
0x233c   :  { %11073 = vmatprep.mubr.msk.bf16.mxu1 %vm359_vm1, %v14380_v4 }
0x2343   :  { %11074 = vmatmul.mubr.msk.bf16.gmra.mrb[16].mxu1 %vm359_vm1, %v14390_v31  ;;  %v7214_v31 = vmul.f32 %v12051_v58, %v15118_v6 }
0x2344   :  { %11077 = vmatprep.mubr.msk.bf16.mxu1 %vm359_vm1, %v14400_v29 }
0x234b   :  { %11078 = vmatmul.mubr.msk.bf16.gmra.mrb[20].mxu1 %vm359_vm1, %v14407_v9 }
0x234f   :  { %v7155_v3 = vpop.xlane.xlu1 %7154 }
0x2350   :  { %12052 = vrcp.f32 %v7155_v3 }
0x2351   :  { %12054 = vrcp.f32 %v7161_v63 }
0x2353   :  { %v7167_v48 = vpop.xlane.xlu1 %7166 }
0x2354   :  { %12056 = vrcp.f32 %v7167_v48 }
0x2355   :  { %12058 = vrcp.f32 %v7158_v22 }
0x2356   :  { %12060 = vrcp.f32 %v7164_v36 }
0x2357   :  { %v7173_v54 = vpop.xlane.xlu1 %7172 }
0x2358   :  { %12062 = vrcp.f32 %v7173_v54 }
0x2359   :  { %12064 = vrcp.f32 %v7170_v2 }
0x235a   :  { %v12053_v4 = vpop.eup %12052 }
0x235b   :  { %v7241_v33 = vpop.permute.xlu1 %7240  ;;  %v7215_v8 = vmul.f32 %v12053_v4, %v15155_v46  ;;  %v12055_v9 = vpop.eup %12054 }
0x235c   :  { %11013 = vmatprep.subr.bf16.mxu0 %v7241_v33  ;;  %v7217_v55 = vmul.f32 %v12055_v9, %v15128_v34 }
0x235d   :  { %11014 = vmatpush3.bf16.msra.mxu0 %v7241_v33  ;;  %v7230_v29 = vpack.c.bf16 %v7215_v8, %v7214_v31 }
0x235e   :  { %v12057_v21 = vpop.eup %12056 }
0x235f   :  { %11019 = vmatprep.mubr.msk.bf16.mxu0 %vm230_vm0, %v7230_v29  ;;  %v7243_v13 = vpop.permute.xlu1 %7242  ;;  %v12059_v18 = vpop.eup %12058  ;;  %v7219_v6 = vmul.f32 %v12057_v21, %v15159_v37 }
0x2360   :  { %11015 = vmatprep.subr.bf16.mxu0 %v7243_v13  ;;  %v12061_v25 = vpop.eup %12060  ;;  %v7216_v46 = vmul.f32 %v12059_v18, %v15123_v52  ;;  %v9743_v52 = vld [vmem:[%s16220_s4 + $0x18] sm:$0xf] }
0x2361   :  { %11016 = vmatpush3.bf16.msra.mxu0 %v7243_v13  ;;  %v7218_v22 = vmul.f32 %v12061_v25, %v15132_v12  ;;  %v7451_v12 = vsel %vm1380_vm3, %v9743_v52, 0 }
0x2362   :  { %v7231_v63 = vpack.c.bf16 %v7217_v55, %v7216_v46  ;;  %v12063_v36 = vpop.eup %12062 }
0x2363   :  { %v7245_v49 = vpop.permute.xlu1 %7244  ;;  %v7232_v47 = vpack.c.bf16 %v7219_v6, %v7218_v22  ;;  %v12065_v2 = vpop.eup %12064  ;;  %v7221_v1 = vmul.f32 %v12063_v36, %v15163_v17 }
0x2364   :  { %11017 = vmatprep.subr.bf16.mxu0 %v7245_v49  ;;  %v7220_v34 = vmul.f32 %v12065_v2, %v15134_v62 }
0x2365   :  { %11018 = vmatpush3.bf16.msra.mxu0 %v7245_v49 }
0x2366   :  { %v7233_v27 = vpack.c.bf16 %v7221_v1, %v7220_v34  ;;  %11405 = vmatprep.subr.msk.bf16.mxu0 %vm1380_vm3, %v9743_v52 }
0x2368   :  { %11020 = vmatmul.mubr.msk.bf16.vlgmr.msra.gmra.mrb[160].mxu0 %vm230_vm0, %v7231_v63 }
0x2369   :  { %11023 = vmatprep.mubr.msk.bf16.mxu0 %vm230_vm0, %v7232_v47  ;;  %11044 = vmatpush3.bf16.msra.mxu0 %v7451_v12 }
0x2370   :  { %11024 = vmatmul.mubr.msk.bf16.gmra.mrb[164].mxu0 %vm230_vm0, %v7233_v27 }
0x23f6   :  { %v15224_v37 = vpop.f32.mrb[0].mxu1 }
0x23f7   :  { %v15226_v41 = vpop.f32.mrb[1].mxu1 }
0x23f8   :  { %v15228_v24 = vpop.f32.mrb[2].mxu1 }
0x23f9   :  { %v7421_v62 = vpack.c.bf16 %v15228_v24, %v15224_v37  ;;  %v7388_v17 = vpop.f32.mrb[3].mxu1 }
0x23fa   :  { %v7420_v11 = vpack.c.bf16 %v7388_v17, %v15226_v41 }
0x23fe   :  { %v11041_v16 = vpop.f32.mrb[4].mxu1 }
0x23ff   :  { %v7401_v53 = vpop.f32.mrb[5].mxu1 }
0x2400   :  { %v11042_v51 = vpop.f32.mrb[6].mxu1 }
0x2401   :  { %v7423_v60 = vpack.c.bf16 %v11042_v51, %v11041_v16  ;;  %v7404_v42 = vpop.f32.mrb[7].mxu1 }
0x2402   :  { %v7422_v57 = vpack.c.bf16 %v7404_v42, %v7401_v53 }
0x2406   :  { %v11067_v26 = vpop.f32.mrb[8].mxu1 }
0x2407   :  { %v7617_v44 = vpop.f32.mrb[9].mxu1 }
0x2408   :  { %v11068_v61 = vpop.f32.mrb[10].mxu1 }
0x2409   :  { %v15233_v32 = vpack.c.bf16 %v11068_v61, %v11067_v26  ;;  %v7620_v5 = vpop.f32.mrb[11].mxu1 }
0x240a   :  { %v7680_v38 = vpack.c.bf16 %v7620_v5, %v7617_v44 }
0x240b   :  { %7694 = vrot.lane.b32.xlu1 %v15233_v32, %s12227_s29 }
0x240c   :  { %7692 = vrot.lane.b32.xlu0 %v7680_v38, %s12227_s29 }
0x240e   :  { %v11071_v45 = vpop.f32.mrb[12].mxu1 }
0x240f   :  { %v7633_v14 = vpop.f32.mrb[13].mxu1 }
0x2410   :  { %v11072_v0 = vpop.f32.mrb[14].mxu1 }
0x2411   :  { %v15238_v3 = vpack.c.bf16 %v11072_v0, %v11071_v45  ;;  %v7636_v48 = vpop.f32.mrb[15].mxu1 }
0x2412   :  { %v15240_v54 = vpack.c.bf16 %v7636_v48, %v7633_v14 }
0x2414   :  { %7696 = vrot.lane.b32.xlu0 %v15240_v54, %s12227_s29 }
0x2416   :  { %v11075_v58 = vpop.f32.mrb[16].mxu1 }
0x2417   :  { %v7649_v4 = vpop.f32.mrb[17].mxu1 }
0x2418   :  { %7698 = vrot.lane.b32.xlu0 %v15238_v3, %s12227_s29  ;;  %v11076_v33 = vpop.f32.mrb[18].mxu1 }
0x2419   :  { %v15246_v31 = vpack.c.bf16 %v11076_v33, %v11075_v58  ;;  %v7652_v8 = vpop.f32.mrb[19].mxu1 }
0x241a   :  { %v15248_v29 = vpack.c.bf16 %v7652_v8, %v7649_v4 }
0x241c   :  { %7793 = vrot.lane.b32.xlu1 %v15248_v29, %s12227_s29  ;;  %11105 = vmatprep.mubr.msk.bf16.mxu1 %vm794_vm2, %v15248_v29 }
0x241e   :  { %v11079_v9 = vpop.f32.mrb[20].mxu1 }
0x241f   :  { %v7665_v13 = vpop.f32.mrb[21].mxu1 }
0x2420   :  { %7795 = vrot.lane.b32.xlu1 %v15246_v31, %s12227_s29  ;;  %v11080_v21 = vpop.f32.mrb[22].mxu1 }
0x2421   :  { %v15256_v18 = vpack.c.bf16 %v11080_v21, %v11079_v9  ;;  %v7668_v25 = vpop.f32.mrb[23].mxu1 }
0x2422   :  { %v15258_v55 = vpack.c.bf16 %v7668_v25, %v7665_v13 }
0x2424   :  { %7799 = vrot.lane.b32.xlu1 %v15256_v18, %s12227_s29  ;;  %7797 = vrot.lane.b32.xlu0 %v15258_v55, %s12227_s29 }
0x2428   :  { %8076 = vrot.lane.b32.xlu1 %v15233_v32, %s12228_s30  ;;  %8074 = vrot.lane.b32.xlu0 %v7680_v38, %s12228_s30 }
0x242c   :  { %8078 = vrot.lane.b32.xlu0 %v15240_v54, %s12228_s30 }
0x243b   :  { %v11021_v49 = vpop.f32.mrb[160].mxu0 }
0x243c   :  { %v7296_v6 = vpop.f32.mrb[161].mxu0 }
0x243d   :  { %v11022_v46 = vpop.f32.mrb[162].mxu0 }
0x243e   :  { %v7417_v22 = vpack.c.bf16 %v11022_v46, %v11021_v49  ;;  %v7299_v63 = vpop.f32.mrb[163].mxu0 }
0x243f   :  { %v7416_v36 = vpack.c.bf16 %v7299_v63, %v7296_v6 }
0x2441   :  { %11045 = vmatprep.mubr.msk.bf16.mxu0 %vm794_vm2, %v7416_v36 }
0x2442   :  { %11046 = vmatmul.mubr.msk.bf16.vlgmr.msra.gmra.mrb[120].mxu0 %vm794_vm2, %v7417_v22 }
0x2443   :  { %v11025_v47 = vpop.f32.mrb[164].mxu0 }
0x2444   :  { %v7312_v2 = vpop.f32.mrb[165].mxu0 }
0x2445   :  { %v11026_v1 = vpop.f32.mrb[166].mxu0 }
0x2446   :  { %v7419_v34 = vpack.c.bf16 %v11026_v1, %v11025_v47  ;;  %v7315_v27 = vpop.f32.mrb[167].mxu0 }
0x2447   :  { %v7418_v52 = vpack.c.bf16 %v7315_v27, %v7312_v2 }
0x2449   :  { %11049 = vmatprep.mubr.msk.bf16.mxu0 %vm794_vm2, %v7418_v52 }
0x244a   :  { %11050 = vmatmul.mubr.msk.bf16.gmra.mrb[124].mxu0 %vm794_vm2, %v7419_v34 }
0x244b   :  { %11053 = vmatprep.mubr.msk.bf16.mxu0 %vm794_vm2, %v7420_v11 }
0x2452   :  { %11054 = vmatmul.mubr.msk.bf16.gmra.mrb[128].mxu0 %vm794_vm2, %v7421_v62 }
0x2453   :  { %11057 = vmatprep.mubr.msk.bf16.mxu0 %vm794_vm2, %v7422_v57 }
0x245a   :  { %11058 = vmatmul.mubr.msk.bf16.gmra.mrb[132].mxu0 %vm794_vm2, %v7423_v60 }
0x245b   :  { %11089 = vmatprep.mubr.msk.bf16.mxu0 %vm794_vm2, %v7680_v38 }
0x247d   :  { %v7695_v41 = vpop.permute.xlu1 %7694 }
0x247e   :  { %v7693_v12 = vpop.permute.xlu0 %7692  ;;  %v7716_v24 = vsel %vm794_vm2, %v7695_v41, 0 }
0x247f   :  { %11406 = vmatprep.subr.msk.bf16.mxu0 %vm794_vm2, %v7693_v12  ;;  %v7713_v37 = vsel %vm794_vm2, %v7693_v12, 0 }
0x2480   :  { %11082 = vmatpush3.bf16.xpose.msra.mxu0 %v7713_v37 }
0x2481   :  { %11407 = vmatprep.subr.msk.bf16.mxu0 %vm794_vm2, %v7695_v41 }
0x2486   :  { %v7697_v17 = vpop.permute.xlu0 %7696 }
0x2487   :  { %v7719_v11 = vsel %vm794_vm2, %v7697_v17, 0 }
0x2488   :  { %11084 = vmatpush3.bf16.xpose.msra.mxu0 %v7716_v24 }
0x2489   :  { %11408 = vmatprep.subr.msk.bf16.mxu0 %vm794_vm2, %v7697_v17 }
0x248a   :  { %v7699_v53 = vpop.permute.xlu0 %7698 }
0x248b   :  { %v7722_v42 = vsel %vm794_vm2, %v7699_v53, 0 }
0x248e   :  { %v7794_v62 = vpop.permute.xlu1 %7793 }
0x248f   :  { %11410 = vmatprep.subr.msk.bf16.mxu1 %vm794_vm2, %v7794_v62  ;;  %v7814_v16 = vsel %vm794_vm2, %v7794_v62, 0 }
0x2490   :  { %11086 = vmatpush3.bf16.xpose.msra.mxu0 %v7719_v11  ;;  %11098 = vmatpush3.bf16.xpose.msra.mxu1 %v7814_v16 }
0x2491   :  { %11409 = vmatprep.subr.msk.bf16.mxu0 %vm794_vm2, %v7699_v53 }
0x2492   :  { %v7796_v51 = vpop.permute.xlu1 %7795 }
0x2493   :  { %11411 = vmatprep.subr.msk.bf16.mxu1 %vm794_vm2, %v7796_v51  ;;  %v7817_v57 = vsel %vm794_vm2, %v7796_v51, 0 }
0x2496   :  { %v7798_v60 = vpop.permute.xlu0 %7797  ;;  %v7800_v44 = vpop.permute.xlu1 %7799 }
0x2497   :  { %v7820_v61 = vsel %vm794_vm2, %v7798_v60, 0  ;;  %v7823_v45 = vsel %vm794_vm2, %v7800_v44, 0 }
0x2498   :  { %11088 = vmatpush3.bf16.xpose.msra.mxu0 %v7722_v42  ;;  %11100 = vmatpush3.bf16.xpose.msra.mxu1 %v7817_v57 }
0x2499   :  { %11412 = vmatprep.subr.msk.bf16.mxu1 %vm794_vm2, %v7798_v60 }
0x249a   :  { %v8075_v26 = vpop.permute.xlu0 %8074  ;;  %v8077_v5 = vpop.permute.xlu1 %8076 }
0x249b   :  { %11113 = vmatprep.subr.bf16.mxu0 %v8075_v26 }
0x249e   :  { %v8079_v38 = vpop.permute.xlu0 %8078 }
0x249f   :  { %11090 = vmatmul.mubr.msk.bf16.vlgmr.msra.gmra.mrb[168].mxu0 %vm794_vm2, %v15233_v32 }
0x24a0   :  { %11093 = vmatprep.mubr.msk.bf16.mxu0 %vm794_vm2, %v15240_v54  ;;  %11102 = vmatpush3.bf16.xpose.msra.mxu1 %v7820_v61 }
0x24a1   :  { %11114 = vmatpush3.bf16.msra.mxu0 %v8075_v26  ;;  %11413 = vmatprep.subr.msk.bf16.mxu1 %vm794_vm2, %v7800_v44 }
0x24a2   :  { %11115 = vmatprep.subr.bf16.mxu0 %v8077_v5 }
0x24a5   :  { %11116 = vmatpush3.bf16.msra.mxu0 %v8077_v5 }
0x24a6   :  { %11117 = vmatprep.subr.bf16.mxu0 %v8079_v38 }
0x24a7   :  { %11094 = vmatmul.mubr.msk.bf16.gmra.mrb[172].mxu0 %vm794_vm2, %v15238_v3 }
0x24a8   :  { %11104 = vmatpush3.bf16.xpose.msra.mxu1 %v7823_v45 }
0x24a9   :  { %11118 = vmatpush3.bf16.msra.mxu0 %v8079_v38 }
0x24af   :  { %11106 = vmatmul.mubr.msk.bf16.vlgmr.msra.gmra.mrb[24].mxu1 %vm794_vm2, %v15246_v31 }
0x24b0   :  { %11109 = vmatprep.mubr.msk.bf16.mxu1 %vm794_vm2, %v15258_v55 }
0x24b7   :  { %11110 = vmatmul.mubr.msk.bf16.gmra.mrb[28].mxu1 %vm794_vm2, %v15256_v18 }
0x2572   :  { %v11091_v32 = vpop.f32.mrb[168].mxu0 }
0x2573   :  { %v7758_v14 = vpop.f32.mrb[169].mxu0  ;;  %v7896_v0 = vsel %vm230_vm0, %v11091_v32, -inf }
0x2574   :  { %7897 = vmax.xlane.f32.xlu0 %v7896_v0  ;;  %v11092_v48 = vpop.f32.mrb[170].mxu0  ;;  %v7890_v4 = vsel %vm230_vm0, %v7758_v14, -inf }
0x2575   :  { %v7761_v54 = vpop.f32.mrb[171].mxu0  ;;  %v7899_v9 = vsel %vm230_vm0, %v11092_v48, -inf }
0x2576   :  { %v7893_v58 = vsel %vm230_vm0, %v7761_v54, -inf }
0x2577   :  { %7894 = vmax.xlane.f32.xlu1 %v7893_v58 }
0x2578   :  { %7891 = vmax.xlane.f32.xlu0 %v7890_v4 }
0x257a   :  { %v15309_v33 = vpop.f32.mrb[172].mxu0 }
0x257b   :  { %v15311_v8 = vpop.f32.mrb[173].mxu0  ;;  %v7908_v49 = vsel %vm230_vm0, %v15309_v33, -inf }
0x257c   :  { %7900 = vmax.xlane.f32.xlu0 %v7899_v9  ;;  %v11096_v13 = vpop.f32.mrb[174].mxu0  ;;  %v7902_v63 = vsel %vm230_vm0, %v15311_v8, -inf }
0x257d   :  { %v15314_v21 = vpop.f32.mrb[175].mxu0  ;;  %v7911_v25 = vsel %vm230_vm0, %v11096_v13, -inf }
0x257e   :  { %7912 = vmax.xlane.f32.xlu1 %v7911_v25  ;;  %v7905_v6 = vsel %vm230_vm0, %v15314_v21, -inf }
0x2580   :  { %7909 = vmax.xlane.f32.xlu0 %v7908_v49 }
0x2582   :  { %7906 = vmax.xlane.f32.xlu1 %v7905_v6  ;;  %v15321_v46 = vpop.f32.mrb[24].mxu1 }
0x2583   :  { %v15323_v22 = vpop.f32.mrb[25].mxu1  ;;  %v7920_v1 = vsel %vm230_vm0, %v15321_v46, -inf }
0x2584   :  { %7903 = vmax.xlane.f32.xlu0 %v7902_v63  ;;  %v15327_v36 = vpop.f32.mrb[26].mxu1  ;;  %v7914_v12 = vsel %vm230_vm0, %v15323_v22, -inf }
0x2585   :  { %v15329_v47 = vpop.f32.mrb[27].mxu1  ;;  %v7923_v2 = vsel %vm230_vm0, %v15327_v36, -inf }
0x2586   :  { %7924 = vmax.xlane.f32.xlu1 %v7923_v2  ;;  %v7917_v34 = vsel %vm230_vm0, %v15329_v47, -inf }
0x2588   :  { %7921 = vmax.xlane.f32.xlu0 %v7920_v1 }
0x258a   :  { %7918 = vmax.xlane.f32.xlu1 %v7917_v34  ;;  %v15337_v27 = vpop.f32.mrb[28].mxu1 }
0x258b   :  { %v15339_v52 = vpop.f32.mrb[29].mxu1  ;;  %v7932_v24 = vsel %vm230_vm0, %v15337_v27, -inf }
0x258c   :  { %7915 = vmax.xlane.f32.xlu0 %v7914_v12  ;;  %v15343_v37 = vpop.f32.mrb[30].mxu1  ;;  %v7926_v17 = vsel %vm230_vm0, %v15339_v52, -inf }
0x258d   :  { %v15345_v41 = vpop.f32.mrb[31].mxu1  ;;  %v7935_v62 = vsel %vm230_vm0, %v15343_v37, -inf }
0x258e   :  { %v7929_v11 = vsel %vm230_vm0, %v15345_v41, -inf }
0x2590   :  { %7933 = vmax.xlane.f32.xlu0 %v7932_v24 }
0x2594   :  { %7927 = vmax.xlane.f32.xlu0 %v7926_v17 }
0x259b   :  { %8163 = vrot.lane.b32.xlu1 %v15248_v29, %s12228_s30 }
0x25aa   :  { %8080 = vrot.lane.b32.xlu0 %v15238_v3, %s12228_s30 }
0x25bf   :  { %7936 = vmax.xlane.f32.xlu1 %v7935_v62 }
0x25c3   :  { %7930 = vmax.xlane.f32.xlu1 %v7929_v11 }
0x25d4   :  { %8165 = vrot.lane.b32.xlu1 %v15246_v31, %s12228_s30 }
0x2601   :  { %v7898_v16 = vpop.xlane.xlu0 %7897 }
0x2602   :  { %v7940_v53 = vsub.f32 %v11091_v32, %v7898_v16 }
0x2604   :  { %v7958_v51 = vmul.f32 1.442695, %v7940_v53  ;;  %v7895_v60 = vpop.xlane.xlu1 %7894 }
0x2605   :  { %v7892_v42 = vpop.xlane.xlu0 %7891  ;;  %v7939_v57 = vsub.f32 %v7761_v54, %v7895_v60 }
0x2606   :  { %12066 = vpow2.f32 %v7958_v51  ;;  %v7938_v29 = vsub.f32 %v7758_v14, %v7892_v42 }
0x2607   :  { %v7956_v5 = vmul.f32 1.442695, %v7939_v57 }
0x2608   :  { %v7954_v3 = vmul.f32 1.442695, %v7938_v29 }
0x2609   :  { %v7901_v26 = vpop.xlane.xlu0 %7900 }
0x260a   :  { %12068 = vpow2.f32 %v7954_v3  ;;  %v7941_v44 = vsub.f32 %v11092_v48, %v7901_v26 }
0x260b   :  { %v7913_v61 = vpop.xlane.xlu1 %7912 }
0x260c   :  { %v7960_v38 = vmul.f32 1.442695, %v7941_v44  ;;  %v7945_v45 = vsub.f32 %v11096_v13, %v7913_v61 }
0x260d   :  { %v7910_v0 = vpop.xlane.xlu0 %7909 }
0x260e   :  { %12070 = vpow2.f32 %v7960_v38  ;;  %v7944_v31 = vsub.f32 %v15309_v33, %v7910_v0  ;;  %v7968_v4 = vmul.f32 1.442695, %v7945_v45 }
0x260f   :  { %v7907_v58 = vpop.xlane.xlu1 %7906  ;;  %12072 = vpow2.f32 %v7956_v5 }
0x2610   :  { %v15362_v32 = vpop.eup %12066  ;;  %v7966_v9 = vmul.f32 1.442695, %v7944_v31  ;;  %v7943_v14 = vsub.f32 %v15314_v21, %v7907_v58 }
0x2611   :  { %v7904_v54 = vpop.xlane.xlu0 %7903  ;;  %v7992_v48 = vsel %vm230_vm0, %v15362_v32, 0.0 }
0x2612   :  { %12074 = vpow2.f32 %v7966_v9  ;;  %v7942_v25 = vsub.f32 %v15311_v8, %v7904_v54  ;;  %7993 = vadd.xlane.f32.xlu0 %v7992_v48  ;;  %v7964_v33 = vmul.f32 1.442695, %v7943_v14 }
0x2613   :  { %v7925_v13 = vpop.xlane.xlu1 %7924  ;;  %12076 = vpow2.f32 %v7968_v4 }
0x2614   :  { %v15368_v49 = vpop.eup %12068  ;;  %v7962_v6 = vmul.f32 1.442695, %v7942_v25 }
0x2615   :  { %v7922_v63 = vpop.xlane.xlu0 %7921  ;;  %v7986_v2 = vsel %vm230_vm0, %v15368_v49, 0.0 }
0x2616   :  { %12078 = vpow2.f32 %v7962_v6  ;;  %v7948_v21 = vsub.f32 %v15321_v46, %v7922_v63  ;;  %7987 = vadd.xlane.f32.xlu0 %v7986_v2  ;;  %v7949_v46 = vsub.f32 %v15327_v36, %v7925_v13 }
0x2617   :  { %v7919_v1 = vpop.xlane.xlu1 %7918  ;;  %12080 = vpow2.f32 %v7964_v33 }
0x2618   :  { %v15373_v34 = vpop.eup %12070  ;;  %v7974_v8 = vmul.f32 1.442695, %v7948_v21  ;;  %v7976_v36 = vmul.f32 1.442695, %v7949_v46  ;;  %v7947_v3 = vsub.f32 %v15329_v47, %v7919_v1 }
0x2619   :  { %v7916_v12 = vpop.xlane.xlu0 %7915  ;;  %v7995_v24 = vsel %vm230_vm0, %v15373_v34, 0.0  ;;  %v15377_v17 = vpop.eup %12072 }
0x261a   :  { %v7946_v62 = vsub.f32 %v15323_v22, %v7916_v12  ;;  %7996 = vadd.xlane.f32.xlu1 %v7995_v24  ;;  %12082 = vpow2.f32 %v7974_v8  ;;  %v7989_v42 = vsel %vm230_vm0, %v15377_v17, 0.0  ;;  %v7972_v45 = vmul.f32 1.442695, %v7947_v3 }
0x261b   :  { %v8164_v11 = vpop.permute.xlu1 %8163 }
0x261c   :  { %v15380_v16 = vpop.eup %12074  ;;  %v7970_v53 = vmul.f32 1.442695, %v7946_v62  ;;  %11129 = vmatprep.subr.bf16.mxu1 %v8164_v11 }
0x261d   :  { %v7934_v51 = vpop.xlane.xlu0 %7933  ;;  %11130 = vmatpush3.bf16.msra.mxu1 %v8164_v11  ;;  %v8004_v60 = vsel %vm230_vm0, %v15380_v16, 0.0  ;;  %v15387_v29 = vpop.eup %12076 }
0x261e   :  { %v7952_v22 = vsub.f32 %v15337_v27, %v7934_v51  ;;  %8005 = vadd.xlane.f32.xlu0 %v8004_v60  ;;  %7990 = vadd.xlane.f32.xlu1 %v7989_v42  ;;  %12084 = vpow2.f32 %v7970_v53  ;;  %v8007_v5 = vsel %vm230_vm0, %v15387_v29, 0.0 }
0x2620   :  { %v15390_v57 = vpop.eup %12078  ;;  %v7982_v26 = vmul.f32 1.442695, %v7952_v22 }
0x2621   :  { %v7928_v44 = vpop.xlane.xlu0 %7927  ;;  %v7998_v61 = vsel %vm230_vm0, %v15390_v57, 0.0  ;;  %v15397_v38 = vpop.eup %12080 }
0x2622   :  { %12086 = vpow2.f32 %v7982_v26  ;;  %v7950_v27 = vsub.f32 %v15339_v52, %v7928_v44  ;;  %7999 = vadd.xlane.f32.xlu0 %v7998_v61  ;;  %8008 = vadd.xlane.f32.xlu1 %v8007_v5  ;;  %v8001_v31 = vsel %vm230_vm0, %v15397_v38, 0.0 }
0x2623   :  { %12088 = vpow2.f32 %v7976_v36 }
0x2624   :  { %v7978_v0 = vmul.f32 1.442695, %v7950_v27  ;;  %v15402_v58 = vpop.eup %12082 }
0x2625   :  { %v8081_v47 = vpop.permute.xlu0 %8080  ;;  %v8016_v4 = vsel %vm230_vm0, %v15402_v58, 0.0 }
0x2626   :  { %12090 = vpow2.f32 %v7978_v0  ;;  %11119 = vmatprep.subr.bf16.mxu0 %v8081_v47  ;;  %8002 = vadd.xlane.f32.xlu1 %v8001_v31 }
0x2627   :  { %11120 = vmatpush3.bf16.msra.mxu0 %v8081_v47  ;;  %12092 = vpow2.f32 %v7972_v45 }
0x2628   :  { %v15406_v52 = vpop.eup %12084 }
0x2629   :  { %v8010_v54 = vsel %vm230_vm0, %v15406_v52, 0.0 }
0x262a   :  { %8017 = vadd.xlane.f32.xlu1 %v8016_v4 }
0x262c   :  { %v15408_v9 = vpop.eup %12086 }
0x262d   :  { %v8028_v14 = vsel %vm230_vm0, %v15408_v9, 0.0  ;;  %v15414_v48 = vpop.eup %12088 }
0x262e   :  { %8029 = vadd.xlane.f32.xlu0 %v8028_v14  ;;  %8011 = vadd.xlane.f32.xlu1 %v8010_v54  ;;  %v8019_v33 = vsel %vm230_vm0, %v15414_v48, 0.0 }
0x2630   :  { %v15416_v25 = vpop.eup %12090 }
0x2631   :  { %v8022_v13 = vsel %vm230_vm0, %v15416_v25, 0.0  ;;  %v15422_v6 = vpop.eup %12092 }
0x2632   :  { %8023 = vadd.xlane.f32.xlu0 %v8022_v13  ;;  %8020 = vadd.xlane.f32.xlu1 %v8019_v33  ;;  %v8013_v63 = vsel %vm230_vm0, %v15422_v6, 0.0 }
0x2636   :  { %8014 = vadd.xlane.f32.xlu1 %v8013_v63 }
0x264c   :  { %v7937_v2 = vpop.xlane.xlu1 %7936 }
0x264d   :  { %v7953_v21 = vsub.f32 %v15343_v37, %v7937_v2 }
0x264f   :  { %v7984_v1 = vmul.f32 1.442695, %v7953_v21 }
0x2650   :  { %v7931_v8 = vpop.xlane.xlu1 %7930 }
0x2651   :  { %12094 = vpow2.f32 %v7984_v1  ;;  %v7951_v12 = vsub.f32 %v15345_v41, %v7931_v8 }
0x2653   :  { %v7980_v24 = vmul.f32 1.442695, %v7951_v12 }
0x2654   :  { %v8166_v62 = vpop.permute.xlu1 %8165 }
0x2655   :  { %12096 = vpow2.f32 %v7980_v24  ;;  %11131 = vmatprep.subr.bf16.mxu1 %v8166_v62 }
0x2656   :  { %11132 = vmatpush3.bf16.msra.mxu1 %v8166_v62 }
0x265b   :  { %v15428_v11 = vpop.eup %12094 }
0x265c   :  { %v8031_v46 = vsel %vm230_vm0, %v15428_v11, 0.0 }
0x265d   :  { %8032 = vadd.xlane.f32.xlu0 %v8031_v46 }
0x265f   :  { %v15432_v53 = vpop.eup %12096 }
0x2660   :  { %v8025_v37 = vsel %vm230_vm0, %v15432_v53, 0.0 }
0x2661   :  { %8026 = vadd.xlane.f32.xlu1 %v8025_v37 }
0x2672   :  { %8169 = vrot.lane.b32.xlu1 %v15256_v18, %s12228_s30 }
0x2673   :  { %8167 = vrot.lane.b32.xlu0 %v15258_v55, %s12228_s30 }
0x269f   :  { %v7994_v41 = vpop.xlane.xlu0 %7993 }
0x26a3   :  { %v7988_v51 = vpop.xlane.xlu0 %7987 }
0x26a7   :  { %v7997_v60 = vpop.xlane.xlu1 %7996 }
0x26a8   :  { %12098 = vrcp.f32 %v7997_v60 }
0x26a9   :  { %12100 = vrcp.f32 %v7988_v51 }
0x26aa   :  { %12102 = vrcp.f32 %v7994_v41 }
0x26ab   :  { %v8006_v42 = vpop.xlane.xlu0 %8005  ;;  %v7991_v22 = vpop.xlane.xlu1 %7990 }
0x26ac   :  { %12104 = vrcp.f32 %v7991_v22 }
0x26af   :  { %v8000_v36 = vpop.xlane.xlu0 %7999  ;;  %v8009_v3 = vpop.xlane.xlu1 %8008 }
0x26b0   :  { %12106 = vrcp.f32 %v8000_v36 }
0x26b1   :  { %12108 = vrcp.f32 %v8009_v3 }
0x26b2   :  { %12110 = vrcp.f32 %v8006_v42  ;;  %v12099_v44 = vpop.eup %12098 }
0x26b3   :  { %v8003_v26 = vpop.xlane.xlu1 %8002  ;;  %v12101_v18 = vpop.eup %12100  ;;  %v8053_v5 = vmul.f32 %v12099_v44, %v15373_v34 }
0x26b4   :  { %12112 = vrcp.f32 %v8003_v26  ;;  %v12103_v61 = vpop.eup %12102  ;;  %v8050_v45 = vmul.f32 %v12101_v18, %v15368_v49 }
0x26b5   :  { %v8052_v47 = vmul.f32 %v12103_v61, %v15362_v32 }
0x26b6   :  { %v12105_v55 = vpop.eup %12104 }
0x26b7   :  { %v8018_v27 = vpop.xlane.xlu1 %8017  ;;  %v8051_v0 = vmul.f32 %v12105_v55, %v15377_v17  ;;  %v8067_v14 = vpack.c.bf16 %v8053_v5, %v8052_v47 }
0x26b9   :  { %v8066_v31 = vpack.c.bf16 %v8051_v0, %v8050_v45 }
0x26ba   :  { %v12107_v4 = vpop.eup %12106 }
0x26bb   :  { %v8012_v54 = vpop.xlane.xlu1 %8011  ;;  %v12109_v13 = vpop.eup %12108  ;;  %11121 = vmatprep.mubr.msk.bf16.mxu0 %vm230_vm0, %v8066_v31  ;;  %v8054_v34 = vmul.f32 %v12107_v4, %v15390_v57 }
0x26bc   :  { %v12111_v33 = vpop.eup %12110  ;;  %11122 = vmatmul.mubr.msk.bf16.vlgmr.msra.gmra.mrb[176].mxu0 %vm230_vm0, %v8067_v14  ;;  %v8057_v17 = vmul.f32 %v12109_v13, %v15387_v29  ;;  %12114 = vrcp.f32 %v8012_v54  ;;  %v8030_v29 = vpop.xlane.xlu0 %8029 }
0x26bd   :  { %v8056_v32 = vmul.f32 %v12111_v33, %v15380_v16 }
0x26be   :  { %v12113_v63 = vpop.eup %12112 }
0x26bf   :  { %v8021_v2 = vpop.xlane.xlu1 %8020  ;;  %v8055_v49 = vmul.f32 %v12113_v63, %v15397_v38  ;;  %v8069_v8 = vpack.c.bf16 %v8057_v17, %v8056_v32 }
0x26c0   :  { %v8024_v16 = vpop.xlane.xlu0 %8023 }
0x26c1   :  { %v8068_v21 = vpack.c.bf16 %v8055_v49, %v8054_v34 }
0x26c3   :  { %11125 = vmatprep.mubr.msk.bf16.mxu0 %vm230_vm0, %v8068_v21  ;;  %v8015_v1 = vpop.xlane.xlu1 %8014 }
0x26c4   :  { %12116 = vrcp.f32 %v8015_v1  ;;  %11126 = vmatmul.mubr.msk.bf16.gmra.mrb[180].mxu0 %vm230_vm0, %v8069_v8 }
0x26c5   :  { %12118 = vrcp.f32 %v8021_v2 }
0x26c6   :  { %v12115_v12 = vpop.eup %12114  ;;  %12120 = vrcp.f32 %v8018_v27 }
0x26c7   :  { %v8058_v62 = vmul.f32 %v12115_v12, %v15406_v52 }
0x26ce   :  { %v12117_v24 = vpop.eup %12116 }
0x26cf   :  { %v8059_v57 = vmul.f32 %v12117_v24, %v15422_v6  ;;  %v12119_v37 = vpop.eup %12118 }
0x26d0   :  { %v12121_v60 = vpop.eup %12120  ;;  %v8061_v52 = vmul.f32 %v12119_v37, %v15414_v48 }
0x26d1   :  { %v8070_v38 = vpack.c.bf16 %v8059_v57, %v8058_v62  ;;  %v8060_v42 = vmul.f32 %v12121_v60, %v15402_v58  ;;  %v9782_v58 = vld [vmem:[%s16220_s4 + $0x1c] sm:$0xf]  ;;  %v15480_v57 = vld [vmem:[%s16219_s7 + $0xb] ss:$0 sm:$0xff] }
0x26d2   :  { %11414 = vmatprep.subr.msk.bf16.mxu0 %vm1380_vm3, %v9782_v58 }
0x26d3   :  { %11137 = vmatprep.mubr.msk.bf16.mxu1 %vm230_vm0, %v8070_v38  ;;  %v8071_v22 = vpack.c.bf16 %v8061_v52, %v8060_v42 }
0x26ea   :  { %v8033_v46 = vpop.xlane.xlu0 %8032 }
0x26eb   :  { %12122 = vrcp.f32 %v8033_v46  ;;  %v5020_v46 = vadd.f32 %v15480_v57, %v14131_v39 }
0x26ec   :  { %12124 = vrcp.f32 %v8024_v16 }
0x26ed   :  { %12126 = vrcp.f32 %v8030_v29  ;;  %v5018_v29 = vadd.f32 %v15480_v57, %v14126_v50  ;;  %v5021_v50 = vadd.f32 %v15480_v57, %v14139_v59 }
0x26ee   :  { %v8168_v41 = vpop.permute.xlu0 %8167  ;;  %v8027_v51 = vpop.xlane.xlu1 %8026 }
0x26ef   :  { %12128 = vrcp.f32 %v8027_v51  ;;  %11133 = vmatprep.subr.bf16.mxu1 %v8168_v41  ;;  %v5019_v51 = vadd.f32 %v15480_v57, %v14134_v40 }
0x26f0   :  { %11134 = vmatpush3.bf16.msra.mxu1 %v8168_v41 }
0x26f2   :  { %v8170_v6 = vpop.permute.xlu1 %8169 }
0x26f3   :  { %11135 = vmatprep.subr.bf16.mxu1 %v8170_v6 }
0x26f4   :  { %11136 = vmatpush3.bf16.msra.mxu1 %v8170_v6 }
0x26f5   :  { %v12123_v36 = vpop.eup %12122 }
0x26f6   :  { %v12125_v3 = vpop.eup %12124  ;;  %v8065_v18 = vmul.f32 %v12123_v36, %v15428_v11  ;;  %v8287_v11 = vsel %vm1380_vm3, %v9782_v58, 0 }
0x26f7   :  { %11138 = vmatmul.mubr.msk.bf16.vlgmr.msra.gmra.mrb[32].mxu1 %vm230_vm0, %v8071_v22  ;;  %v12127_v26 = vpop.eup %12126  ;;  %v8062_v61 = vmul.f32 %v12125_v3, %v15416_v25  ;;  %11146 = vmatpush3.bf16.msra.mxu0 %v8287_v11 }
0x26f8   :  { %v8064_v48 = vmul.f32 %v12127_v26, %v15408_v9  ;;  %v5022_v26 = vadd.f32 %v15480_v57, %v14150_v10 }
0x26f9   :  { %v12129_v44 = vpop.eup %12128 }
0x26fa   :  { %v8063_v55 = vmul.f32 %v12129_v44, %v15432_v53  ;;  %v8073_v27 = vpack.c.bf16 %v8065_v18, %v8064_v48  ;;  %v5023_v18 = vadd.f32 %v15480_v57, %v14158_v35 }
0x26fc   :  { %v8072_v5 = vpack.c.bf16 %v8063_v55, %v8062_v61  ;;  %v5025_v55 = vadd.f32 %v15480_v57, %v14163_v15 }
0x26fe   :  { %11141 = vmatprep.mubr.msk.bf16.mxu1 %vm230_vm0, %v8072_v5 }
0x26ff   :  { %11142 = vmatmul.mubr.msk.bf16.gmra.mrb[36].mxu1 %vm230_vm0, %v8073_v27  ;;  %v5024_v27 = vadd.f32 %v15480_v57, %v14155_v30 }
0x278f   :  { %v11123_v25 = vpop.f32.mrb[176].mxu0 }
0x2790   :  { %v8132_v45 = vpop.f32.mrb[177].mxu0 }
0x2791   :  { %v11124_v53 = vpop.f32.mrb[178].mxu0 }
0x2792   :  { %v8253_v0 = vpack.c.bf16 %v11124_v53, %v11123_v25  ;;  %v8135_v9 = vpop.f32.mrb[179].mxu0 }
0x2793   :  { %v8252_v47 = vpack.c.bf16 %v8135_v9, %v8132_v45  ;;  %v5026_v45 = vadd.f32 %v15480_v57, %v14174_v20  ;;  %v5028_v9 = vadd.f32 %v15480_v57, %v14179_v23 }
0x2795   :  { %11147 = vmatprep.mubr.msk.bf16.mxu0 %vm794_vm2, %v8252_v47 }
0x2796   :  { %11148 = vmatmul.mubr.msk.bf16.vlgmr.msra.gmra.mrb[120].mxu0 %vm794_vm2, %v8253_v0  ;;  %v5029_v0 = vadd.f32 %v15480_v57, %v14187_v43  ;;  %v5032_v43 = vadd.f32 %v15480_v57, %v14203_v56 }
0x2797   :  { %v11127_v31 = vpop.f32.mrb[180].mxu0 }
0x2798   :  { %v8148_v4 = vpop.f32.mrb[181].mxu0 }
0x2799   :  { %v11128_v14 = vpop.f32.mrb[182].mxu0 }
0x279a   :  { %v8255_v54 = vpack.c.bf16 %v11128_v14, %v11127_v31  ;;  %v8151_v13 = vpop.f32.mrb[183].mxu0 }
0x279b   :  { %v8254_v33 = vpack.c.bf16 %v8151_v13, %v8148_v4  ;;  %v5027_v4 = vadd.f32 %v15480_v57, %v14182_v19 }
0x279d   :  { %11151 = vmatprep.mubr.msk.bf16.mxu0 %vm794_vm2, %v8254_v33 }
0x279e   :  { %11152 = vmatmul.mubr.msk.bf16.gmra.mrb[124].mxu0 %vm794_vm2, %v8255_v54 }
0x27ca   :  { %v11139_v63 = vpop.f32.mrb[32].mxu1 }
0x27cb   :  { %v8221_v2 = vpop.f32.mrb[33].mxu1 }
0x27cc   :  { %v11140_v34 = vpop.f32.mrb[34].mxu1 }
0x27cd   :  { %v8257_v49 = vpack.c.bf16 %v11140_v34, %v11139_v63  ;;  %v8224_v17 = vpop.f32.mrb[35].mxu1 }
0x27ce   :  { %v8256_v21 = vpack.c.bf16 %v8224_v17, %v8221_v2  ;;  %v5030_v2 = vadd.f32 %v15480_v57, %v14196_v28  ;;  %v5033_v17 = vadd.f32 %v15480_v57, %v14211_v7 }
0x27d0   :  { %11155 = vmatprep.mubr.msk.bf16.mxu0 %vm794_vm2, %v8256_v21 }
0x27d1   :  { %11156 = vmatmul.mubr.msk.bf16.gmra.mrb[128].mxu0 %vm794_vm2, %v8257_v49 }
0x27d2   :  { %v11143_v32 = vpop.f32.mrb[36].mxu1 }
0x27d3   :  { %v8237_v1 = vpop.f32.mrb[37].mxu1 }
0x27d4   :  { %v11144_v8 = vpop.f32.mrb[38].mxu1 }
0x27d5   :  { %v8259_v12 = vpack.c.bf16 %v11144_v8, %v11143_v32  ;;  %v8240_v24 = vpop.f32.mrb[39].mxu1 }
0x27d6   :  { %v8258_v62 = vpack.c.bf16 %v8240_v24, %v8237_v1  ;;  %v16226_v1 = vld [vmem:[#allocation2_spill] sm:$0xff] }
0x27d7   :  { %v5031_v8 = vadd.f32 %v15480_v57, %v16226_v1  ;;  %v11481_v1 = vld [vmem:[%s16221_s5 + $0x18] sm:$0xff]  }
0x27d8   :  { %11159 = vmatprep.mubr.msk.bf16.mxu0 %vm794_vm2, %v8258_v62 }
0x27d9   :  { %11160 = vmatmul.mubr.msk.bf16.gmra.mrb[132].mxu0 %vm794_vm2, %v8259_v12 }
0x2869   :  { %v11149_v38 = vpop.f32.mrb[120].mxu0 }
0x286a   :  { %v8323_v16 = vpop.f32.mrb[121].mxu0  ;;  %v15490_v52 = vadd.f32 %v11149_v38, %v5020_v46 }
0x286b   :  { %v15486_v37 = vadd.f32 %v8323_v16, %v5018_v29  ;;  %v11150_v41 = vpop.f32.mrb[122].mxu0 }
0x286c   :  { %v8326_v60 = vpop.f32.mrb[123].mxu0  ;;  %v15500_v22 = vadd.f32 %v11150_v41, %v5021_v50  ;;  %v8408_v40 = vsel %vm359_vm1, %v15490_v52, 0.0 }
0x286d   :  { %v15492_v6 = vadd.f32 %v8326_v60, %v5019_v51  ;;  %v8402_v42 = vsel %vm359_vm1, %v15486_v37, 0.0 }
0x286e   :  { %8403 = vadd.xlane.f32.xlu0 %v8402_v42  ;;  %v8411_v5 = vsel %vm359_vm1, %v15500_v22, 0.0 }
0x286f   :  { %v8405_v39 = vsel %vm359_vm1, %v15492_v6, 0.0 }
0x2870   :  { %8406 = vadd.xlane.f32.xlu1 %v8405_v39 }
0x2871   :  { %v11153_v36 = vpop.f32.mrb[124].mxu0 }
0x2872   :  { %8409 = vadd.xlane.f32.xlu0 %v8408_v40  ;;  %v8339_v3 = vpop.f32.mrb[125].mxu0  ;;  %v15522_v58 = vadd.f32 %v11153_v36, %v5024_v27 }
0x2873   :  { %v11154_v44 = vpop.f32.mrb[126].mxu0  ;;  %v15508_v61 = vadd.f32 %v8339_v3, %v5022_v26 }
0x2874   :  { %v8342_v59 = vpop.f32.mrb[127].mxu0  ;;  %v15518_v10 = vadd.f32 %v11154_v44, %v5025_v55  ;;  %v8420_v25 = vsel %vm359_vm1, %v15522_v58, 0.0 }
0x2875   :  { %v15512_v48 = vadd.f32 %v8342_v59, %v5023_v18  ;;  %v8414_v15 = vsel %vm359_vm1, %v15508_v61, 0.0 }
0x2876   :  { %8412 = vadd.xlane.f32.xlu0 %v8411_v5  ;;  %v8423_v11 = vsel %vm359_vm1, %v15518_v10, 0.0 }
0x2877   :  { %v8417_v35 = vsel %vm359_vm1, %v15512_v48, 0.0 }
0x2878   :  { %8418 = vadd.xlane.f32.xlu1 %v8417_v35 }
0x287a   :  { %8415 = vadd.xlane.f32.xlu0 %v8414_v15 }
0x287c   :  { %8424 = vadd.xlane.f32.xlu1 %v8423_v11 }
0x287e   :  { %8421 = vadd.xlane.f32.xlu0 %v8420_v25 }
0x28a4   :  { %v11157_v30 = vpop.f32.mrb[128].mxu0 }
0x28a5   :  { %v8355_v53 = vpop.f32.mrb[129].mxu0  ;;  %v15542_v13 = vadd.f32 %v11157_v30, %v5028_v9 }
0x28a6   :  { %v15536_v47 = vadd.f32 %v8355_v53, %v5026_v45  ;;  %v11158_v31 = vpop.f32.mrb[130].mxu0 }
0x28a7   :  { %v15540_v14 = vadd.f32 %v11158_v31, %v5029_v0  ;;  %v8358_v54 = vpop.f32.mrb[131].mxu0  ;;  %v8432_v19 = vsel %vm359_vm1, %v15542_v13, 0.0 }
0x28a8   :  { %v15544_v33 = vadd.f32 %v8358_v54, %v5027_v4  ;;  %v8426_v20 = vsel %vm359_vm1, %v15536_v47, 0.0 }
0x28a9   :  { %8427 = vadd.xlane.f32.xlu0 %v8426_v20  ;;  %v8435_v56 = vsel %vm359_vm1, %v15540_v14, 0.0 }
0x28aa   :  { %v8429_v23 = vsel %vm359_vm1, %v15544_v33, 0.0 }
0x28ab   :  { %8430 = vadd.xlane.f32.xlu1 %v8429_v23 }
0x28ac   :  { %v11161_v63 = vpop.f32.mrb[132].mxu0 }
0x28ad   :  { %v15556_v34 = vadd.f32 %v11161_v63, %v5032_v43  ;;  %8433 = vadd.xlane.f32.xlu0 %v8432_v19  ;;  %v8371_v49 = vpop.f32.mrb[133].mxu0 }
0x28ae   :  { %v15560_v21 = vadd.f32 %v8371_v49, %v5030_v2  ;;  %v11162_v32 = vpop.f32.mrb[134].mxu0 }
0x28af   :  { %v15566_v12 = vadd.f32 %v11162_v32, %v5033_v17  ;;  %8436 = vadd.xlane.f32.xlu1 %v8435_v56  ;;  %v8374_v28 = vpop.f32.mrb[135].mxu0  ;;  %v8444_v38 = vsel %vm359_vm1, %v15556_v34, 0.0  ;;  %v11480_v56 = vld [vmem:[%s16221_s5 + $0x10] sm:$0xff]  }
0x28b0   :  { %v15568_v24 = vadd.f32 %v8374_v28, %v5031_v8  ;;  %v8438_v62 = vsel %vm359_vm1, %v15560_v21, 0.0  ;;  %11163 = vmatprep.subr.bf16.mxu1 %v11480_v56 }
0x28b1   :  { %8439 = vadd.xlane.f32.xlu0 %v8438_v62  ;;  %v8447_v57 = vsel %vm359_vm1, %v15566_v12, 0.0  ;;  %11164 = vmatpush3.bf16.msra.mxu1 %v11480_v56 }
0x28b2   :  { %v8441_v7 = vsel %vm359_vm1, %v15568_v24, 0.0  ;;  %11165 = vmatprep.subr.bf16.mxu1 %v11481_v1 }
0x28b3   :  { %8442 = vadd.xlane.f32.xlu1 %v8441_v7 }
0x28b5   :  { %8445 = vadd.xlane.f32.xlu0 %v8444_v38  ;;  %11166 = vmatpush3.bf16.msra.mxu1 %v11481_v1 }
0x28b7   :  { %8448 = vadd.xlane.f32.xlu1 %v8447_v57 }
0x28fb   :  { %v8404_v29 = vpop.xlane.xlu0 %8403 }
0x28fc   :  { %v8450_v16 = vmul.f32 0.03125, %v8404_v29 }
0x28fd   :  { %v8407_v46 = vpop.xlane.xlu1 %8406 }
0x28fe   :  { %v15579_v41 = vsub.f32 %v15486_v37, %v8450_v16  ;;  %v8451_v51 = vmul.f32 0.03125, %v8407_v46 }
0x28ff   :  { %v8410_v60 = vpop.xlane.xlu0 %8409 }
0x2900   :  { %v15582_v42 = vsub.f32 %v15492_v6, %v8451_v51  ;;  %v8452_v50 = vmul.f32 0.03125, %v8410_v60  ;;  %v8482_v39 = vmul.f32 %v15579_v41, %v15579_v41 }
0x2902   :  { %v15587_v36 = vsub.f32 %v15490_v52, %v8452_v50  ;;  %v8498_v40 = vsel %vm359_vm1, %v8482_v39, 0.0  ;;  %v8483_v3 = vmul.f32 %v15582_v42, %v15582_v42 }
0x2903   :  { %v8413_v26 = vpop.xlane.xlu0 %8412  ;;  %8499 = vadd.xlane.f32.xlu0 %v8498_v40 }
0x2904   :  { %v8453_v44 = vmul.f32 0.03125, %v8413_v26  ;;  %v8501_v18 = vsel %vm359_vm1, %v8483_v3, 0.0  ;;  %v8484_v59 = vmul.f32 %v15587_v36, %v15587_v36 }
0x2905   :  { %8502 = vadd.xlane.f32.xlu1 %v8501_v18  ;;  %v8419_v55 = vpop.xlane.xlu1 %8418 }
0x2906   :  { %v15596_v5 = vsub.f32 %v15500_v22, %v8453_v44  ;;  %v8455_v27 = vmul.f32 0.03125, %v8419_v55  ;;  %v8504_v35 = vsel %vm359_vm1, %v8484_v59, 0.0 }
0x2907   :  { %v8416_v15 = vpop.xlane.xlu0 %8415  ;;  %8505 = vadd.xlane.f32.xlu0 %v8504_v35 }
0x2908   :  { %v15600_v11 = vsub.f32 %v15512_v48, %v8455_v27  ;;  %v8454_v25 = vmul.f32 0.03125, %v8416_v15  ;;  %v8485_v30 = vmul.f32 %v15596_v5, %v15596_v5 }
0x2909   :  { %v8425_v45 = vpop.xlane.xlu1 %8424 }
0x290a   :  { %v15605_v53 = vsub.f32 %v15508_v61, %v8454_v25  ;;  %v8457_v0 = vmul.f32 0.03125, %v8425_v45  ;;  %v8507_v9 = vsel %vm359_vm1, %v8485_v30, 0.0  ;;  %v8487_v31 = vmul.f32 %v15600_v11, %v15600_v11 }
0x290b   :  { %v8422_v4 = vpop.xlane.xlu0 %8421  ;;  %8508 = vadd.xlane.f32.xlu1 %v8507_v9 }
0x290c   :  { %v15611_v54 = vsub.f32 %v15518_v10, %v8457_v0  ;;  %v8456_v20 = vmul.f32 0.03125, %v8422_v4  ;;  %v8486_v23 = vmul.f32 %v15605_v53, %v15605_v53  ;;  %v8513_v19 = vsel %vm359_vm1, %v8487_v31, 0.0 }
0x290e   :  { %v15616_v43 = vsub.f32 %v15522_v58, %v8456_v20  ;;  %v8510_v63 = vsel %vm359_vm1, %v8486_v23, 0.0  ;;  %v8489_v2 = vmul.f32 %v15611_v54, %v15611_v54 }
0x290f   :  { %8511 = vadd.xlane.f32.xlu0 %v8510_v63  ;;  %8514 = vadd.xlane.f32.xlu1 %v8513_v19 }
0x2910   :  { %v8488_v49 = vmul.f32 %v15616_v43, %v15616_v43  ;;  %v8519_v32 = vsel %vm359_vm1, %v8489_v2, 0.0 }
0x2912   :  { %v8516_v17 = vsel %vm359_vm1, %v8488_v49, 0.0 }
0x2913   :  { %8517 = vadd.xlane.f32.xlu0 %v8516_v17  ;;  %8520 = vadd.xlane.f32.xlu1 %v8519_v32 }
0x2936   :  { %v8428_v8 = vpop.xlane.xlu0 %8427 }
0x2937   :  { %v8458_v28 = vmul.f32 0.03125, %v8428_v8 }
0x2938   :  { %v8431_v62 = vpop.xlane.xlu1 %8430 }
0x2939   :  { %v15633_v7 = vsub.f32 %v15536_v47, %v8458_v28  ;;  %v8459_v38 = vmul.f32 0.03125, %v8431_v62 }
0x293a   :  { %v8434_v57 = vpop.xlane.xlu0 %8433 }
0x293b   :  { %v15636_v29 = vsub.f32 %v15544_v33, %v8459_v38  ;;  %v8460_v16 = vmul.f32 0.03125, %v8434_v57  ;;  %v8490_v46 = vmul.f32 %v15633_v7, %v15633_v7 }
0x293c   :  { %v8437_v51 = vpop.xlane.xlu1 %8436 }
0x293d   :  { %v15641_v60 = vsub.f32 %v15542_v13, %v8460_v16  ;;  %v8461_v50 = vmul.f32 0.03125, %v8437_v51  ;;  %v8522_v39 = vsel %vm359_vm1, %v8490_v46, 0.0  ;;  %v8491_v40 = vmul.f32 %v15636_v29, %v15636_v29 }
0x293e   :  { %8523 = vadd.xlane.f32.xlu0 %v8522_v39  ;;  %v8440_v3 = vpop.xlane.xlu0 %8439 }
0x293f   :  { %v15647_v26 = vsub.f32 %v15540_v14, %v8461_v50  ;;  %v8462_v44 = vmul.f32 0.03125, %v8440_v3  ;;  %v8525_v18 = vsel %vm359_vm1, %v8491_v40, 0.0  ;;  %v8492_v59 = vmul.f32 %v15641_v60, %v15641_v60 }
0x2940   :  { %8526 = vadd.xlane.f32.xlu1 %v8525_v18  ;;  %v8443_v55 = vpop.xlane.xlu1 %8442 }
0x2941   :  { %v15653_v27 = vsub.f32 %v15560_v21, %v8462_v44  ;;  %v8463_v35 = vmul.f32 0.03125, %v8443_v55  ;;  %v8528_v15 = vsel %vm359_vm1, %v8492_v59, 0.0  ;;  %v8493_v25 = vmul.f32 %v15647_v26, %v15647_v26 }
0x2942   :  { %8529 = vadd.xlane.f32.xlu0 %v8528_v15  ;;  %v8446_v30 = vpop.xlane.xlu0 %8445  ;;  %v15683_v15 = vld [vmem:[%s16219_s7 + $0x9] ss:$0 sm:$0xff] }
0x2943   :  { %v15659_v45 = vsub.f32 %v15568_v24, %v8463_v35  ;;  %v8464_v0 = vmul.f32 0.03125, %v8446_v30  ;;  %v8531_v9 = vsel %vm359_vm1, %v8493_v25, 0.0  ;;  %v8494_v31 = vmul.f32 %v15653_v27, %v15653_v27 }
0x2944   :  { %8532 = vadd.xlane.f32.xlu1 %v8531_v9  ;;  %v8449_v4 = vpop.xlane.xlu1 %8448 }
0x2945   :  { %v15665_v20 = vsub.f32 %v15556_v34, %v8464_v0  ;;  %v8465_v23 = vmul.f32 0.03125, %v8449_v4  ;;  %v8534_v63 = vsel %vm359_vm1, %v8494_v31, 0.0  ;;  %v8495_v19 = vmul.f32 %v15659_v45, %v15659_v45 }
0x2946   :  { %8535 = vadd.xlane.f32.xlu0 %v8534_v63 }
0x2947   :  { %v15671_v2 = vsub.f32 %v15566_v12, %v8465_v23  ;;  %v8537_v49 = vsel %vm359_vm1, %v8495_v19, 0.0  ;;  %v8496_v17 = vmul.f32 %v15665_v20, %v15665_v20 }
0x2948   :  { %8538 = vadd.xlane.f32.xlu1 %v8537_v49 }
0x2949   :  { %v8540_v32 = vsel %vm359_vm1, %v8496_v17, 0.0  ;;  %v8497_v56 = vmul.f32 %v15671_v2, %v15671_v2 }
0x294a   :  { %8541 = vadd.xlane.f32.xlu0 %v8540_v32  ;;  %v15691_v32 = vld [vmem:[%s16219_s7 + $0xa] ss:$0 sm:$0xff] }
0x294b   :  { %v8543_v1 = vsel %vm359_vm1, %v8497_v56, 0.0 }
0x294c   :  { %8544 = vadd.xlane.f32.xlu1 %v8543_v1 }
0x2990   :  { %v8500_v8 = vpop.xlane.xlu0 %8499 }
0x2991   :  { %v8546_v28 = vmul.f32 0.03125, %v8500_v8 }
0x2992   :  { %v8503_v62 = vpop.xlane.xlu1 %8502 }
0x2993   :  { %v8562_v38 = vadd.f32 1e-05, %v8546_v28  ;;  %v8547_v57 = vmul.f32 0.03125, %v8503_v62 }
0x2994   :  { %v8506_v16 = vpop.xlane.xlu0 %8505 }
0x2995   :  { %12130 = vrsqrt.f32 %v8562_v38  ;;  %v8563_v46 = vadd.f32 1e-05, %v8547_v57  ;;  %v8548_v51 = vmul.f32 0.03125, %v8506_v16 }
0x2997   :  { %12132 = vrsqrt.f32 %v8563_v46  ;;  %v8564_v50 = vadd.f32 1e-05, %v8548_v51 }
0x2998   :  { %v8509_v39 = vpop.xlane.xlu1 %8508 }
0x2999   :  { %12134 = vrsqrt.f32 %v8564_v50  ;;  %v8549_v40 = vmul.f32 0.03125, %v8509_v39 }
0x299b   :  { %v8565_v3 = vadd.f32 1e-05, %v8549_v40 }
0x299c   :  { %v8512_v44 = vpop.xlane.xlu0 %8511  ;;  %v8515_v18 = vpop.xlane.xlu1 %8514 }
0x299d   :  { %12136 = vrsqrt.f32 %v8565_v3  ;;  %v8550_v59 = vmul.f32 0.03125, %v8512_v44  ;;  %v8551_v55 = vmul.f32 0.03125, %v8515_v18 }
0x299f   :  { %v12131_v35 = vpop.eup %12130  ;;  %v8566_v25 = vadd.f32 1e-05, %v8550_v59  ;;  %v8567_v30 = vadd.f32 1e-05, %v8551_v55 }
0x29a0   :  { %v8594_v0 = vmul.f32 %v12131_v35, %v15579_v41  ;;  %v8518_v9 = vpop.xlane.xlu0 %8517  ;;  %v8521_v31 = vpop.xlane.xlu1 %8520 }
0x29a1   :  { %v12133_v4 = vpop.eup %12132  ;;  %12138 = vrsqrt.f32 %v8566_v25  ;;  %v8552_v23 = vmul.f32 0.03125, %v8518_v9  ;;  %v8553_v63 = vmul.f32 0.03125, %v8521_v31 }
0x29a2   :  { %v8595_v19 = vmul.f32 %v12133_v4, %v15582_v42  ;;  %12140 = vrsqrt.f32 %v8567_v30  ;;  %v8614_v49 = vmul.f32 %v15683_v15, %v8594_v0 }
0x29a3   :  { %v12135_v17 = vpop.eup %12134  ;;  %v8568_v56 = vadd.f32 1e-05, %v8552_v23  ;;  %v8569_v1 = vadd.f32 1e-05, %v8553_v63 }
0x29a4   :  { %v8596_v41 = vmul.f32 %v12135_v17, %v15587_v36  ;;  %v8615_v8 = vmul.f32 %v15683_v15, %v8595_v19  ;;  %v8634_v28 = vadd.f32 %v15691_v32, %v8614_v49 }
0x29a5   :  { %12142 = vrsqrt.f32 %v8568_v56 }
0x29a6   :  { %12144 = vrsqrt.f32 %v8569_v1  ;;  %v8635_v42 = vadd.f32 %v15691_v32, %v8615_v8  ;;  %v8616_v38 = vmul.f32 %v15683_v15, %v8596_v41 }
0x29a7   :  { %v12137_v62 = vpop.eup %12136 }
0x29a8   :  { %v8597_v57 = vmul.f32 %v12137_v62, %v15596_v5  ;;  %v8650_v16 = vpack.c.bf16 %v8635_v42, %v8634_v28  ;;  %v8636_v50 = vadd.f32 %v15691_v32, %v8616_v38 }
0x29aa   :  { %v8617_v46 = vmul.f32 %v15683_v15, %v8597_v57  ;;  %11167 = vmatprep.mubr.msk.bf16.mxu1 %vm359_vm1, %v8650_v16 }
0x29ab   :  { %v12139_v51 = vpop.eup %12138 }
0x29ac   :  { %v12141_v36 = vpop.eup %12140  ;;  %v8637_v39 = vadd.f32 %v15691_v32, %v8617_v46  ;;  %v8598_v40 = vmul.f32 %v12139_v51, %v15605_v53 }
0x29ad   :  { %v8599_v3 = vmul.f32 %v12141_v36, %v15600_v11 }
0x29ae   :  { %v8651_v44 = vpack.c.bf16 %v8637_v39, %v8636_v50  ;;  %v8618_v18 = vmul.f32 %v15683_v15, %v8598_v40 }
0x29af   :  { %v12143_v59 = vpop.eup %12142  ;;  %v8619_v5 = vmul.f32 %v15683_v15, %v8599_v3 }
0x29b0   :  { %v12145_v55 = vpop.eup %12144  ;;  %v8600_v35 = vmul.f32 %v12143_v59, %v15616_v43  ;;  %11168 = vmatmul.mubr.msk.bf16.vlgmr.msra.gmra.mrb[40].mxu1 %vm359_vm1, %v8651_v44  ;;  %v8638_v25 = vadd.f32 %v15691_v32, %v8618_v18 }
0x29b1   :  { %v8601_v30 = vmul.f32 %v12145_v55, %v15611_v54  ;;  %v8639_v0 = vadd.f32 %v15691_v32, %v8619_v5 }
0x29b2   :  { %v8620_v53 = vmul.f32 %v15683_v15, %v8600_v35 }
0x29b3   :  { %v8621_v11 = vmul.f32 %v15683_v15, %v8601_v30  ;;  %v8652_v9 = vpack.c.bf16 %v8639_v0, %v8638_v25 }
0x29b4   :  { %v8640_v31 = vadd.f32 %v15691_v32, %v8620_v53 }
0x29b5   :  { %v8641_v4 = vadd.f32 %v15691_v32, %v8621_v11  ;;  %11171 = vmatprep.mubr.msk.bf16.mxu1 %vm359_vm1, %v8652_v9 }
0x29b7   :  { %v8653_v43 = vpack.c.bf16 %v8641_v4, %v8640_v31 }
0x29b9   :  { %11172 = vmatmul.mubr.msk.bf16.gmra.mrb[44].mxu1 %vm359_vm1, %v8653_v43 }
0x29cb   :  { %v8524_v23 = vpop.xlane.xlu0 %8523 }
0x29cc   :  { %v8554_v63 = vmul.f32 0.03125, %v8524_v23 }
0x29cd   :  { %v8527_v19 = vpop.xlane.xlu1 %8526 }
0x29ce   :  { %v8570_v54 = vadd.f32 1e-05, %v8554_v63  ;;  %v8555_v49 = vmul.f32 0.03125, %v8527_v19 }
0x29cf   :  { %v8530_v17 = vpop.xlane.xlu0 %8529 }
0x29d0   :  { %12146 = vrsqrt.f32 %v8570_v54  ;;  %v8571_v56 = vadd.f32 1e-05, %v8555_v49  ;;  %v8556_v1 = vmul.f32 0.03125, %v8530_v17 }
0x29d1   :  { %v8533_v41 = vpop.xlane.xlu1 %8532 }
0x29d2   :  { %12148 = vrsqrt.f32 %v8571_v56  ;;  %v8572_v8 = vadd.f32 1e-05, %v8556_v1  ;;  %v8557_v28 = vmul.f32 0.03125, %v8533_v41 }
0x29d3   :  { %v8536_v42 = vpop.xlane.xlu0 %8535 }
0x29d4   :  { %12150 = vrsqrt.f32 %v8572_v8  ;;  %v8573_v62 = vadd.f32 1e-05, %v8557_v28  ;;  %v8558_v38 = vmul.f32 0.03125, %v8536_v42 }
0x29d5   :  { %v8539_v57 = vpop.xlane.xlu1 %8538 }
0x29d6   :  { %12152 = vrsqrt.f32 %v8573_v62  ;;  %v8574_v16 = vadd.f32 1e-05, %v8558_v38  ;;  %v8559_v46 = vmul.f32 0.03125, %v8539_v57 }
0x29d7   :  { %v8542_v51 = vpop.xlane.xlu0 %8541 }
0x29d8   :  { %12154 = vrsqrt.f32 %v8574_v16  ;;  %v8575_v36 = vadd.f32 1e-05, %v8559_v46  ;;  %v8560_v50 = vmul.f32 0.03125, %v8542_v51  ;;  %v11485_v16 = vld [vmem:[%s16222_s6 + $0x58] sm:$0xff]   ;;  %v11486_v46 = vld [vmem:[%s16222_s6 + $0x60] sm:$0xff]   ;;  %v11487_v51 = vld [vmem:[%s16222_s6 + $0x68] sm:$0xff]  }
0x29d9   :  { %v8545_v39 = vpop.xlane.xlu1 %8544 }
0x29da   :  { %v12147_v40 = vpop.eup %12146  ;;  %12156 = vrsqrt.f32 %v8575_v36  ;;  %v8576_v3 = vadd.f32 1e-05, %v8560_v50  ;;  %v8561_v44 = vmul.f32 0.03125, %v8545_v39  ;;  %v11488_v36 = vld [vmem:[%s16222_s6 + $0x70] sm:$0xff]   ;;  %v11489_v50 = vld [vmem:[%s16222_s6 + $0x78] sm:$0xff]  }
0x29db   :  { %v8602_v18 = vmul.f32 %v12147_v40, %v15633_v7  ;;  %v15773_v39 = vld [vmem:[%s16219_s7 + $0xd] ss:$0 sm:$0xff] }
0x29dc   :  { %v12149_v59 = vpop.eup %12148  ;;  %12158 = vrsqrt.f32 %v8576_v3  ;;  %v8577_v5 = vadd.f32 1e-05, %v8561_v44 }
0x29dd   :  { %v8603_v55 = vmul.f32 %v12149_v59, %v15636_v29  ;;  %v8622_v35 = vmul.f32 %v15683_v15, %v8602_v18 }
0x29de   :  { %v12151_v25 = vpop.eup %12150  ;;  %12160 = vrsqrt.f32 %v8577_v5 }
0x29df   :  { %v8604_v30 = vmul.f32 %v12151_v25, %v15641_v60  ;;  %v8623_v0 = vmul.f32 %v15683_v15, %v8603_v55  ;;  %v8642_v7 = vadd.f32 %v15691_v32, %v8622_v35 }
0x29e0   :  { %v12153_v53 = vpop.eup %12152 }
0x29e1   :  { %v8624_v11 = vmul.f32 %v15683_v15, %v8604_v30  ;;  %v8605_v9 = vmul.f32 %v12153_v53, %v15647_v26  ;;  %v8643_v31 = vadd.f32 %v15691_v32, %v8623_v0 }
0x29e2   :  { %v12155_v4 = vpop.eup %12154 }
0x29e3   :  { %v8625_v29 = vmul.f32 %v15683_v15, %v8605_v9  ;;  %v8606_v43 = vmul.f32 %v12155_v4, %v15653_v27  ;;  %v8654_v23 = vpack.c.bf16 %v8643_v31, %v8642_v7  ;;  %v8644_v60 = vadd.f32 %v15691_v32, %v8624_v11 }
0x29e4   :  { %v12157_v63 = vpop.eup %12156 }
0x29e5   :  { %v8645_v19 = vadd.f32 %v15691_v32, %v8625_v29  ;;  %v8607_v54 = vmul.f32 %v12157_v63, %v15659_v45  ;;  %11175 = vmatprep.mubr.msk.bf16.mxu1 %vm359_vm1, %v8654_v23  ;;  %v8626_v26 = vmul.f32 %v15683_v15, %v8606_v43 }
0x29e6   :  { %v12159_v49 = vpop.eup %12158 }
0x29e7   :  { %v8655_v17 = vpack.c.bf16 %v8645_v19, %v8644_v60  ;;  %v8608_v56 = vmul.f32 %v12159_v49, %v15665_v20  ;;  %v8627_v1 = vmul.f32 %v15683_v15, %v8607_v54  ;;  %v8646_v28 = vadd.f32 %v15691_v32, %v8626_v26 }
0x29e8   :  { %v12161_v41 = vpop.eup %12160 }
0x29e9   :  { %v8628_v27 = vmul.f32 %v15683_v15, %v8608_v56  ;;  %v8609_v8 = vmul.f32 %v12161_v41, %v15671_v2  ;;  %11176 = vmatmul.mubr.msk.bf16.gmra.mrb[48].mxu1 %vm359_vm1, %v8655_v17  ;;  %v8647_v45 = vadd.f32 %v15691_v32, %v8627_v1  ;;  %v11482_v2 = vld [vmem:[%s16222_s6 + $0x40] sm:$0xff]  }
0x29ea   :  { %11183 = vmatprep.subr.bf16.mxu0 %v11482_v2 }
0x29eb   :  { %v8629_v42 = vmul.f32 %v15683_v15, %v8609_v8  ;;  %v8656_v62 = vpack.c.bf16 %v8647_v45, %v8646_v28  ;;  %v8648_v38 = vadd.f32 %v15691_v32, %v8628_v27  ;;  %11184 = vmatpush3.bf16.msra.mxu0 %v11482_v2  ;;  %v11483_v15 = vld [vmem:[%s16222_s6 + $0x48] sm:$0xff]  }
0x29ec   :  { %11185 = vmatprep.subr.bf16.mxu0 %v11483_v15 }
0x29ed   :  { %v8649_v20 = vadd.f32 %v15691_v32, %v8629_v42  ;;  %11179 = vmatprep.mubr.msk.bf16.mxu1 %vm359_vm1, %v8656_v62  ;;  %v11484_v32 = vld [vmem:[%s16222_s6 + $0x50] sm:$0xff]  }
0x29ef   :  { %v8657_v57 = vpack.c.bf16 %v8649_v20, %v8648_v38  ;;  %11186 = vmatpush3.bf16.msra.mxu0 %v11483_v15 }
0x29f0   :  { %11187 = vmatprep.subr.bf16.mxu0 %v11484_v32 }
0x29f1   :  { %11180 = vmatmul.mubr.msk.bf16.gmra.mrb[52].mxu1 %vm359_vm1, %v8657_v57 }
0x29f3   :  { %11188 = vmatpush3.bf16.msra.mxu0 %v11484_v32 }
0x29f4   :  { %11189 = vmatprep.subr.bf16.mxu0 %v11485_v16 }
0x29f7   :  { %11190 = vmatpush3.bf16.msra.mxu0 %v11485_v16 }
0x29f8   :  { %11191 = vmatprep.subr.bf16.mxu0 %v11486_v46 }
0x29fb   :  { %11192 = vmatpush3.bf16.msra.mxu0 %v11486_v46 }
0x29fc   :  { %11193 = vmatprep.subr.bf16.mxu0 %v11487_v51 }
0x29ff   :  { %11194 = vmatpush3.bf16.msra.mxu0 %v11487_v51 }
0x2a00   :  { %11195 = vmatprep.subr.bf16.mxu0 %v11488_v36 }
0x2a03   :  { %11196 = vmatpush3.bf16.msra.mxu0 %v11488_v36 }
0x2a04   :  { %11197 = vmatprep.subr.bf16.mxu0 %v11489_v50 }
0x2a07   :  { %11198 = vmatpush3.bf16.msra.mxu0 %v11489_v50 }
0x2a83   :  { %v11169_v40 = vpop.f32.mrb[40].mxu1 }
0x2a84   :  { %v15776_v3 = vadd.f32 %v11169_v40, %v15773_v39  ;;  %v8737_v44 = vpop.f32.mrb[41].mxu1 }
0x2a85   :  { %v15779_v18 = vadd.f32 %v15773_v39, %v8737_v44  ;;  %v11170_v59 = vpop.f32.mrb[42].mxu1 }
0x2a86   :  { %v8802_v5 = vmul.f32 %v15776_v3, %v15776_v3  ;;  %v15784_v55 = vadd.f32 %v11170_v59, %v15773_v39  ;;  %v8740_v35 = vpop.f32.mrb[43].mxu1 }
0x2a87   :  { %v8800_v25 = vmul.f32 %v15779_v18, %v15779_v18  ;;  %v15789_v30 = vadd.f32 %v15773_v39, %v8740_v35 }
0x2a88   :  { %v8818_v0 = vmul.f32 %v8802_v5, %v15776_v3  ;;  %v8803_v53 = vmul.f32 %v15784_v55, %v15784_v55 }
0x2a89   :  { %v8816_v11 = vmul.f32 %v8800_v25, %v15779_v18  ;;  %v8801_v9 = vmul.f32 %v15789_v30, %v15789_v30 }
0x2a8a   :  { %v8834_v7 = vmul.f32 0.044715, %v8818_v0  ;;  %v8819_v31 = vmul.f32 %v8803_v53, %v15784_v55 }
0x2a8b   :  { %v8832_v4 = vmul.f32 0.044715, %v8816_v11  ;;  %v8817_v29 = vmul.f32 %v8801_v9, %v15789_v30 }
0x2a8c   :  { %v8850_v43 = vadd.f32 %v8834_v7, %v15776_v3  ;;  %v8835_v23 = vmul.f32 0.044715, %v8819_v31  ;;  %v11173_v63 = vpop.f32.mrb[44].mxu1 }
0x2a8d   :  { %v8848_v60 = vadd.f32 %v8832_v4, %v15779_v18  ;;  %v8833_v19 = vmul.f32 0.044715, %v8817_v29  ;;  %v15802_v54 = vadd.f32 %v11173_v63, %v15773_v39  ;;  %v8753_v26 = vpop.f32.mrb[45].mxu1 }
0x2a8e   :  { %v8866_v49 = vmul.f32 0.7978846, %v8850_v43  ;;  %v8851_v17 = vadd.f32 %v8835_v23, %v15784_v55  ;;  %v15806_v56 = vadd.f32 %v15773_v39, %v8753_v26  ;;  %v11174_v1 = vpop.f32.mrb[46].mxu1 }
0x2a8f   :  { %v8864_v41 = vmul.f32 0.7978846, %v8848_v60  ;;  %v8849_v27 = vadd.f32 %v8833_v19, %v15789_v30  ;;  %v8806_v8 = vmul.f32 %v15802_v54, %v15802_v54  ;;  %v15812_v28 = vadd.f32 %v11174_v1, %v15773_v39  ;;  %v8756_v45 = vpop.f32.mrb[47].mxu1 }
0x2a90   :  { %12162 = vtanh.f32 %v8866_v49  ;;  %v8867_v42 = vmul.f32 0.7978846, %v8851_v17  ;;  %v8804_v62 = vmul.f32 %v15806_v56, %v15806_v56  ;;  %v8757_v38 = vadd.f32 %v15773_v39, %v8756_v45 }
0x2a91   :  { %12164 = vtanh.f32 %v8864_v41  ;;  %v8865_v20 = vmul.f32 0.7978846, %v8849_v27  ;;  %v8822_v57 = vmul.f32 %v8806_v8, %v15802_v54  ;;  %v8807_v2 = vmul.f32 %v15812_v28, %v15812_v28 }
0x2a92   :  { %12166 = vtanh.f32 %v8867_v42  ;;  %v8820_v15 = vmul.f32 %v8804_v62, %v15806_v56  ;;  %v8805_v32 = vmul.f32 %v8757_v38, %v8757_v38 }
0x2a93   :  { %12168 = vtanh.f32 %v8865_v20  ;;  %v8838_v16 = vmul.f32 0.044715, %v8822_v57  ;;  %v8823_v46 = vmul.f32 %v8807_v2, %v15812_v28 }
0x2a94   :  { %v8836_v51 = vmul.f32 0.044715, %v8820_v15  ;;  %v8821_v36 = vmul.f32 %v8805_v32, %v8757_v38 }
0x2a95   :  { %v8854_v50 = vadd.f32 %v8838_v16, %v15802_v54  ;;  %v8839_v40 = vmul.f32 0.044715, %v8823_v46 }
0x2a96   :  { %v8852_v44 = vadd.f32 %v8836_v51, %v15806_v56  ;;  %v8837_v59 = vmul.f32 0.044715, %v8821_v36 }
0x2a97   :  { %v8870_v5 = vmul.f32 0.7978846, %v8854_v50  ;;  %v8855_v35 = vadd.f32 %v8839_v40, %v15812_v28 }
0x2a98   :  { %v8868_v25 = vmul.f32 0.7978846, %v8852_v44  ;;  %v8853_v0 = vadd.f32 %v8837_v59, %v8757_v38 }
0x2a99   :  { %12170 = vtanh.f32 %v8870_v5  ;;  %v8871_v53 = vmul.f32 0.7978846, %v8855_v35 }
0x2a9a   :  { %v12163_v11 = vpop.eup %12162  ;;  %12172 = vtanh.f32 %v8868_v25  ;;  %v8869_v9 = vmul.f32 0.7978846, %v8853_v0 }
0x2a9b   :  { %v12165_v7 = vpop.eup %12164  ;;  %v8898_v31 = vadd.f32 1.0, %v12163_v11  ;;  %12174 = vtanh.f32 %v8871_v53 }
0x2a9c   :  { %v12167_v4 = vpop.eup %12166  ;;  %12176 = vtanh.f32 %v8869_v9  ;;  %v8896_v29 = vadd.f32 1.0, %v12165_v7 }
0x2a9d   :  { %v12169_v43 = vpop.eup %12168  ;;  %v8914_v23 = vmul.f32 0.5, %v8898_v31  ;;  %v8899_v63 = vadd.f32 1.0, %v12167_v4 }
0x2a9e   :  { %v8897_v60 = vadd.f32 1.0, %v12169_v43  ;;  %v8912_v19 = vmul.f32 0.5, %v8896_v29 }
0x2a9f   :  { %v8915_v26 = vmul.f32 0.5, %v8899_v63  ;;  %v8930_v17 = vmul.f32 %v8914_v23, %v15776_v3 }
0x2aa0   :  { %v8913_v49 = vmul.f32 0.5, %v8897_v60  ;;  %v8928_v41 = vmul.f32 %v8912_v19, %v15779_v18 }
0x2aa1   :  { %v8931_v1 = vmul.f32 %v8915_v26, %v15784_v55 }
0x2aa2   :  { %v8929_v27 = vmul.f32 %v8913_v49, %v15789_v30 }
0x2aa3   :  { %v12171_v8 = vpop.eup %12170  ;;  %v8945_v45 = vpack.c.bf16 %v8931_v1, %v8930_v17 }
0x2aa4   :  { %v12173_v42 = vpop.eup %12172  ;;  %v8944_v62 = vpack.c.bf16 %v8929_v27, %v8928_v41  ;;  %v8902_v20 = vadd.f32 1.0, %v12171_v8 }
0x2aa5   :  { %v12175_v57 = vpop.eup %12174  ;;  %v8900_v2 = vadd.f32 1.0, %v12173_v42 }
0x2aa6   :  { %v12177_v15 = vpop.eup %12176  ;;  %11199 = vmatprep.mubr.bf16.mxu0 %v8944_v62  ;;  %v8903_v32 = vadd.f32 1.0, %v12175_v57  ;;  %v8918_v16 = vmul.f32 0.5, %v8902_v20 }
0x2aa7   :  { %11200 = vmatmul.mubr.bf16.vlgmr.msra.gmra.mrb[184].mxu0 %v8945_v45  ;;  %v8901_v46 = vadd.f32 1.0, %v12177_v15  ;;  %v8916_v3 = vmul.f32 0.5, %v8900_v2 }
0x2aa8   :  { %v8919_v51 = vmul.f32 0.5, %v8903_v32  ;;  %v8934_v18 = vmul.f32 %v8918_v16, %v15802_v54 }
0x2aa9   :  { %v8917_v55 = vmul.f32 0.5, %v8901_v46  ;;  %v8932_v36 = vmul.f32 %v8916_v3, %v15806_v56 }
0x2aaa   :  { %v8935_v30 = vmul.f32 %v8919_v51, %v15812_v28 }
0x2aab   :  { %v8933_v50 = vmul.f32 %v8917_v55, %v8757_v38 }
0x2aac   :  { %v8947_v40 = vpack.c.bf16 %v8935_v30, %v8934_v18 }
0x2aad   :  { %v8946_v44 = vpack.c.bf16 %v8933_v50, %v8932_v36 }
0x2aaf   :  { %11203 = vmatprep.mubr.bf16.mxu0 %v8946_v44 }
0x2ab0   :  { %11204 = vmatmul.mubr.bf16.gmra.mrb[188].mxu0 %v8947_v40 }
0x2abc   :  { %v11177_v59 = vpop.f32.mrb[48].mxu1 }
0x2abd   :  { %v15833_v5 = vadd.f32 %v11177_v59, %v15773_v39  ;;  %v8769_v35 = vpop.f32.mrb[49].mxu1 }
0x2abe   :  { %v15836_v25 = vadd.f32 %v15773_v39, %v8769_v35  ;;  %v11178_v0 = vpop.f32.mrb[50].mxu1 }
0x2abf   :  { %v8810_v54 = vmul.f32 %v15833_v5, %v15833_v5  ;;  %v15841_v28 = vadd.f32 %v11178_v0, %v15773_v39  ;;  %v8772_v56 = vpop.f32.mrb[51].mxu1 }
0x2ac0   :  { %v8808_v38 = vmul.f32 %v15836_v25, %v15836_v25  ;;  %v15846_v53 = vadd.f32 %v15773_v39, %v8772_v56 }
0x2ac1   :  { %v8826_v11 = vmul.f32 %v8810_v54, %v15833_v5  ;;  %v8811_v9 = vmul.f32 %v15841_v28, %v15841_v28 }
0x2ac2   :  { %v8824_v7 = vmul.f32 %v8808_v38, %v15836_v25  ;;  %v8809_v31 = vmul.f32 %v15846_v53, %v15846_v53 }
0x2ac3   :  { %v8842_v4 = vmul.f32 0.044715, %v8826_v11  ;;  %v8827_v29 = vmul.f32 %v8811_v9, %v15841_v28 }
0x2ac4   :  { %v8840_v43 = vmul.f32 0.044715, %v8824_v7  ;;  %v8825_v23 = vmul.f32 %v8809_v31, %v15846_v53  ;;  %v11181_v63 = vpop.f32.mrb[52].mxu1 }
0x2ac5   :  { %v8858_v60 = vadd.f32 %v8842_v4, %v15833_v5  ;;  %v8843_v19 = vmul.f32 0.044715, %v8827_v29  ;;  %v15858_v26 = vadd.f32 %v11181_v63, %v15773_v39  ;;  %v8785_v49 = vpop.f32.mrb[53].mxu1 }
0x2ac6   :  { %v8856_v17 = vadd.f32 %v8840_v43, %v15836_v25  ;;  %v8841_v1 = vmul.f32 0.044715, %v8825_v23  ;;  %v15862_v41 = vadd.f32 %v15773_v39, %v8785_v49  ;;  %v11182_v27 = vpop.f32.mrb[54].mxu1 }
0x2ac7   :  { %v8874_v8 = vmul.f32 0.7978846, %v8858_v60  ;;  %v8859_v45 = vadd.f32 %v8843_v19, %v15841_v28  ;;  %v8814_v42 = vmul.f32 %v15858_v26, %v15858_v26  ;;  %v15868_v62 = vadd.f32 %v11182_v27, %v15773_v39  ;;  %v8788_v20 = vpop.f32.mrb[55].mxu1 }
0x2ac8   :  { %v8872_v57 = vmul.f32 0.7978846, %v8856_v17  ;;  %v8857_v2 = vadd.f32 %v8841_v1, %v15846_v53  ;;  %v8812_v15 = vmul.f32 %v15862_v41, %v15862_v41  ;;  %v15874_v32 = vadd.f32 %v15773_v39, %v8788_v20 }
0x2ac9   :  { %12178 = vtanh.f32 %v8874_v8  ;;  %v8875_v16 = vmul.f32 0.7978846, %v8859_v45  ;;  %v8830_v46 = vmul.f32 %v8814_v42, %v15858_v26  ;;  %v8815_v3 = vmul.f32 %v15868_v62, %v15868_v62 }
0x2aca   :  { %12180 = vtanh.f32 %v8872_v57  ;;  %v8873_v51 = vmul.f32 0.7978846, %v8857_v2  ;;  %v8828_v55 = vmul.f32 %v8812_v15, %v15862_v41  ;;  %v8813_v18 = vmul.f32 %v15874_v32, %v15874_v32 }
0x2acb   :  { %12182 = vtanh.f32 %v8875_v16  ;;  %v8846_v30 = vmul.f32 0.044715, %v8830_v46  ;;  %v8831_v36 = vmul.f32 %v8815_v3, %v15868_v62 }
0x2acc   :  { %12184 = vtanh.f32 %v8873_v51  ;;  %v8844_v39 = vmul.f32 0.044715, %v8828_v55  ;;  %v8829_v50 = vmul.f32 %v8813_v18, %v15874_v32 }
0x2acd   :  { %v8862_v40 = vadd.f32 %v8846_v30, %v15858_v26  ;;  %v8847_v44 = vmul.f32 0.044715, %v8831_v36 }
0x2ace   :  { %v8860_v59 = vadd.f32 %v8844_v39, %v15862_v41  ;;  %v8845_v35 = vmul.f32 0.044715, %v8829_v50 }
0x2acf   :  { %v8878_v0 = vmul.f32 0.7978846, %v8862_v40  ;;  %v8863_v54 = vadd.f32 %v8847_v44, %v15868_v62 }
0x2ad0   :  { %v8876_v56 = vmul.f32 0.7978846, %v8860_v59  ;;  %v8861_v38 = vadd.f32 %v8845_v35, %v15874_v32  ;;  %v15899_v59 = vld [vmem:[%s16219_s7 + $0xc] ss:$0 sm:$0xff] }
0x2ad1   :  { %12186 = vtanh.f32 %v8878_v0  ;;  %v8879_v11 = vmul.f32 0.7978846, %v8863_v54 }
0x2ad2   :  { %12188 = vtanh.f32 %v8876_v56  ;;  %v8877_v9 = vmul.f32 0.7978846, %v8861_v38 }
0x2ad3   :  { %v12179_v7 = vpop.eup %12178  ;;  %12190 = vtanh.f32 %v8879_v11 }
0x2ad4   :  { %v12181_v31 = vpop.eup %12180  ;;  %12192 = vtanh.f32 %v8877_v9  ;;  %v8906_v4 = vadd.f32 1.0, %v12179_v7 }
0x2ad5   :  { %v12183_v29 = vpop.eup %12182  ;;  %v8904_v43 = vadd.f32 1.0, %v12181_v31 }
0x2ad6   :  { %v12185_v23 = vpop.eup %12184  ;;  %v8907_v63 = vadd.f32 1.0, %v12183_v29  ;;  %v8922_v60 = vmul.f32 0.5, %v8906_v4 }
0x2ad7   :  { %v8905_v19 = vadd.f32 1.0, %v12185_v23  ;;  %v8920_v49 = vmul.f32 0.5, %v8904_v43 }
0x2ad8   :  { %v8923_v17 = vmul.f32 0.5, %v8907_v63  ;;  %v8938_v27 = vmul.f32 %v8922_v60, %v15833_v5 }
0x2ad9   :  { %v8921_v1 = vmul.f32 0.5, %v8905_v19  ;;  %v8936_v42 = vmul.f32 %v8920_v49, %v15836_v25 }
0x2ada   :  { %v8939_v8 = vmul.f32 %v8923_v17, %v15841_v28 }
0x2adb   :  { %v12187_v45 = vpop.eup %12186  ;;  %v8937_v20 = vmul.f32 %v8921_v1, %v15846_v53 }
0x2adc   :  { %v12189_v57 = vpop.eup %12188  ;;  %v8949_v2 = vpack.c.bf16 %v8939_v8, %v8938_v27  ;;  %v8910_v15 = vadd.f32 1.0, %v12187_v45 }
0x2add   :  { %v12191_v16 = vpop.eup %12190  ;;  %v8948_v46 = vpack.c.bf16 %v8937_v20, %v8936_v42  ;;  %v8908_v3 = vadd.f32 1.0, %v12189_v57 }
0x2ade   :  { %v12193_v51 = vpop.eup %12192  ;;  %v8911_v55 = vadd.f32 1.0, %v12191_v16  ;;  %v8926_v18 = vmul.f32 0.5, %v8910_v15 }
0x2adf   :  { %11207 = vmatprep.mubr.bf16.mxu0 %v8948_v46  ;;  %v8909_v30 = vadd.f32 1.0, %v12193_v51  ;;  %v8924_v36 = vmul.f32 0.5, %v8908_v3 }
0x2ae0   :  { %11208 = vmatmul.mubr.bf16.gmra.mrb[192].mxu0 %v8949_v2  ;;  %v8927_v5 = vmul.f32 0.5, %v8911_v55  ;;  %v8942_v39 = vmul.f32 %v8926_v18, %v15858_v26 }
0x2ae1   :  { %v8925_v28 = vmul.f32 0.5, %v8909_v30  ;;  %v8940_v53 = vmul.f32 %v8924_v36, %v15862_v41 }
0x2ae2   :  { %v8943_v25 = vmul.f32 %v8927_v5, %v15868_v62 }
0x2ae3   :  { %v8941_v50 = vmul.f32 %v8925_v28, %v15874_v32 }
0x2ae4   :  { %v8951_v40 = vpack.c.bf16 %v8943_v25, %v8942_v39 }
0x2ae5   :  { %v8950_v44 = vpack.c.bf16 %v8941_v50, %v8940_v53 }
0x2ae7   :  { %11211 = vmatprep.mubr.bf16.mxu0 %v8950_v44 }
0x2ae8   :  { %11212 = vmatmul.mubr.bf16.gmra.mrb[196].mxu0 %v8951_v40 }
0x2b7a   :  { %v11201_v35 = vpop.f32.mrb[184].mxu0 }
0x2b7b   :  { %v9116_v0 = vadd.f32 %v15490_v52, %v11201_v35  ;;  %v9051_v54 = vpop.f32.mrb[185].mxu0 }
0x2b7c   :  { %v9114_v26 = vadd.f32 %v15486_v37, %v9051_v54  ;;  %v11202_v62 = vpop.f32.mrb[186].mxu0 }
0x2b7d   :  { %v15904_v41 = vadd.f32 %v15899_v59, %v9116_v0  ;;  %v9117_v32 = vadd.f32 %v15500_v22, %v11202_v62  ;;  %v9054_v56 = vpop.f32.mrb[187].mxu0 }
0x2b7e   :  { %v9115_v38 = vadd.f32 %v15492_v6, %v9054_v56  ;;  %v15909_v11 = vadd.f32 %v15899_v59, %v9114_v26 }
0x2b7f   :  { %v15912_v9 = vadd.f32 %v15899_v59, %v9117_v32  ;;  %v9158_v52 = vsel %vm359_vm1, %v15904_v41, 0.0 }
0x2b80   :  { %9159 = vadd.xlane.f32.xlu0 %v9158_v52  ;;  %v15917_v37 = vadd.f32 %v15899_v59, %v9115_v38  ;;  %v9152_v6 = vsel %vm359_vm1, %v15909_v11, 0.0 }
0x2b81   :  { %v9161_v7 = vsel %vm359_vm1, %v15912_v9, 0.0 }
0x2b82   :  { %9162 = vadd.xlane.f32.xlu1 %v9161_v7  ;;  %v9155_v23 = vsel %vm359_vm1, %v15917_v37, 0.0 }
0x2b83   :  { %v11205_v22 = vpop.f32.mrb[188].mxu0 }
0x2b84   :  { %v9120_v31 = vadd.f32 %v15522_v58, %v11205_v22  ;;  %v9067_v4 = vpop.f32.mrb[189].mxu0  ;;  %9153 = vadd.xlane.f32.xlu0 %v9152_v6 }
0x2b85   :  { %v9118_v29 = vadd.f32 %v15508_v61, %v9067_v4  ;;  %v11206_v43 = vpop.f32.mrb[190].mxu0 }
0x2b86   :  { %v15928_v63 = vadd.f32 %v15899_v59, %v9120_v31  ;;  %v9121_v60 = vadd.f32 %v15518_v10, %v11206_v43  ;;  %v9070_v19 = vpop.f32.mrb[191].mxu0  ;;  %9156 = vadd.xlane.f32.xlu1 %v9155_v23 }
0x2b87   :  { %v9119_v49 = vadd.f32 %v15512_v48, %v9070_v19  ;;  %v15933_v17 = vadd.f32 %v15899_v59, %v9118_v29 }
0x2b88   :  { %v15936_v58 = vadd.f32 %v15899_v59, %v9121_v60  ;;  %v9170_v61 = vsel %vm359_vm1, %v15928_v63, 0.0 }
0x2b89   :  { %9171 = vadd.xlane.f32.xlu0 %v9170_v61  ;;  %v15941_v1 = vadd.f32 %v15899_v59, %v9119_v49  ;;  %v9164_v48 = vsel %vm359_vm1, %v15933_v17, 0.0 }
0x2b8a   :  { %v9173_v10 = vsel %vm359_vm1, %v15936_v58, 0.0 }
0x2b8b   :  { %9174 = vadd.xlane.f32.xlu1 %v9173_v10  ;;  %v9167_v27 = vsel %vm359_vm1, %v15941_v1, 0.0 }
0x2b8d   :  { %9165 = vadd.xlane.f32.xlu0 %v9164_v48 }
0x2b8f   :  { %9168 = vadd.xlane.f32.xlu1 %v9167_v27 }
0x2bb3   :  { %v11209_v8 = vpop.f32.mrb[192].mxu0 }
0x2bb4   :  { %v9124_v45 = vadd.f32 %v15542_v13, %v11209_v8  ;;  %v9083_v42 = vpop.f32.mrb[193].mxu0 }
0x2bb5   :  { %v9122_v20 = vadd.f32 %v15536_v47, %v9083_v42  ;;  %v11210_v57 = vpop.f32.mrb[194].mxu0 }
0x2bb6   :  { %v15952_v2 = vadd.f32 %v15899_v59, %v9124_v45  ;;  %v9125_v15 = vadd.f32 %v15540_v14, %v11210_v57  ;;  %v9086_v16 = vpop.f32.mrb[195].mxu0 }
0x2bb7   :  { %v9123_v46 = vadd.f32 %v15544_v33, %v9086_v16  ;;  %v15957_v3 = vadd.f32 %v15899_v59, %v9122_v20 }
0x2bb8   :  { %v15960_v51 = vadd.f32 %v15899_v59, %v9125_v15  ;;  %v9182_v13 = vsel %vm359_vm1, %v15952_v2, 0.0 }
0x2bb9   :  { %9183 = vadd.xlane.f32.xlu0 %v9182_v13  ;;  %v15965_v47 = vadd.f32 %v15899_v59, %v9123_v46  ;;  %v9176_v33 = vsel %vm359_vm1, %v15957_v3, 0.0 }
0x2bba   :  { %v9185_v55 = vsel %vm359_vm1, %v15960_v51, 0.0 }
0x2bbb   :  { %9186 = vadd.xlane.f32.xlu1 %v9185_v55  ;;  %v11213_v14 = vpop.f32.mrb[196].mxu0  ;;  %v9179_v39 = vsel %vm359_vm1, %v15965_v47, 0.0 }
0x2bbc   :  { %v9099_v18 = vpop.f32.mrb[197].mxu0  ;;  %v9128_v30 = vadd.f32 %v15556_v34, %v11213_v14 }
0x2bbd   :  { %v9126_v36 = vadd.f32 %v15560_v21, %v9099_v18  ;;  %9177 = vadd.xlane.f32.xlu0 %v9176_v33  ;;  %v11214_v5 = vpop.f32.mrb[198].mxu0 }
0x2bbe   :  { %v9102_v28 = vpop.f32.mrb[199].mxu0  ;;  %v9129_v53 = vadd.f32 %v15566_v12, %v11214_v5  ;;  %v15981_v40 = vadd.f32 %v15899_v59, %v9128_v30 }
0x2bbf   :  { %v15976_v25 = vadd.f32 %v15899_v59, %v9126_v36  ;;  %v9127_v50 = vadd.f32 %v15568_v24, %v9102_v28  ;;  %9180 = vadd.xlane.f32.xlu1 %v9179_v39 }
0x2bc0   :  { %v15989_v44 = vadd.f32 %v15899_v59, %v9129_v53  ;;  %v9194_v12 = vsel %vm359_vm1, %v15981_v40, 0.0 }
0x2bc1   :  { %v15984_v34 = vadd.f32 %v15899_v59, %v9127_v50  ;;  %v9188_v21 = vsel %vm359_vm1, %v15976_v25, 0.0 }
0x2bc2   :  { %9189 = vadd.xlane.f32.xlu0 %v9188_v21  ;;  %v9197_v24 = vsel %vm359_vm1, %v15989_v44, 0.0 }
0x2bc3   :  { %v9191_v35 = vsel %vm359_vm1, %v15984_v34, 0.0 }
0x2bc4   :  { %9192 = vadd.xlane.f32.xlu1 %v9191_v35 }
0x2bc6   :  { %9195 = vadd.xlane.f32.xlu0 %v9194_v12 }
0x2bc8   :  { %9198 = vadd.xlane.f32.xlu1 %v9197_v24 }
0x2c0d   :  { %v9160_v0 = vpop.xlane.xlu0 %9159 }
0x2c0e   :  { %v9202_v54 = vmul.f32 0.03125, %v9160_v0 }
0x2c0f   :  { %v9163_v26 = vpop.xlane.xlu1 %9162 }
0x2c10   :  { %v15998_v62 = vsub.f32 %v15904_v41, %v9202_v54  ;;  %v9203_v59 = vmul.f32 0.03125, %v9163_v26 }
0x2c11   :  { %v9154_v32 = vpop.xlane.xlu0 %9153 }
0x2c12   :  { %v16001_v56 = vsub.f32 %v15912_v9, %v9203_v59  ;;  %v9200_v38 = vmul.f32 0.03125, %v9154_v32  ;;  %v9234_v52 = vmul.f32 %v15998_v62, %v15998_v62 }
0x2c13   :  { %v9157_v7 = vpop.xlane.xlu1 %9156 }
0x2c14   :  { %v16006_v22 = vsub.f32 %v15909_v11, %v9200_v38  ;;  %v9201_v6 = vmul.f32 0.03125, %v9157_v7  ;;  %v9254_v31 = vsel %vm359_vm1, %v9234_v52, 0.0  ;;  %v9235_v41 = vmul.f32 %v16001_v56, %v16001_v56 }
0x2c15   :  { %9255 = vadd.xlane.f32.xlu0 %v9254_v31 }
0x2c16   :  { %v16012_v4 = vsub.f32 %v15917_v37, %v9201_v6  ;;  %v9172_v9 = vpop.xlane.xlu0 %9171  ;;  %v9257_v29 = vsel %vm359_vm1, %v9235_v41, 0.0  ;;  %v9232_v43 = vmul.f32 %v16006_v22, %v16006_v22 }
0x2c17   :  { %v9206_v23 = vmul.f32 0.03125, %v9172_v9  ;;  %9258 = vadd.xlane.f32.xlu1 %v9257_v29 }
0x2c18   :  { %v9175_v11 = vpop.xlane.xlu1 %9174  ;;  %v9248_v60 = vsel %vm359_vm1, %v9232_v43, 0.0  ;;  %v9233_v19 = vmul.f32 %v16012_v4, %v16012_v4 }
0x2c19   :  { %v16021_v49 = vsub.f32 %v15928_v63, %v9206_v23  ;;  %v9207_v61 = vmul.f32 0.03125, %v9175_v11  ;;  %9249 = vadd.xlane.f32.xlu0 %v9248_v60 }
0x2c1a   :  { %v9166_v37 = vpop.xlane.xlu0 %9165  ;;  %v9251_v10 = vsel %vm359_vm1, %v9233_v19, 0.0 }
0x2c1b   :  { %v16025_v48 = vsub.f32 %v15936_v58, %v9207_v61  ;;  %v9204_v27 = vmul.f32 0.03125, %v9166_v37  ;;  %9252 = vadd.xlane.f32.xlu1 %v9251_v10  ;;  %v9238_v8 = vmul.f32 %v16021_v49, %v16021_v49 }
0x2c1c   :  { %v9169_v45 = vpop.xlane.xlu1 %9168 }
0x2c1d   :  { %v16030_v42 = vsub.f32 %v15933_v17, %v9204_v27  ;;  %v9205_v20 = vmul.f32 0.03125, %v9169_v45  ;;  %v9266_v63 = vsel %vm359_vm1, %v9238_v8, 0.0  ;;  %v9239_v57 = vmul.f32 %v16025_v48, %v16025_v48 }
0x2c1e   :  { %9267 = vadd.xlane.f32.xlu0 %v9266_v63 }
0x2c1f   :  { %v16036_v15 = vsub.f32 %v15941_v1, %v9205_v20  ;;  %v9269_v58 = vsel %vm359_vm1, %v9239_v57, 0.0  ;;  %v9236_v16 = vmul.f32 %v16030_v42, %v16030_v42 }
0x2c20   :  { %9270 = vadd.xlane.f32.xlu1 %v9269_v58 }
0x2c21   :  { %v9260_v46 = vsel %vm359_vm1, %v9236_v16, 0.0  ;;  %v9237_v17 = vmul.f32 %v16036_v15, %v16036_v15 }
0x2c22   :  { %9261 = vadd.xlane.f32.xlu0 %v9260_v46 }
0x2c23   :  { %v9263_v13 = vsel %vm359_vm1, %v9237_v17, 0.0 }
0x2c24   :  { %9264 = vadd.xlane.f32.xlu1 %v9263_v13 }
0x2c46   :  { %v9184_v55 = vpop.xlane.xlu0 %9183 }
0x2c47   :  { %v9210_v14 = vmul.f32 0.03125, %v9184_v55 }
0x2c48   :  { %v9187_v18 = vpop.xlane.xlu1 %9186 }
0x2c49   :  { %v16046_v1 = vsub.f32 %v15952_v2, %v9210_v14  ;;  %v9211_v33 = vmul.f32 0.03125, %v9187_v18 }
0x2c4a   :  { %v9178_v30 = vpop.xlane.xlu0 %9177 }
0x2c4b   :  { %v16049_v36 = vsub.f32 %v15960_v51, %v9211_v33  ;;  %v9208_v5 = vmul.f32 0.03125, %v9178_v30  ;;  %v9242_v28 = vmul.f32 %v16046_v1, %v16046_v1 }
0x2c4c   :  { %v9181_v39 = vpop.xlane.xlu1 %9180 }
0x2c4d   :  { %v16054_v53 = vsub.f32 %v15957_v3, %v9208_v5  ;;  %v9209_v50 = vmul.f32 0.03125, %v9181_v39  ;;  %v9278_v21 = vsel %vm359_vm1, %v9242_v28, 0.0  ;;  %v9243_v2 = vmul.f32 %v16049_v36, %v16049_v36  ;;  %v16096_v5 = vld [vmem:[%s16219_s7 + $0xe] ss:$0 sm:$0xff] }
0x2c4e   :  { %9279 = vadd.xlane.f32.xlu0 %v9278_v21 }
0x2c4f   :  { %v16060_v35 = vsub.f32 %v15965_v47, %v9209_v50  ;;  %v9190_v51 = vpop.xlane.xlu0 %9189  ;;  %v9281_v12 = vsel %vm359_vm1, %v9243_v2, 0.0  ;;  %v9240_v24 = vmul.f32 %v16054_v53, %v16054_v53 }
0x2c50   :  { %v9212_v0 = vmul.f32 0.03125, %v9190_v51  ;;  %9282 = vadd.xlane.f32.xlu1 %v9281_v12  ;;  %v16102_v51 = vld [vmem:[%s16219_s7 + $0xf] ss:$0 sm:$0xff] }
0x2c51   :  { %v9193_v3 = vpop.xlane.xlu1 %9192  ;;  %v9272_v54 = vsel %vm359_vm1, %v9240_v24, 0.0  ;;  %v9241_v26 = vmul.f32 %v16060_v35, %v16060_v35 }
0x2c52   :  { %v16069_v59 = vsub.f32 %v15976_v25, %v9212_v0  ;;  %v9213_v32 = vmul.f32 0.03125, %v9193_v3  ;;  %9273 = vadd.xlane.f32.xlu0 %v9272_v54 }
0x2c53   :  { %v9196_v47 = vpop.xlane.xlu0 %9195  ;;  %v9275_v38 = vsel %vm359_vm1, %v9241_v26, 0.0 }
0x2c54   :  { %v16073_v52 = vsub.f32 %v15984_v34, %v9213_v32  ;;  %v9214_v7 = vmul.f32 0.03125, %v9196_v47  ;;  %9276 = vadd.xlane.f32.xlu1 %v9275_v38  ;;  %v9244_v6 = vmul.f32 %v16069_v59, %v16069_v59 }
0x2c55   :  { %v9199_v31 = vpop.xlane.xlu1 %9198 }
0x2c56   :  { %v16078_v41 = vsub.f32 %v15981_v40, %v9214_v7  ;;  %v9215_v9 = vmul.f32 0.03125, %v9199_v31  ;;  %v9284_v25 = vsel %vm359_vm1, %v9244_v6, 0.0  ;;  %v9245_v29 = vmul.f32 %v16073_v52, %v16073_v52 }
0x2c57   :  { %9285 = vadd.xlane.f32.xlu0 %v9284_v25 }
0x2c58   :  { %v16084_v43 = vsub.f32 %v15989_v44, %v9215_v9  ;;  %v9287_v34 = vsel %vm359_vm1, %v9245_v29, 0.0  ;;  %v9246_v23 = vmul.f32 %v16078_v41, %v16078_v41 }
0x2c59   :  { %9288 = vadd.xlane.f32.xlu1 %v9287_v34 }
0x2c5a   :  { %v9290_v11 = vsel %vm359_vm1, %v9246_v23, 0.0  ;;  %v9247_v40 = vmul.f32 %v16084_v43, %v16084_v43 }
0x2c5b   :  { %9291 = vadd.xlane.f32.xlu0 %v9290_v11 }
0x2c5c   :  { %v9293_v60 = vsel %vm359_vm1, %v9247_v40, 0.0 }
0x2c5d   :  { %9294 = vadd.xlane.f32.xlu1 %v9293_v60 }
0x2ca2   :  { %v9256_v19 = vpop.xlane.xlu0 %9255 }
0x2ca3   :  { %v9298_v61 = vmul.f32 0.03125, %v9256_v19 }
0x2ca4   :  { %v9259_v37 = vpop.xlane.xlu1 %9258 }
0x2ca5   :  { %v9314_v44 = vadd.f32 1e-05, %v9298_v61  ;;  %v9299_v10 = vmul.f32 0.03125, %v9259_v37 }
0x2ca6   :  { %v9250_v27 = vpop.xlane.xlu0 %9249 }
0x2ca7   :  { %12194 = vrsqrt.f32 %v9314_v44  ;;  %v9315_v8 = vadd.f32 1e-05, %v9299_v10  ;;  %v9296_v45 = vmul.f32 0.03125, %v9250_v27 }
0x2ca8   :  { %v9253_v20 = vpop.xlane.xlu1 %9252 }
0x2ca9   :  { %12196 = vrsqrt.f32 %v9315_v8  ;;  %v9312_v63 = vadd.f32 1e-05, %v9296_v45  ;;  %v9297_v57 = vmul.f32 0.03125, %v9253_v20 }
0x2cab   :  { %12198 = vrsqrt.f32 %v9312_v63  ;;  %v9313_v58 = vadd.f32 1e-05, %v9297_v57  ;;  %v9268_v16 = vpop.xlane.xlu0 %9267 }
0x2cac   :  { %v9302_v46 = vmul.f32 0.03125, %v9268_v16 }
0x2cad   :  { %12200 = vrsqrt.f32 %v9313_v58  ;;  %v9271_v17 = vpop.xlane.xlu1 %9270 }
0x2cae   :  { %v9318_v13 = vadd.f32 1e-05, %v9302_v46  ;;  %v9303_v55 = vmul.f32 0.03125, %v9271_v17 }
0x2caf   :  { %v9262_v14 = vpop.xlane.xlu0 %9261 }
0x2cb0   :  { %12202 = vrsqrt.f32 %v9318_v13  ;;  %v9319_v18 = vadd.f32 1e-05, %v9303_v55  ;;  %v9300_v33 = vmul.f32 0.03125, %v9262_v14 }
0x2cb1   :  { %v12195_v30 = vpop.eup %12194  ;;  %v9265_v28 = vpop.xlane.xlu1 %9264 }
0x2cb2   :  { %v9346_v39 = vmul.f32 %v12195_v30, %v15998_v62  ;;  %12204 = vrsqrt.f32 %v9319_v18  ;;  %v9316_v50 = vadd.f32 1e-05, %v9300_v33  ;;  %v9301_v21 = vmul.f32 0.03125, %v9265_v28 }
0x2cb3   :  { %v12197_v2 = vpop.eup %12196 }
0x2cb4   :  { %v9366_v12 = vmul.f32 %v16096_v5, %v9346_v39  ;;  %v9347_v24 = vmul.f32 %v12197_v2, %v16001_v56  ;;  %12206 = vrsqrt.f32 %v9316_v50  ;;  %v9317_v0 = vadd.f32 1e-05, %v9301_v21 }
0x2cb5   :  { %v12199_v3 = vpop.eup %12198 }
0x2cb6   :  { %v9386_v54 = vadd.f32 %v16102_v51, %v9366_v12  ;;  %v9367_v62 = vmul.f32 %v16096_v5, %v9347_v24  ;;  %v9344_v26 = vmul.f32 %v12199_v3, %v16006_v22  ;;  %12208 = vrsqrt.f32 %v9317_v0 }
0x2cb7   :  { %v12201_v32 = vpop.eup %12200 }
0x2cb8   :  { %9402 = vst.msk [vmem:[%s16223_s8 + $0x10] sm:$0xff] %vm359_vm1, %v9386_v54  ;;  %v9387_v47 = vadd.f32 %v16102_v51, %v9367_v62  ;;  %v9364_v56 = vmul.f32 %v16096_v5, %v9344_v26  ;;  %v9345_v38 = vmul.f32 %v12201_v32, %v16012_v4 }
0x2cba   :  { %v12203_v7 = vpop.eup %12202  ;;  %9403 = vst.msk [vmem:[%s16223_s8 + $0x18] sm:$0xff] %vm359_vm1, %v9387_v47  ;;  %v9384_v22 = vadd.f32 %v16102_v51, %v9364_v56  ;;  %v9365_v6 = vmul.f32 %v16096_v5, %v9345_v38 }
0x2cbb   :  { %v9350_v31 = vmul.f32 %v12203_v7, %v16021_v49 }
0x2cbc   :  { %v12205_v9 = vpop.eup %12204  ;;  %9400 = vst.msk [vmem:[%s16223_s8] sm:$0xff] %vm359_vm1, %v9384_v22  ;;  %v9385_v4 = vadd.f32 %v16102_v51, %v9365_v6 }
0x2cbd   :  { %v9370_v25 = vmul.f32 %v16096_v5, %v9350_v31  ;;  %v9351_v29 = vmul.f32 %v12205_v9, %v16025_v48 }
0x2cbe   :  { %v12207_v34 = vpop.eup %12206  ;;  %9401 = vst.msk [vmem:[%s16223_s8 + $0x8] sm:$0xff] %vm359_vm1, %v9385_v4 }
0x2cbf   :  { %v9390_v49 = vadd.f32 %v16102_v51, %v9370_v25  ;;  %v9371_v23 = vmul.f32 %v16096_v5, %v9351_v29  ;;  %v9348_v11 = vmul.f32 %v12207_v34, %v16030_v42 }
0x2cc0   :  { %v12209_v40 = vpop.eup %12208 }
0x2cc1   :  { %9406 = vst.msk [vmem:[%s16223_s8 + $0x30] sm:$0xff] %vm359_vm1, %v9390_v49  ;;  %v9391_v48 = vadd.f32 %v16102_v51, %v9371_v23  ;;  %v9368_v60 = vmul.f32 %v16096_v5, %v9348_v11  ;;  %v9349_v19 = vmul.f32 %v12209_v40, %v16036_v15 }
0x2cc3   :  { %9407 = vst.msk [vmem:[%s16223_s8 + $0x38] sm:$0xff] %vm359_vm1, %v9391_v48  ;;  %v9388_v61 = vadd.f32 %v16102_v51, %v9368_v60  ;;  %v9369_v42 = vmul.f32 %v16096_v5, %v9349_v19 }
0x2cc5   :  { %9404 = vst.msk [vmem:[%s16223_s8 + $0x20] sm:$0xff] %vm359_vm1, %v9388_v61  ;;  %v9389_v37 = vadd.f32 %v16102_v51, %v9369_v42 }
0x2cc7   :  { %9405 = vst.msk [vmem:[%s16223_s8 + $0x28] sm:$0xff] %vm359_vm1, %v9389_v37 }
0x2cdb   :  { %v9280_v15 = vpop.xlane.xlu0 %9279 }
0x2cdc   :  { %v9306_v44 = vmul.f32 0.03125, %v9280_v15 }
0x2cdd   :  { %v9283_v10 = vpop.xlane.xlu1 %9282 }
0x2cde   :  { %v9322_v27 = vadd.f32 1e-05, %v9306_v44  ;;  %v9307_v8 = vmul.f32 0.03125, %v9283_v10 }
0x2cdf   :  { %v9274_v45 = vpop.xlane.xlu0 %9273 }
0x2ce0   :  { %12210 = vrsqrt.f32 %v9322_v27  ;;  %v9323_v20 = vadd.f32 1e-05, %v9307_v8  ;;  %v9304_v63 = vmul.f32 0.03125, %v9274_v45 }
0x2ce1   :  { %v9277_v57 = vpop.xlane.xlu1 %9276 }
0x2ce2   :  { %12212 = vrsqrt.f32 %v9323_v20  ;;  %v9320_v58 = vadd.f32 1e-05, %v9304_v63  ;;  %v9305_v16 = vmul.f32 0.03125, %v9277_v57 }
0x2ce4   :  { %12214 = vrsqrt.f32 %v9320_v58  ;;  %v9321_v46 = vadd.f32 1e-05, %v9305_v16  ;;  %v9286_v17 = vpop.xlane.xlu0 %9285 }
0x2ce5   :  { %v9308_v13 = vmul.f32 0.03125, %v9286_v17 }
0x2ce6   :  { %12216 = vrsqrt.f32 %v9321_v46  ;;  %v9289_v55 = vpop.xlane.xlu1 %9288 }
0x2ce7   :  { %v9324_v14 = vadd.f32 1e-05, %v9308_v13  ;;  %v9309_v18 = vmul.f32 0.03125, %v9289_v55 }
0x2ce8   :  { %v9292_v33 = vpop.xlane.xlu0 %9291 }
0x2ce9   :  { %12218 = vrsqrt.f32 %v9324_v14  ;;  %v9325_v30 = vadd.f32 1e-05, %v9309_v18  ;;  %v9310_v28 = vmul.f32 0.03125, %v9292_v33 }
0x2cea   :  { %v12211_v39 = vpop.eup %12210  ;;  %v9295_v50 = vpop.xlane.xlu1 %9294 }
0x2ceb   :  { %v9354_v21 = vmul.f32 %v12211_v39, %v16046_v1  ;;  %12220 = vrsqrt.f32 %v9325_v30  ;;  %v9326_v2 = vadd.f32 1e-05, %v9310_v28  ;;  %v9311_v12 = vmul.f32 0.03125, %v9295_v50 }
0x2cec   :  { %v12213_v24 = vpop.eup %12212 }
0x2ced   :  { %v9374_v0 = vmul.f32 %v16096_v5, %v9354_v21  ;;  %v9355_v3 = vmul.f32 %v12213_v24, %v16049_v36  ;;  %12222 = vrsqrt.f32 %v9326_v2  ;;  %v9327_v54 = vadd.f32 1e-05, %v9311_v12 }
0x2cee   :  { %v12215_v62 = vpop.eup %12214 }
0x2cef   :  { %v9394_v26 = vadd.f32 %v16102_v51, %v9374_v0  ;;  %v9375_v32 = vmul.f32 %v16096_v5, %v9355_v3  ;;  %v9352_v47 = vmul.f32 %v12215_v62, %v16054_v53  ;;  %12224 = vrsqrt.f32 %v9327_v54 }
0x2cf0   :  { %v12217_v56 = vpop.eup %12216 }
0x2cf1   :  { %9410 = vst.msk [vmem:[%s16223_s8 + $0x50] sm:$0xff] %vm359_vm1, %v9394_v26  ;;  %v9395_v1 = vadd.f32 %v16102_v51, %v9375_v32  ;;  %v9372_v36 = vmul.f32 %v16096_v5, %v9352_v47  ;;  %v9353_v38 = vmul.f32 %v12217_v56, %v16060_v35 }
0x2cf3   :  { %v12219_v7 = vpop.eup %12218  ;;  %9411 = vst.msk [vmem:[%s16223_s8 + $0x58] sm:$0xff] %vm359_vm1, %v9395_v1  ;;  %v9392_v53 = vadd.f32 %v16102_v51, %v9372_v36  ;;  %v9373_v22 = vmul.f32 %v16096_v5, %v9353_v38 }
0x2cf4   :  { %v9356_v6 = vmul.f32 %v12219_v7, %v16069_v59 }
0x2cf5   :  { %v12221_v31 = vpop.eup %12220  ;;  %9408 = vst.msk [vmem:[%s16223_s8 + $0x40] sm:$0xff] %vm359_vm1, %v9392_v53  ;;  %v9393_v35 = vadd.f32 %v16102_v51, %v9373_v22 }
0x2cf6   :  { %v9376_v9 = vmul.f32 %v16096_v5, %v9356_v6  ;;  %v9357_v4 = vmul.f32 %v12221_v31, %v16073_v52 }
0x2cf7   :  { %v12223_v25 = vpop.eup %12222  ;;  %9409 = vst.msk [vmem:[%s16223_s8 + $0x48] sm:$0xff] %vm359_vm1, %v9393_v35 }
0x2cf8   :  { %v9396_v59 = vadd.f32 %v16102_v51, %v9376_v9  ;;  %v9377_v29 = vmul.f32 %v16096_v5, %v9357_v4  ;;  %v9358_v34 = vmul.f32 %v12223_v25, %v16078_v41 }
0x2cf9   :  { %v12225_v49 = vpop.eup %12224 }
0x2cfa   :  { %9412 = vst.msk [vmem:[%s16223_s8 + $0x60] sm:$0xff] %vm359_vm1, %v9396_v59  ;;  %v9397_v52 = vadd.f32 %v16102_v51, %v9377_v29  ;;  %v9378_v23 = vmul.f32 %v16096_v5, %v9358_v34  ;;  %v9359_v11 = vmul.f32 %v12225_v49, %v16084_v43 }
0x2cfc   :  { %9413 = vst.msk [vmem:[%s16223_s8 + $0x68] sm:$0xff] %vm359_vm1, %v9397_v52  ;;  %v9398_v40 = vadd.f32 %v16102_v51, %v9378_v23  ;;  %v9379_v41 = vmul.f32 %v16096_v5, %v9359_v11 }
0x2cfe   :  { %9414 = vst.msk [vmem:[%s16223_s8 + $0x70] sm:$0xff] %vm359_vm1, %v9398_v40  ;;  %v9399_v48 = vadd.f32 %v16102_v51, %v9379_v41 }
0x2d00   :  { %9415 = vst.msk [vmem:[%s16223_s8 + $0x78] sm:$0xff] %vm359_vm1, %v9399_v48 }

</bundles_post_ra>
